<compile_context>
chip_gen: v5e
topology: v5e:2x2
jax: 0.10.0
libtpu: 0.0.40
codegen_flags: <defaults>
</compile_context>

<pallas_src>
from functools import partial

import numpy as np
import jax
import jax.numpy as jnp
from jax import lax
from jax.experimental import pallas as pl
from jax.experimental.pallas import tpu as pltpu


# (ry, ky) tap pairs per output parity for ConvTranspose2d(k=4, s=2, p=1).
# ry indexes the 1-padded conv output (mid_pad row = m + ry), ky is the kernel
# tap.  Columns behave identically with (rx, kx).
#   parity 0 (o = 2m)   : (1, 1), (0, 3)
#   parity 1 (o = 2m+1) : (2, 0), (1, 2)
_DECONV_TAPS = (((1, 1), (0, 3)), ((2, 0), (1, 2)))


def _pad_hw1(a):
    """Zero-pad a (B, H, W, C) value by 1 on each side of H and W, in VMEM."""
    B, H, W, C = a.shape
    zw = jnp.zeros((B, H, 1, C), a.dtype)
    a = jnp.concatenate([zw, a, zw], axis=2)            # (B, H, W+2, C)
    zh = jnp.zeros((B, 1, W + 2, C), a.dtype)
    return jnp.concatenate([zh, a, zh], axis=1)         # (B, H+2, W+2, C)


def _decoder_kernel(x_ref, w1_ref, b1_ref, w2_ref, b2_ref, o_ref,
                    *, H, W, mm_dtype):
    """One batch tile per grid step.

    x_ref : (Bt, H, W, Cin)      NHWC input tile (unpadded)
    w1_ref: (9, Cin, Cmid)       conv3x3 weights, leading index = dy*3 + dx
    b1_ref: (1, Cmid)            f32
    w2_ref: (16, Cmid, Cout)     deconv weights, leading index = ky*4 + kx
    b2_ref: (1, Cout)            f32
    o_ref : (Bt, 2H, W, 2*Cout)  rows parity-interleaved, channel = (px, cout)
    """
    Bt, _, _, Cin = x_ref.shape
    Cmid = w1_ref.shape[2]
    Cout = w2_ref.shape[2]
    M = Bt * H * W

    # Cast once (before any window duplication), then pad by 1 in VMEM.
    xp = _pad_hw1(x_ref[...].astype(mm_dtype))           # (Bt, H+2, W+2, Cin)

    # ---- stage 1: conv3x3 + bias + ReLU, shift-and-accumulate (9 matmuls) --
    acc1 = None
    for dy in range(3):
        for dx in range(3):
            win = xp[:, dy:dy + H, dx:dx + W, :].reshape(M, Cin)
            contrib = jnp.dot(win, w1_ref[dy * 3 + dx],
                              preferred_element_type=jnp.float32)
            acc1 = contrib if acc1 is None else acc1 + contrib
    mid = jnp.maximum(acc1 + b1_ref[...], 0.0)            # (M, Cmid) f32
    mid = mid.reshape(Bt, H, W, Cmid).astype(mm_dtype)    # single cast
    midp = _pad_hw1(mid)                                  # (Bt, H+2, W+2, Cmid)

    # ---- stage 2: ConvTranspose2d(4, s=2, p=1) + bias + ReLU ---------------
    # Tap-sparse shift-and-accumulate: each output parity reads only 4 taps,
    # so 16 matmuls of K=Cmid total (no zero-padded K=9*Cmid operand/weight).
    rows = []
    for py in (0, 1):
        parts = []
        for px in (0, 1):
            acc2 = None
            for ry, ky in _DECONV_TAPS[py]:
                for rx, kx in _DECONV_TAPS[px]:
                    win = midp[:, ry:ry + H, rx:rx + W, :].reshape(M, Cmid)
                    contrib = jnp.dot(win, w2_ref[ky * 4 + kx],
                                      preferred_element_type=jnp.float32)
                    acc2 = contrib if acc2 is None else acc2 + contrib
            parts.append(jnp.maximum(acc2 + b2_ref[...], 0.0)
                         .astype(o_ref.dtype))
        # pack px with channels on the lane axis: (Bt*H, W, 2*Cout)
        rows.append(jnp.concatenate(parts, axis=-1)
                    .reshape(Bt * H, W, 2 * Cout))
    # interleave the row parity: (Bt*H, 2, W, 2*Cout) -> (Bt, 2H, W, 2*Cout)
    y = jnp.stack(rows, axis=1)
    o_ref[...] = y.reshape(Bt, 2 * H, W, 2 * Cout)


def _pack_params(w1, b1, w2, b2, mm_dtype):
    """Repack PyTorch-layout weights for per-tap static indexing."""
    Cmid, Cin = w1.shape[0], w1.shape[1]
    Cout = w2.shape[1]
    # conv3x3: (Cmid, Cin, 3, 3) -> (9, Cin, Cmid), leading index (dy, dx).
    w1p = jnp.transpose(w1, (2, 3, 1, 0)).reshape(9, Cin, Cmid).astype(mm_dtype)
    # deconv: (Cmid, Cout, 4, 4) -> (16, Cmid, Cout), leading index (ky, kx).
    w2p = jnp.transpose(w2, (2, 3, 0, 1)).reshape(16, Cmid, Cout).astype(mm_dtype)
    b1p = b1.reshape(1, Cmid).astype(jnp.float32)
    b2p = b2.reshape(1, Cout).astype(jnp.float32)
    return w1p, b1p, w2p, b2p


def _vmem_capacity_bytes():
    try:
        return int(pltpu.get_tpu_info().vmem_capacity_bytes)
    except Exception:
        return 64 * 1024 * 1024   # conservative (v7x per-TensorCore VMEM)


def _vmem_estimate_bytes(bt, H, W, Cin, Cmid, Cout, in_bytes, mm_bytes):
    """Rough per-grid-step VMEM working set (double buffers + live values)."""
    hw, hpwp = H * W, (H + 2) * (W + 2)
    est = 0
    est += 2 * bt * hw * Cin * in_bytes            # x block, double-buffered
    est += 2 * bt * 4 * hw * Cout * in_bytes       # out block, double-buffered
    est += bt * hpwp * Cin * mm_bytes              # padded x (mm dtype)
    est += bt * hw * Cmid * 4                      # stage-1 f32 accumulator
    est += bt * hpwp * Cmid * mm_bytes             # padded mid (mm dtype)
    est += bt * hw * Cmid * mm_bytes               # transient window slice
    est += bt * hw * Cout * 6 * 4                  # stage-2 acc + parity parts
    est += (9 * Cin * Cmid + 16 * Cmid * Cout) * mm_bytes  # resident weights
    return est


def _pick_batch_tile(N, budget, est_fn):
    best = 1
    for bt in range(1, N + 1):
        if N % bt:
            continue
        if N >= 2 and N // bt < 2:
            continue               # keep >= 2 grid steps (v7x has 2 TCs)
        if est_fn(bt) <= budget:
            best = max(best, bt)
    return best


def decoder_block_v2(x_nchw, params, *, batch_tile=None,
                     matmul_dtype=jnp.bfloat16):
    """Pallas implementation of DecoderBlockV2(is_deconv=True).forward.

    x_nchw : (N, Cin, H, W) float32
    params : (w1 (Cmid,Cin,3,3), b1 (Cmid,), w2 (Cmid,Cout,4,4), b2 (Cout,))
             in PyTorch layouts.
    returns: (N, Cout, 2H, 2W) float32
    """
    w1, b1, w2, b2 = params
    N, Cin, H, W = x_nchw.shape
    Cmid = w1.shape[0]
    Cout = w2.shape[1]
    mm_dtype = jnp.dtype(matmul_dtype)

    cap = _vmem_capacity_bytes()
    est_fn = partial(_vmem_estimate_bytes, H=H, W=W, Cin=Cin, Cmid=Cmid,
                     Cout=Cout, in_bytes=x_nchw.dtype.itemsize,
                     mm_bytes=mm_dtype.itemsize)
    bt = (_pick_batch_tile(N, int(cap * 0.55), est_fn)
          if batch_tile is None else batch_tile)
    assert N % bt == 0, "batch_tile must divide the batch size"

    # glue: NCHW -> NHWC (padding & parity interleave happen inside the kernel)
    x_nhwc = jnp.transpose(x_nchw, (0, 2, 3, 1))
    w1p, b1p, w2p, b2p = _pack_params(w1, b1, w2, b2, mm_dtype)

    kernel = partial(_decoder_kernel, H=H, W=W, mm_dtype=mm_dtype)

    out_p = pl.pallas_call(
        kernel,
        out_shape=jax.ShapeDtypeStruct((N, 2 * H, W, 2 * Cout), x_nchw.dtype),
        grid_spec=pltpu.PrefetchScalarGridSpec(
            num_scalar_prefetch=0,
            grid=(N // bt,),
            in_specs=[
                pl.BlockSpec((bt, H, W, Cin), lambda n: (n, 0, 0, 0)),
                pl.BlockSpec((9, Cin, Cmid), lambda n: (0, 0, 0)),
                pl.BlockSpec((1, Cmid), lambda n: (0, 0)),
                pl.BlockSpec((16, Cmid, Cout), lambda n: (0, 0, 0)),
                pl.BlockSpec((1, Cout), lambda n: (0, 0)),
            ],
            out_specs=pl.BlockSpec((bt, 2 * H, W, 2 * Cout),
                                   lambda n: (n, 0, 0, 0)),
        ),
        compiler_params=pltpu.CompilerParams(
            dimension_semantics=("parallel",),
            vmem_limit_bytes=int(cap * 0.8)),
    )(x_nhwc, w1p, b1p, w2p, b2p)

    # glue: (N, 2H, W, (px, Cout)) -> (N, 2H, 2W, Cout) is a pure dim-merge
    # reshape (row-major), then the unavoidable NHWC -> NCHW transpose.
    out_nhwc = out_p.reshape(N, 2 * H, 2 * W, Cout)
    return jnp.transpose(out_nhwc, (0, 3, 1, 2))


def ref_forward(x, w1, b1, w2, b2):
    """Pure-JAX reference (NCHW), mirrors PyTorch semantics."""
    y = lax.conv_general_dilated(
        x, w1, window_strides=(1, 1), padding=((1, 1), (1, 1)),
        dimension_numbers=('NCHW', 'OIHW', 'NCHW'),
        precision=lax.Precision.HIGHEST)
    y = jnp.maximum(y + b1[None, :, None, None], 0.0)

    # ConvTranspose2d(k=4,s=2,p=1) == conv over 2x-dilated input, pad=2,
    # with spatially flipped kernel and (in,out) channel axes swapped.
    w2_conv = jnp.transpose(w2[:, :, ::-1, ::-1], (1, 0, 2, 3))  # (Cout,Cmid,4,4)
    z = lax.conv_general_dilated(
        y, w2_conv, window_strides=(1, 1), padding=((2, 2), (2, 2)),
        lhs_dilation=(2, 2),
        dimension_numbers=('NCHW', 'OIHW', 'NCHW'),
        precision=lax.Precision.HIGHEST)
    z = jnp.maximum(z + b2[None, :, None, None], 0.0)
    return z


if __name__ == "__main__":
    def make_case(key, N, Cin, Cmid, Cout, H, W):
        k0, k1, k2, k3, k4 = jax.random.split(key, 5)
        x = jax.random.normal(k0, (N, Cin, H, W), jnp.float32)
        w1 = jax.random.normal(k1, (Cmid, Cin, 3, 3), jnp.float32) * 0.1
        b1 = jax.random.normal(k2, (Cmid,), jnp.float32) * 0.1
        w2 = jax.random.normal(k3, (Cmid, Cout, 4, 4), jnp.float32) * 0.1
        b2 = jax.random.normal(k4, (Cout,), jnp.float32) * 0.1
        return x, (w1, b1, w2, b2)

    key = jax.random.PRNGKey(0)
    ka, kb = jax.random.split(key)

    # Case 1: primary shapes, f32 matmul operands (auto tiling -> grid of 2).
    x, params = make_case(ka, N=2, Cin=8, Cmid=16, Cout=8, H=16, W=16)
    out = jax.block_until_ready(
        decoder_block_v2(x, params, matmul_dtype=jnp.float32))
    assert out.shape == (2, 8, 32, 32)
    ref = ref_forward(x, *params)
    np.testing.assert_allclose(np.asarray(out), np.asarray(ref),
                               rtol=2e-3, atol=2e-3)

    # Case 2: default bf16 matmul operands (f32 accumulation), N=4 -> auto
    # batch tile of 2 (keeps >=2 parallel grid steps for v7x megacore).
    x2, params2 = make_case(kb, N=4, Cin=8, Cmid=16, Cout=8, H=8, W=8)
    out2 = jax.block_until_ready(decoder_block_v2(x2, params2))
    assert out2.shape == (4, 8, 16, 16)
    ref2 = ref_forward(x2, *params2)
    np.testing.assert_allclose(np.asarray(out2), np.asarray(ref2),
                               rtol=5e-2, atol=2e-2)

    print("KERNEL_OK")
</pallas_src>

<mosaic_0001>
module attributes {stable_mosaic.version = 11 : i64} {
  func.func @_decoder_kernel(%arg0: i32, %arg1: memref<1x16x16x8xf32, #tpu.memory_space<vmem>>, %arg2: memref<9x8x16xf32, #tpu.memory_space<vmem>>, %arg3: memref<1x16xf32, #tpu.memory_space<vmem>>, %arg4: memref<16x16x8xf32, #tpu.memory_space<vmem>>, %arg5: memref<1x8xf32, #tpu.memory_space<vmem>>, %arg6: memref<1x32x16x16xf32, #tpu.memory_space<vmem>>) attributes {dimension_semantics = [#tpu.dimension_semantics<parallel>], iteration_bounds = array<i64: 2>, scalar_prefetch = 0 : i64, scratch_operands = 0 : i64, tpu.core_type = #tpu.core_type<tc>, window_params = [{transform_indices = @transform_0, window_bounds = array<i64: 1, 16, 16, 8>}, {pipeline_mode = #tpu.pipeline_mode<synchronous>, transform_indices = @transform_1, window_bounds = array<i64: 9, 8, 16>}, {pipeline_mode = #tpu.pipeline_mode<synchronous>, transform_indices = @transform_2, window_bounds = array<i64: 1, 16>}, {pipeline_mode = #tpu.pipeline_mode<synchronous>, transform_indices = @transform_3, window_bounds = array<i64: 16, 16, 8>}, {pipeline_mode = #tpu.pipeline_mode<synchronous>, transform_indices = @transform_4, window_bounds = array<i64: 1, 8>}, {transform_indices = @transform_5, window_bounds = array<i64: 1, 32, 16, 16>}]} {
    %c0 = arith.constant 0 : index
    %c0_0 = arith.constant 0 : index
    %c0_1 = arith.constant 0 : index
    %c0_2 = arith.constant 0 : index
    %0 = vector.load %arg1[%c0, %c0_0, %c0_1, %c0_2] : memref<1x16x16x8xf32, #tpu.memory_space<vmem>>, vector<1x16x16x8xf32>
    %cst = arith.constant 0.000000e+00 : f32
    %1 = vector.broadcast %cst : f32 to vector<1x16x1x8xf32>
    %2 = tpu.concatenate %1, %0, %1 in 2 : vector<1x16x1x8xf32>, vector<1x16x16x8xf32>, vector<1x16x1x8xf32> -> vector<1x16x18x8xf32>
    %cst_3 = arith.constant 0.000000e+00 : f32
    %3 = vector.broadcast %cst_3 : f32 to vector<1x1x18x8xf32>
    %4 = tpu.concatenate %3, %2, %3 in 1 : vector<1x1x18x8xf32>, vector<1x16x18x8xf32>, vector<1x1x18x8xf32> -> vector<1x18x18x8xf32>
    %5 = vector.extract_strided_slice %4 {offsets = [0, 0, 0, 0], sizes = [1, 16, 16, 8], strides = [1, 1, 1, 1]} : vector<1x18x18x8xf32> to vector<1x16x16x8xf32>
    %6 = vector.shape_cast %5 : vector<1x16x16x8xf32> to vector<256x8xf32>
    %c0_4 = arith.constant 0 : index
    %c0_5 = arith.constant 0 : index
    %c0_6 = arith.constant 0 : index
    %7 = vector.load %arg2[%c0_4, %c0_5, %c0_6] : memref<9x8x16xf32, #tpu.memory_space<vmem>>, vector<1x8x16xf32>
    %8 = vector.shape_cast %7 : vector<1x8x16xf32> to vector<8x16xf32>
    %cst_7 = arith.constant dense<0.000000e+00> : vector<256x16xf32>
    %9 = tpu.matmul %6, %8, %cst_7 {dimension_numbers = #tpu.dot_dimension_numbers<[1], [0], [0], [1], [0, 0, 1, 1], [], []>} : vector<256x8xf32>, vector<8x16xf32>, vector<256x16xf32> -> vector<256x16xf32>
    %10 = vector.extract_strided_slice %4 {offsets = [0, 0, 1, 0], sizes = [1, 16, 16, 8], strides = [1, 1, 1, 1]} : vector<1x18x18x8xf32> to vector<1x16x16x8xf32>
    %11 = vector.shape_cast %10 : vector<1x16x16x8xf32> to vector<256x8xf32>
    %c1 = arith.constant 1 : index
    %c0_8 = arith.constant 0 : index
    %c0_9 = arith.constant 0 : index
    %12 = vector.load %arg2[%c1, %c0_8, %c0_9] : memref<9x8x16xf32, #tpu.memory_space<vmem>>, vector<1x8x16xf32>
    %13 = vector.shape_cast %12 : vector<1x8x16xf32> to vector<8x16xf32>
    %cst_10 = arith.constant dense<0.000000e+00> : vector<256x16xf32>
    %14 = tpu.matmul %11, %13, %cst_10 {dimension_numbers = #tpu.dot_dimension_numbers<[1], [0], [0], [1], [0, 0, 1, 1], [], []>} : vector<256x8xf32>, vector<8x16xf32>, vector<256x16xf32> -> vector<256x16xf32>
    %15 = arith.addf %9, %14 : vector<256x16xf32>
    %16 = vector.extract_strided_slice %4 {offsets = [0, 0, 2, 0], sizes = [1, 16, 16, 8], strides = [1, 1, 1, 1]} : vector<1x18x18x8xf32> to vector<1x16x16x8xf32>
    %17 = vector.shape_cast %16 : vector<1x16x16x8xf32> to vector<256x8xf32>
    %c2 = arith.constant 2 : index
    %c0_11 = arith.constant 0 : index
    %c0_12 = arith.constant 0 : index
    %18 = vector.load %arg2[%c2, %c0_11, %c0_12] : memref<9x8x16xf32, #tpu.memory_space<vmem>>, vector<1x8x16xf32>
    %19 = vector.shape_cast %18 : vector<1x8x16xf32> to vector<8x16xf32>
    %cst_13 = arith.constant dense<0.000000e+00> : vector<256x16xf32>
    %20 = tpu.matmul %17, %19, %cst_13 {dimension_numbers = #tpu.dot_dimension_numbers<[1], [0], [0], [1], [0, 0, 1, 1], [], []>} : vector<256x8xf32>, vector<8x16xf32>, vector<256x16xf32> -> vector<256x16xf32>
    %21 = arith.addf %15, %20 : vector<256x16xf32>
    %22 = vector.extract_strided_slice %4 {offsets = [0, 1, 0, 0], sizes = [1, 16, 16, 8], strides = [1, 1, 1, 1]} : vector<1x18x18x8xf32> to vector<1x16x16x8xf32>
    %23 = vector.shape_cast %22 : vector<1x16x16x8xf32> to vector<256x8xf32>
    %c3 = arith.constant 3 : index
    %c0_14 = arith.constant 0 : index
    %c0_15 = arith.constant 0 : index
    %24 = vector.load %arg2[%c3, %c0_14, %c0_15] : memref<9x8x16xf32, #tpu.memory_space<vmem>>, vector<1x8x16xf32>
    %25 = vector.shape_cast %24 : vector<1x8x16xf32> to vector<8x16xf32>
    %cst_16 = arith.constant dense<0.000000e+00> : vector<256x16xf32>
    %26 = tpu.matmul %23, %25, %cst_16 {dimension_numbers = #tpu.dot_dimension_numbers<[1], [0], [0], [1], [0, 0, 1, 1], [], []>} : vector<256x8xf32>, vector<8x16xf32>, vector<256x16xf32> -> vector<256x16xf32>
    %27 = arith.addf %21, %26 : vector<256x16xf32>
    %28 = vector.extract_strided_slice %4 {offsets = [0, 1, 1, 0], sizes = [1, 16, 16, 8], strides = [1, 1, 1, 1]} : vector<1x18x18x8xf32> to vector<1x16x16x8xf32>
    %29 = vector.shape_cast %28 : vector<1x16x16x8xf32> to vector<256x8xf32>
    %c4 = arith.constant 4 : index
    %c0_17 = arith.constant 0 : index
    %c0_18 = arith.constant 0 : index
    %30 = vector.load %arg2[%c4, %c0_17, %c0_18] : memref<9x8x16xf32, #tpu.memory_space<vmem>>, vector<1x8x16xf32>
    %31 = vector.shape_cast %30 : vector<1x8x16xf32> to vector<8x16xf32>
    %cst_19 = arith.constant dense<0.000000e+00> : vector<256x16xf32>
    %32 = tpu.matmul %29, %31, %cst_19 {dimension_numbers = #tpu.dot_dimension_numbers<[1], [0], [0], [1], [0, 0, 1, 1], [], []>} : vector<256x8xf32>, vector<8x16xf32>, vector<256x16xf32> -> vector<256x16xf32>
    %33 = arith.addf %27, %32 : vector<256x16xf32>
    %34 = vector.extract_strided_slice %4 {offsets = [0, 1, 2, 0], sizes = [1, 16, 16, 8], strides = [1, 1, 1, 1]} : vector<1x18x18x8xf32> to vector<1x16x16x8xf32>
    %35 = vector.shape_cast %34 : vector<1x16x16x8xf32> to vector<256x8xf32>
    %c5 = arith.constant 5 : index
    %c0_20 = arith.constant 0 : index
    %c0_21 = arith.constant 0 : index
    %36 = vector.load %arg2[%c5, %c0_20, %c0_21] : memref<9x8x16xf32, #tpu.memory_space<vmem>>, vector<1x8x16xf32>
    %37 = vector.shape_cast %36 : vector<1x8x16xf32> to vector<8x16xf32>
    %cst_22 = arith.constant dense<0.000000e+00> : vector<256x16xf32>
    %38 = tpu.matmul %35, %37, %cst_22 {dimension_numbers = #tpu.dot_dimension_numbers<[1], [0], [0], [1], [0, 0, 1, 1], [], []>} : vector<256x8xf32>, vector<8x16xf32>, vector<256x16xf32> -> vector<256x16xf32>
    %39 = arith.addf %33, %38 : vector<256x16xf32>
    %40 = vector.extract_strided_slice %4 {offsets = [0, 2, 0, 0], sizes = [1, 16, 16, 8], strides = [1, 1, 1, 1]} : vector<1x18x18x8xf32> to vector<1x16x16x8xf32>
    %41 = vector.shape_cast %40 : vector<1x16x16x8xf32> to vector<256x8xf32>
    %c6 = arith.constant 6 : index
    %c0_23 = arith.constant 0 : index
    %c0_24 = arith.constant 0 : index
    %42 = vector.load %arg2[%c6, %c0_23, %c0_24] : memref<9x8x16xf32, #tpu.memory_space<vmem>>, vector<1x8x16xf32>
    %43 = vector.shape_cast %42 : vector<1x8x16xf32> to vector<8x16xf32>
    %cst_25 = arith.constant dense<0.000000e+00> : vector<256x16xf32>
    %44 = tpu.matmul %41, %43, %cst_25 {dimension_numbers = #tpu.dot_dimension_numbers<[1], [0], [0], [1], [0, 0, 1, 1], [], []>} : vector<256x8xf32>, vector<8x16xf32>, vector<256x16xf32> -> vector<256x16xf32>
    %45 = arith.addf %39, %44 : vector<256x16xf32>
    %46 = vector.extract_strided_slice %4 {offsets = [0, 2, 1, 0], sizes = [1, 16, 16, 8], strides = [1, 1, 1, 1]} : vector<1x18x18x8xf32> to vector<1x16x16x8xf32>
    %47 = vector.shape_cast %46 : vector<1x16x16x8xf32> to vector<256x8xf32>
    %c7 = arith.constant 7 : index
    %c0_26 = arith.constant 0 : index
    %c0_27 = arith.constant 0 : index
    %48 = vector.load %arg2[%c7, %c0_26, %c0_27] : memref<9x8x16xf32, #tpu.memory_space<vmem>>, vector<1x8x16xf32>
    %49 = vector.shape_cast %48 : vector<1x8x16xf32> to vector<8x16xf32>
    %cst_28 = arith.constant dense<0.000000e+00> : vector<256x16xf32>
    %50 = tpu.matmul %47, %49, %cst_28 {dimension_numbers = #tpu.dot_dimension_numbers<[1], [0], [0], [1], [0, 0, 1, 1], [], []>} : vector<256x8xf32>, vector<8x16xf32>, vector<256x16xf32> -> vector<256x16xf32>
    %51 = arith.addf %45, %50 : vector<256x16xf32>
    %52 = vector.extract_strided_slice %4 {offsets = [0, 2, 2, 0], sizes = [1, 16, 16, 8], strides = [1, 1, 1, 1]} : vector<1x18x18x8xf32> to vector<1x16x16x8xf32>
    %53 = vector.shape_cast %52 : vector<1x16x16x8xf32> to vector<256x8xf32>
    %c8 = arith.constant 8 : index
    %c0_29 = arith.constant 0 : index
    %c0_30 = arith.constant 0 : index
    %54 = vector.load %arg2[%c8, %c0_29, %c0_30] : memref<9x8x16xf32, #tpu.memory_space<vmem>>, vector<1x8x16xf32>
    %55 = vector.shape_cast %54 : vector<1x8x16xf32> to vector<8x16xf32>
    %cst_31 = arith.constant dense<0.000000e+00> : vector<256x16xf32>
    %56 = tpu.matmul %53, %55, %cst_31 {dimension_numbers = #tpu.dot_dimension_numbers<[1], [0], [0], [1], [0, 0, 1, 1], [], []>} : vector<256x8xf32>, vector<8x16xf32>, vector<256x16xf32> -> vector<256x16xf32>
    %57 = arith.addf %51, %56 : vector<256x16xf32>
    %c0_32 = arith.constant 0 : index
    %c0_33 = arith.constant 0 : index
    %58 = vector.load %arg3[%c0_32, %c0_33] : memref<1x16xf32, #tpu.memory_space<vmem>>, vector<1x16xf32>
    %59 = vector.broadcast %58 : vector<1x16xf32> to vector<256x16xf32>
    %60 = arith.addf %57, %59 : vector<256x16xf32>
    %cst_34 = arith.constant 0.000000e+00 : f32
    %61 = vector.broadcast %cst_34 : f32 to vector<256x16xf32>
    %62 = arith.maximumf %60, %61 : vector<256x16xf32>
    %63 = vector.shape_cast %62 : vector<256x16xf32> to vector<1x16x16x16xf32>
    %cst_35 = arith.constant 0.000000e+00 : f32
    %64 = vector.broadcast %cst_35 : f32 to vector<1x16x1x16xf32>
    %65 = tpu.concatenate %64, %63, %64 in 2 : vector<1x16x1x16xf32>, vector<1x16x16x16xf32>, vector<1x16x1x16xf32> -> vector<1x16x18x16xf32>
    %cst_36 = arith.constant 0.000000e+00 : f32
    %66 = vector.broadcast %cst_36 : f32 to vector<1x1x18x16xf32>
    %67 = tpu.concatenate %66, %65, %66 in 1 : vector<1x1x18x16xf32>, vector<1x16x18x16xf32>, vector<1x1x18x16xf32> -> vector<1x18x18x16xf32>
    %68 = vector.extract_strided_slice %67 {offsets = [0, 1, 1, 0], sizes = [1, 16, 16, 16], strides = [1, 1, 1, 1]} : vector<1x18x18x16xf32> to vector<1x16x16x16xf32>
    %69 = vector.shape_cast %68 : vector<1x16x16x16xf32> to vector<256x16xf32>
    %c5_37 = arith.constant 5 : index
    %c0_38 = arith.constant 0 : index
    %c0_39 = arith.constant 0 : index
    %70 = vector.load %arg4[%c5_37, %c0_38, %c0_39] : memref<16x16x8xf32, #tpu.memory_space<vmem>>, vector<1x16x8xf32>
    %71 = vector.shape_cast %70 : vector<1x16x8xf32> to vector<16x8xf32>
    %cst_40 = arith.constant dense<0.000000e+00> : vector<256x8xf32>
    %72 = tpu.matmul %69, %71, %cst_40 {dimension_numbers = #tpu.dot_dimension_numbers<[1], [0], [0], [1], [0, 0, 1, 1], [], []>} : vector<256x16xf32>, vector<16x8xf32>, vector<256x8xf32> -> vector<256x8xf32>
    %73 = vector.extract_strided_slice %67 {offsets = [0, 1, 0, 0], sizes = [1, 16, 16, 16], strides = [1, 1, 1, 1]} : vector<1x18x18x16xf32> to vector<1x16x16x16xf32>
    %74 = vector.shape_cast %73 : vector<1x16x16x16xf32> to vector<256x16xf32>
    %c7_41 = arith.constant 7 : index
    %c0_42 = arith.constant 0 : index
    %c0_43 = arith.constant 0 : index
    %75 = vector.load %arg4[%c7_41, %c0_42, %c0_43] : memref<16x16x8xf32, #tpu.memory_space<vmem>>, vector<1x16x8xf32>
    %76 = vector.shape_cast %75 : vector<1x16x8xf32> to vector<16x8xf32>
    %cst_44 = arith.constant dense<0.000000e+00> : vector<256x8xf32>
    %77 = tpu.matmul %74, %76, %cst_44 {dimension_numbers = #tpu.dot_dimension_numbers<[1], [0], [0], [1], [0, 0, 1, 1], [], []>} : vector<256x16xf32>, vector<16x8xf32>, vector<256x8xf32> -> vector<256x8xf32>
    %78 = arith.addf %72, %77 : vector<256x8xf32>
    %79 = vector.extract_strided_slice %67 {offsets = [0, 0, 1, 0], sizes = [1, 16, 16, 16], strides = [1, 1, 1, 1]} : vector<1x18x18x16xf32> to vector<1x16x16x16xf32>
    %80 = vector.shape_cast %79 : vector<1x16x16x16xf32> to vector<256x16xf32>
    %c13 = arith.constant 13 : index
    %c0_45 = arith.constant 0 : index
    %c0_46 = arith.constant 0 : index
    %81 = vector.load %arg4[%c13, %c0_45, %c0_46] : memref<16x16x8xf32, #tpu.memory_space<vmem>>, vector<1x16x8xf32>
    %82 = vector.shape_cast %81 : vector<1x16x8xf32> to vector<16x8xf32>
    %cst_47 = arith.constant dense<0.000000e+00> : vector<256x8xf32>
    %83 = tpu.matmul %80, %82, %cst_47 {dimension_numbers = #tpu.dot_dimension_numbers<[1], [0], [0], [1], [0, 0, 1, 1], [], []>} : vector<256x16xf32>, vector<16x8xf32>, vector<256x8xf32> -> vector<256x8xf32>
    %84 = arith.addf %78, %83 : vector<256x8xf32>
    %85 = vector.extract_strided_slice %67 {offsets = [0, 0, 0, 0], sizes = [1, 16, 16, 16], strides = [1, 1, 1, 1]} : vector<1x18x18x16xf32> to vector<1x16x16x16xf32>
    %86 = vector.shape_cast %85 : vector<1x16x16x16xf32> to vector<256x16xf32>
    %c15 = arith.constant 15 : index
    %c0_48 = arith.constant 0 : index
    %c0_49 = arith.constant 0 : index
    %87 = vector.load %arg4[%c15, %c0_48, %c0_49] : memref<16x16x8xf32, #tpu.memory_space<vmem>>, vector<1x16x8xf32>
    %88 = vector.shape_cast %87 : vector<1x16x8xf32> to vector<16x8xf32>
    %cst_50 = arith.constant dense<0.000000e+00> : vector<256x8xf32>
    %89 = tpu.matmul %86, %88, %cst_50 {dimension_numbers = #tpu.dot_dimension_numbers<[1], [0], [0], [1], [0, 0, 1, 1], [], []>} : vector<256x16xf32>, vector<16x8xf32>, vector<256x8xf32> -> vector<256x8xf32>
    %90 = arith.addf %84, %89 : vector<256x8xf32>
    %c0_51 = arith.constant 0 : index
    %c0_52 = arith.constant 0 : index
    %91 = vector.load %arg5[%c0_51, %c0_52] : memref<1x8xf32, #tpu.memory_space<vmem>>, vector<1x8xf32>
    %92 = vector.broadcast %91 : vector<1x8xf32> to vector<256x8xf32>
    %93 = arith.addf %90, %92 : vector<256x8xf32>
    %cst_53 = arith.constant 0.000000e+00 : f32
    %94 = vector.broadcast %cst_53 : f32 to vector<256x8xf32>
    %95 = arith.maximumf %93, %94 : vector<256x8xf32>
    %96 = vector.extract_strided_slice %67 {offsets = [0, 1, 2, 0], sizes = [1, 16, 16, 16], strides = [1, 1, 1, 1]} : vector<1x18x18x16xf32> to vector<1x16x16x16xf32>
    %97 = vector.shape_cast %96 : vector<1x16x16x16xf32> to vector<256x16xf32>
    %c4_54 = arith.constant 4 : index
    %c0_55 = arith.constant 0 : index
    %c0_56 = arith.constant 0 : index
    %98 = vector.load %arg4[%c4_54, %c0_55, %c0_56] : memref<16x16x8xf32, #tpu.memory_space<vmem>>, vector<1x16x8xf32>
    %99 = vector.shape_cast %98 : vector<1x16x8xf32> to vector<16x8xf32>
    %cst_57 = arith.constant dense<0.000000e+00> : vector<256x8xf32>
    %100 = tpu.matmul %97, %99, %cst_57 {dimension_numbers = #tpu.dot_dimension_numbers<[1], [0], [0], [1], [0, 0, 1, 1], [], []>} : vector<256x16xf32>, vector<16x8xf32>, vector<256x8xf32> -> vector<256x8xf32>
    %101 = vector.extract_strided_slice %67 {offsets = [0, 1, 1, 0], sizes = [1, 16, 16, 16], strides = [1, 1, 1, 1]} : vector<1x18x18x16xf32> to vector<1x16x16x16xf32>
    %102 = vector.shape_cast %101 : vector<1x16x16x16xf32> to vector<256x16xf32>
    %c6_58 = arith.constant 6 : index
    %c0_59 = arith.constant 0 : index
    %c0_60 = arith.constant 0 : index
    %103 = vector.load %arg4[%c6_58, %c0_59, %c0_60] : memref<16x16x8xf32, #tpu.memory_space<vmem>>, vector<1x16x8xf32>
    %104 = vector.shape_cast %103 : vector<1x16x8xf32> to vector<16x8xf32>
    %cst_61 = arith.constant dense<0.000000e+00> : vector<256x8xf32>
    %105 = tpu.matmul %102, %104, %cst_61 {dimension_numbers = #tpu.dot_dimension_numbers<[1], [0], [0], [1], [0, 0, 1, 1], [], []>} : vector<256x16xf32>, vector<16x8xf32>, vector<256x8xf32> -> vector<256x8xf32>
    %106 = arith.addf %100, %105 : vector<256x8xf32>
    %107 = vector.extract_strided_slice %67 {offsets = [0, 0, 2, 0], sizes = [1, 16, 16, 16], strides = [1, 1, 1, 1]} : vector<1x18x18x16xf32> to vector<1x16x16x16xf32>
    %108 = vector.shape_cast %107 : vector<1x16x16x16xf32> to vector<256x16xf32>
    %c12 = arith.constant 12 : index
    %c0_62 = arith.constant 0 : index
    %c0_63 = arith.constant 0 : index
    %109 = vector.load %arg4[%c12, %c0_62, %c0_63] : memref<16x16x8xf32, #tpu.memory_space<vmem>>, vector<1x16x8xf32>
    %110 = vector.shape_cast %109 : vector<1x16x8xf32> to vector<16x8xf32>
    %cst_64 = arith.constant dense<0.000000e+00> : vector<256x8xf32>
    %111 = tpu.matmul %108, %110, %cst_64 {dimension_numbers = #tpu.dot_dimension_numbers<[1], [0], [0], [1], [0, 0, 1, 1], [], []>} : vector<256x16xf32>, vector<16x8xf32>, vector<256x8xf32> -> vector<256x8xf32>
    %112 = arith.addf %106, %111 : vector<256x8xf32>
    %113 = vector.extract_strided_slice %67 {offsets = [0, 0, 1, 0], sizes = [1, 16, 16, 16], strides = [1, 1, 1, 1]} : vector<1x18x18x16xf32> to vector<1x16x16x16xf32>
    %114 = vector.shape_cast %113 : vector<1x16x16x16xf32> to vector<256x16xf32>
    %c14 = arith.constant 14 : index
    %c0_65 = arith.constant 0 : index
    %c0_66 = arith.constant 0 : index
    %115 = vector.load %arg4[%c14, %c0_65, %c0_66] : memref<16x16x8xf32, #tpu.memory_space<vmem>>, vector<1x16x8xf32>
    %116 = vector.shape_cast %115 : vector<1x16x8xf32> to vector<16x8xf32>
    %cst_67 = arith.constant dense<0.000000e+00> : vector<256x8xf32>
    %117 = tpu.matmul %114, %116, %cst_67 {dimension_numbers = #tpu.dot_dimension_numbers<[1], [0], [0], [1], [0, 0, 1, 1], [], []>} : vector<256x16xf32>, vector<16x8xf32>, vector<256x8xf32> -> vector<256x8xf32>
    %118 = arith.addf %112, %117 : vector<256x8xf32>
    %c0_68 = arith.constant 0 : index
    %c0_69 = arith.constant 0 : index
    %119 = vector.load %arg5[%c0_68, %c0_69] : memref<1x8xf32, #tpu.memory_space<vmem>>, vector<1x8xf32>
    %120 = vector.broadcast %119 : vector<1x8xf32> to vector<256x8xf32>
    %121 = arith.addf %118, %120 : vector<256x8xf32>
    %cst_70 = arith.constant 0.000000e+00 : f32
    %122 = vector.broadcast %cst_70 : f32 to vector<256x8xf32>
    %123 = arith.maximumf %121, %122 : vector<256x8xf32>
    %124 = tpu.concatenate %95, %123 in 1 : vector<256x8xf32>, vector<256x8xf32> -> vector<256x16xf32>
    %125 = vector.shape_cast %124 : vector<256x16xf32> to vector<16x16x16xf32>
    %126 = vector.extract_strided_slice %67 {offsets = [0, 2, 1, 0], sizes = [1, 16, 16, 16], strides = [1, 1, 1, 1]} : vector<1x18x18x16xf32> to vector<1x16x16x16xf32>
    %127 = vector.shape_cast %126 : vector<1x16x16x16xf32> to vector<256x16xf32>
    %c1_71 = arith.constant 1 : index
    %c0_72 = arith.constant 0 : index
    %c0_73 = arith.constant 0 : index
    %128 = vector.load %arg4[%c1_71, %c0_72, %c0_73] : memref<16x16x8xf32, #tpu.memory_space<vmem>>, vector<1x16x8xf32>
    %129 = vector.shape_cast %128 : vector<1x16x8xf32> to vector<16x8xf32>
    %cst_74 = arith.constant dense<0.000000e+00> : vector<256x8xf32>
    %130 = tpu.matmul %127, %129, %cst_74 {dimension_numbers = #tpu.dot_dimension_numbers<[1], [0], [0], [1], [0, 0, 1, 1], [], []>} : vector<256x16xf32>, vector<16x8xf32>, vector<256x8xf32> -> vector<256x8xf32>
    %131 = vector.extract_strided_slice %67 {offsets = [0, 2, 0, 0], sizes = [1, 16, 16, 16], strides = [1, 1, 1, 1]} : vector<1x18x18x16xf32> to vector<1x16x16x16xf32>
    %132 = vector.shape_cast %131 : vector<1x16x16x16xf32> to vector<256x16xf32>
    %c3_75 = arith.constant 3 : index
    %c0_76 = arith.constant 0 : index
    %c0_77 = arith.constant 0 : index
    %133 = vector.load %arg4[%c3_75, %c0_76, %c0_77] : memref<16x16x8xf32, #tpu.memory_space<vmem>>, vector<1x16x8xf32>
    %134 = vector.shape_cast %133 : vector<1x16x8xf32> to vector<16x8xf32>
    %cst_78 = arith.constant dense<0.000000e+00> : vector<256x8xf32>
    %135 = tpu.matmul %132, %134, %cst_78 {dimension_numbers = #tpu.dot_dimension_numbers<[1], [0], [0], [1], [0, 0, 1, 1], [], []>} : vector<256x16xf32>, vector<16x8xf32>, vector<256x8xf32> -> vector<256x8xf32>
    %136 = arith.addf %130, %135 : vector<256x8xf32>
    %137 = vector.extract_strided_slice %67 {offsets = [0, 1, 1, 0], sizes = [1, 16, 16, 16], strides = [1, 1, 1, 1]} : vector<1x18x18x16xf32> to vector<1x16x16x16xf32>
    %138 = vector.shape_cast %137 : vector<1x16x16x16xf32> to vector<256x16xf32>
    %c9 = arith.constant 9 : index
    %c0_79 = arith.constant 0 : index
    %c0_80 = arith.constant 0 : index
    %139 = vector.load %arg4[%c9, %c0_79, %c0_80] : memref<16x16x8xf32, #tpu.memory_space<vmem>>, vector<1x16x8xf32>
    %140 = vector.shape_cast %139 : vector<1x16x8xf32> to vector<16x8xf32>
    %cst_81 = arith.constant dense<0.000000e+00> : vector<256x8xf32>
    %141 = tpu.matmul %138, %140, %cst_81 {dimension_numbers = #tpu.dot_dimension_numbers<[1], [0], [0], [1], [0, 0, 1, 1], [], []>} : vector<256x16xf32>, vector<16x8xf32>, vector<256x8xf32> -> vector<256x8xf32>
    %142 = arith.addf %136, %141 : vector<256x8xf32>
    %143 = vector.extract_strided_slice %67 {offsets = [0, 1, 0, 0], sizes = [1, 16, 16, 16], strides = [1, 1, 1, 1]} : vector<1x18x18x16xf32> to vector<1x16x16x16xf32>
    %144 = vector.shape_cast %143 : vector<1x16x16x16xf32> to vector<256x16xf32>
    %c11 = arith.constant 11 : index
    %c0_82 = arith.constant 0 : index
    %c0_83 = arith.constant 0 : index
    %145 = vector.load %arg4[%c11, %c0_82, %c0_83] : memref<16x16x8xf32, #tpu.memory_space<vmem>>, vector<1x16x8xf32>
    %146 = vector.shape_cast %145 : vector<1x16x8xf32> to vector<16x8xf32>
    %cst_84 = arith.constant dense<0.000000e+00> : vector<256x8xf32>
    %147 = tpu.matmul %144, %146, %cst_84 {dimension_numbers = #tpu.dot_dimension_numbers<[1], [0], [0], [1], [0, 0, 1, 1], [], []>} : vector<256x16xf32>, vector<16x8xf32>, vector<256x8xf32> -> vector<256x8xf32>
    %148 = arith.addf %142, %147 : vector<256x8xf32>
    %c0_85 = arith.constant 0 : index
    %c0_86 = arith.constant 0 : index
    %149 = vector.load %arg5[%c0_85, %c0_86] : memref<1x8xf32, #tpu.memory_space<vmem>>, vector<1x8xf32>
    %150 = vector.broadcast %149 : vector<1x8xf32> to vector<256x8xf32>
    %151 = arith.addf %148, %150 : vector<256x8xf32>
    %cst_87 = arith.constant 0.000000e+00 : f32
    %152 = vector.broadcast %cst_87 : f32 to vector<256x8xf32>
    %153 = arith.maximumf %151, %152 : vector<256x8xf32>
    %154 = vector.extract_strided_slice %67 {offsets = [0, 2, 2, 0], sizes = [1, 16, 16, 16], strides = [1, 1, 1, 1]} : vector<1x18x18x16xf32> to vector<1x16x16x16xf32>
    %155 = vector.shape_cast %154 : vector<1x16x16x16xf32> to vector<256x16xf32>
    %c0_88 = arith.constant 0 : index
    %c0_89 = arith.constant 0 : index
    %c0_90 = arith.constant 0 : index
    %156 = vector.load %arg4[%c0_88, %c0_89, %c0_90] : memref<16x16x8xf32, #tpu.memory_space<vmem>>, vector<1x16x8xf32>
    %157 = vector.shape_cast %156 : vector<1x16x8xf32> to vector<16x8xf32>
    %cst_91 = arith.constant dense<0.000000e+00> : vector<256x8xf32>
    %158 = tpu.matmul %155, %157, %cst_91 {dimension_numbers = #tpu.dot_dimension_numbers<[1], [0], [0], [1], [0, 0, 1, 1], [], []>} : vector<256x16xf32>, vector<16x8xf32>, vector<256x8xf32> -> vector<256x8xf32>
    %159 = vector.extract_strided_slice %67 {offsets = [0, 2, 1, 0], sizes = [1, 16, 16, 16], strides = [1, 1, 1, 1]} : vector<1x18x18x16xf32> to vector<1x16x16x16xf32>
    %160 = vector.shape_cast %159 : vector<1x16x16x16xf32> to vector<256x16xf32>
    %c2_92 = arith.constant 2 : index
    %c0_93 = arith.constant 0 : index
    %c0_94 = arith.constant 0 : index
    %161 = vector.load %arg4[%c2_92, %c0_93, %c0_94] : memref<16x16x8xf32, #tpu.memory_space<vmem>>, vector<1x16x8xf32>
    %162 = vector.shape_cast %161 : vector<1x16x8xf32> to vector<16x8xf32>
    %cst_95 = arith.constant dense<0.000000e+00> : vector<256x8xf32>
    %163 = tpu.matmul %160, %162, %cst_95 {dimension_numbers = #tpu.dot_dimension_numbers<[1], [0], [0], [1], [0, 0, 1, 1], [], []>} : vector<256x16xf32>, vector<16x8xf32>, vector<256x8xf32> -> vector<256x8xf32>
    %164 = arith.addf %158, %163 : vector<256x8xf32>
    %165 = vector.extract_strided_slice %67 {offsets = [0, 1, 2, 0], sizes = [1, 16, 16, 16], strides = [1, 1, 1, 1]} : vector<1x18x18x16xf32> to vector<1x16x16x16xf32>
    %166 = vector.shape_cast %165 : vector<1x16x16x16xf32> to vector<256x16xf32>
    %c8_96 = arith.constant 8 : index
    %c0_97 = arith.constant 0 : index
    %c0_98 = arith.constant 0 : index
    %167 = vector.load %arg4[%c8_96, %c0_97, %c0_98] : memref<16x16x8xf32, #tpu.memory_space<vmem>>, vector<1x16x8xf32>
    %168 = vector.shape_cast %167 : vector<1x16x8xf32> to vector<16x8xf32>
    %cst_99 = arith.constant dense<0.000000e+00> : vector<256x8xf32>
    %169 = tpu.matmul %166, %168, %cst_99 {dimension_numbers = #tpu.dot_dimension_numbers<[1], [0], [0], [1], [0, 0, 1, 1], [], []>} : vector<256x16xf32>, vector<16x8xf32>, vector<256x8xf32> -> vector<256x8xf32>
    %170 = arith.addf %164, %169 : vector<256x8xf32>
    %171 = vector.extract_strided_slice %67 {offsets = [0, 1, 1, 0], sizes = [1, 16, 16, 16], strides = [1, 1, 1, 1]} : vector<1x18x18x16xf32> to vector<1x16x16x16xf32>
    %172 = vector.shape_cast %171 : vector<1x16x16x16xf32> to vector<256x16xf32>
    %c10 = arith.constant 10 : index
    %c0_100 = arith.constant 0 : index
    %c0_101 = arith.constant 0 : index
    %173 = vector.load %arg4[%c10, %c0_100, %c0_101] : memref<16x16x8xf32, #tpu.memory_space<vmem>>, vector<1x16x8xf32>
    %174 = vector.shape_cast %173 : vector<1x16x8xf32> to vector<16x8xf32>
    %cst_102 = arith.constant dense<0.000000e+00> : vector<256x8xf32>
    %175 = tpu.matmul %172, %174, %cst_102 {dimension_numbers = #tpu.dot_dimension_numbers<[1], [0], [0], [1], [0, 0, 1, 1], [], []>} : vector<256x16xf32>, vector<16x8xf32>, vector<256x8xf32> -> vector<256x8xf32>
    %176 = arith.addf %170, %175 : vector<256x8xf32>
    %c0_103 = arith.constant 0 : index
    %c0_104 = arith.constant 0 : index
    %177 = vector.load %arg5[%c0_103, %c0_104] : memref<1x8xf32, #tpu.memory_space<vmem>>, vector<1x8xf32>
    %178 = vector.broadcast %177 : vector<1x8xf32> to vector<256x8xf32>
    %179 = arith.addf %176, %178 : vector<256x8xf32>
    %cst_105 = arith.constant 0.000000e+00 : f32
    %180 = vector.broadcast %cst_105 : f32 to vector<256x8xf32>
    %181 = arith.maximumf %179, %180 : vector<256x8xf32>
    %182 = tpu.concatenate %153, %181 in 1 : vector<256x8xf32>, vector<256x8xf32> -> vector<256x16xf32>
    %183 = vector.shape_cast %182 : vector<256x16xf32> to vector<16x16x16xf32>
    %184 = vector.shape_cast %125 : vector<16x16x16xf32> to vector<16x1x16x16xf32>
    %185 = vector.shape_cast %183 : vector<16x16x16xf32> to vector<16x1x16x16xf32>
    %186 = tpu.concatenate %184, %185 in 1 : vector<16x1x16x16xf32>, vector<16x1x16x16xf32> -> vector<16x2x16x16xf32>
    %187 = vector.shape_cast %186 : vector<16x2x16x16xf32> to vector<1x32x16x16xf32>
    %c0_106 = arith.constant 0 : index
    %c0_107 = arith.constant 0 : index
    %c0_108 = arith.constant 0 : index
    %c0_109 = arith.constant 0 : index
    %188 = vector.load %arg6[%c0_106, %c0_107, %c0_108, %c0_109] : memref<1x32x16x16xf32, #tpu.memory_space<vmem>>, vector<1x32x16x16xf32>
    tpu.vector_store %arg6[%c0_106, %c0_107, %c0_108, %c0_109], %187 {strides = array<i32>} : memref<1x32x16x16xf32, #tpu.memory_space<vmem>>, vector<1x32x16x16xf32>,
    return
  }
  func.func @transform_0(%arg0: i32) -> (i32, i32, i32, i32) {
    %c0_i32 = arith.constant 0 : i32
    %c0_i32_0 = arith.constant 0 : i32
    %c0_i32_1 = arith.constant 0 : i32
    %c0_i32_2 = arith.constant 0 : i32
    return %arg0, %c0_i32, %c0_i32_0, %c0_i32_1 : i32, i32, i32, i32
  }
  func.func @transform_1(%arg0: i32) -> (i32, i32, i32) {
    %c0_i32 = arith.constant 0 : i32
    %c0_i32_0 = arith.constant 0 : i32
    %c0_i32_1 = arith.constant 0 : i32
    %c0_i32_2 = arith.constant 0 : i32
    return %c0_i32, %c0_i32_0, %c0_i32_1 : i32, i32, i32
  }
  func.func @transform_2(%arg0: i32) -> (i32, i32) {
    %c0_i32 = arith.constant 0 : i32
    %c0_i32_0 = arith.constant 0 : i32
    %c0_i32_1 = arith.constant 0 : i32
    return %c0_i32, %c0_i32_0 : i32, i32
  }
  func.func @transform_3(%arg0: i32) -> (i32, i32, i32) {
    %c0_i32 = arith.constant 0 : i32
    %c0_i32_0 = arith.constant 0 : i32
    %c0_i32_1 = arith.constant 0 : i32
    %c0_i32_2 = arith.constant 0 : i32
    return %c0_i32, %c0_i32_0, %c0_i32_1 : i32, i32, i32
  }
  func.func @transform_4(%arg0: i32) -> (i32, i32) {
    %c0_i32 = arith.constant 0 : i32
    %c0_i32_0 = arith.constant 0 : i32
    %c0_i32_1 = arith.constant 0 : i32
    return %c0_i32, %c0_i32_0 : i32, i32
  }
  func.func @transform_5(%arg0: i32) -> (i32, i32, i32, i32) {
    %c0_i32 = arith.constant 0 : i32
    %c0_i32_0 = arith.constant 0 : i32
    %c0_i32_1 = arith.constant 0 : i32
    %c0_i32_2 = arith.constant 0 : i32
    return %arg0, %c0_i32, %c0_i32_0, %c0_i32_1 : i32, i32, i32, i32
  }
}

</mosaic_0001>

<bundles_post_ra>
// kernel: tpu_custom_call.1
= control target key start
LH: loop header
LB: loop body
LE: loop exit
PB: predicated region body
PF: predicated region fallthrough
CT: control target
= control target key end

     0   :  { %s6372_s18 = smov 0   ;;  %s9961_s0 = inlined_call_operand.vmem [shape: f32[2,16,16,8], index: 0, kind: input, shape index: {}]   ;;  %s9962_s1 = inlined_call_operand.vmem [shape: f32[9,8,16], index: 1, kind: input, shape index: {}]   ;;  %s9963_s2 = inlined_call_operand.vmem [shape: f32[1,16], index: 2, kind: input, shape index: {}]   ;;  %s9964_s3 = inlined_call_operand.vmem [shape: f32[16,16,8], index: 3, kind: input, shape index: {}]   ;;  %s9965_s4 = inlined_call_operand.vmem [shape: f32[1,8], index: 4, kind: input, shape index: {}]   ;;  %s9966_s5 = inlined_call_operand.vmem [shape: f32[2,32,16,16], index: 5, kind: output, shape index: {}]  }
   0x1 LB: > { %s5471_s19 = sadd.s32 4294967295, %s6338_s18   ;;  %p5475_p0 = scmp.ge.s32.totalorder %s6338_s18, 1  ;;  %s6338_s18 = sphi %s6372_s18, %s15_s18  }
   0x2   : > { %p187_p1 = scmp.lt.s32.totalorder %s6338_s18, 3 }
   0x4   : > { %p188_p2 = pnand %p5475_p0, %p187_p1 }
   0x6   : > { %191 = sbr.rel (%p188_p2) target bundleno = 1875 (0x753), region = 40 }
   0xb   : > { %v5480_v0 = vld [vmem:[%s9962_s1 + $0x8] sm:$0xff]  ;;  %vm514_vm0 = vcmask 64512   ;;  %p215_p3 = scmp.lt.s32.totalorder %s5471_s19, 1  ;;  %v9967_v1 = vmov 0.0   ;;  %v5543_v3 = vld [vmem:[%s9962_s1 + $0x10] sm:$0xff]  ;;  %v5576_v4 = vld [vmem:[%s9962_s1 + $0x18] sm:$0xff] }
   0xc   : > { %592 = vmatpush.msra.mxu0 %v5480_v0  ;;  %v6384_v2 = vrot.slane %v9967_v1, 1  ;;  %6314 = vmatpush.msra.mxu1 %v5480_v0  ;;  %v402_v5 = vld [vmem:[%s9962_s1] sm:$0xff]  ;;  %vm289_vm1 = vcmask 1040384   ;;  %vm434_vm2 = vcmask 1046528   ;;  %vm865_vm3 = vcmask 1045504   ;;  %s6341_s27 = smov 8  }
   0xd   : > { %6315 = vmatpush.msra.mxu2 %v5480_v0  ;;  %6316 = vmatpush.msra.mxu3 %v5480_v0  ;;  %s10590_s19 = smov (!%p215_p3, %s5471_s19), 1  ;;  %v5609_v6 = vld [vmem:[%s9962_s1 + $0x20] sm:$0xff]  ;;  %vm2388_vm4 = vcmask 130048  }
   0xe   : > { %10183 = vst [vmem:[#allocation2_spill] sm:$0xff] %v6384_v2  ;;  %5481 = vmatmul.msk.f32.vlgmr.msra.gmra.mxu0 %vm514_vm0, %v6384_v2  ;;  %s6312_s30 = sshll.u32 %s10590_s19, 8  ;;  %767 = vmatpush.msrb.mxu1 %v402_v5  ;;  %s6313_s11 = sshll.u32 %s10590_s19, 9 }
   0xf   : > { %1022 = vmatpush.msrb.mxu2 %v5543_v3  ;;  %1174 = vmatpush.msrb.mxu3 %v5576_v4  ;;  %s6406_s8 = scalar_lea.vmem %s9961_s0, %s6312_s30  ;;  %s8948_s14 = scalar_lea.vmem %s9966_s5, %s6313_s11 }
  0x10   : > { %1331 = vmatpush.msrb.mxu0 %v5609_v6  ;;  %v231_v7 = vld [vmem:[%s6406_s8 + $0x30] sm:$0xff]  ;;  %v232_v8 = vld [vmem:[%s6406_s8 + $0x38] sm:$0xff]  ;;  %v225_v19 = vld [vmem:[%s6406_s8] sm:$0xff] }
  0x11   : > { %v239_v9 = vld [vmem:[%s6406_s8 + $0x70] sm:$0xff]  ;;  %v299_v10 = vrot.slane %v231_v7, 7  ;;  %v300_v11 = vrot.slane %v232_v8, 7  ;;  %v240_v12 = vld [vmem:[%s6406_s8 + $0x78] sm:$0xff]  ;;  %v226_v20 = vld [vmem:[%s6406_s8 + $0x8] sm:$0xff]  ;;  %v290_v24 = vrot.slane %v225_v19, 7 }
  0x12   : > { %v311_v13 = vrot.slane %v239_v9, 7  ;;  %v247_v14 = vld [vmem:[%s6406_s8 + $0xb0] sm:$0xff]  ;;  %v248_v15 = vld [vmem:[%s6406_s8 + $0xb8] sm:$0xff]  ;;  %v312_v16 = vrot.slane %v240_v12, 7  ;;  %v291_v32 = vrot.slane %v226_v20, 7  ;;  %v233_v37 = vld [vmem:[%s6406_s8 + $0x40] sm:$0xff] }
  0x13   : > { %v323_v17 = vrot.slane %v247_v14, 7  ;;  %v324_v18 = vrot.slane %v248_v15, 7  ;;  %v6417_v21 = vsel %vm289_vm1, %v299_v10, %v300_v11  ;;  %v6420_v22 = vsel %vm289_vm1, 0.0, %v299_v10  ;;  %v234_v46 = vld [vmem:[%s6406_s8 + $0x48] sm:$0xff]  ;;  %v241_v47 = vld [vmem:[%s6406_s8 + $0x80] sm:$0xff]  ;;  %v227_v62 = vld [vmem:[%s6406_s8 + $0x10] sm:$0xff] }
  0x14   : > { %10184 = vst [vmem:[#allocation3_spill] sm:$0xff] %v6417_v21  ;;  %v6423_v23 = vsel %vm289_vm1, 0.0, %v311_v13  ;;  %v452_v25 = vrot.slane %v6420_v22, 1  ;;  %v453_v26 = vrot.slane %v6417_v21, 1  ;;  %v6428_v27 = vsel %vm289_vm1, %v311_v13, %v312_v16  ;;  %v242_v51 = vld [vmem:[%s6406_s8 + $0x88] sm:$0xff]  ;;  %v249_v54 = vld [vmem:[%s6406_s8 + $0xc0] sm:$0xff] }
  0x15   : > { %10185 = vst [vmem:[#allocation4_spill] sm:$0xff] %v6420_v22  ;;  %v472_v28 = vrot.slane %v6423_v23, 1  ;;  %v473_v29 = vrot.slane %v6428_v27, 1  ;;  %v6435_v30 = vsel %vm289_vm1, %v323_v17, %v324_v18  ;;  %v6438_v31 = vsel %vm289_vm1, 0.0, %v323_v17  ;;  %v250_v55 = vld [vmem:[%s6406_s8 + $0xc8] sm:$0xff]  ;;  %v228_v63 = vld [vmem:[%s6406_s8 + $0x18] sm:$0xff] }
  0x16   : > { %10186 = vst [vmem:[#allocation5_spill] sm:$0xff] %v6423_v23  ;;  %5482 = vmatmul.msk.f32.gmra.mxu0 %vm514_vm0, %v6384_v2  ;;  %v6441_v33 = vsel %vm434_vm2, %v452_v25, %v453_v26  ;;  %v492_v34 = vrot.slane %v6438_v31, 1  ;;  %v493_v35 = vrot.slane %v6435_v30, 1  ;;  %v6446_v36 = vsel %vm289_vm1, 0.0, %v290_v24 }
  0x17   : > { %10187 = vst [vmem:[#allocation6_spill] sm:$0xff] %v6435_v30  ;;  %5489 = vmatmul.msk.f32.vlgmr.msra.gmra.mxu1 %vm514_vm0, %v6441_v33  ;;  %v6452_v38 = vsel %vm434_vm2, %v472_v28, %v473_v29  ;;  %v6455_v39 = vsel %vm289_vm1, %v290_v24, %v291_v32  ;;  %v437_v40 = vrot.slane %v6446_v36, 1  ;;  %v6459_v41 = vsel %vm289_vm1, %v300_v11, 0.0  ;;  %v5706_v30 = vld [vmem:[%s9962_s1 + $0x38] sm:$0xff] }
  0x18   : > { %10188 = vst [vmem:[#allocation7_spill] sm:$0xff] %v6438_v31  ;;  %5497 = vmatmul.msk.f32.vlgmr.msra.gmra.mxu2 %vm514_vm0, %v6452_v38  ;;  %v6464_v42 = vsel %vm434_vm2, %v492_v34, %v493_v35  ;;  %v438_v43 = vrot.slane %v6455_v39, 1  ;;  %v455_v44 = vrot.slane %v6459_v41, 1  ;;  %v6469_v45 = vsel %vm289_vm1, %v312_v16, 0.0 }
  0x19   : > { %10189 = vst [vmem:[#allocation8_spill] sm:$0xff] %v6441_v33  ;;  %5505 = vmatmul.msk.f32.vlgmr.msra.gmra.mxu3 %vm514_vm0, %v6464_v42  ;;  %v475_v48 = vrot.slane %v6469_v45, 1  ;;  %v6477_v49 = vsel %vm289_vm1, %v324_v18, 0.0  ;;  %v302_v50 = vrot.slane %v233_v37, 7  ;;  %v6487_v56 = vsel %vm289_vm1, %v291_v32, 0.0 }
  0x1a   : > { %10190 = vst [vmem:[#allocation9_spill] sm:$0xff] %v6452_v38  ;;  %v6481_v52 = vsel %vm434_vm2, %v437_v40, %v438_v43  ;;  %v495_v53 = vrot.slane %v6477_v49, 1  ;;  %v303_v57 = vrot.slane %v234_v46, 7  ;;  %v314_v58 = vrot.slane %v241_v47, 7  ;;  %v235_v40 = vld [vmem:[%s6406_s8 + $0x50] sm:$0xff]  ;;  %v244_v47 = vld [vmem:[%s6406_s8 + $0x98] sm:$0xff]  ;;  %1781 = vmatpush.msra.mxu3 %v5706_v30 }
  0x1b   : > { %10191 = vst [vmem:[#allocation10_spill] sm:$0xff] %v6464_v42  ;;  %v6490_v59 = vsel %vm434_vm2, %v453_v26, %v455_v44  ;;  %v6493_v60 = vsel %vm434_vm2, %v473_v29, %v475_v48  ;;  %v315_v61 = vrot.slane %v242_v51, 7  ;;  %v6503_v3 = vsel %vm289_vm1, 0.0, %v302_v50  ;;  %v243_v46 = vld [vmem:[%s6406_s8 + $0x90] sm:$0xff]  ;;  %v252_v51 = vld [vmem:[%s6406_s8 + $0xd8] sm:$0xff]  ;;  %v5642_v30 = vld [vmem:[%s9962_s1 + $0x28] sm:$0xff] }
  0x1c   : > { %10192 = vst [vmem:[#allocation11_spill] sm:$0xff] %v6477_v49  ;;  %v6500_v0 = vsel %vm289_vm1, %v302_v50, %v303_v57  ;;  %v326_v4 = vrot.slane %v249_v54, 7  ;;  %v327_v5 = vrot.slane %v250_v55, 7  ;;  %v6506_v6 = vsel %vm434_vm2, %v493_v35, %v495_v53  ;;  %v251_v50 = vld [vmem:[%s6406_s8 + $0xd0] sm:$0xff]  ;;  %v254_v49 = vld [vmem:[%s6406_s8 + $0xe8] sm:$0xff]  ;;  %1487 = vmatpush.msra.mxu1 %v5642_v30 }
  0x1d   : > { %10193 = vst [vmem:[#allocation12_spill] sm:$0xff] %v6490_v59  ;;  %v440_v7 = vrot.slane %v6487_v56, 1  ;;  %v6510_v8 = vsel %vm289_vm1, %v314_v58, %v315_v61  ;;  %v6513_v9 = vsel %vm289_vm1, 0.0, %v314_v58  ;;  %v293_v12 = vrot.slane %v227_v62, 7 }
  0x1e   : > { %10194 = vst [vmem:[#allocation13_spill] sm:$0xff] %v6493_v60  ;;  %5483 = vmatmul.msk.f32.gmra.mxu0 %vm514_vm0, %v6481_v52  ;;  %v6518_v10 = vsel %vm289_vm1, %v326_v4, %v327_v5  ;;  %v6521_v11 = vsel %vm289_vm1, 0.0, %v326_v4  ;;  %v294_v13 = vrot.slane %v228_v63, 7  ;;  %v457_v14 = vrot.slane %v6503_v3, 1 }
  0x1f   : > { %10195 = vst [vmem:[#allocation14_spill] sm:$0xff] %v6500_v0  ;;  %5490 = vmatmul.msk.f32.gmra.mxu1 %vm514_vm0, %v6490_v59  ;;  %v458_v15 = vrot.slane %v6500_v0, 1  ;;  %v477_v16 = vrot.slane %v6513_v9, 1  ;;  %v478_v17 = vrot.slane %v6510_v8, 1  ;;  %v6532_v18 = vsel %vm434_vm2, %v438_v43, %v440_v7  ;;  %v236_v43 = vld [vmem:[%s6406_s8 + $0x58] sm:$0xff] }
  0x20   : > { %10196 = vst [vmem:[#allocation15_spill] sm:$0xff] %v6503_v3  ;;  %5498 = vmatmul.msk.f32.gmra.mxu2 %vm514_vm0, %v6493_v60  ;;  %v497_v19 = vrot.slane %v6521_v11, 1  ;;  %v498_v20 = vrot.slane %v6518_v10, 1  ;;  %v6537_v24 = vsel %vm289_vm1, %v293_v12, %v294_v13  ;;  %v6540_v25 = vsel %vm289_vm1, 0.0, %v293_v12  ;;  %v229_v12 = vld [vmem:[%s6406_s8 + $0x20] sm:$0xff] }
  0x21   : > { %10197 = vst [vmem:[#allocation16_spill] sm:$0xff] %v6506_v6  ;;  %5506 = vmatmul.msk.f32.gmra.mxu3 %vm514_vm0, %v6506_v6  ;;  %v6543_v26 = vsel %vm434_vm2, %v457_v14, %v458_v15  ;;  %v6548_v28 = vsel %vm434_vm2, %v477_v16, %v478_v17  ;;  %v6551_v29 = vsel %vm289_vm1, %v303_v57, 0.0  ;;  %v442_v34 = vrot.slane %v6540_v25, 1  ;;  %v230_v14 = vld [vmem:[%s6406_s8 + $0x28] sm:$0xff] }
  0x22   : > { %10198 = vst [vmem:[#allocation17_spill] sm:$0xff] %v6518_v10  ;;  %v6554_v32 = vsel %vm434_vm2, %v497_v19, %v498_v20  ;;  %v443_v35 = vrot.slane %v6537_v24, 1  ;;  %v6559_v37 = vsel %vm289_vm1, %v315_v61, 0.0  ;;  %v6566_v44 = vsel %vm289_vm1, %v327_v5, 0.0  ;;  %v253_v10 = vld [vmem:[%s6406_s8 + $0xe0] sm:$0xff] }
  0x23   : > { %10199 = vst [vmem:[#allocation18_spill] sm:$0xff] %v6521_v11  ;;  %v460_v48 = vrot.slane %v6551_v29, 1  ;;  %v480_v53 = vrot.slane %v6559_v37, 1  ;;  %v305_v54 = vrot.slane %v235_v40, 7  ;;  %v306_v55 = vrot.slane %v236_v43, 7 }
  0x24   : > { %10200 = vst [vmem:[#allocation19_spill] sm:$0xff] %v6543_v26  ;;  %v6579_v57 = vsel %vm434_vm2, %v442_v34, %v443_v35  ;;  %v500_v58 = vrot.slane %v6566_v44, 1  ;;  %v317_v61 = vrot.slane %v243_v46, 7  ;;  %v318_v62 = vrot.slane %v244_v47, 7 }
  0x25   : > { %10201 = vst [vmem:[#allocation20_spill] sm:$0xff] %v6548_v28  ;;  %v6583_v63 = vsel %vm289_vm1, %v294_v13, 0.0  ;;  %v329_v4 = vrot.slane %v251_v50, 7  ;;  %v330_v5 = vrot.slane %v252_v51, 7  ;;  %v6586_v7 = vsel %vm434_vm2, %v458_v15, %v460_v48 }
  0x26   : > { %5484 = vmatmul.msk.f32.gmra.mxu0 %vm514_vm0, %v6532_v18  ;;  %10202 = vst [vmem:[#allocation21_spill] sm:$0xff] %v6554_v32  ;;  %v6593_v16 = vsel %vm434_vm2, %v478_v17, %v480_v53  ;;  %v6596_v19 = vsel %vm289_vm1, %v305_v54, %v306_v55  ;;  %v6599_v34 = vsel %vm289_vm1, 0.0, %v305_v54  ;;  %v6602_v13 = vsel %vm434_vm2, %v498_v20, %v500_v58 }
  0x27   : > { %5491 = vmatmul.msk.f32.gmra.mxu1 %vm514_vm0, %v6543_v26  ;;  %10203 = vst [vmem:[#allocation22_spill] sm:$0xff] %v6566_v44  ;;  %v445_v15 = vrot.slane %v6583_v63, 1  ;;  %v6606_v40 = vsel %vm289_vm1, %v317_v61, %v318_v62  ;;  %v6609_v43 = vsel %vm289_vm1, 0.0, %v317_v61  ;;  %v6614_v17 = vsel %vm289_vm1, %v329_v4, %v330_v5  ;;  %v238_v44 = vld [vmem:[%s6406_s8 + $0x68] sm:$0xff] }
  0x28   : > { %5499 = vmatmul.msk.f32.gmra.mxu2 %vm514_vm0, %v6548_v28  ;;  %10204 = vst [vmem:[#allocation23_spill] sm:$0xff] %v6586_v7  ;;  %v6617_v46 = vsel %vm289_vm1, 0.0, %v329_v4  ;;  %v296_v47 = vrot.slane %v229_v12, 7  ;;  %v297_v20 = vrot.slane %v230_v14, 7  ;;  %v462_v48 = vrot.slane %v6599_v34, 1 }
  0x29   : > { %5507 = vmatmul.msk.f32.gmra.mxu3 %vm514_vm0, %v6554_v32  ;;  %10205 = vst [vmem:[#allocation24_spill] sm:$0xff] %v6593_v16  ;;  %v463_v50 = vrot.slane %v6596_v19, 1  ;;  %v482_v51 = vrot.slane %v6609_v43, 1  ;;  %v483_v53 = vrot.slane %v6606_v40, 1  ;;  %v6628_v54 = vsel %vm434_vm2, %v443_v35, %v445_v15 }
  0x2a   : > { %10206 = vst [vmem:[#allocation25_spill] sm:$0xff] %v6596_v19  ;;  %v502_v58 = vrot.slane %v6617_v46, 1  ;;  %v503_v61 = vrot.slane %v6614_v17, 1  ;;  %v6633_v4 = vsel %vm289_vm1, %v296_v47, %v297_v20  ;;  %v6636_v12 = vsel %vm289_vm1, 0.0, %v296_v47 }
  0x2b   : > { %10207 = vst [vmem:[#allocation26_spill] sm:$0xff] %v6599_v34  ;;  %v6639_v14 = vsel %vm434_vm2, %v462_v48, %v463_v50  ;;  %v6644_v35 = vsel %vm434_vm2, %v482_v51, %v483_v53  ;;  %v6647_v15 = vsel %vm289_vm1, %v306_v55, 0.0  ;;  %v447_v47 = vrot.slane %v6636_v12, 1  ;;  %v245_v55 = vld [vmem:[%s6406_s8 + $0xa0] sm:$0xff] }
  0x2c   : > { %10208 = vst [vmem:[#allocation27_spill] sm:$0xff] %v6602_v13  ;;  %v6650_v1 = vsel %vm434_vm2, %v502_v58, %v503_v61  ;;  %v448_v2 = vrot.slane %v6633_v4, 1  ;;  %v6655_v48 = vsel %vm289_vm1, %v318_v62, 0.0  ;;  %v6662_v51 = vsel %vm289_vm1, %v330_v5, 0.0  ;;  %v5675_v5 = vld [vmem:[%s9962_s1 + $0x30] sm:$0xff] }
  0x2d   : > { %10209 = vst [vmem:[#allocation28_spill] sm:$0xff] %v6614_v17  ;;  %v237_v17 = vld [vmem:[%s6406_s8 + $0x60] sm:$0xff]  ;;  %v465_v58 = vrot.slane %v6647_v15, 1  ;;  %v485_v62 = vrot.slane %v6655_v48, 1  ;;  %v505_v31 = vrot.slane %v6662_v51, 1  ;;  %v320_v6 = vrot.slane %v245_v55, 7  ;;  %1634 = vmatpush.msra.mxu2 %v5675_v5 }
  0x2e   : > { %5485 = vmatmul.msk.f32.gmra.mxu0 %vm514_vm0, %v6579_v57  ;;  %10210 = vst [vmem:[#allocation29_spill] sm:$0xff] %v6617_v46  ;;  %v246_v46 = vld [vmem:[%s6406_s8 + $0xa8] sm:$0xff]  ;;  %v308_v11 = vrot.slane %v237_v17, 7  ;;  %v6681_v32 = vsel %vm434_vm2, %v447_v47, %v448_v2  ;;  %v6685_v17 = vsel %vm289_vm1, %v297_v20, 0.0 }
  0x2f   : > { %5492 = vmatmul.msk.f32.gmra.mxu1 %vm514_vm0, %v6586_v7  ;;  %10211 = vst [vmem:[#allocation30_spill] sm:$0xff] %v6633_v4  ;;  %v321_v42 = vrot.slane %v246_v46, 7  ;;  %v6693_v47 = vsel %vm434_vm2, %v483_v53, %v485_v62 }
  0x30   : > { %5500 = vmatmul.msk.f32.gmra.mxu2 %vm514_vm0, %v6593_v16  ;;  %10212 = vst [vmem:[#allocation31_spill] sm:$0xff] %v6639_v14  ;;  %v6699_v46 = vsel %vm289_vm1, 0.0, %v308_v11 }
  0x31   : > { %5508 = vmatmul.msk.f32.gmra.mxu3 %vm514_vm0, %v6602_v13  ;;  %10213 = vst [vmem:[#allocation32_spill] sm:$0xff] %v6650_v1  ;;  %v309_v13 = vrot.slane %v238_v44, 7  ;;  %v332_v44 = vrot.slane %v253_v10, 7  ;;  %v450_v10 = vrot.slane %v6685_v17, 1  ;;  %v6709_v20 = vsel %vm289_vm1, %v320_v6, %v321_v42 }
  0x32   : > { %10214 = vst [vmem:[#allocation33_spill] sm:$0xff] %v6655_v48  ;;  %v6688_v48 = vsel %vm434_vm2, %v463_v50, %v465_v58  ;;  %v6712_v50 = vsel %vm289_vm1, 0.0, %v320_v6  ;;  %v488_v55 = vrot.slane %v6709_v20, 1  ;;  %v5739_v58 = vld [vmem:[%s9962_s1 + $0x40] sm:$0xff] }
  0x33   : > { %10215 = vst [vmem:[#allocation34_spill] sm:$0xff] %v6662_v51  ;;  %v6696_v51 = vsel %vm289_vm1, %v308_v11, %v309_v13  ;;  %v6720_v53 = vsel %vm289_vm1, 0.0, %v332_v44  ;;  %v487_v6 = vrot.slane %v6712_v50, 1  ;;  %v6734_v62 = vsel %vm434_vm2, %v448_v2, %v450_v10  ;;  %1928 = vmatpush.msra.mxu0 %v5739_v58 }
  0x34   : > { %10216 = vst [vmem:[#allocation35_spill] sm:$0xff] %v6688_v48  ;;  %v507_v5 = vrot.slane %v6720_v53, 1  ;;  %v6753_v10 = vsel %vm289_vm1, %v321_v42, 0.0 }
  0x35   : > { %10217 = vst [vmem:[#allocation36_spill] sm:$0xff] %v6693_v47 }
  0x36   : > { %5486 = vmatmul.msk.f32.gmra.mxu0 %vm514_vm0, %v6628_v54  ;;  %10218 = vst [vmem:[#allocation37_spill] sm:$0xff] %v6696_v51 }
  0x37   : > { %5493 = vmatmul.msk.f32.gmra.mxu1 %vm514_vm0, %v6639_v14  ;;  %10219 = vst [vmem:[#allocation38_spill] sm:$0xff] %v6699_v46 }
  0x38   : > { %5501 = vmatmul.msk.f32.gmra.mxu2 %vm514_vm0, %v6644_v35  ;;  %10221 = vst [vmem:[#allocation40_spill] sm:$0xff] %v6709_v20  ;;  %v6747_v20 = vsel %vm289_vm1, %v309_v13, 0.0  ;;  %v490_v13 = vrot.slane %v6753_v10, 1 }
  0x39   : > { %5509 = vmatmul.msk.f32.gmra.mxu3 %vm514_vm0, %v6650_v1  ;;  %v333_v1 = vrot.slane %v254_v49, 7  ;;  %v6705_v49 = vsel %vm434_vm2, %v503_v61, %v505_v31  ;;  %10222 = vst [vmem:[#allocation41_spill] sm:$0xff] %v6712_v50  ;;  %v467_v31 = vrot.slane %v6699_v46, 1  ;;  %v468_v61 = vrot.slane %v6696_v51, 1 }
  0x3a   : > { %10220 = vst [vmem:[#allocation39_spill] sm:$0xff] %v6705_v49 }
  0x3b   : > { %v6717_v11 = vsel %vm289_vm1, %v332_v44, %v333_v1  ;;  %10223 = vst [vmem:[#allocation42_spill] sm:$0xff] %v6734_v62  ;;  %v6739_v30 = vsel %vm434_vm2, %v467_v31, %v468_v61  ;;  %v6758_v31 = vsel %vm289_vm1, %v333_v1, 0.0  ;;  %v6773_v1 = vsel %vm434_vm2, %v488_v55, %v490_v13 }
  0x3c   : > { %v508_v44 = vrot.slane %v6717_v11, 1  ;;  %10224 = vst [vmem:[#allocation43_spill] sm:$0xff] %v6739_v30  ;;  %v510_v58 = vrot.slane %v6758_v31, 1 }
  0x3d   : > { %10228 = vst [vmem:[#allocation47_spill] sm:$0xff] %v6773_v1 }
  0x3e   : > { %5487 = vmatmul.msk.f32.gmra.mxu0 %vm514_vm0, %v6681_v32  ;;  %v6750_v2 = vsel %vm434_vm2, %v507_v5, %v508_v44  ;;  %v6776_v5 = vsel %vm434_vm2, %v508_v44, %v510_v58  ;;  %v871_v44 = vrot.slane %v6487_v56, 2  ;;  %v874_v58 = vrot.slane %v6537_v24, 2 }
  0x3f   : > { %5494 = vmatmul.msk.f32.gmra.mxu1 %vm514_vm0, %v6688_v48  ;;  %10226 = vst [vmem:[#allocation45_spill] sm:$0xff] %v6750_v2 }
  0x40   : > { %5502 = vmatmul.msk.f32.gmra.mxu2 %vm514_vm0, %v6693_v47  ;;  %10229 = vst [vmem:[#allocation48_spill] sm:$0xff] %v6776_v5 }
  0x41   : > { %5510 = vmatmul.msk.f32.gmra.mxu3 %vm514_vm0, %v6705_v49  ;;  %v6744_v49 = vsel %vm434_vm2, %v487_v6, %v488_v55  ;;  %v470_v6 = vrot.slane %v6747_v20, 1 }
  0x42   : > { %10225 = vst [vmem:[#allocation44_spill] sm:$0xff] %v6744_v49 }
  0x43   : > { %v6768_v42 = vsel %vm434_vm2, %v468_v61, %v470_v6  ;;  %v10230_v61 = vmov 0.0  }
  0x44   : > { %10227 = vst [vmem:[#allocation46_spill] sm:$0xff] %v6768_v42  ;;  %v6785_v6 = vrot.slane %v10230_v61, 2 }
  0x46   : > { %5488 = vmatmul.msk.f32.gmra.mxu0 %vm514_vm0, %v6734_v62  ;;  %10231 = vst [vmem:[#allocation49_spill] sm:$0xff] %v6785_v6 }
  0x47   : > { %5495 = vmatmul.msk.f32.gmra.mxu1 %vm514_vm0, %v6739_v30 }
  0x48   : > { %5503 = vmatmul.msk.f32.gmra.mxu2 %vm514_vm0, %v6744_v49 }
  0x49   : > { %5511 = vmatmul.msk.f32.gmra.mxu3 %vm514_vm0, %v6750_v2 }
  0x4e   : > { %5610 = vmatmul.msk.f32.vlgmr.msrb.gmra.mxu0 %vm514_vm0, %v6481_v52  ;;  %v868_v52 = vrot.slane %v6446_v36, 2 }
  0x4f   : > { %5496 = vmatmul.msk.f32.gmra.mxu1 %vm514_vm0, %v6768_v42 }
  0x50   : > { %5504 = vmatmul.msk.f32.gmra.mxu2 %vm514_vm0, %v6773_v1 }
  0x51   : > { %5512 = vmatmul.msk.f32.gmra.mxu3 %vm514_vm0, %v6776_v5 }
  0x56   : > { %5611 = vmatmul.msk.f32.gmra.mxu0 %vm514_vm0, %v6532_v18  ;;  %v869_v18 = vrot.slane %v6455_v39, 2 }
  0x57   : > { %768 = vmatmul.f32.vlgmr.msrb.gmra.mxu1 %v10230_v61 }
  0x58   : > { %5544 = vmatmul.msk.f32.vlgmr.msrb.gmra.mxu2 %vm514_vm0, %v6785_v6  ;;  %v6806_v55 = vsel %vm865_vm3, %v868_v52, %v869_v18  ;;  %v6818_v13 = vsel %vm865_vm3, %v869_v18, %v871_v44  ;;  %v878_v18 = vrot.slane %v6636_v12, 2  ;;  %v879_v44 = vrot.slane %v6633_v4, 2 }
  0x59   : > { %5577 = vmatmul.msk.f32.vlgmr.msrb.gmra.mxu3 %vm514_vm0, %v6446_v36 }
  0x5e   : > { %5612 = vmatmul.msk.f32.gmra.mxu0 %vm514_vm0, %v6579_v57 }
  0x5f   : > { %771 = vmatmul.f32.gmra.mxu1 %v10230_v61 }
  0x60   : > { %5545 = vmatmul.msk.f32.gmra.mxu2 %vm514_vm0, %v6785_v6 }
  0x61   : > { %5578 = vmatmul.msk.f32.gmra.mxu3 %vm514_vm0, %v6455_v39 }
  0x66   : > { %5613 = vmatmul.msk.f32.gmra.mxu0 %vm514_vm0, %v6628_v54 }
  0x67   : > { %5513 = vmatmul.msk.f32.gmra.mxu1 %vm514_vm0, %v6446_v36  ;;  %v873_v36 = vrot.slane %v6540_v25, 2 }
  0x68   : > { %5546 = vmatmul.msk.f32.gmra.mxu2 %vm514_vm0, %v6806_v55 }
  0x69   : > { %5579 = vmatmul.msk.f32.gmra.mxu3 %vm514_vm0, %v6540_v25  ;;  %v6831_v56 = vsel %vm865_vm3, %v873_v36, %v874_v58  ;;  %v881_v36 = vrot.slane %v6685_v17, 2  ;;  %v884_v17 = vrot.slane %v6417_v21, 2 }
  0x6e   : > { %5614 = vmatmul.msk.f32.gmra.mxu0 %vm514_vm0, %v6681_v32 }
  0x6f   : > { %5514 = vmatmul.msk.f32.gmra.mxu1 %vm514_vm0, %v6455_v39  ;;  %v876_v39 = vrot.slane %v6583_v63, 2  ;;  %v6856_v63 = vsel %vm865_vm3, %v878_v18, %v879_v44  ;;  %v883_v18 = vrot.slane %v6420_v22, 2 }
  0x70   : > { %5547 = vmatmul.msk.f32.gmra.mxu2 %vm514_vm0, %v6818_v13 }
  0x71   : > { %5580 = vmatmul.msk.f32.gmra.mxu3 %vm514_vm0, %v6537_v24  ;;  %v6843_v52 = vsel %vm865_vm3, %v874_v58, %v876_v39  ;;  %v6870_v39 = vsel %vm865_vm3, %v879_v44, %v881_v36  ;;  %v6887_v44 = vsel %vm865_vm3, %v883_v18, %v884_v17  ;;  %v886_v36 = vrot.slane %v6459_v41, 2 }
  0x72   : > { %v888_v41 = vrot.slane %v6503_v3, 2 }
  0x73   : > { %v6907_v18 = vsel %vm865_vm3, %v884_v17, %v886_v36 }
  0x74   : > { %10233 = vst [vmem:[#allocation51_spill] sm:$0xff] %v6907_v18 }
  0x76   : > { %5615 = vmatmul.msk.f32.gmra.mxu0 %vm514_vm0, %v6734_v62 }
  0x77   : > { %5515 = vmatmul.msk.f32.gmra.mxu1 %vm514_vm0, %v6540_v25 }
  0x78   : > { %5548 = vmatmul.msk.f32.gmra.mxu2 %vm514_vm0, %v6831_v56 }
  0x79   : > { %5581 = vmatmul.msk.f32.gmra.mxu3 %vm514_vm0, %v6636_v12 }
  0x7e   : > { %5616 = vmatmul.msk.f32.gmra.mxu0 %vm514_vm0, %v6441_v33 }
  0x7f   : > { %5516 = vmatmul.msk.f32.gmra.mxu1 %vm514_vm0, %v6537_v24 }
  0x80   : > { %5549 = vmatmul.msk.f32.gmra.mxu2 %vm514_vm0, %v6843_v52 }
  0x81   : > { %5582 = vmatmul.msk.f32.gmra.mxu3 %vm514_vm0, %v6633_v4 }
  0x86   : > { %5617 = vmatmul.msk.f32.gmra.mxu0 %vm514_vm0, %v6490_v59 }
  0x87   : > { %5517 = vmatmul.msk.f32.gmra.mxu1 %vm514_vm0, %v6636_v12 }
  0x88   : > { %5550 = vmatmul.msk.f32.gmra.mxu2 %vm514_vm0, %v6856_v63 }
  0x89   : > { %5583 = vmatmul.msk.f32.gmra.mxu3 %vm514_vm0, %v6420_v22 }
  0x8b   : > { %v6865_v58 = vpop.f32.mrf.mxu0 }
  0x8e   : > { %5618 = vmatmul.msk.f32.gmra.mxu0 %vm514_vm0, %v6543_v26 }
  0x8f   : > { %5518 = vmatmul.msk.f32.gmra.mxu1 %vm514_vm0, %v6633_v4 }
  0x90   : > { %5551 = vmatmul.msk.f32.gmra.mxu2 %vm514_vm0, %v6870_v39 }
  0x91   : > { %5584 = vmatmul.msk.f32.gmra.mxu3 %vm514_vm0, %v6417_v21 }
  0x93   : > { %v6880_v61 = vpop.f32.mrf.mxu0 }
  0x94   : > { %v6882_v6 = vpop.f32.mrf.mxu1 }
  0x96   : > { %5619 = vmatmul.msk.f32.gmra.mxu0 %vm514_vm0, %v6586_v7 }
  0x97   : > { %5519 = vmatmul.msk.f32.gmra.mxu1 %vm514_vm0, %v6420_v22 }
  0x98   : > { %5552 = vmatmul.msk.f32.gmra.mxu2 %vm514_vm0, %v6887_v44 }
  0x99   : > { %5585 = vmatmul.msk.f32.gmra.mxu3 %vm514_vm0, %v6503_v3 }
  0x9b   : > { %v6896_v26 = vpop.f32.mrf.mxu0  ;;  %v6898_v59 = vpop.f32.mrf.mxu2 }
  0x9c   : > { %v6900_v33 = vpop.f32.mrf.mxu3  ;;  %v6902_v7 = vpop.f32.mrf.mxu1 }
  0x9d   : > { %10232 = vst [vmem:[#allocation50_spill] sm:$0xff] %v6900_v33  ;;  %v889_v33 = vrot.slane %v6500_v0, 2 }
  0x9e   : > { %5620 = vmatmul.msk.f32.gmra.mxu0 %vm514_vm0, %v6639_v14 }
  0x9f   : > { %5520 = vmatmul.msk.f32.gmra.mxu1 %vm514_vm0, %v6417_v21  ;;  %v6928_v36 = vsel %vm865_vm3, %v888_v41, %v889_v33  ;;  %v891_v21 = vrot.slane %v6551_v29, 2  ;;  %v893_v29 = vrot.slane %v6599_v34, 2 }
  0xa0   : > { %5553 = vmatmul.msk.f32.gmra.mxu2 %vm514_vm0, %v6907_v18  ;;  %10235 = vst [vmem:[#allocation53_spill] sm:$0xff] %v6928_v36 }
  0xa1   : > { %5586 = vmatmul.msk.f32.gmra.mxu3 %vm514_vm0, %v6500_v0  ;;  %v6948_v41 = vsel %vm865_vm3, %v889_v33, %v891_v21 }
  0xa2   : > { %10237 = vst [vmem:[#allocation55_spill] sm:$0xff] %v6948_v41 }
  0xa3   : > { %v6917_v22 = vpop.f32.mrf.mxu0  ;;  %v6919_v62 = vpop.f32.mrf.mxu2 }
  0xa4   : > { %v6921_v14 = vpop.f32.mrf.mxu3  ;;  %v6923_v17 = vpop.f32.mrf.mxu1 }
  0xa5   : > { %10234 = vst [vmem:[#allocation52_spill] sm:$0xff] %v6921_v14 }
  0xa6   : > { %5621 = vmatmul.msk.f32.gmra.mxu0 %vm514_vm0, %v6688_v48 }
  0xa7   : > { %5521 = vmatmul.msk.f32.gmra.mxu1 %vm514_vm0, %v6503_v3 }
  0xa8   : > { %5554 = vmatmul.msk.f32.gmra.mxu2 %vm514_vm0, %v6928_v36 }
  0xa9   : > { %5587 = vmatmul.msk.f32.gmra.mxu3 %vm514_vm0, %v6599_v34 }
  0xab   : > { %v6937_v14 = vpop.f32.mrf.mxu0  ;;  %v6939_v18 = vpop.f32.mrf.mxu2 }
  0xac   : > { %v6941_v4 = vpop.f32.mrf.mxu3  ;;  %v6943_v48 = vpop.f32.mrf.mxu1 }
  0xad   : > { %10236 = vst [vmem:[#allocation54_spill] sm:$0xff] %v6941_v4  ;;  %v894_v4 = vrot.slane %v6596_v19, 2 }
  0xae   : > { %5622 = vmatmul.msk.f32.gmra.mxu0 %vm514_vm0, %v6739_v30 }
  0xaf   : > { %5522 = vmatmul.msk.f32.gmra.mxu1 %vm514_vm0, %v6500_v0  ;;  %v6969_v33 = vsel %vm865_vm3, %v893_v29, %v894_v4  ;;  %v896_v0 = vrot.slane %v6647_v15, 2  ;;  %v898_v15 = vrot.slane %v6699_v46, 2 }
  0xb0   : > { %5555 = vmatmul.msk.f32.gmra.mxu2 %vm514_vm0, %v6948_v41  ;;  %10240 = vst [vmem:[#allocation58_spill] sm:$0xff] %v6969_v33 }
  0xb1   : > { %5588 = vmatmul.msk.f32.gmra.mxu3 %vm514_vm0, %v6596_v19  ;;  %v6989_v29 = vsel %vm865_vm3, %v894_v4, %v896_v0 }
  0xb2   : > { %10243 = vst [vmem:[#allocation61_spill] sm:$0xff] %v6989_v29 }
  0xb3   : > { %v6958_v3 = vpop.f32.mrf.mxu0  ;;  %v6960_v36 = vpop.f32.mrf.mxu2 }
  0xb4   : > { %10238 = vst [vmem:[#allocation56_spill] sm:$0xff] %v6960_v36  ;;  %v6962_v30 = vpop.f32.mrf.mxu3  ;;  %v6964_v21 = vpop.f32.mrf.mxu1 }
  0xb5   : > { %10239 = vst [vmem:[#allocation57_spill] sm:$0xff] %v6962_v30 }
  0xb6   : > { %5623 = vmatmul.msk.f32.gmra.mxu0 %vm514_vm0, %v6768_v42 }
  0xb7   : > { %5523 = vmatmul.msk.f32.gmra.mxu1 %vm514_vm0, %v6599_v34 }
  0xb8   : > { %5556 = vmatmul.msk.f32.gmra.mxu2 %vm514_vm0, %v6969_v33 }
  0xb9   : > { %5589 = vmatmul.msk.f32.gmra.mxu3 %vm514_vm0, %v6699_v46 }
  0xbb   : > { %v6978_v30 = vpop.f32.mrf.mxu0  ;;  %v6980_v41 = vpop.f32.mrf.mxu2 }
  0xbc   : > { %10241 = vst [vmem:[#allocation59_spill] sm:$0xff] %v6980_v41  ;;  %v6982_v36 = vpop.f32.mrf.mxu3  ;;  %v6984_v42 = vpop.f32.mrf.mxu1 }
  0xbd   : > { %10242 = vst [vmem:[#allocation60_spill] sm:$0xff] %v6982_v36  ;;  %v899_v36 = vrot.slane %v6696_v51, 2 }
  0xbe   : > { %5624 = vmatmul.msk.f32.gmra.mxu0 %vm514_vm0, %v6452_v38 }
  0xbf   : > { %5524 = vmatmul.msk.f32.gmra.mxu1 %vm514_vm0, %v6596_v19  ;;  %v7010_v4 = vsel %vm865_vm3, %v898_v15, %v899_v36  ;;  %v901_v19 = vrot.slane %v6747_v20, 2  ;;  %v903_v20 = vrot.slane %v6423_v23, 2 }
  0xc0   : > { %5557 = vmatmul.msk.f32.gmra.mxu2 %vm514_vm0, %v6989_v29  ;;  %10246 = vst [vmem:[#allocation64_spill] sm:$0xff] %v7010_v4 }
  0xc1   : > { %5590 = vmatmul.msk.f32.gmra.mxu3 %vm514_vm0, %v6696_v51  ;;  %v7028_v15 = vsel %vm865_vm3, %v899_v36, %v901_v19 }
  0xc2   : > { %10249 = vst [vmem:[#allocation67_spill] sm:$0xff] %v7028_v15 }
  0xc3   : > { %v6999_v34 = vpop.f32.mrf.mxu0  ;;  %v7001_v33 = vpop.f32.mrf.mxu2 }
  0xc4   : > { %10244 = vst [vmem:[#allocation62_spill] sm:$0xff] %v7001_v33  ;;  %v7003_v38 = vpop.f32.mrf.mxu3  ;;  %v7005_v0 = vpop.f32.mrf.mxu1 }
  0xc5   : > { %10245 = vst [vmem:[#allocation63_spill] sm:$0xff] %v7003_v38 }
  0xc6   : > { %5625 = vmatmul.msk.f32.gmra.mxu0 %vm514_vm0, %v6493_v60 }
  0xc7   : > { %5525 = vmatmul.msk.f32.gmra.mxu1 %vm514_vm0, %v6699_v46 }
  0xc8   : > { %5558 = vmatmul.msk.f32.gmra.mxu2 %vm514_vm0, %v7010_v4 }
  0xc9   : > { %5591 = vmatmul.msk.f32.gmra.mxu3 %vm514_vm0, %v6423_v23 }
  0xcb   : > { %v1333_v38 = vpop.f32.mrf.mxu0  ;;  %v7019_v29 = vpop.f32.mrf.mxu2 }
  0xcc   : > { %10247 = vst [vmem:[#allocation65_spill] sm:$0xff] %v7019_v29  ;;  %v7021_v33 = vpop.f32.mrf.mxu3  ;;  %v7023_v60 = vpop.f32.mrf.mxu1 }
  0xcd   : > { %10248 = vst [vmem:[#allocation66_spill] sm:$0xff] %v7021_v33  ;;  %v904_v33 = vrot.slane %v6428_v27, 2 }
  0xce   : > { %5626 = vmatmul.msk.f32.gmra.mxu0 %vm514_vm0, %v6548_v28 }
  0xcf   : > { %5526 = vmatmul.msk.f32.gmra.mxu1 %vm514_vm0, %v6696_v51  ;;  %v7045_v36 = vsel %vm865_vm3, %v903_v20, %v904_v33  ;;  %v906_v51 = vrot.slane %v6469_v45, 2 }
  0xd0   : > { %5559 = vmatmul.msk.f32.gmra.mxu2 %vm514_vm0, %v7028_v15 }
  0xd1   : > { %5592 = vmatmul.msk.f32.gmra.mxu3 %vm514_vm0, %v6428_v27  ;;  %v7058_v20 = vsel %vm865_vm3, %v904_v33, %v906_v51 }
  0xd3   : > { %v1336_v46 = vpop.f32.mrf.mxu0  ;;  %v7038_v4 = vpop.f32.mrf.mxu2 }
  0xd4   : > { %10250 = vst [vmem:[#allocation68_spill] sm:$0xff] %v7038_v4  ;;  %v7040_v28 = vpop.f32.mrf.mxu3  ;;  %v769_v19 = vpop.f32.mrf.mxu1 }
  0xd5   : > { %10251 = vst [vmem:[#allocation69_spill] sm:$0xff] %v7040_v28  ;;  %v770_v28 = vadd.f32 %v769_v19, %v6865_v58  ;;  %v909_v58 = vrot.slane %v6510_v8, 2 }
  0xd6   : > { %5627 = vmatmul.msk.f32.gmra.mxu0 %vm514_vm0, %v6593_v16 }
  0xd7   : > { %5527 = vmatmul.msk.f32.gmra.mxu1 %vm514_vm0, %v6423_v23 }
  0xd8   : > { %5560 = vmatmul.msk.f32.gmra.mxu2 %vm514_vm0, %v7045_v36 }
  0xd9   : > { %5593 = vmatmul.msk.f32.gmra.mxu3 %vm514_vm0, %v6513_v9 }
  0xdb   : > { %v1339_v15 = vpop.f32.mrf.mxu0  ;;  %v1024_v4 = vpop.f32.mrf.mxu2 }
  0xdc   : > { %v1120_v29 = vadd.f32 %v1024_v4, %v770_v28  ;;  %v1176_v16 = vpop.f32.mrf.mxu3  ;;  %v772_v41 = vpop.f32.mrf.mxu1  ;;  %v908_v28 = vrot.slane %v6513_v9, 2 }
  0xdd   : > { %v773_v4 = vadd.f32 %v772_v41, %v6880_v61  ;;  %v911_v61 = vrot.slane %v6559_v37, 2 }
  0xde   : > { %5628 = vmatmul.msk.f32.gmra.mxu0 %vm514_vm0, %v6644_v35  ;;  %v1272_v23 = vadd.f32 %v1176_v16, %v1120_v29 }
  0xdf   : > { %5528 = vmatmul.msk.f32.gmra.mxu1 %vm514_vm0, %v6428_v27 }
  0xe0   : > { %5561 = vmatmul.msk.f32.gmra.mxu2 %vm514_vm0, %v7058_v20  ;;  %v7064_v45 = vadd.f32 %v1333_v38, %v1272_v23  ;;  %v7074_v23 = vsel %vm865_vm3, %v908_v28, %v909_v58 }
  0xe1   : > { %5594 = vmatmul.msk.f32.gmra.mxu3 %vm514_vm0, %v6510_v8 }
  0xe2   : > { %10252 = vst [vmem:[#allocation70_spill] sm:$0xff] %v7064_v45 }
  0xe3   : > { %v1342_v51 = vpop.f32.mrf.mxu0  ;;  %v1027_v33 = vpop.f32.mrf.mxu2 }
  0xe4   : > { %v1121_v16 = vadd.f32 %v1027_v33, %v773_v4  ;;  %v1179_v29 = vpop.f32.mrf.mxu3  ;;  %v775_v19 = vpop.f32.mrf.mxu1 }
  0xe5   : > { %v776_v41 = vadd.f32 %v775_v19, %v6896_v26  ;;  %v913_v26 = vrot.slane %v6609_v43, 2  ;;  %v914_v19 = vrot.slane %v6606_v40, 2 }
  0xe6   : > { %5629 = vmatmul.msk.f32.gmra.mxu0 %vm514_vm0, %v6693_v47  ;;  %v1273_v38 = vadd.f32 %v1179_v29, %v1121_v16  ;;  %v7089_v29 = vsel %vm865_vm3, %v909_v58, %v911_v61 }
  0xe7   : > { %5529 = vmatmul.msk.f32.gmra.mxu1 %vm514_vm0, %v6513_v9 }
  0xe8   : > { %5562 = vmatmul.msk.f32.gmra.mxu2 %vm514_vm0, %v7074_v23  ;;  %v7080_v45 = vadd.f32 %v1336_v46, %v1273_v38 }
  0xe9   : > { %5595 = vmatmul.msk.f32.gmra.mxu3 %vm514_vm0, %v6609_v43 }
  0xeb   : > { %v1345_v4 = vpop.f32.mrf.mxu0  ;;  %v1030_v33 = vpop.f32.mrf.mxu2 }
  0xec   : > { %v1122_v28 = vadd.f32 %v1030_v33, %v776_v41  ;;  %v1182_v47 = vpop.f32.mrf.mxu3  ;;  %v778_v16 = vpop.f32.mrf.mxu1 }
  0xed   : > { %v779_v38 = vadd.f32 %v778_v16, %v6917_v22  ;;  %v10255_v22 = vld [vmem:[#allocation33_spill] sm:$0xff] }
  0xee   : > { %5630 = vmatmul.msk.f32.gmra.mxu0 %vm514_vm0, %v6744_v49  ;;  %v1274_v46 = vadd.f32 %v1182_v47, %v1122_v28  ;;  %v916_v16 = vrot.slane %v10255_v22, 2 }
  0xef   : > { %5530 = vmatmul.msk.f32.gmra.mxu1 %vm514_vm0, %v6510_v8 }
  0xf0   : > { %5563 = vmatmul.msk.f32.gmra.mxu2 %vm514_vm0, %v7089_v29  ;;  %v7095_v37 = vadd.f32 %v1339_v15, %v1274_v46  ;;  %v7105_v15 = vsel %vm865_vm3, %v913_v26, %v914_v19  ;;  %v7120_v49 = vsel %vm865_vm3, %v914_v19, %v916_v16 }
  0xf1   : > { %5596 = vmatmul.msk.f32.gmra.mxu3 %vm514_vm0, %v6606_v40 }
  0xf2   : > { %10253 = vst [vmem:[#allocation71_spill] sm:$0xff] %v7095_v37 }
  0xf3   : > { %v1348_v58 = vpop.f32.mrf.mxu0  ;;  %v1033_v61 = vpop.f32.mrf.mxu2 }
  0xf4   : > { %v1123_v47 = vadd.f32 %v1033_v61, %v779_v38  ;;  %v1185_v41 = vpop.f32.mrf.mxu3  ;;  %v781_v33 = vpop.f32.mrf.mxu1 }
  0xf5   : > { %v782_v38 = vadd.f32 %v781_v33, %v6937_v14  ;;  %v10258_v14 = vld [vmem:[#allocation40_spill] sm:$0xff] }
  0xf6   : > { %5631 = vmatmul.msk.f32.gmra.mxu0 %vm514_vm0, %v6773_v1  ;;  %v1275_v28 = vadd.f32 %v1185_v41, %v1123_v47  ;;  %v10256_v41 = vld [vmem:[#allocation10_spill] sm:$0xff]  ;;  %v919_v33 = vrot.slane %v10258_v14, 2 }
  0xf7   : > { %5531 = vmatmul.msk.f32.gmra.mxu1 %vm514_vm0, %v6609_v43 }
  0xf8   : > { %5564 = vmatmul.msk.f32.gmra.mxu2 %vm514_vm0, %v7105_v15  ;;  %v7111_v46 = vadd.f32 %v1342_v51, %v1275_v28 }
  0xf9   : > { %5597 = vmatmul.msk.f32.gmra.mxu3 %vm514_vm0, %v6712_v50 }
  0xfa   : > { %10254 = vst [vmem:[#allocation72_spill] sm:$0xff] %v7111_v46 }
  0xfb   : > { %v1351_v61 = vpop.f32.mrf.mxu0  ;;  %v1036_v1 = vpop.f32.mrf.mxu2 }
  0xfc   : > { %v1124_v26 = vadd.f32 %v1036_v1, %v782_v38  ;;  %v1188_v37 = vpop.f32.mrf.mxu3  ;;  %v784_v47 = vpop.f32.mrf.mxu1  ;;  %v918_v1 = vrot.slane %v6712_v50, 2 }
  0xfd   : > { %v785_v22 = vadd.f32 %v784_v47, %v6958_v3  ;;  %v10261_v3 = vld [vmem:[#allocation7_spill] sm:$0xff]  ;;  %v921_v47 = vrot.slane %v6753_v10, 2 }
  0xfe   : > { %5632 = vmatmul.msk.f32.gmra.mxu0 %vm514_vm0, %v10256_v41  ;;  %v1276_v51 = vadd.f32 %v1188_v37, %v1124_v26  ;;  %v10259_v41 = vld [vmem:[#allocation16_spill] sm:$0xff] }
  0xff   : > { %5532 = vmatmul.msk.f32.gmra.mxu1 %vm514_vm0, %v6606_v40 }
 0x100   : > { %5565 = vmatmul.msk.f32.gmra.mxu2 %vm514_vm0, %v7120_v49  ;;  %v7126_v28 = vadd.f32 %v1345_v4, %v1276_v51  ;;  %v7136_v4 = vsel %vm865_vm3, %v918_v1, %v919_v33 }
 0x101   : > { %5598 = vmatmul.msk.f32.gmra.mxu3 %vm514_vm0, %v10258_v14 }
 0x102   : > { %10257 = vst [vmem:[#allocation33_spill] sm:$0xff] %v7126_v28 }
 0x103   : > { %v1354_v19 = vpop.f32.mrf.mxu0  ;;  %v1039_v16 = vpop.f32.mrf.mxu2 }
 0x104   : > { %v1125_v37 = vadd.f32 %v1039_v16, %v785_v22  ;;  %v1191_v38 = vpop.f32.mrf.mxu3  ;;  %v787_v26 = vpop.f32.mrf.mxu1 }
 0x105   : > { %v788_v22 = vadd.f32 %v787_v26, %v6978_v30  ;;  %v10264_v30 = vld [vmem:[#allocation6_spill] sm:$0xff] }
 0x106   : > { %5633 = vmatmul.msk.f32.gmra.mxu0 %vm514_vm0, %v10259_v41  ;;  %v1277_v51 = vadd.f32 %v1191_v38, %v1125_v37  ;;  %v10262_v38 = vld [vmem:[#allocation21_spill] sm:$0xff]  ;;  %v924_v26 = vrot.slane %v10264_v30, 2 }
 0x107   : > { %5533 = vmatmul.msk.f32.gmra.mxu1 %vm514_vm0, %v6712_v50  ;;  %v7151_v50 = vsel %vm865_vm3, %v919_v33, %v921_v47 }
 0x108   : > { %5566 = vmatmul.msk.f32.gmra.mxu2 %vm514_vm0, %v7136_v4  ;;  %v7142_v28 = vadd.f32 %v1348_v58, %v1277_v51 }
 0x109   : > { %5599 = vmatmul.msk.f32.gmra.mxu3 %vm514_vm0, %v10261_v3 }
 0x10a   : > { %10260 = vst [vmem:[#allocation73_spill] sm:$0xff] %v7142_v28 }
 0x10b   : > { %v1357_v16 = vpop.f32.mrf.mxu0  ;;  %v1042_v41 = vpop.f32.mrf.mxu2 }
 0x10c   : > { %v1126_v1 = vadd.f32 %v1042_v41, %v788_v22  ;;  %v1194_v46 = vpop.f32.mrf.mxu3  ;;  %v790_v37 = vpop.f32.mrf.mxu1  ;;  %v923_v41 = vrot.slane %v10261_v3, 2 }
 0x10d   : > { %v791_v51 = vadd.f32 %v790_v37, %v6999_v34  ;;  %v10267_v34 = vld [vmem:[#allocation18_spill] sm:$0xff]  ;;  %v10268_v37 = vld [vmem:[#allocation11_spill] sm:$0xff] }
 0x10e   : > { %5634 = vmatmul.msk.f32.gmra.mxu0 %vm514_vm0, %v10262_v38  ;;  %v1278_v58 = vadd.f32 %v1194_v46, %v1126_v1  ;;  %v10265_v38 = vld [vmem:[#allocation27_spill] sm:$0xff] }
 0x10f   : > { %5534 = vmatmul.msk.f32.gmra.mxu1 %vm514_vm0, %v10258_v14 }
 0x110   : > { %5567 = vmatmul.msk.f32.gmra.mxu2 %vm514_vm0, %v7151_v50  ;;  %v7157_v10 = vadd.f32 %v1351_v61, %v1278_v58  ;;  %v7167_v61 = vsel %vm865_vm3, %v923_v41, %v924_v26 }
 0x111   : > { %5600 = vmatmul.msk.f32.gmra.mxu3 %vm514_vm0, %v10264_v30 }
 0x112   : > { %10263 = vst [vmem:[#allocation74_spill] sm:$0xff] %v7157_v10 }
 0x113   : > { %v1360_v33 = vpop.f32.mrf.mxu0  ;;  %v1045_v47 = vpop.f32.mrf.mxu2 }
 0x114   : > { %v1127_v46 = vadd.f32 %v1045_v47, %v791_v51  ;;  %v1197_v22 = vpop.f32.mrf.mxu3  ;;  %v793_v1 = vpop.f32.mrf.mxu1  ;;  %v926_v51 = vrot.slane %v10268_v37, 2 }
 0x115   : > { %v794_v47 = vadd.f32 %v793_v1, %v6882_v6  ;;  %v10272_v6 = vld [vmem:[#allocation17_spill] sm:$0xff] }
 0x116   : > { %5635 = vmatmul.msk.f32.gmra.mxu0 %vm514_vm0, %v10265_v38  ;;  %v1279_v58 = vadd.f32 %v1197_v22, %v1127_v46  ;;  %v10269_v22 = vld [vmem:[#allocation32_spill] sm:$0xff]  ;;  %v929_v1 = vrot.slane %v10272_v6, 2 }
 0x117   : > { %5535 = vmatmul.msk.f32.gmra.mxu1 %vm514_vm0, %v10261_v3  ;;  %v7182_v3 = vsel %vm865_vm3, %v924_v26, %v926_v51 }
 0x118   : > { %5568 = vmatmul.msk.f32.gmra.mxu2 %vm514_vm0, %v7167_v61  ;;  %v7173_v10 = vadd.f32 %v1354_v19, %v1279_v58  ;;  %10270 = vst [vmem:[#allocation18_spill] sm:$0xff] %v7182_v3 }
 0x119   : > { %5601 = vmatmul.msk.f32.gmra.mxu3 %vm514_vm0, %v10267_v34 }
 0x11a   : > { %10266 = vst [vmem:[#allocation75_spill] sm:$0xff] %v7173_v10 }
 0x11b   : > { %v1363_v38 = vpop.f32.mrf.mxu0  ;;  %v1048_v28 = vpop.f32.mrf.mxu2 }
 0x11c   : > { %v1128_v41 = vadd.f32 %v1048_v28, %v794_v47  ;;  %v1200_v14 = vpop.f32.mrf.mxu3  ;;  %v796_v46 = vpop.f32.mrf.mxu1  ;;  %v928_v28 = vrot.slane %v10267_v34, 2 }
 0x11d   : > { %v797_v37 = vadd.f32 %v796_v46, %v6902_v7  ;;  %v10275_v46 = vld [vmem:[#allocation29_spill] sm:$0xff] }
 0x11e   : > { %5636 = vmatmul.msk.f32.gmra.mxu0 %vm514_vm0, %v10269_v22  ;;  %v1280_v19 = vadd.f32 %v1200_v14, %v1128_v41  ;;  %v10273_v22 = vld [vmem:[#allocation39_spill] sm:$0xff] }
 0x11f   : > { %5536 = vmatmul.msk.f32.gmra.mxu1 %vm514_vm0, %v10264_v30 }
 0x120   : > { %5569 = vmatmul.msk.f32.gmra.mxu2 %vm514_vm0, %v7182_v3  ;;  %v7188_v58 = vadd.f32 %v1357_v16, %v1280_v19  ;;  %v7198_v16 = vsel %vm865_vm3, %v928_v28, %v929_v1  ;;  %v256_v3 = vld [vmem:[%s6406_s8 + $0xf8] sm:$0xff] }
 0x121   : > { %5602 = vmatmul.msk.f32.gmra.mxu3 %vm514_vm0, %v10272_v6 }
 0x122   : > { %10271 = vst [vmem:[#allocation11_spill] sm:$0xff] %v7188_v58 }
 0x123   : > { %v1366_v26 = vpop.f32.mrf.mxu0  ;;  %v1051_v51 = vpop.f32.mrf.mxu2 }
 0x124   : > { %v1129_v14 = vadd.f32 %v1051_v51, %v797_v37  ;;  %v1203_v47 = vpop.f32.mrf.mxu3  ;;  %v799_v41 = vpop.f32.mrf.mxu1  ;;  %v10276_v37 = vld [vmem:[#allocation22_spill] sm:$0xff] }
 0x125   : > { %v931_v51 = vrot.slane %v10276_v37, 2  ;;  %v800_v58 = vadd.f32 %v799_v41, %v6923_v17 }
 0x126   : > { %5637 = vmatmul.msk.f32.gmra.mxu0 %vm514_vm0, %v10273_v22  ;;  %v1281_v19 = vadd.f32 %v1203_v47, %v1129_v14  ;;  %v255_v47 = vld [vmem:[%s6406_s8 + $0xf0] sm:$0xff] }
 0x127   : > { %5537 = vmatmul.msk.f32.gmra.mxu1 %vm514_vm0, %v10267_v34  ;;  %v335_v37 = vrot.slane %v255_v47, 7 }
 0x128   : > { %5570 = vmatmul.msk.f32.gmra.mxu2 %vm514_vm0, %v7198_v16  ;;  %v7204_v7 = vadd.f32 %v1360_v33, %v1281_v19  ;;  %v7215_v33 = vsel %vm865_vm3, %v929_v1, %v931_v51 }
 0x129   : > { %5603 = vmatmul.msk.f32.gmra.mxu3 %vm514_vm0, %v10275_v46 }
 0x12a   : > { %10274 = vst [vmem:[#allocation76_spill] sm:$0xff] %v7204_v7  ;;  %v336_v7 = vrot.slane %v256_v3, 7  ;;  %v7232_v3 = vsel %vm289_vm1, 0.0, %v335_v37 }
 0x12b   : > { %v1369_v22 = vpop.f32.mrf.mxu0  ;;  %v1054_v10 = vpop.f32.mrf.mxu2 }
 0x12c   : > { %v1130_v28 = vadd.f32 %v1054_v10, %v800_v58  ;;  %v1206_v30 = vpop.f32.mrf.mxu3  ;;  %v802_v14 = vpop.f32.mrf.mxu1  ;;  %v10278_v10 = vld [vmem:[#allocation28_spill] sm:$0xff]  ;;  %v933_v58 = vrot.slane %v10275_v46, 2 }
 0x12d   : > { %v934_v41 = vrot.slane %v10278_v10, 2  ;;  %v803_v1 = vadd.f32 %v802_v14, %v6943_v48  ;;  %v1305_v48 = vrot.slane %v7232_v3, 1 }
 0x12e   : > { %5638 = vmatmul.msk.f32.gmra.mxu0 %vm514_vm0, %v6750_v2  ;;  %v1282_v19 = vadd.f32 %v1206_v30, %v1130_v28  ;;  %v7229_v28 = vsel %vm289_vm1, %v335_v37, %v336_v7 }
 0x12f   : > { %5538 = vmatmul.msk.f32.gmra.mxu1 %vm514_vm0, %v10272_v6  ;;  %v1306_v14 = vrot.slane %v7229_v28, 1 }
 0x130   : > { %5571 = vmatmul.msk.f32.gmra.mxu2 %vm514_vm0, %v7215_v33  ;;  %v7221_v17 = vadd.f32 %v1363_v38, %v1282_v19 }
 0x131   : > { %5604 = vmatmul.msk.f32.gmra.mxu3 %vm514_vm0, %v10278_v10 }
 0x132   : > { %10277 = vst [vmem:[#allocation22_spill] sm:$0xff] %v7221_v17  ;;  %v7237_v17 = vsel %vm865_vm3, %v933_v58, %v934_v41  ;;  %v5773_v58 = vld [vmem:[%s9964_s3 + $0x58] sm:$0xff] }
 0x133   : > { %v1372_v30 = vpop.f32.mrf.mxu0  ;;  %v1057_v51 = vpop.f32.mrf.mxu2  ;;  %10279 = vst [vmem:[#allocation28_spill] sm:$0xff] %v7237_v17  ;;  %2644 = vmatpush.msrb.mxu2 %v5773_v58 }
 0x134   : > { %v1131_v47 = vadd.f32 %v1057_v51, %v803_v1  ;;  %v1209_v38 = vpop.f32.mrf.mxu3  ;;  %v805_v19 = vpop.f32.mrf.mxu1  ;;  %v10281_v1 = vld [vmem:[#allocation34_spill] sm:$0xff] }
 0x135   : > { %v936_v51 = vrot.slane %v10281_v1, 2 }
 0x136   : > { %5639 = vmatmul.msk.f32.gmra.mxu0 %vm514_vm0, %v6776_v5  ;;  %v1283_v2 = vadd.f32 %v1209_v38, %v1131_v47  ;;  %v5841_v47 = vld [vmem:[%s9964_s3 + $0xd8] sm:$0xff]  ;;  %v806_v38 = vadd.f32 %v805_v19, %v6964_v21 }
 0x137   : > { %5539 = vmatmul.msk.f32.gmra.mxu1 %vm514_vm0, %v10275_v46  ;;  %v7258_v46 = vsel %vm434_vm2, %v1305_v48, %v1306_v14  ;;  %2762 = vmatpush.msrb.mxu3 %v5841_v47  ;;  %v5775_v48 = vld [vmem:[%s9964_s3 + $0x78] sm:$0xff] }
 0x138   : > { %5572 = vmatmul.msk.f32.gmra.mxu2 %vm514_vm0, %v7237_v17  ;;  %v7245_v37 = vadd.f32 %v1366_v26, %v1283_v2  ;;  %v7261_v26 = vsel %vm289_vm1, %v336_v7, 0.0  ;;  %v7266_v17 = vsel %vm865_vm3, %v934_v41, %v936_v51  ;;  %2467 = vmatpush.msrb.mxu1 %v5775_v48  ;;  %v938_v41 = vrot.slane %v6720_v53, 2  ;;  %v5875_v51 = vld [vmem:[%s9964_s3 + $0xf8] sm:$0xff] }
 0x139   : > { %5605 = vmatmul.msk.f32.gmra.mxu3 %vm514_vm0, %v6720_v53  ;;  %v1308_v19 = vrot.slane %v7261_v26, 1  ;;  %2912 = vmatpush.msrb.mxu0 %v5875_v51 }
 0x13a   : > { %10280 = vst [vmem:[#allocation77_spill] sm:$0xff] %v7245_v37 }
 0x13b   : > { %v1375_v5 = vpop.f32.mrf.mxu0  ;;  %v1060_v2 = vpop.f32.mrf.mxu2 }
 0x13c   : > { %v1132_v1 = vadd.f32 %v1060_v2, %v806_v38  ;;  %v1212_v37 = vpop.f32.mrf.mxu3  ;;  %v808_v6 = vpop.f32.mrf.mxu1  ;;  %v7287_v38 = vsel %vm434_vm2, %v1306_v14, %v1308_v19 }
 0x13d   : > { %v809_v58 = vadd.f32 %v808_v6, %v6984_v42  ;;  %v941_v6 = vrot.slane %v6758_v31, 2 }
 0x13e   : > { %5640 = vmatmul.msk.f32.gmra.mxu0 %vm514_vm0, %v7258_v46  ;;  %v1284_v21 = vadd.f32 %v1212_v37, %v1132_v1  ;;  %v939_v37 = vrot.slane %v6717_v11, 2 }
 0x13f   : > { %5540 = vmatmul.msk.f32.gmra.mxu1 %vm514_vm0, %v10278_v10 }
 0x140   : > { %5573 = vmatmul.msk.f32.gmra.mxu2 %vm514_vm0, %v7266_v17  ;;  %v7276_v7 = vadd.f32 %v1369_v22, %v1284_v21  ;;  %v7292_v48 = vsel %vm865_vm3, %v938_v41, %v939_v37 }
 0x141   : > { %5606 = vmatmul.msk.f32.gmra.mxu3 %vm514_vm0, %v6717_v11 }
 0x142   : > { %10282 = vst [vmem:[#allocation34_spill] sm:$0xff] %v7276_v7 }
 0x143   : > { %v1378_v47 = vpop.f32.mrf.mxu0  ;;  %v1063_v22 = vpop.f32.mrf.mxu2 }
 0x144   : > { %v1133_v2 = vadd.f32 %v1063_v22, %v809_v58  ;;  %v1215_v1 = vpop.f32.mrf.mxu3  ;;  %v811_v21 = vpop.f32.mrf.mxu1 }
 0x145   : > { %v812_v14 = vadd.f32 %v811_v21, %v7005_v0 }
 0x146   : > { %5641 = vmatmul.msk.f32.gmra.mxu0 %vm514_vm0, %v7287_v38  ;;  %v1285_v7 = vadd.f32 %v1215_v1, %v1133_v2  ;;  %v7307_v2 = vsel %vm865_vm3, %v939_v37, %v941_v6 }
 0x147   : > { %5541 = vmatmul.msk.f32.gmra.mxu1 %vm514_vm0, %v6720_v53 }
 0x148   : > { %5574 = vmatmul.msk.f32.gmra.mxu2 %vm514_vm0, %v7292_v48  ;;  %v7298_v42 = vadd.f32 %v1372_v30, %v1285_v7 }
 0x149   : > { %5607 = vmatmul.msk.f32.gmra.mxu3 %vm514_vm0, %v7232_v3 }
 0x14b   : > { %v1381_v19 = vpop.f32.mrf.mxu0  ;;  %v1066_v51 = vpop.f32.mrf.mxu2 }
 0x14c   : > { %v1134_v41 = vadd.f32 %v1066_v51, %v812_v14  ;;  %v1218_v58 = vpop.f32.mrf.mxu3  ;;  %v814_v22 = vpop.f32.mrf.mxu1 }
 0x14d   : > { %v815_v0 = vadd.f32 %v814_v22, %v7023_v60 }
 0x14e   : > { %5740 = vmatmul.msk.f32.vlgmr.msra.gmra.mxu0 %vm514_vm0, %v6831_v56  ;;  %v1286_v30 = vadd.f32 %v1218_v58, %v1134_v41 }
 0x14f   : > { %5542 = vmatmul.msk.f32.gmra.mxu1 %vm514_vm0, %v6717_v11 }
 0x150   : > { %5575 = vmatmul.msk.f32.gmra.mxu2 %vm514_vm0, %v7307_v2  ;;  %v7313_v31 = vadd.f32 %v1375_v5, %v1286_v30 }
 0x151   : > { %5608 = vmatmul.msk.f32.gmra.mxu3 %vm514_vm0, %v7229_v28 }
 0x153   : > { %v1384_v7 = vpop.f32.mrf.mxu0  ;;  %v1069_v1 = vpop.f32.mrf.mxu2 }
 0x154   : > { %v1135_v21 = vadd.f32 %v1069_v1, %v815_v0  ;;  %v1221_v14 = vpop.f32.mrf.mxu3  ;;  %v817_v37 = vpop.f32.mrf.mxu1 }
 0x155   : > { %v818_v60 = vadd.f32 %v817_v37, %v6898_v59 }
 0x156   : > { %5741 = vmatmul.msk.f32.gmra.mxu0 %vm514_vm0, %v6843_v52  ;;  %v1287_v6 = vadd.f32 %v1221_v14, %v1135_v21 }
 0x157   : > { %5643 = vmatmul.msk.f32.vlgmr.msra.gmra.mxu1 %vm514_vm0, %v6806_v55 }
 0x158   : > { %5676 = vmatmul.msk.f32.vlgmr.msra.gmra.mxu2 %vm514_vm0, %v6540_v25  ;;  %v7324_v5 = vadd.f32 %v1378_v47, %v1287_v6 }
 0x159   : > { %5707 = vmatmul.msk.f32.vlgmr.msra.gmra.mxu3 %vm514_vm0, %v6579_v57 }
 0x15b   : > { %v1387_v51 = vpop.f32.mrf.mxu0  ;;  %v1072_v41 = vpop.f32.mrf.mxu2 }
 0x15c   : > { %v1136_v58 = vadd.f32 %v1072_v41, %v818_v60  ;;  %v1224_v22 = vpop.f32.mrf.mxu3  ;;  %v820_v30 = vpop.f32.mrf.mxu1 }
 0x15d   : > { %v821_v59 = vadd.f32 %v820_v30, %v6919_v62 }
 0x15e   : > { %5742 = vmatmul.msk.f32.gmra.mxu0 %vm514_vm0, %v6856_v63  ;;  %v1288_v0 = vadd.f32 %v1224_v22, %v1136_v58 }
 0x15f   : > { %5644 = vmatmul.msk.f32.gmra.mxu1 %vm514_vm0, %v6818_v13 }
 0x160   : > { %5677 = vmatmul.msk.f32.gmra.mxu2 %vm514_vm0, %v6537_v24  ;;  %v7335_v25 = vadd.f32 %v1381_v19, %v1288_v0 }
 0x161   : > { %5708 = vmatmul.msk.f32.gmra.mxu3 %vm514_vm0, %v6628_v54 }
 0x163   : > { %v1390_v57 = vpop.f32.mrf.mxu0  ;;  %v1075_v55 = vpop.f32.mrf.mxu2 }
 0x164   : > { %v1137_v47 = vadd.f32 %v1075_v55, %v821_v59  ;;  %v1227_v1 = vpop.f32.mrf.mxu3  ;;  %v823_v21 = vpop.f32.mrf.mxu1  ;;  %v10286_v59 = vld [vmem:[#allocation51_spill] sm:$0xff] }
 0x165   : > { %v824_v54 = vadd.f32 %v823_v21, %v6939_v18  ;;  %v10285_v18 = vld [vmem:[#allocation56_spill] sm:$0xff] }
 0x166   : > { %5743 = vmatmul.msk.f32.gmra.mxu0 %vm514_vm0, %v6870_v39  ;;  %v1289_v14 = vadd.f32 %v1227_v1, %v1137_v47  ;;  %v10288_v47 = vld [vmem:[#allocation8_spill] sm:$0xff]  ;;  %v10289_v1 = vld [vmem:[#allocation59_spill] sm:$0xff] }
 0x167   : > { %5645 = vmatmul.msk.f32.gmra.mxu1 %vm514_vm0, %v6831_v56 }
 0x168   : > { %5678 = vmatmul.msk.f32.gmra.mxu2 %vm514_vm0, %v6636_v12  ;;  %v7346_v24 = vadd.f32 %v1384_v7, %v1289_v14  ;;  %v10283_v12 = vld [vmem:[#allocation30_spill] sm:$0xff] }
 0x169   : > { %5709 = vmatmul.msk.f32.gmra.mxu3 %vm514_vm0, %v6681_v32  ;;  %v10284_v32 = vld [vmem:[#allocation42_spill] sm:$0xff] }
 0x16b   : > { %v1393_v62 = vpop.f32.mrf.mxu0  ;;  %v1078_v13 = vpop.f32.mrf.mxu2 }
 0x16c   : > { %v1138_v19 = vadd.f32 %v1078_v13, %v824_v54  ;;  %v1230_v37 = vpop.f32.mrf.mxu3  ;;  %v826_v6 = vpop.f32.mrf.mxu1 }
 0x16d   : > { %v827_v7 = vadd.f32 %v826_v6, %v10285_v18  ;;  %v10290_v6 = vld [vmem:[#allocation53_spill] sm:$0xff] }
 0x16e   : > { %5744 = vmatmul.msk.f32.gmra.mxu0 %vm514_vm0, %v6887_v44  ;;  %v1290_v60 = vadd.f32 %v1230_v37, %v1138_v19 }
 0x16f   : > { %5646 = vmatmul.msk.f32.gmra.mxu1 %vm514_vm0, %v6843_v52  ;;  %v10287_v52 = vld [vmem:[#allocation4_spill] sm:$0xff] }
 0x170   : > { %5679 = vmatmul.msk.f32.gmra.mxu2 %vm514_vm0, %v10283_v12  ;;  %v7357_v56 = vadd.f32 %v1387_v51, %v1290_v60  ;;  %v10292_v12 = vld [vmem:[#allocation12_spill] sm:$0xff] }
 0x171   : > { %5710 = vmatmul.msk.f32.gmra.mxu3 %vm514_vm0, %v10284_v32  ;;  %v10293_v32 = vld [vmem:[#allocation62_spill] sm:$0xff] }
 0x173   : > { %v1396_v41 = vpop.f32.mrf.mxu0  ;;  %v1081_v58 = vpop.f32.mrf.mxu2 }
 0x174   : > { %v1139_v22 = vadd.f32 %v1081_v58, %v827_v7  ;;  %v1233_v30 = vpop.f32.mrf.mxu3  ;;  %v829_v0 = vpop.f32.mrf.mxu1 }
 0x175   : > { %v830_v21 = vadd.f32 %v829_v0, %v10289_v1  ;;  %v10297_v1 = vld [vmem:[#allocation65_spill] sm:$0xff] }
 0x176   : > { %5745 = vmatmul.msk.f32.gmra.mxu0 %vm514_vm0, %v10286_v59  ;;  %v1291_v55 = vadd.f32 %v1233_v30, %v1139_v22 }
 0x177   : > { %5647 = vmatmul.msk.f32.gmra.mxu1 %vm514_vm0, %v6856_v63  ;;  %v10291_v63 = vld [vmem:[#allocation3_spill] sm:$0xff] }
 0x178   : > { %5680 = vmatmul.msk.f32.gmra.mxu2 %vm514_vm0, %v10287_v52  ;;  %v7368_v51 = vadd.f32 %v1390_v57, %v1291_v55  ;;  %v10294_v55 = vld [vmem:[#allocation55_spill] sm:$0xff] }
 0x179   : > { %5711 = vmatmul.msk.f32.gmra.mxu3 %vm514_vm0, %v10288_v47  ;;  %v10296_v47 = vld [vmem:[#allocation19_spill] sm:$0xff] }
 0x17b   : > { %v1399_v14 = vpop.f32.mrf.mxu0  ;;  %v1084_v54 = vpop.f32.mrf.mxu2 }
 0x17c   : > { %v1140_v13 = vadd.f32 %v1084_v54, %v830_v21  ;;  %v1236_v19 = vpop.f32.mrf.mxu3  ;;  %v832_v37 = vpop.f32.mrf.mxu1 }
 0x17d   : > { %v833_v18 = vadd.f32 %v832_v37, %v10293_v32  ;;  %v10300_v32 = vld [vmem:[#allocation23_spill] sm:$0xff] }
 0x17e   : > { %5746 = vmatmul.msk.f32.gmra.mxu0 %vm514_vm0, %v10290_v6  ;;  %v1292_v60 = vadd.f32 %v1236_v19, %v1140_v13 }
 0x17f   : > { %5648 = vmatmul.msk.f32.gmra.mxu1 %vm514_vm0, %v6870_v39  ;;  %v10295_v39 = vld [vmem:[#allocation15_spill] sm:$0xff] }
 0x180   : > { %5681 = vmatmul.msk.f32.gmra.mxu2 %vm514_vm0, %v10291_v63  ;;  %v7379_v57 = vadd.f32 %v1393_v62, %v1292_v60  ;;  %v10298_v63 = vld [vmem:[#allocation58_spill] sm:$0xff] }
 0x181   : > { %5712 = vmatmul.msk.f32.gmra.mxu3 %vm514_vm0, %v10292_v12 }
 0x183   : > { %v1402_v7 = vpop.f32.mrf.mxu0  ;;  %v1087_v58 = vpop.f32.mrf.mxu2 }
 0x184   : > { %v1141_v22 = vadd.f32 %v1087_v58, %v833_v18  ;;  %v1239_v30 = vpop.f32.mrf.mxu3  ;;  %v835_v0 = vpop.f32.mrf.mxu1  ;;  %v10301_v18 = vld [vmem:[#allocation68_spill] sm:$0xff] }
 0x185   : > { %v836_v21 = vadd.f32 %v835_v0, %v10297_v1 }
 0x186   : > { %5747 = vmatmul.msk.f32.gmra.mxu0 %vm514_vm0, %v10294_v55  ;;  %v1293_v52 = vadd.f32 %v1239_v30, %v1141_v22 }
 0x187   : > { %5649 = vmatmul.msk.f32.gmra.mxu1 %vm514_vm0, %v6887_v44  ;;  %v10299_v44 = vld [vmem:[#allocation14_spill] sm:$0xff] }
 0x188   : > { %5682 = vmatmul.msk.f32.gmra.mxu2 %vm514_vm0, %v10295_v39  ;;  %v7390_v62 = vadd.f32 %v1396_v41, %v1293_v52 }
 0x189   : > { %5713 = vmatmul.msk.f32.gmra.mxu3 %vm514_vm0, %v10296_v47  ;;  %v10302_v47 = vld [vmem:[#allocation61_spill] sm:$0xff] }
 0x18b   : > { %v1405_v54 = vpop.f32.mrf.mxu0  ;;  %v1090_v13 = vpop.f32.mrf.mxu2 }
 0x18c   : > { %v1142_v19 = vadd.f32 %v1090_v13, %v836_v21  ;;  %v1242_v37 = vpop.f32.mrf.mxu3  ;;  %v838_v60 = vpop.f32.mrf.mxu1  ;;  %v10304_v21 = vld [vmem:[#allocation31_spill] sm:$0xff]  ;;  %v10305_v13 = vld [vmem:[#allocation50_spill] sm:$0xff] }
 0x18d   : > { %v839_v58 = vadd.f32 %v838_v60, %v10301_v18  ;;  %v10306_v18 = vld [vmem:[#allocation64_spill] sm:$0xff] }
 0x18e   : > { %5748 = vmatmul.msk.f32.gmra.mxu0 %vm514_vm0, %v10298_v63  ;;  %v1294_v12 = vadd.f32 %v1242_v37, %v1142_v19 }
 0x18f   : > { %5650 = vmatmul.msk.f32.gmra.mxu1 %vm514_vm0, %v10286_v59  ;;  %v10303_v59 = vld [vmem:[#allocation26_spill] sm:$0xff] }
 0x190   : > { %5683 = vmatmul.msk.f32.gmra.mxu2 %vm514_vm0, %v10299_v44  ;;  %v7401_v41 = vadd.f32 %v1399_v14, %v1294_v12 }
 0x191   : > { %5714 = vmatmul.msk.f32.gmra.mxu3 %vm514_vm0, %v10300_v32 }
 0x193   : > { %v1408_v22 = vpop.f32.mrf.mxu0  ;;  %v1093_v30 = vpop.f32.mrf.mxu2 }
 0x194   : > { %v1143_v0 = vadd.f32 %v1093_v30, %v839_v58  ;;  %v1245_v52 = vpop.f32.mrf.mxu3  ;;  %v841_v39 = vpop.f32.mrf.mxu1  ;;  %v10308_v30 = vld [vmem:[#allocation35_spill] sm:$0xff] }
 0x195   : > { %v842_v19 = vadd.f32 %v841_v39, %v10305_v13 }
 0x196   : > { %5749 = vmatmul.msk.f32.gmra.mxu0 %vm514_vm0, %v10302_v47  ;;  %v1295_v1 = vadd.f32 %v1245_v52, %v1143_v0  ;;  %v10309_v0 = vld [vmem:[#allocation52_spill] sm:$0xff] }
 0x197   : > { %5651 = vmatmul.msk.f32.gmra.mxu1 %vm514_vm0, %v10290_v6  ;;  %v10307_v6 = vld [vmem:[#allocation25_spill] sm:$0xff] }
 0x198   : > { %5684 = vmatmul.msk.f32.gmra.mxu2 %vm514_vm0, %v10303_v59  ;;  %v7412_v14 = vadd.f32 %v1402_v7, %v1295_v1 }
 0x199   : > { %5715 = vmatmul.msk.f32.gmra.mxu3 %vm514_vm0, %v10304_v21 }
 0x19b   : > { %v1411_v37 = vpop.f32.mrf.mxu0  ;;  %v1096_v60 = vpop.f32.mrf.mxu2 }
 0x19c   : > { %v1144_v12 = vadd.f32 %v1096_v60, %v842_v19  ;;  %v1248_v44 = vpop.f32.mrf.mxu3  ;;  %v844_v32 = vpop.f32.mrf.mxu1  ;;  %v10310_v19 = vld [vmem:[#allocation67_spill] sm:$0xff] }
 0x19d   : > { %v845_v52 = vadd.f32 %v844_v32, %v10309_v0 }
 0x19e   : > { %5750 = vmatmul.msk.f32.gmra.mxu0 %vm514_vm0, %v10306_v18  ;;  %v1296_v58 = vadd.f32 %v1248_v44, %v1144_v12  ;;  %v10312_v12 = vld [vmem:[#allocation43_spill] sm:$0xff]  ;;  %v10313_v44 = vld [vmem:[#allocation54_spill] sm:$0xff] }
 0x19f   : > { %5652 = vmatmul.msk.f32.gmra.mxu1 %vm514_vm0, %v10294_v55  ;;  %v10311_v55 = vld [vmem:[#allocation38_spill] sm:$0xff] }
 0x1a0   : > { %5685 = vmatmul.msk.f32.gmra.mxu2 %vm514_vm0, %v10307_v6  ;;  %v7423_v7 = vadd.f32 %v1405_v54, %v1296_v58 }
 0x1a1   : > { %5716 = vmatmul.msk.f32.gmra.mxu3 %vm514_vm0, %v10308_v30 }
 0x1a3   : > { %v1414_v39 = vpop.f32.mrf.mxu0  ;;  %v1099_v1 = vpop.f32.mrf.mxu2 }
 0x1a4   : > { %v1145_v59 = vadd.f32 %v1099_v1, %v845_v52  ;;  %v1251_v21 = vpop.f32.mrf.mxu3  ;;  %v847_v13 = vpop.f32.mrf.mxu1 }
 0x1a5   : > { %v848_v32 = vadd.f32 %v847_v13, %v10313_v44 }
 0x1a6   : > { %5751 = vmatmul.msk.f32.gmra.mxu0 %vm514_vm0, %v10310_v19  ;;  %v1297_v60 = vadd.f32 %v1251_v21, %v1145_v59  ;;  %v10315_v59 = vld [vmem:[#allocation46_spill] sm:$0xff]  ;;  %v10316_v21 = vld [vmem:[#allocation57_spill] sm:$0xff] }
 0x1a7   : > { %5653 = vmatmul.msk.f32.gmra.mxu1 %vm514_vm0, %v10298_v63  ;;  %v10314_v63 = vld [vmem:[#allocation37_spill] sm:$0xff] }
 0x1a8   : > { %5686 = vmatmul.msk.f32.gmra.mxu2 %vm514_vm0, %v10311_v55  ;;  %v7434_v54 = vadd.f32 %v1408_v22, %v1297_v60 }
 0x1a9   : > { %5717 = vmatmul.msk.f32.gmra.mxu3 %vm514_vm0, %v10312_v12 }
 0x1ab   : > { %v1417_v58 = vpop.f32.mrf.mxu0  ;;  %v1102_v6 = vpop.f32.mrf.mxu2 }
 0x1ac   : > { %v1146_v30 = vadd.f32 %v1102_v6, %v848_v32  ;;  %v1254_v0 = vpop.f32.mrf.mxu3  ;;  %v850_v52 = vpop.f32.mrf.mxu1 }
 0x1ad   : > { %v851_v13 = vadd.f32 %v850_v52, %v10316_v21  ;;  %v5840_v52 = vld [vmem:[%s9964_s3 + $0xd0] sm:$0xff] }
 0x1ae   : > { %5752 = vmatmul.msk.f32.gmra.mxu0 %vm514_vm0, %v7045_v36  ;;  %v1298_v1 = vadd.f32 %v1254_v0, %v1146_v30  ;;  %v10318_v30 = vld [vmem:[#allocation9_spill] sm:$0xff]  ;;  %v5772_v0 = vld [vmem:[%s9964_s3 + $0x50] sm:$0xff]  ;;  %2763 = vmatpush.msrb.mxu3 %v5840_v52 }
 0x1af   : > { %5654 = vmatmul.msk.f32.gmra.mxu1 %vm514_vm0, %v10302_v47  ;;  %v10317_v47 = vld [vmem:[#allocation5_spill] sm:$0xff]  ;;  %2645 = vmatpush.msrb.mxu2 %v5772_v0 }
 0x1b0   : > { %5687 = vmatmul.msk.f32.gmra.mxu2 %vm514_vm0, %v10314_v63  ;;  %v7445_v22 = vadd.f32 %v1411_v37, %v1298_v1  ;;  %v10319_v1 = vld [vmem:[#allocation60_spill] sm:$0xff] }
 0x1b1   : > { %5718 = vmatmul.msk.f32.gmra.mxu3 %vm514_vm0, %v10315_v59 }
 0x1b3   : > { %v1420_v60 = vpop.f32.mrf.mxu0  ;;  %v1105_v55 = vpop.f32.mrf.mxu2 }
 0x1b4   : > { %v1147_v12 = vadd.f32 %v1105_v55, %v851_v13  ;;  %v1257_v44 = vpop.f32.mrf.mxu3  ;;  %v853_v32 = vpop.f32.mrf.mxu1 }
 0x1b5   : > { %v854_v63 = vadd.f32 %v853_v32, %v10319_v1  ;;  %v10321_v32 = vld [vmem:[#allocation63_spill] sm:$0xff] }
 0x1b6   : > { %5753 = vmatmul.msk.f32.gmra.mxu0 %vm514_vm0, %v7058_v20  ;;  %v1299_v6 = vadd.f32 %v1257_v44, %v1147_v12  ;;  %v10320_v44 = vld [vmem:[#allocation13_spill] sm:$0xff] }
 0x1b7   : > { %5655 = vmatmul.msk.f32.gmra.mxu1 %vm514_vm0, %v10306_v18 }
 0x1b8   : > { %5688 = vmatmul.msk.f32.gmra.mxu2 %vm514_vm0, %v10317_v47  ;;  %v7456_v37 = vadd.f32 %v1414_v39, %v1299_v6 }
 0x1b9   : > { %5719 = vmatmul.msk.f32.gmra.mxu3 %vm514_vm0, %v10318_v30 }
 0x1bb   : > { %v1423_v59 = vpop.f32.mrf.mxu0  ;;  %v1108_v18 = vpop.f32.mrf.mxu2 }
 0x1bc   : > { %v1148_v21 = vadd.f32 %v1108_v18, %v854_v63  ;;  %v1260_v39 = vpop.f32.mrf.mxu3  ;;  %v856_v13 = vpop.f32.mrf.mxu1  ;;  %v10322_v18 = vld [vmem:[#allocation20_spill] sm:$0xff] }
 0x1bd   : > { %v857_v6 = vadd.f32 %v856_v13, %v10321_v32 }
 0x1be   : > { %5754 = vmatmul.msk.f32.gmra.mxu0 %vm514_vm0, %v7074_v23  ;;  %v1300_v55 = vadd.f32 %v1260_v39, %v1148_v21  ;;  %v10323_v21 = vld [vmem:[#allocation66_spill] sm:$0xff] }
 0x1bf   : > { %5656 = vmatmul.msk.f32.gmra.mxu1 %vm514_vm0, %v10310_v19  ;;  %v5874_v19 = vld [vmem:[%s9964_s3 + $0xf0] sm:$0xff] }
 0x1c0   : > { %5689 = vmatmul.msk.f32.gmra.mxu2 %vm514_vm0, %v6428_v27  ;;  %v7473_v12 = vadd.f32 %v1417_v58, %v1300_v55  ;;  %v5774_v27 = vld [vmem:[%s9964_s3 + $0x70] sm:$0xff]  ;;  %2913 = vmatpush.msrb.mxu0 %v5874_v19 }
 0x1c1   : > { %5720 = vmatmul.msk.f32.gmra.mxu3 %vm514_vm0, %v10320_v44  ;;  %2468 = vmatpush.msrb.mxu1 %v5774_v27 }
 0x1c3   : > { %v1426_v47 = vpop.f32.mrf.mxu0  ;;  %v1111_v30 = vpop.f32.mrf.mxu2 }
 0x1c4   : > { %v1149_v0 = vadd.f32 %v1111_v30, %v857_v6  ;;  %v1263_v52 = vpop.f32.mrf.mxu3  ;;  %v859_v1 = vpop.f32.mrf.mxu1  ;;  %v10325_v30 = vld [vmem:[#allocation69_spill] sm:$0xff] }
 0x1c5   : > { %v860_v39 = vadd.f32 %v859_v1, %v10323_v21 }
 0x1c6   : > { %5755 = vmatmul.msk.f32.gmra.mxu0 %vm514_vm0, %v7089_v29  ;;  %v1301_v63 = vadd.f32 %v1263_v52, %v1149_v0 }
 0x1c7   : > { %5657 = vmatmul.msk.f32.gmra.mxu1 %vm514_vm0, %v7045_v36 }
 0x1c8   : > { %5690 = vmatmul.msk.f32.gmra.mxu2 %vm514_vm0, %v6513_v9  ;;  %v7490_v58 = vadd.f32 %v1420_v60, %v1301_v63  ;;  %v10324_v60 = vld [vmem:[#allocation24_spill] sm:$0xff] }
 0x1c9   : > { %5721 = vmatmul.msk.f32.gmra.mxu3 %vm514_vm0, %v10322_v18 }
 0x1cb   : > { %v1930_v13 = vpop.f32.mrf.mxu0  ;;  %v1114_v55 = vpop.f32.mrf.mxu2 }
 0x1cc   : > { %v1150_v44 = vadd.f32 %v1114_v55, %v860_v39  ;;  %v1266_v32 = vpop.f32.mrf.mxu3  ;;  %v862_v6 = vpop.f32.mrf.mxu1 }
 0x1cd   : > { %v863_v0 = vadd.f32 %v862_v6, %v10325_v30 }
 0x1ce   : > { %5756 = vmatmul.msk.f32.gmra.mxu0 %vm514_vm0, %v7105_v15  ;;  %v1302_v36 = vadd.f32 %v1266_v32, %v1150_v44 }
 0x1cf   : > { %5658 = vmatmul.msk.f32.gmra.mxu1 %vm514_vm0, %v7058_v20  ;;  %v10326_v20 = vld [vmem:[#allocation70_spill] sm:$0xff] }
 0x1d0   : > { %5691 = vmatmul.msk.f32.gmra.mxu2 %vm514_vm0, %v6510_v8  ;;  %v7501_v9 = vadd.f32 %v1423_v59, %v1302_v36 }
 0x1d1   : > { %5722 = vmatmul.msk.f32.gmra.mxu3 %vm514_vm0, %v10324_v60 }
 0x1d3   : > { %v1933_v52 = vpop.f32.mrf.mxu0  ;;  %v1117_v1 = vpop.f32.mrf.mxu2 }
 0x1d4   : > { %v1151_v63 = vadd.f32 %v1117_v1, %v863_v0  ;;  %v1269_v27 = vpop.f32.mrf.mxu3  ;;  %v1489_v19 = vpop.f32.mrf.mxu1 }
 0x1d5   : > { %v1585_v59 = vadd.f32 %v1489_v19, %v10326_v20 }
 0x1d6   : > { %5757 = vmatmul.msk.f32.gmra.mxu0 %vm514_vm0, %v7120_v49  ;;  %v1303_v18 = vadd.f32 %v1269_v27, %v1151_v63  ;;  %v10328_v63 = vld [vmem:[#allocation41_spill] sm:$0xff]  ;;  %v10329_v27 = vld [vmem:[#allocation44_spill] sm:$0xff] }
 0x1d7   : > { %5659 = vmatmul.msk.f32.gmra.mxu1 %vm514_vm0, %v7074_v23  ;;  %v10327_v23 = vld [vmem:[#allocation36_spill] sm:$0xff] }
 0x1d8   : > { %5692 = vmatmul.msk.f32.gmra.mxu2 %vm514_vm0, %v6609_v43  ;;  %v7512_v8 = vadd.f32 %v1426_v47, %v1303_v18  ;;  %v10330_v18 = vld [vmem:[#allocation71_spill] sm:$0xff] }
 0x1d9   : > { %5723 = vmatmul.msk.f32.gmra.mxu3 %vm514_vm0, %v6644_v35  ;;  %v7528_v35 = vld [vmem:[%s9963_s2] ss:$0 sm:$0xff] }
 0x1db   : > { %v1936_v21 = vpop.f32.mrf.mxu0  ;;  %v1636_v39 = vpop.f32.mrf.mxu2 }
 0x1dc   : > { %v1732_v55 = vadd.f32 %v1636_v39, %v1585_v59  ;;  %v1783_v44 = vpop.f32.mrf.mxu3  ;;  %v1492_v32 = vpop.f32.mrf.mxu1 }
 0x1dd   : > { %v1586_v47 = vadd.f32 %v1492_v32, %v7080_v45 }
 0x1de   : > { %5758 = vmatmul.msk.f32.gmra.mxu0 %vm514_vm0, %v7136_v4  ;;  %v1879_v6 = vadd.f32 %v1783_v44, %v1732_v55 }
 0x1df   : > { %5660 = vmatmul.msk.f32.gmra.mxu1 %vm514_vm0, %v7089_v29 }
 0x1e0   : > { %v2026_v43 = vadd.f32 %v1930_v13, %v1879_v6  ;;  %5693 = vmatmul.msk.f32.gmra.mxu2 %vm514_vm0, %v6606_v40 }
 0x1e1   : > { %5724 = vmatmul.msk.f32.gmra.mxu3 %vm514_vm0, %v10327_v23 }
 0x1e2   : > { %v2062_v40 = vadd.f32 %v7528_v35, %v2026_v43 }
 0x1e3   : > { %v1939_v36 = vpop.f32.mrf.mxu0  ;;  %v1639_v60 = vpop.f32.mrf.mxu2 }
 0x1e4   : > { %v1733_v30 = vadd.f32 %v1639_v60, %v1586_v47  ;;  %v1786_v0 = vpop.f32.mrf.mxu3  ;;  %v1495_v1 = vpop.f32.mrf.mxu1  ;;  %v2094_v45 = vmax.f32 %v2062_v40, 0.0  ;;  %v10331_v60 = vld [vmem:[#allocation40_spill] sm:$0xff] }
 0x1e5   : > { %v1587_v20 = vadd.f32 %v1495_v1, %v10330_v18  ;;  %v10335_v18 = vld [vmem:[#allocation7_spill] sm:$0xff] }
 0x1e6   : > { %5759 = vmatmul.msk.f32.gmra.mxu0 %vm514_vm0, %v7151_v50  ;;  %v1880_v29 = vadd.f32 %v1786_v0, %v1733_v30  ;;  %v10332_v30 = vld [vmem:[#allocation47_spill] sm:$0xff]  ;;  %v10333_v0 = vld [vmem:[#allocation72_spill] sm:$0xff] }
 0x1e7   : > { %5661 = vmatmul.msk.f32.gmra.mxu1 %vm514_vm0, %v7105_v15  ;;  %v7544_v15 = vrot.slane %v2094_v45, 7 }
 0x1e8   : > { %v2027_v13 = vadd.f32 %v1933_v52, %v1880_v29  ;;  %5694 = vmatmul.msk.f32.gmra.mxu2 %vm514_vm0, %v10328_v63 }
 0x1e9   : > { %5725 = vmatmul.msk.f32.gmra.mxu3 %vm514_vm0, %v10329_v27 }
 0x1ea   : > { %v2063_v19 = vadd.f32 %v7528_v35, %v2027_v13 }
 0x1eb   : > { %v1942_v59 = vpop.f32.mrf.mxu0  ;;  %v1642_v39 = vpop.f32.mrf.mxu2 }
 0x1ec   : > { %v2095_v55 = vmax.f32 %v2063_v19, 0.0  ;;  %v1734_v44 = vadd.f32 %v1642_v39, %v1587_v20  ;;  %v1789_v32 = vpop.f32.mrf.mxu3  ;;  %v1498_v6 = vpop.f32.mrf.mxu1  ;;  %v10336_v20 = vld [vmem:[#allocation10_spill] sm:$0xff] }
 0x1ed   : > { %v1588_v1 = vadd.f32 %v1498_v6, %v10333_v0 }
 0x1ee   : > { %5760 = vmatmul.msk.f32.gmra.mxu0 %vm514_vm0, %v7167_v61  ;;  %v7546_v52 = vrot.slane %v2095_v55, 7  ;;  %v1881_v43 = vadd.f32 %v1789_v32, %v1734_v44  ;;  %v10337_v44 = vld [vmem:[#allocation33_spill] sm:$0xff] }
 0x1ef   : > { %5662 = vmatmul.msk.f32.gmra.mxu1 %vm514_vm0, %v7120_v49  ;;  %v10334_v49 = vld [vmem:[#allocation18_spill] sm:$0xff] }
 0x1f0   : > { %v7553_v23 = vsel %vm289_vm1, %v7544_v15, %v7546_v52  ;;  %v2028_v47 = vadd.f32 %v1936_v21, %v1881_v43  ;;  %5695 = vmatmul.msk.f32.gmra.mxu2 %vm514_vm0, %v10331_v60 }
 0x1f1   : > { %5726 = vmatmul.msk.f32.gmra.mxu3 %vm514_vm0, %v10332_v30 }
 0x1f2   : > { %v2064_v45 = vadd.f32 %v7528_v35, %v2028_v47 }
 0x1f3   : > { %v1945_v40 = vpop.f32.mrf.mxu0  ;;  %v1645_v29 = vpop.f32.mrf.mxu2 }
 0x1f4   : > { %v1735_v13 = vadd.f32 %v1645_v29, %v1588_v1  ;;  %v1792_v63 = vpop.f32.mrf.mxu3  ;;  %v1501_v27 = vpop.f32.mrf.mxu1  ;;  %v2096_v39 = vmax.f32 %v2064_v45, 0.0  ;;  %v10340_v45 = vld [vmem:[#allocation73_spill] sm:$0xff] }
 0x1f5   : > { %v1589_v32 = vadd.f32 %v1501_v27, %v10337_v44  ;;  %v10339_v27 = vld [vmem:[#allocation16_spill] sm:$0xff] }
 0x1f6   : > { %5761 = vmatmul.msk.f32.gmra.mxu0 %vm514_vm0, %v10334_v49  ;;  %v1882_v19 = vadd.f32 %v1792_v63, %v1735_v13  ;;  %v10338_v63 = vld [vmem:[#allocation6_spill] sm:$0xff] }
 0x1f7   : > { %5663 = vmatmul.msk.f32.gmra.mxu1 %vm514_vm0, %v7136_v4  ;;  %v7573_v4 = vrot.slane %v2096_v39, 7 }
 0x1f8   : > { %v2029_v21 = vadd.f32 %v1939_v36, %v1882_v19  ;;  %5696 = vmatmul.msk.f32.gmra.mxu2 %vm514_vm0, %v10335_v18 }
 0x1f9   : > { %5727 = vmatmul.msk.f32.gmra.mxu3 %vm514_vm0, %v10336_v20 }
 0x1fa   : > { %v2065_v55 = vadd.f32 %v7528_v35, %v2029_v21 }
 0x1fb   : > { %v1948_v6 = vpop.f32.mrf.mxu0  ;;  %v1648_v43 = vpop.f32.mrf.mxu2 }
 0x1fc   : > { %v2097_v60 = vmax.f32 %v2065_v55, 0.0  ;;  %v1736_v47 = vadd.f32 %v1648_v43, %v1589_v32  ;;  %v1795_v30 = vpop.f32.mrf.mxu3  ;;  %v1504_v0 = vpop.f32.mrf.mxu1  ;;  %v10341_v32 = vld [vmem:[#allocation21_spill] sm:$0xff] }
 0x1fd   : > { %v1590_v19 = vadd.f32 %v1504_v0, %v10340_v45 }
 0x1fe   : > { %5762 = vmatmul.msk.f32.gmra.mxu0 %vm514_vm0, %v7198_v16  ;;  %v7575_v36 = vrot.slane %v2097_v60, 7  ;;  %v1883_v1 = vadd.f32 %v1795_v30, %v1736_v47  ;;  %v10342_v47 = vld [vmem:[#allocation74_spill] sm:$0xff] }
 0x1ff   : > { %5664 = vmatmul.msk.f32.gmra.mxu1 %vm514_vm0, %v7151_v50 }
 0x200   : > { %v7582_v29 = vsel %vm289_vm1, %v7573_v4, %v7575_v36  ;;  %v2030_v13 = vadd.f32 %v1942_v59, %v1883_v1  ;;  %5697 = vmatmul.msk.f32.gmra.mxu2 %vm514_vm0, %v10338_v63 }
 0x201   : > { %5728 = vmatmul.msk.f32.gmra.mxu3 %vm514_vm0, %v10339_v27 }
 0x202   : > { %v2066_v50 = vadd.f32 %v7528_v35, %v2030_v13 }
 0x203   : > { %v1951_v21 = vpop.f32.mrf.mxu0  ;;  %v1651_v18 = vpop.f32.mrf.mxu2 }
 0x204   : > { %v1737_v20 = vadd.f32 %v1651_v18, %v1590_v19  ;;  %v1798_v39 = vpop.f32.mrf.mxu3  ;;  %v1507_v55 = vpop.f32.mrf.mxu1  ;;  %v2098_v43 = vmax.f32 %v2066_v50, 0.0  ;;  %v10343_v19 = vld [vmem:[#allocation28_spill] sm:$0xff]  ;;  %v10347_v50 = vld [vmem:[#allocation75_spill] sm:$0xff] }
 0x205   : > { %v1591_v30 = vadd.f32 %v1507_v55, %v10342_v47  ;;  %v10346_v55 = vld [vmem:[#allocation27_spill] sm:$0xff] }
 0x206   : > { %5763 = vmatmul.msk.f32.gmra.mxu0 %vm514_vm0, %v7215_v33  ;;  %v1884_v44 = vadd.f32 %v1798_v39, %v1737_v20  ;;  %v10345_v39 = vld [vmem:[#allocation17_spill] sm:$0xff] }
 0x207   : > { %5665 = vmatmul.msk.f32.gmra.mxu1 %vm514_vm0, %v7167_v61  ;;  %v7602_v61 = vrot.slane %v2098_v43, 7 }
 0x208   : > { %v2031_v59 = vadd.f32 %v1945_v40, %v1884_v44  ;;  %5698 = vmatmul.msk.f32.gmra.mxu2 %vm514_vm0, %v10267_v34 }
 0x209   : > { %5729 = vmatmul.msk.f32.gmra.mxu3 %vm514_vm0, %v10341_v32 }
 0x20a   : > { %v2067_v60 = vadd.f32 %v7528_v35, %v2031_v59 }
 0x20b   : > { %v1954_v0 = vpop.f32.mrf.mxu0  ;;  %v1654_v1 = vpop.f32.mrf.mxu2 }
 0x20c   : > { %v2099_v63 = vmax.f32 %v2067_v60, 0.0  ;;  %v1738_v13 = vadd.f32 %v1654_v1, %v1591_v30  ;;  %v1801_v27 = vpop.f32.mrf.mxu3  ;;  %v1510_v45 = vpop.f32.mrf.mxu1  ;;  %v10348_v1 = vld [vmem:[#allocation29_spill] sm:$0xff] }
 0x20d   : > { %v1592_v44 = vadd.f32 %v1510_v45, %v10347_v50  ;;  %v10350_v45 = vld [vmem:[#allocation11_spill] sm:$0xff] }
 0x20e   : > { %5764 = vmatmul.msk.f32.gmra.mxu0 %vm514_vm0, %v10343_v19  ;;  %v7604_v34 = vrot.slane %v2099_v63, 7  ;;  %v1885_v40 = vadd.f32 %v1801_v27, %v1738_v13  ;;  %v10349_v63 = vld [vmem:[#allocation32_spill] sm:$0xff] }
 0x20f   : > { %5666 = vmatmul.msk.f32.gmra.mxu1 %vm514_vm0, %v10334_v49 }
 0x210   : > { %v7611_v18 = vsel %vm289_vm1, %v7602_v61, %v7604_v34  ;;  %v2032_v20 = vadd.f32 %v1948_v6, %v1885_v40  ;;  %5699 = vmatmul.msk.f32.gmra.mxu2 %vm514_vm0, %v10345_v39 }
 0x211   : > { %10344 = vst [vmem:[#allocation30_spill] sm:$0xff] %v7611_v18  ;;  %5730 = vmatmul.msk.f32.gmra.mxu3 %vm514_vm0, %v10346_v55 }
 0x212   : > { %v2068_v49 = vadd.f32 %v7528_v35, %v2032_v20 }
 0x213   : > { %v1957_v59 = vpop.f32.mrf.mxu0  ;;  %v1657_v32 = vpop.f32.mrf.mxu2 }
 0x214   : > { %v1739_v43 = vadd.f32 %v1657_v32, %v1592_v44  ;;  %v1804_v60 = vpop.f32.mrf.mxu3  ;;  %v1513_v47 = vpop.f32.mrf.mxu1  ;;  %v2100_v13 = vmax.f32 %v2068_v49, 0.0  ;;  %v10352_v49 = vld [vmem:[#allocation39_spill] sm:$0xff] }
 0x215   : > { %v1593_v40 = vadd.f32 %v1513_v47, %v10350_v45 }
 0x216   : > { %5765 = vmatmul.msk.f32.gmra.mxu0 %vm514_vm0, %v7266_v17  ;;  %v1886_v30 = vadd.f32 %v1804_v60, %v1739_v43 }
 0x217   : > { %5667 = vmatmul.msk.f32.gmra.mxu1 %vm514_vm0, %v7198_v16  ;;  %v7631_v16 = vrot.slane %v2100_v13, 7 }
 0x218   : > { %v2033_v6 = vadd.f32 %v1951_v21, %v1886_v30  ;;  %5700 = vmatmul.msk.f32.gmra.mxu2 %vm514_vm0, %v10348_v1  ;;  %v10353_v30 = vld [vmem:[#allocation76_spill] sm:$0xff] }
 0x219   : > { %5731 = vmatmul.msk.f32.gmra.mxu3 %vm514_vm0, %v10349_v63 }
 0x21a   : > { %v2069_v27 = vadd.f32 %v7528_v35, %v2033_v6 }
 0x21b   : > { %v1960_v39 = vpop.f32.mrf.mxu0  ;;  %v1660_v55 = vpop.f32.mrf.mxu2 }
 0x21c   : > { %v2101_v50 = vmax.f32 %v2069_v27, 0.0  ;;  %v1740_v20 = vadd.f32 %v1660_v55, %v1593_v40  ;;  %v1807_v44 = vpop.f32.mrf.mxu3  ;;  %v1516_v32 = vpop.f32.mrf.mxu1 }
 0x21d   : > { %v1594_v6 = vadd.f32 %v1516_v32, %v10353_v30  ;;  %v10355_v32 = vld [vmem:[#allocation22_spill] sm:$0xff] }
 0x21e   : > { %5766 = vmatmul.msk.f32.gmra.mxu0 %vm514_vm0, %v7292_v48  ;;  %v7633_v21 = vrot.slane %v2101_v50, 7  ;;  %v1887_v43 = vadd.f32 %v1807_v44, %v1740_v20  ;;  %v10354_v50 = vld [vmem:[#allocation45_spill] sm:$0xff] }
 0x21f   : > { %5668 = vmatmul.msk.f32.gmra.mxu1 %vm514_vm0, %v7215_v33 }
 0x220   : > { %v7640_v60 = vsel %vm289_vm1, %v7631_v16, %v7633_v21  ;;  %v2034_v47 = vadd.f32 %v1954_v0, %v1887_v43  ;;  %5701 = vmatmul.msk.f32.gmra.mxu2 %vm514_vm0, %v10278_v10  ;;  %v1461_v0 = vrot.slane %v7232_v3, 2  ;;  %v1462_v10 = vrot.slane %v7229_v28, 2 }
 0x221   : > { %10351 = vst [vmem:[#allocation42_spill] sm:$0xff] %v7640_v60  ;;  %5732 = vmatmul.msk.f32.gmra.mxu3 %vm514_vm0, %v10352_v49 }
 0x222   : > { %v2070_v33 = vadd.f32 %v7528_v35, %v2034_v47  ;;  %v7661_v49 = vsel %vm865_vm3, %v1461_v0, %v1462_v10  ;;  %v10357_v0 = vld [vmem:[#allocation48_spill] sm:$0xff] }
 0x223   : > { %v1963_v1 = vpop.f32.mrf.mxu0  ;;  %v1663_v63 = vpop.f32.mrf.mxu2 }
 0x224   : > { %v1741_v13 = vadd.f32 %v1663_v63, %v1594_v6  ;;  %v1810_v27 = vpop.f32.mrf.mxu3  ;;  %v1519_v45 = vpop.f32.mrf.mxu1  ;;  %v2102_v20 = vmax.f32 %v2070_v33, 0.0  ;;  %v1464_v33 = vrot.slane %v7261_v26, 2 }
 0x225   : > { %v1595_v43 = vadd.f32 %v1519_v45, %v10355_v32 }
 0x226   : > { %5767 = vmatmul.msk.f32.gmra.mxu0 %vm514_vm0, %v7307_v2  ;;  %v1888_v40 = vadd.f32 %v1810_v27, %v1741_v13  ;;  %v7683_v26 = vsel %vm865_vm3, %v1462_v10, %v1464_v33 }
 0x227   : > { %5669 = vmatmul.msk.f32.gmra.mxu1 %vm514_vm0, %v10343_v19 }
 0x228   : > { %v2035_v55 = vadd.f32 %v1957_v59, %v1888_v40  ;;  %5702 = vmatmul.msk.f32.gmra.mxu2 %vm514_vm0, %v6720_v53  ;;  %v7665_v53 = vrot.slane %v2102_v20, 7 }
 0x229   : > { %5733 = vmatmul.msk.f32.gmra.mxu3 %vm514_vm0, %v10354_v50 }
 0x22a   : > { %v2071_v44 = vadd.f32 %v7528_v35, %v2035_v55  ;;  %v10358_v55 = vld [vmem:[#allocation77_spill] sm:$0xff] }
 0x22b   : > { %v1966_v47 = vpop.f32.mrf.mxu0  ;;  %v1666_v30 = vpop.f32.mrf.mxu2 }
 0x22c   : > { %v2103_v6 = vmax.f32 %v2071_v44, 0.0  ;;  %v1742_v63 = vadd.f32 %v1666_v30, %v1595_v43  ;;  %v1813_v19 = vpop.f32.mrf.mxu3  ;;  %v1522_v59 = vpop.f32.mrf.mxu1 }
 0x22d   : > { %v1596_v50 = vadd.f32 %v1522_v59, %v10358_v55 }
 0x22e   : > { %5768 = vmatmul.msk.f32.gmra.mxu0 %vm514_vm0, %v7661_v49  ;;  %v7667_v13 = vrot.slane %v2103_v6, 7  ;;  %v1889_v27 = vadd.f32 %v1813_v19, %v1742_v63  ;;  %v10359_v63 = vld [vmem:[#allocation34_spill] sm:$0xff] }
 0x22f   : > { %5670 = vmatmul.msk.f32.gmra.mxu1 %vm514_vm0, %v7266_v17 }
 0x230   : > { %v7675_v45 = vsel %vm289_vm1, %v7665_v53, %v7667_v13  ;;  %v2036_v40 = vadd.f32 %v1960_v39, %v1889_v27  ;;  %5703 = vmatmul.msk.f32.gmra.mxu2 %vm514_vm0, %v6717_v11 }
 0x231   : > { %10356 = vst [vmem:[#allocation56_spill] sm:$0xff] %v7675_v45  ;;  %5734 = vmatmul.msk.f32.gmra.mxu3 %vm514_vm0, %v10357_v0 }
 0x232   : > { %v2072_v39 = vadd.f32 %v7528_v35, %v2036_v40 }
 0x233   : > { %v1969_v20 = vpop.f32.mrf.mxu0  ;;  %v1669_v44 = vpop.f32.mrf.mxu2 }
 0x234   : > { %v1743_v17 = vadd.f32 %v1669_v44, %v1596_v50  ;;  %v1816_v32 = vpop.f32.mrf.mxu3  ;;  %v1525_v43 = vpop.f32.mrf.mxu1  ;;  %v2104_v10 = vmax.f32 %v2072_v39, 0.0  ;;  %v10360_v50 = vld [vmem:[#allocation49_spill] sm:$0xff]  ;;  %v5975_v39 = vld [vmem:[%s9964_s3 + $0xc8] sm:$0xff] }
 0x235   : > { %v1597_v19 = vadd.f32 %v1525_v43, %v10359_v63  ;;  %3506 = vmatpush.msra.mxu3 %v5975_v39  ;;  %v10362_v63 = vmov 0.0  }
 0x236   : > { %5769 = vmatmul.msk.f32.gmra.mxu0 %vm514_vm0, %v7683_v26  ;;  %v1890_v30 = vadd.f32 %v1816_v32, %v1743_v17 }
 0x237   : > { %5671 = vmatmul.msk.f32.gmra.mxu1 %vm514_vm0, %v7292_v48  ;;  %v7698_v48 = vrot.slane %v2104_v10, 7  ;;  %v6009_v10 = vld [vmem:[%s9964_s3 + $0xe8] sm:$0xff] }
 0x238   : > { %v2037_v11 = vadd.f32 %v1963_v1, %v1890_v30  ;;  %5704 = vmatmul.msk.f32.gmra.mxu2 %vm514_vm0, %v7232_v3  ;;  %3654 = vmatpush.msra.mxu0 %v6009_v10 }
 0x239   : > { %5735 = vmatmul.msk.f32.gmra.mxu3 %vm514_vm0, %v7258_v46 }
 0x23a   : > { %v2073_v6 = vadd.f32 %v7528_v35, %v2037_v11 }
 0x23b   : > { %v1972_v59 = vpop.f32.mrf.mxu0  ;;  %v1672_v27 = vpop.f32.mrf.mxu2 }
 0x23c   : > { %v2105_v33 = vmax.f32 %v2073_v6, 0.0  ;;  %v1744_v40 = vadd.f32 %v1672_v27, %v1597_v19  ;;  %v1819_v0 = vpop.f32.mrf.mxu3  ;;  %v1528_v55 = vpop.f32.mrf.mxu1  ;;  %v10363_v19 = vld [vmem:[#allocation2_spill] sm:$0xff] }
 0x23d   : > { %v1598_v17 = vadd.f32 %v1528_v55, %v7298_v42  ;;  %v5909_v42 = vld [vmem:[%s9964_s3 + $0x68] sm:$0xff] }
 0x23e   : > { %5770 = vmatmul.msk.f32.gmra.mxu0 %vm514_vm0, %v10360_v50  ;;  %v7700_v3 = vrot.slane %v2105_v33, 7  ;;  %v1891_v1 = vadd.f32 %v1819_v0, %v1744_v40  ;;  %3211 = vmatpush.msra.mxu1 %v5909_v42 }
 0x23f   : > { %5672 = vmatmul.msk.f32.gmra.mxu1 %vm514_vm0, %v7307_v2  ;;  %v5907_v2 = vld [vmem:[%s9964_s3 + $0x48] sm:$0xff] }
 0x240   : > { %v7707_v46 = vsel %vm289_vm1, %v7698_v48, %v7700_v3  ;;  %v2038_v44 = vadd.f32 %v1966_v47, %v1891_v1  ;;  %5705 = vmatmul.msk.f32.gmra.mxu2 %vm514_vm0, %v7229_v28 }
 0x241   : > { %10361 = vst [vmem:[#allocation51_spill] sm:$0xff] %v7707_v46  ;;  %5736 = vmatmul.msk.f32.gmra.mxu3 %vm514_vm0, %v7287_v38  ;;  %3388 = vmatpush.msra.mxu2 %v5907_v2 }
 0x242   : > { %v2074_v28 = vadd.f32 %v7528_v35, %v2038_v44 }
 0x243   : > { %v1975_v32 = vpop.f32.mrf.mxu0  ;;  %v1675_v43 = vpop.f32.mrf.mxu2 }
 0x244   : > { %v1745_v30 = vadd.f32 %v1675_v43, %v1598_v17  ;;  %v1822_v47 = vpop.f32.mrf.mxu3  ;;  %v1531_v11 = vpop.f32.mrf.mxu1  ;;  %v2106_v27 = vmax.f32 %v2074_v28, 0.0 }
 0x245   : > { %v1599_v40 = vadd.f32 %v1531_v11, %v7313_v31  ;;  %v7754_v11 = vsel %vm289_vm1, 0.0, %v7544_v15  ;;  %v7767_v15 = vsel %vm289_vm1, %v7546_v52, 0.0 }
 0x246   : > { %5771 = vmatmul.msk.f32.gmra.mxu0 %vm514_vm0, %v10360_v50  ;;  %v1892_v38 = vadd.f32 %v1822_v47, %v1745_v30 }
 0x247   : > { %5673 = vmatmul.msk.f32.gmra.mxu1 %vm514_vm0, %v7661_v49  ;;  %v7737_v49 = vrot.slane %v2106_v27, 7 }
 0x248   : > { %v2039_v6 = vadd.f32 %v1969_v20, %v1892_v38  ;;  %1725 = vmatmul.f32.gmra.mxu2 %v10362_v63 }
 0x249   : > { %5737 = vmatmul.msk.f32.gmra.mxu3 %vm514_vm0, %v10363_v19 }
 0x24a   : > { %v2075_v33 = vadd.f32 %v7528_v35, %v2039_v6 }
 0x24b   : > { %v1978_v0 = vpop.f32.mrf.mxu0  ;;  %v1678_v55 = vpop.f32.mrf.mxu2 }
 0x24c   : > { %v2107_v1 = vmax.f32 %v2075_v33, 0.0  ;;  %v1746_v44 = vadd.f32 %v1678_v55, %v1599_v40  ;;  %v1825_v17 = vpop.f32.mrf.mxu3  ;;  %v1534_v43 = vpop.f32.mrf.mxu1 }
 0x24d   : > { %v1600_v30 = vadd.f32 %v1534_v43, %v7324_v5 }
 0x24e   : > { %2914 = vmatmul.f32.vlgmr.msrb.gmra.mxu0 %v10362_v63  ;;  %v7739_v20 = vrot.slane %v2107_v1, 7  ;;  %v1893_v2 = vadd.f32 %v1825_v17, %v1746_v44  ;;  %v2305_v17 = vrot.slane %v7767_v15, 1 }
 0x24f   : > { %5674 = vmatmul.msk.f32.gmra.mxu1 %vm514_vm0, %v7683_v26  ;;  %v2303_v26 = vrot.slane %v7553_v23, 1 }
 0x250   : > { %v7746_v31 = vsel %vm289_vm1, %v7737_v49, %v7739_v20  ;;  %v2040_v39 = vadd.f32 %v1972_v59, %v1893_v2  ;;  %1728 = vmatmul.f32.gmra.mxu2 %v10362_v63  ;;  %v2302_v59 = vrot.slane %v7754_v11, 1 }
 0x251   : > { %10364 = vst [vmem:[#allocation4_spill] sm:$0xff] %v7746_v31  ;;  %5738 = vmatmul.msk.f32.gmra.mxu3 %vm514_vm0, %v10363_v19 }
 0x252   : > { %v2076_v6 = vadd.f32 %v7528_v35, %v2040_v39  ;;  %v7763_v5 = vsel %vm434_vm2, %v2302_v59, %v2303_v26 }
 0x253   : > { %v1981_v47 = vpop.f32.mrf.mxu0  ;;  %v1681_v28 = vpop.f32.mrf.mxu2 }
 0x254   : > { %v1747_v38 = vadd.f32 %v1681_v28, %v1600_v30  ;;  %v1828_v42 = vpop.f32.mrf.mxu3  ;;  %v1537_v10 = vpop.f32.mrf.mxu1  ;;  %v2108_v40 = vmax.f32 %v2076_v6, 0.0 }
 0x255   : > { %v1601_v1 = vadd.f32 %v1537_v10, %v7335_v25  ;;  %v7785_v25 = vsel %vm434_vm2, %v2303_v26, %v2305_v17  ;;  %v2308_v26 = vrot.slane %v7582_v29, 1 }
 0x256   : > { %2917 = vmatmul.f32.gmra.mxu0 %v10362_v63  ;;  %v1894_v27 = vadd.f32 %v1828_v42, %v1747_v38  ;;  %10365 = vst [vmem:[#allocation8_spill] sm:$0xff] %v7785_v25 }
 0x257   : > { %5776 = vmatmul.msk.f32.vlgmr.msrb.gmra.mxu1 %vm2388_vm4, %v7754_v11 }
 0x258   : > { %v2041_v33 = vadd.f32 %v1975_v32, %v1894_v27  ;;  %5808 = vmatmul.msk.f32.vlgmr.msrb.gmra.mxu2 %vm2388_vm4, %v7763_v5  ;;  %v7778_v32 = vrot.slane %v2108_v40, 7  ;;  %v7799_v27 = vsel %vm289_vm1, 0.0, %v7573_v4  ;;  %v7813_v4 = vsel %vm289_vm1, %v7575_v36, 0.0 }
 0x259   : > { %5842 = vmatmul.msk.f32.vlgmr.msrb.gmra.mxu3 %vm2388_vm4, %v10363_v19  ;;  %10367 = vst [vmem:[#allocation53_spill] sm:$0xff] %v7813_v4 }
 0x25a   : > { %v2077_v55 = vadd.f32 %v7528_v35, %v2041_v33 }
 0x25b   : > { %v1984_v44 = vpop.f32.mrf.mxu0  ;;  %v1684_v43 = vpop.f32.mrf.mxu2 }
 0x25c   : > { %v2109_v2 = vmax.f32 %v2077_v55, 0.0  ;;  %v1748_v39 = vadd.f32 %v1684_v43, %v1601_v1  ;;  %v1831_v52 = vpop.f32.mrf.mxu3  ;;  %v1540_v30 = vpop.f32.mrf.mxu1 }
 0x25d   : > { %v1602_v59 = vadd.f32 %v1540_v30, %v7346_v24 }
 0x25e   : > { %5876 = vmatmul.msk.f32.gmra.mxu0 %vm2388_vm4, %v7754_v11  ;;  %v7780_v28 = vrot.slane %v2109_v2, 7  ;;  %v1895_v38 = vadd.f32 %v1831_v52, %v1748_v39 }
 0x25f   : > { %5777 = vmatmul.msk.f32.gmra.mxu1 %vm2388_vm4, %v7553_v23 }
 0x260   : > { %v7790_v42 = vsel %vm289_vm1, %v7778_v32, %v7780_v28  ;;  %v2042_v10 = vadd.f32 %v1978_v0, %v1895_v38  ;;  %5809 = vmatmul.msk.f32.gmra.mxu2 %vm2388_vm4, %v7785_v25  ;;  %v2307_v0 = vrot.slane %v7799_v27, 1 }
 0x261   : > { %10366 = vst [vmem:[#allocation59_spill] sm:$0xff] %v7790_v42  ;;  %5843 = vmatmul.msk.f32.gmra.mxu3 %vm2388_vm4, %v10363_v19 }
 0x262   : > { %v2078_v17 = vadd.f32 %v7528_v35, %v2042_v10  ;;  %v7809_v24 = vsel %vm434_vm2, %v2307_v0, %v2308_v26  ;;  %v2310_v10 = vrot.slane %v7813_v4, 1 }
 0x263   : > { %v1987_v6 = vpop.f32.mrf.mxu0  ;;  %v1687_v33 = vpop.f32.mrf.mxu2 }
 0x264   : > { %v1749_v40 = vadd.f32 %v1687_v33, %v1602_v59  ;;  %v1834_v55 = vpop.f32.mrf.mxu3  ;;  %v1543_v1 = vpop.f32.mrf.mxu1  ;;  %v2110_v39 = vmax.f32 %v2078_v17, 0.0 }
 0x265   : > { %v1603_v30 = vadd.f32 %v1543_v1, %v7357_v56 }
 0x266   : > { %5877 = vmatmul.msk.f32.gmra.mxu0 %vm2388_vm4, %v7553_v23  ;;  %v1896_v43 = vadd.f32 %v1834_v55, %v1749_v40 }
 0x267   : > { %5778 = vmatmul.msk.f32.gmra.mxu1 %vm2388_vm4, %v7799_v27 }
 0x268   : > { %v2043_v2 = vadd.f32 %v1981_v47, %v1896_v43  ;;  %5810 = vmatmul.msk.f32.gmra.mxu2 %vm2388_vm4, %v7809_v24  ;;  %v7824_v47 = vrot.slane %v2110_v39, 7  ;;  %v7829_v43 = vsel %vm434_vm2, %v2308_v26, %v2310_v10  ;;  %v7845_v26 = vsel %vm289_vm1, 0.0, %v7602_v61 }
 0x269   : > { %5844 = vmatmul.msk.f32.gmra.mxu3 %vm2388_vm4, %v7763_v5  ;;  %10368 = vst [vmem:[#allocation3_spill] sm:$0xff] %v7845_v26  ;;  %v7859_v61 = vsel %vm289_vm1, %v7604_v34, 0.0 }
 0x26a   : > { %v2079_v52 = vadd.f32 %v7528_v35, %v2043_v2  ;;  %10369 = vst [vmem:[#allocation12_spill] sm:$0xff] %v7859_v61 }
 0x26b   : > { %v1990_v38 = vpop.f32.mrf.mxu0  ;;  %v1690_v59 = vpop.f32.mrf.mxu2 }
 0x26c   : > { %v2111_v33 = vmax.f32 %v2079_v52, 0.0  ;;  %v1750_v40 = vadd.f32 %v1690_v59, %v1603_v30  ;;  %v1837_v36 = vpop.f32.mrf.mxu3  ;;  %v1546_v55 = vpop.f32.mrf.mxu1  ;;  %v2313_v52 = vrot.slane %v7611_v18, 1 }
 0x26d   : > { %v1604_v2 = vadd.f32 %v1546_v55, %v7368_v51 }
 0x26e   : > { %5878 = vmatmul.msk.f32.gmra.mxu0 %vm2388_vm4, %v7799_v27  ;;  %v7826_v0 = vrot.slane %v2111_v33, 7  ;;  %v1897_v17 = vadd.f32 %v1837_v36, %v1750_v40 }
 0x26f   : > { %5779 = vmatmul.msk.f32.gmra.mxu1 %vm2388_vm4, %v7582_v29 }
 0x270   : > { %v7836_v56 = vsel %vm289_vm1, %v7824_v47, %v7826_v0  ;;  %v2044_v1 = vadd.f32 %v1984_v44, %v1897_v17  ;;  %5811 = vmatmul.msk.f32.gmra.mxu2 %vm2388_vm4, %v7829_v43  ;;  %v2312_v44 = vrot.slane %v7845_v26, 1 }
 0x271   : > { %5845 = vmatmul.msk.f32.gmra.mxu3 %vm2388_vm4, %v7785_v25 }
 0x272   : > { %v2080_v40 = vadd.f32 %v7528_v35, %v2044_v1  ;;  %v7855_v51 = vsel %vm434_vm2, %v2312_v44, %v2313_v52 }
 0x273   : > { %v1993_v39 = vpop.f32.mrf.mxu0  ;;  %v1693_v30 = vpop.f32.mrf.mxu2 }
 0x274   : > { %v1751_v10 = vadd.f32 %v1693_v30, %v1604_v2  ;;  %v1840_v59 = vpop.f32.mrf.mxu3  ;;  %v1549_v33 = vpop.f32.mrf.mxu1  ;;  %v2112_v17 = vmax.f32 %v2080_v40, 0.0 }
 0x275   : > { %v1605_v2 = vadd.f32 %v1549_v33, %v7379_v57 }
 0x276   : > { %5879 = vmatmul.msk.f32.gmra.mxu0 %vm2388_vm4, %v7582_v29  ;;  %v1898_v36 = vadd.f32 %v1840_v59, %v1751_v10  ;;  %v2315_v10 = vrot.slane %v7859_v61, 1 }
 0x277   : > { %5780 = vmatmul.msk.f32.gmra.mxu1 %vm2388_vm4, %v7845_v26 }
 0x278   : > { %v2045_v55 = vadd.f32 %v1987_v6, %v1898_v36  ;;  %5812 = vmatmul.msk.f32.gmra.mxu2 %vm2388_vm4, %v7855_v51  ;;  %v7870_v6 = vrot.slane %v2112_v17, 7 }
 0x279   : > { %5846 = vmatmul.msk.f32.gmra.mxu3 %vm2388_vm4, %v7809_v24 }
 0x27a   : > { %v2081_v1 = vadd.f32 %v7528_v35, %v2045_v55  ;;  %v7875_v55 = vsel %vm434_vm2, %v2313_v52, %v2315_v10  ;;  %v7891_v52 = vsel %vm289_vm1, 0.0, %v7631_v16  ;;  %v7905_v16 = vsel %vm289_vm1, %v7633_v21, 0.0 }
 0x27b   : > { %v1996_v30 = vpop.f32.mrf.mxu0  ;;  %v1696_v59 = vpop.f32.mrf.mxu2  ;;  %10371 = vst [vmem:[#allocation55_spill] sm:$0xff] %v7891_v52 }
 0x27c   : > { %v2113_v44 = vmax.f32 %v2081_v1, 0.0  ;;  %v1752_v63 = vadd.f32 %v1696_v59, %v1605_v2  ;;  %v1843_v34 = vpop.f32.mrf.mxu3  ;;  %v1552_v4 = vpop.f32.mrf.mxu1  ;;  %v2318_v1 = vrot.slane %v7640_v60, 1  ;;  %10372 = vst [vmem:[#allocation15_spill] sm:$0xff] %v7905_v16 }
 0x27e   : > { %5880 = vmatmul.msk.f32.gmra.mxu0 %vm2388_vm4, %v7845_v26  ;;  %v7872_v36 = vrot.slane %v2113_v44, 7  ;;  %v1899_v40 = vadd.f32 %v1843_v34, %v1752_v63  ;;  %v1606_v63 = vadd.f32 %v1552_v4, %v7390_v62 }
 0x27f   : > { %5781 = vmatmul.msk.f32.gmra.mxu1 %vm2388_vm4, %v7611_v18 }
 0x280   : > { %v7882_v57 = vsel %vm289_vm1, %v7870_v6, %v7872_v36  ;;  %v2046_v33 = vadd.f32 %v1990_v38, %v1899_v40  ;;  %5813 = vmatmul.msk.f32.gmra.mxu2 %vm2388_vm4, %v7875_v55  ;;  %v2317_v38 = vrot.slane %v7891_v52, 1 }
 0x281   : > { %10370 = vst [vmem:[#allocation62_spill] sm:$0xff] %v7882_v57  ;;  %5847 = vmatmul.msk.f32.gmra.mxu3 %vm2388_vm4, %v7829_v43 }
 0x282   : > { %v2082_v34 = vadd.f32 %v7528_v35, %v2046_v33  ;;  %v7901_v62 = vsel %vm434_vm2, %v2317_v38, %v2318_v1 }
 0x283   : > { %v1999_v17 = vpop.f32.mrf.mxu0  ;;  %v1699_v2 = vpop.f32.mrf.mxu2 }
 0x284   : > { %v1753_v10 = vadd.f32 %v1699_v2, %v1606_v63  ;;  %v1846_v59 = vpop.f32.mrf.mxu3  ;;  %v1555_v44 = vpop.f32.mrf.mxu1  ;;  %v2114_v63 = vmax.f32 %v2082_v34, 0.0 }
 0x285   : > { %v1607_v2 = vadd.f32 %v1555_v44, %v7401_v41 }
 0x286   : > { %5881 = vmatmul.msk.f32.gmra.mxu0 %vm2388_vm4, %v7611_v18  ;;  %v1900_v40 = vadd.f32 %v1846_v59, %v1753_v10  ;;  %v2320_v59 = vrot.slane %v7905_v16, 1 }
 0x287   : > { %5782 = vmatmul.msk.f32.gmra.mxu1 %vm2388_vm4, %v7891_v52 }
 0x288   : > { %v2047_v4 = vadd.f32 %v1993_v39, %v1900_v40  ;;  %5814 = vmatmul.msk.f32.gmra.mxu2 %vm2388_vm4, %v7901_v62  ;;  %v7916_v39 = vrot.slane %v2114_v63, 7  ;;  %v2323_v63 = vrot.slane %v7675_v45, 1 }
 0x289   : > { %5848 = vmatmul.msk.f32.gmra.mxu3 %vm2388_vm4, %v7855_v51 }
 0x28a   : > { %v2083_v33 = vadd.f32 %v7528_v35, %v2047_v4  ;;  %v7921_v4 = vsel %vm434_vm2, %v2318_v1, %v2320_v59  ;;  %v7937_v1 = vsel %vm289_vm1, 0.0, %v7665_v53 }
 0x28b   : > { %v2002_v10 = vpop.f32.mrf.mxu0  ;;  %v1702_v38 = vpop.f32.mrf.mxu2  ;;  %10374 = vst [vmem:[#allocation65_spill] sm:$0xff] %v7937_v1 }
 0x28c   : > { %v2115_v61 = vmax.f32 %v2083_v33, 0.0  ;;  %v1754_v26 = vadd.f32 %v1702_v38, %v1607_v2  ;;  %v1849_v21 = vpop.f32.mrf.mxu3  ;;  %v1558_v18 = vpop.f32.mrf.mxu1 }
 0x28e   : > { %5882 = vmatmul.msk.f32.gmra.mxu0 %vm2388_vm4, %v7891_v52  ;;  %v7918_v40 = vrot.slane %v2115_v61, 7  ;;  %v1901_v34 = vadd.f32 %v1849_v21, %v1754_v26  ;;  %v1608_v26 = vadd.f32 %v1558_v18, %v7412_v14  ;;  %v7951_v18 = vsel %vm289_vm1, %v7667_v13, 0.0 }
 0x28f   : > { %5783 = vmatmul.msk.f32.gmra.mxu1 %vm2388_vm4, %v7640_v60  ;;  %10375 = vst [vmem:[#allocation58_spill] sm:$0xff] %v7951_v18 }
 0x290   : > { %v7928_v41 = vsel %vm289_vm1, %v7916_v39, %v7918_v40  ;;  %v2048_v44 = vadd.f32 %v1996_v30, %v1901_v34  ;;  %5815 = vmatmul.msk.f32.gmra.mxu2 %vm2388_vm4, %v7921_v4  ;;  %v2322_v30 = vrot.slane %v7937_v1, 1 }
 0x291   : > { %10373 = vst [vmem:[#allocation19_spill] sm:$0xff] %v7928_v41  ;;  %5849 = vmatmul.msk.f32.gmra.mxu3 %vm2388_vm4, %v7875_v55 }
 0x292   : > { %v2084_v21 = vadd.f32 %v7528_v35, %v2048_v44  ;;  %v7947_v14 = vsel %vm434_vm2, %v2322_v30, %v2323_v63 }
 0x293   : > { %v2005_v61 = vpop.f32.mrf.mxu0  ;;  %v1705_v33 = vpop.f32.mrf.mxu2 }
 0x294   : > { %v1755_v2 = vadd.f32 %v1705_v33, %v1608_v26  ;;  %v1852_v59 = vpop.f32.mrf.mxu3  ;;  %v1561_v38 = vpop.f32.mrf.mxu1  ;;  %v2116_v26 = vmax.f32 %v2084_v21, 0.0 }
 0x295   : > { %v1609_v33 = vadd.f32 %v1561_v38, %v7423_v7 }
 0x296   : > { %5883 = vmatmul.msk.f32.gmra.mxu0 %vm2388_vm4, %v7640_v60  ;;  %v1902_v34 = vadd.f32 %v1852_v59, %v1755_v2  ;;  %v2325_v59 = vrot.slane %v7951_v18, 1 }
 0x297   : > { %5784 = vmatmul.msk.f32.gmra.mxu1 %vm2388_vm4, %v7937_v1 }
 0x298   : > { %v2049_v53 = vadd.f32 %v1999_v17, %v1902_v34  ;;  %5816 = vmatmul.msk.f32.gmra.mxu2 %vm2388_vm4, %v7947_v14  ;;  %v7962_v17 = vrot.slane %v2116_v26, 7  ;;  %v2328_v26 = vrot.slane %v7707_v46, 1 }
 0x299   : > { %5850 = vmatmul.msk.f32.gmra.mxu3 %vm2388_vm4, %v7901_v62 }
 0x29a   : > { %v2085_v44 = vadd.f32 %v7528_v35, %v2049_v53  ;;  %v7967_v53 = vsel %vm434_vm2, %v2323_v63, %v2325_v59  ;;  %v7983_v63 = vsel %vm289_vm1, 0.0, %v7698_v48 }
 0x29b   : > { %v2008_v2 = vpop.f32.mrf.mxu0  ;;  %v1708_v30 = vpop.f32.mrf.mxu2  ;;  %10377 = vst [vmem:[#allocation23_spill] sm:$0xff] %v7983_v63 }
 0x29c   : > { %v2117_v16 = vmax.f32 %v2085_v44, 0.0  ;;  %v1756_v52 = vadd.f32 %v1708_v30, %v1609_v33  ;;  %v1855_v13 = vpop.f32.mrf.mxu3  ;;  %v1564_v60 = vpop.f32.mrf.mxu1 }
 0x29e   : > { %5884 = vmatmul.msk.f32.gmra.mxu0 %vm2388_vm4, %v7937_v1  ;;  %v7964_v34 = vrot.slane %v2117_v16, 7  ;;  %v1903_v21 = vadd.f32 %v1855_v13, %v1756_v52  ;;  %v1610_v52 = vadd.f32 %v1564_v60, %v7434_v54  ;;  %v7997_v60 = vsel %vm289_vm1, %v7700_v3, 0.0 }
 0x29f   : > { %5785 = vmatmul.msk.f32.gmra.mxu1 %vm2388_vm4, %v7675_v45  ;;  %10378 = vst [vmem:[#allocation68_spill] sm:$0xff] %v7997_v60 }
 0x2a0   : > { %v7974_v7 = vsel %vm289_vm1, %v7962_v17, %v7964_v34  ;;  %v2050_v38 = vadd.f32 %v2002_v10, %v1903_v21  ;;  %5817 = vmatmul.msk.f32.gmra.mxu2 %vm2388_vm4, %v7967_v53  ;;  %v2327_v10 = vrot.slane %v7983_v63, 1 }
 0x2a1   : > { %10376 = vst [vmem:[#allocation14_spill] sm:$0xff] %v7974_v7  ;;  %5851 = vmatmul.msk.f32.gmra.mxu3 %vm2388_vm4, %v7921_v4 }
 0x2a2   : > { %v2086_v13 = vadd.f32 %v7528_v35, %v2050_v38  ;;  %v7993_v54 = vsel %vm434_vm2, %v2327_v10, %v2328_v26 }
 0x2a3   : > { %v2011_v16 = vpop.f32.mrf.mxu0  ;;  %v1711_v44 = vpop.f32.mrf.mxu2 }
 0x2a4   : > { %v1757_v33 = vadd.f32 %v1711_v44, %v1610_v52  ;;  %v1858_v59 = vpop.f32.mrf.mxu3  ;;  %v1567_v30 = vpop.f32.mrf.mxu1  ;;  %v2118_v52 = vmax.f32 %v2086_v13, 0.0 }
 0x2a5   : > { %v1611_v44 = vadd.f32 %v1567_v30, %v7445_v22 }
 0x2a6   : > { %5885 = vmatmul.msk.f32.gmra.mxu0 %vm2388_vm4, %v7675_v45  ;;  %v1904_v21 = vadd.f32 %v1858_v59, %v1757_v33  ;;  %v2330_v59 = vrot.slane %v7997_v60, 1 }
 0x2a7   : > { %5786 = vmatmul.msk.f32.gmra.mxu1 %vm2388_vm4, %v7983_v63 }
 0x2a8   : > { %v2051_v48 = vadd.f32 %v2005_v61, %v1904_v21  ;;  %5818 = vmatmul.msk.f32.gmra.mxu2 %vm2388_vm4, %v7993_v54  ;;  %v8008_v61 = vrot.slane %v2118_v52, 7  ;;  %v2333_v52 = vrot.slane %v7746_v31, 1 }
 0x2a9   : > { %5852 = vmatmul.msk.f32.gmra.mxu3 %vm2388_vm4, %v7947_v14 }
 0x2aa   : > { %v2087_v38 = vadd.f32 %v7528_v35, %v2051_v48  ;;  %v8013_v48 = vsel %vm434_vm2, %v2328_v26, %v2330_v59  ;;  %v8029_v26 = vsel %vm289_vm1, 0.0, %v7737_v49 }
 0x2ab   : > { %v2014_v33 = vpop.f32.mrf.mxu0  ;;  %v1714_v10 = vpop.f32.mrf.mxu2  ;;  %10379 = vst [vmem:[#allocation61_spill] sm:$0xff] %v8013_v48 }
 0x2ac   : > { %v2119_v18 = vmax.f32 %v2087_v38, 0.0  ;;  %v1758_v1 = vadd.f32 %v1714_v10, %v1611_v44  ;;  %v1861_v3 = vpop.f32.mrf.mxu3  ;;  %v1570_v45 = vpop.f32.mrf.mxu1  ;;  %10381 = vst [vmem:[#allocation31_spill] sm:$0xff] %v8029_v26 }
 0x2ae   : > { %5886 = vmatmul.msk.f32.gmra.mxu0 %vm2388_vm4, %v7983_v63  ;;  %v8010_v21 = vrot.slane %v2119_v18, 7  ;;  %v1905_v13 = vadd.f32 %v1861_v3, %v1758_v1  ;;  %v1612_v1 = vadd.f32 %v1570_v45, %v7456_v37  ;;  %v8043_v45 = vsel %vm289_vm1, %v7739_v20, 0.0 }
 0x2af   : > { %5787 = vmatmul.msk.f32.gmra.mxu1 %vm2388_vm4, %v7707_v46  ;;  %10383 = vst [vmem:[#allocation64_spill] sm:$0xff] %v8043_v45 }
 0x2b0   : > { %v8020_v22 = vsel %vm289_vm1, %v8008_v61, %v8010_v21  ;;  %v2052_v30 = vadd.f32 %v2008_v2, %v1905_v13  ;;  %5819 = vmatmul.msk.f32.gmra.mxu2 %vm2388_vm4, %v8013_v48  ;;  %v2332_v2 = vrot.slane %v8029_v26, 1 }
 0x2b1   : > { %10380 = vst [vmem:[#allocation26_spill] sm:$0xff] %v8020_v22  ;;  %5853 = vmatmul.msk.f32.gmra.mxu3 %vm2388_vm4, %v7967_v53 }
 0x2b2   : > { %v2088_v3 = vadd.f32 %v7528_v35, %v2052_v30  ;;  %v8039_v37 = vsel %vm434_vm2, %v2332_v2, %v2333_v52 }
 0x2b3   : > { %v2017_v18 = vpop.f32.mrf.mxu0  ;;  %v1717_v38 = vpop.f32.mrf.mxu2  ;;  %10382 = vst [vmem:[#allocation50_spill] sm:$0xff] %v8039_v37 }
 0x2b4   : > { %v1759_v44 = vadd.f32 %v1717_v38, %v1612_v1  ;;  %v1864_v59 = vpop.f32.mrf.mxu3  ;;  %v1573_v10 = vpop.f32.mrf.mxu1  ;;  %v2120_v1 = vmax.f32 %v2088_v3, 0.0 }
 0x2b5   : > { %v1613_v38 = vadd.f32 %v1573_v10, %v7473_v12 }
 0x2b6   : > { %5887 = vmatmul.msk.f32.gmra.mxu0 %vm2388_vm4, %v7707_v46  ;;  %v1906_v13 = vadd.f32 %v1864_v59, %v1759_v44  ;;  %v2335_v59 = vrot.slane %v8043_v45, 1 }
 0x2b7   : > { %5788 = vmatmul.msk.f32.gmra.mxu1 %vm2388_vm4, %v8029_v26 }
 0x2b8   : > { %v2053_v49 = vadd.f32 %v2011_v16, %v1906_v13  ;;  %5820 = vmatmul.msk.f32.gmra.mxu2 %vm2388_vm4, %v8039_v37  ;;  %v8054_v16 = vrot.slane %v2120_v1, 7  ;;  %v5908_v1 = vld [vmem:[%s9964_s3 + $0x60] sm:$0xff] }
 0x2b9   : > { %5854 = vmatmul.msk.f32.gmra.mxu3 %vm2388_vm4, %v7993_v54  ;;  %3212 = vmatpush.msra.mxu1 %v5908_v1 }
 0x2ba   : > { %v2089_v30 = vadd.f32 %v7528_v35, %v2053_v49  ;;  %v8059_v35 = vsel %vm434_vm2, %v2333_v52, %v2335_v59 }
 0x2bb   : > { %v2020_v44 = vpop.f32.mrf.mxu0  ;;  %v1720_v2 = vpop.f32.mrf.mxu2 }
 0x2bc   : > { %v2121_v60 = vmax.f32 %v2089_v30, 0.0  ;;  %v1760_v63 = vadd.f32 %v1720_v2, %v1613_v38  ;;  %v1867_v20 = vpop.f32.mrf.mxu3  ;;  %v1576_v46 = vpop.f32.mrf.mxu1  ;;  %v6008_v30 = vld [vmem:[%s9964_s3 + $0xe0] sm:$0xff]  ;;  %v2338_v38 = vrot.slane %v7790_v42, 1 }
 0x2bd   : > { %v1614_v52 = vadd.f32 %v1576_v46, %v7490_v58  ;;  %3655 = vmatpush.msra.mxu0 %v6008_v30 }
 0x2be   : > { %5888 = vmatmul.msk.f32.gmra.mxu0 %vm2388_vm4, %v8029_v26  ;;  %v8056_v13 = vrot.slane %v2121_v60, 7  ;;  %v1907_v3 = vadd.f32 %v1867_v20, %v1760_v63  ;;  %v5906_v63 = vld [vmem:[%s9964_s3 + $0x40] sm:$0xff] }
 0x2bf   : > { %5789 = vmatmul.msk.f32.gmra.mxu1 %vm2388_vm4, %v7746_v31  ;;  %v5974_v60 = vld [vmem:[%s9964_s3 + $0xc0] sm:$0xff]  ;;  %3389 = vmatpush.msra.mxu2 %v5906_v63 }
 0x2c0   : > { %v8066_v12 = vsel %vm289_vm1, %v8054_v16, %v8056_v13  ;;  %v2054_v10 = vadd.f32 %v2014_v33, %v1907_v3  ;;  %5821 = vmatmul.msk.f32.gmra.mxu2 %vm2388_vm4, %v8059_v35  ;;  %v8081_v33 = vsel %vm289_vm1, 0.0, %v7778_v32  ;;  %3507 = vmatpush.msra.mxu3 %v5974_v60  ;;  %v6329_v20 = vld [vmem:[%s9963_s2] ss:$0 sm:$0xff] }
 0x2c1   : > { %10384 = vst [vmem:[#allocation25_spill] sm:$0xff] %v8066_v12  ;;  %5855 = vmatmul.msk.f32.gmra.mxu3 %vm2388_vm4, %v8013_v48  ;;  %v2337_v32 = vrot.slane %v8081_v33, 1 }
 0x2c2   : > { %10385 = vst [vmem:[#allocation35_spill] sm:$0xff] %v8081_v33  ;;  %v2090_v3 = vadd.f32 %v6329_v20, %v2054_v10 }
 0x2c3   : > { %v2023_v49 = vpop.f32.mrf.mxu0  ;;  %v1723_v59 = vpop.f32.mrf.mxu2  ;;  %v8099_v60 = vsel %vm434_vm2, %v2337_v32, %v2338_v38 }
 0x2c4   : > { %v1761_v58 = vadd.f32 %v1723_v59, %v1614_v52  ;;  %v1870_v46 = vpop.f32.mrf.mxu3  ;;  %v1579_v2 = vpop.f32.mrf.mxu1  ;;  %10386 = vst [vmem:[#allocation52_spill] sm:$0xff] %v8099_v60  ;;  %v8103_v52 = vsel %vm289_vm1, %v7780_v28, 0.0  ;;  %v2122_v30 = vmax.f32 %v2090_v3, 0.0 }
 0x2c5   : > { %10387 = vst [vmem:[#allocation67_spill] sm:$0xff] %v8103_v52  ;;  %v1615_v59 = vadd.f32 %v1579_v2, %v7501_v9 }
 0x2c6   : > { %5889 = vmatmul.msk.f32.gmra.mxu0 %vm2388_vm4, %v7746_v31  ;;  %v1908_v63 = vadd.f32 %v1870_v46, %v1761_v58  ;;  %v2340_v46 = vrot.slane %v8103_v52, 1 }
 0x2c7   : > { %5790 = vmatmul.msk.f32.gmra.mxu1 %vm2388_vm4, %v8081_v33 }
 0x2c8   : > { %v2055_v1 = vadd.f32 %v2017_v18, %v1908_v63  ;;  %5822 = vmatmul.msk.f32.gmra.mxu2 %vm2388_vm4, %v8099_v60  ;;  %v8113_v18 = vrot.slane %v2122_v30, 7  ;;  %v8118_v3 = vsel %vm434_vm2, %v2338_v38, %v2340_v46  ;;  %v2343_v38 = vrot.slane %v7836_v56, 1 }
 0x2c9   : > { %5856 = vmatmul.msk.f32.gmra.mxu3 %vm2388_vm4, %v8039_v37 }
 0x2ca   : > { %v2091_v10 = vadd.f32 %v6329_v20, %v2055_v1 }
 0x2cb   : > { %v2915_v58 = vpop.f32.mrf.mxu0  ;;  %v1726_v32 = vpop.f32.mrf.mxu2 }
 0x2cc   : > { %v2123_v45 = vmax.f32 %v2091_v10, 0.0  ;;  %v1762_v26 = vadd.f32 %v1726_v32, %v1615_v59  ;;  %v1873_v31 = vpop.f32.mrf.mxu3  ;;  %v1582_v28 = vpop.f32.mrf.mxu1 }
 0x2ce   : > { %5890 = vmatmul.msk.f32.gmra.mxu0 %vm2388_vm4, %v8081_v33  ;;  %v8115_v63 = vrot.slane %v2123_v45, 7  ;;  %v1909_v37 = vadd.f32 %v1873_v31, %v1762_v26  ;;  %v1616_v31 = vadd.f32 %v1582_v28, %v7512_v8  ;;  %v8134_v45 = vsel %vm289_vm1, 0.0, %v7824_v47 }
 0x2cf   : > { %5791 = vmatmul.msk.f32.gmra.mxu1 %vm2388_vm4, %v7790_v42  ;;  %v8147_v47 = vsel %vm289_vm1, %v7826_v0, 0.0 }
 0x2d0   : > { %v8125_v9 = vsel %vm289_vm1, %v8113_v18, %v8115_v63  ;;  %v2056_v2 = vadd.f32 %v2020_v44, %v1909_v37  ;;  %5823 = vmatmul.msk.f32.gmra.mxu2 %vm2388_vm4, %v8118_v3  ;;  %v2342_v37 = vrot.slane %v8134_v45, 1 }
 0x2d1   : > { %5857 = vmatmul.msk.f32.gmra.mxu3 %vm2388_vm4, %v8059_v35 }
 0x2d2   : > { %v2092_v44 = vadd.f32 %v6329_v20, %v2056_v2  ;;  %v8143_v8 = vsel %vm434_vm2, %v2342_v37, %v2343_v38 }
 0x2d3   : > { %v2918_v26 = vpop.f32.mrf.mxu0  ;;  %v1729_v1 = vpop.f32.mrf.mxu2 }
 0x2d4   : > { %v1763_v30 = vadd.f32 %v1729_v1, %v1616_v31  ;;  %v1876_v10 = vpop.f32.mrf.mxu3  ;;  %v2470_v59 = vpop.f32.mrf.mxu1  ;;  %v2124_v28 = vmax.f32 %v2092_v44, 0.0  ;;  %v2345_v1 = vrot.slane %v8147_v47, 1  ;;  %v2348_v44 = vrot.slane %v7882_v57, 1 }
 0x2d6   : > { %5891 = vmatmul.msk.f32.gmra.mxu0 %vm2388_vm4, %v7790_v42  ;;  %v1910_v46 = vadd.f32 %v1876_v10, %v1763_v30  ;;  %v8156_v0 = vrot.slane %v2124_v28, 7 }
 0x2d7   : > { %5792 = vmatmul.msk.f32.gmra.mxu1 %vm2388_vm4, %v8134_v45 }
 0x2d8   : > { %v2057_v32 = vadd.f32 %v2023_v49, %v1910_v46  ;;  %5824 = vmatmul.msk.f32.gmra.mxu2 %vm2388_vm4, %v8143_v8 }
 0x2d9   : > { %5858 = vmatmul.msk.f32.gmra.mxu3 %vm2388_vm4, %v8099_v60  ;;  %v8161_v60 = vsel %vm434_vm2, %v2343_v38, %v2345_v1  ;;  %v8178_v38 = vsel %vm289_vm1, 0.0, %v7870_v6  ;;  %v8191_v6 = vsel %vm289_vm1, %v7872_v36, 0.0 }
 0x2da   : > { %v2093_v2 = vadd.f32 %v6329_v20, %v2057_v32  ;;  %10389 = vst [vmem:[#allocation43_spill] sm:$0xff] %v8178_v38 }
 0x2db   : > { %v2921_v31 = vpop.f32.mrf.mxu0  ;;  %v2647_v30 = vpop.f32.mrf.mxu2  ;;  %10390 = vst [vmem:[#allocation54_spill] sm:$0xff] %v8191_v6 }
 0x2dc   : > { %v2125_v10 = vmax.f32 %v2093_v2, 0.0  ;;  %v2648_v37 = vadd.f32 %v2647_v30, %v2470_v59  ;;  %v2765_v52 = vpop.f32.mrf.mxu3  ;;  %v2473_v33 = vpop.f32.mrf.mxu1 }
 0x2de   : > { %5892 = vmatmul.msk.f32.gmra.mxu0 %vm2388_vm4, %v8134_v45  ;;  %v8158_v49 = vrot.slane %v2125_v10, 7  ;;  %v2861_v46 = vadd.f32 %v2765_v52, %v2648_v37 }
 0x2df   : > { %5793 = vmatmul.msk.f32.gmra.mxu1 %vm2388_vm4, %v7836_v56 }
 0x2e0   : > { %v8168_v20 = vsel %vm289_vm1, %v8156_v0, %v8158_v49  ;;  %v8170_v59 = vadd.f32 %v2915_v58, %v2861_v46  ;;  %5825 = vmatmul.msk.f32.gmra.mxu2 %vm2388_vm4, %v8161_v60  ;;  %v2347_v58 = vrot.slane %v8178_v38, 1  ;;  %v2350_v46 = vrot.slane %v8191_v6, 1 }
 0x2e1   : > { %5859 = vmatmul.msk.f32.gmra.mxu3 %vm2388_vm4, %v8118_v3 }
 0x2e2   : > { %10388 = vst [vmem:[#allocation38_spill] sm:$0xff] %v8170_v59  ;;  %v8187_v10 = vsel %vm434_vm2, %v2347_v58, %v2348_v44 }
 0x2e3   : > { %v2924_v52 = vpop.f32.mrf.mxu0  ;;  %v2650_v32 = vpop.f32.mrf.mxu2 }
 0x2e4   : > { %v2651_v28 = vadd.f32 %v2650_v32, %v2473_v33  ;;  %v2768_v2 = vpop.f32.mrf.mxu3  ;;  %v2476_v1 = vpop.f32.mrf.mxu1 }
 0x2e6   : > { %5893 = vmatmul.msk.f32.gmra.mxu0 %vm2388_vm4, %v7836_v56  ;;  %v2862_v30 = vadd.f32 %v2768_v2, %v2651_v28 }
 0x2e7   : > { %5794 = vmatmul.msk.f32.gmra.mxu1 %vm2388_vm4, %v8178_v38 }
 0x2e8   : > { %v8193_v37 = vadd.f32 %v2918_v26, %v2862_v30  ;;  %5826 = vmatmul.msk.f32.gmra.mxu2 %vm2388_vm4, %v8187_v10  ;;  %v8203_v26 = vsel %vm434_vm2, %v2348_v44, %v2350_v46 }
 0x2e9   : > { %5860 = vmatmul.msk.f32.gmra.mxu3 %vm2388_vm4, %v8143_v8 }
 0x2ea   : > { %10391 = vst [vmem:[#allocation37_spill] sm:$0xff] %v8193_v37 }
 0x2eb   : > { %v2927_v33 = vpop.f32.mrf.mxu0  ;;  %v2653_v32 = vpop.f32.mrf.mxu2 }
 0x2ec   : > { %v2654_v28 = vadd.f32 %v2653_v32, %v2476_v1  ;;  %v2771_v2 = vpop.f32.mrf.mxu3  ;;  %v2479_v58 = vpop.f32.mrf.mxu1  ;;  %v8215_v32 = vsel %vm289_vm1, 0.0, %v7916_v39  ;;  %v8228_v39 = vsel %vm289_vm1, %v7918_v40, 0.0 }
 0x2ed   : > { %10393 = vst [vmem:[#allocation57_spill] sm:$0xff] %v8215_v32 }
 0x2ee   : > { %5894 = vmatmul.msk.f32.gmra.mxu0 %vm2388_vm4, %v8178_v38  ;;  %v2863_v36 = vadd.f32 %v2771_v2, %v2654_v28  ;;  %v2353_v28 = vrot.slane %v7928_v41, 1  ;;  %10394 = vst [vmem:[#allocation5_spill] sm:$0xff] %v8228_v39 }
 0x2ef   : > { %5795 = vmatmul.msk.f32.gmra.mxu1 %vm2388_vm4, %v7882_v57 }
 0x2f0   : > { %v8207_v30 = vadd.f32 %v2921_v31, %v2863_v36  ;;  %5827 = vmatmul.msk.f32.gmra.mxu2 %vm2388_vm4, %v8203_v26  ;;  %v2352_v31 = vrot.slane %v8215_v32, 1 }
 0x2f1   : > { %5861 = vmatmul.msk.f32.gmra.mxu3 %vm2388_vm4, %v8161_v60 }
 0x2f2   : > { %10392 = vst [vmem:[#allocation46_spill] sm:$0xff] %v8207_v30  ;;  %v8224_v30 = vsel %vm434_vm2, %v2352_v31, %v2353_v28 }
 0x2f3   : > { %v2930_v1 = vpop.f32.mrf.mxu0  ;;  %v2656_v44 = vpop.f32.mrf.mxu2 }
 0x2f4   : > { %v2657_v46 = vadd.f32 %v2656_v44, %v2479_v58  ;;  %v2774_v2 = vpop.f32.mrf.mxu3  ;;  %v2482_v37 = vpop.f32.mrf.mxu1  ;;  %v2355_v44 = vrot.slane %v8228_v39, 1 }
 0x2f6   : > { %5895 = vmatmul.msk.f32.gmra.mxu0 %vm2388_vm4, %v7882_v57  ;;  %v2864_v36 = vadd.f32 %v2774_v2, %v2657_v46 }
 0x2f7   : > { %5796 = vmatmul.msk.f32.gmra.mxu1 %vm2388_vm4, %v8215_v32 }
 0x2f8   : > { %v8230_v59 = vadd.f32 %v2924_v52, %v2864_v36  ;;  %5828 = vmatmul.msk.f32.gmra.mxu2 %vm2388_vm4, %v8224_v30  ;;  %v8240_v52 = vsel %vm434_vm2, %v2353_v28, %v2355_v44 }
 0x2f9   : > { %5862 = vmatmul.msk.f32.gmra.mxu3 %vm2388_vm4, %v8187_v10 }
 0x2fa   : > { %10395 = vst [vmem:[#allocation9_spill] sm:$0xff] %v8230_v59 }
 0x2fb   : > { %v2933_v58 = vpop.f32.mrf.mxu0  ;;  %v2659_v46 = vpop.f32.mrf.mxu2 }
 0x2fc   : > { %v2660_v2 = vadd.f32 %v2659_v46, %v2482_v37  ;;  %v2777_v6 = vpop.f32.mrf.mxu3  ;;  %v2485_v31 = vpop.f32.mrf.mxu1  ;;  %v8252_v46 = vsel %vm289_vm1, 0.0, %v7962_v17  ;;  %v8265_v17 = vsel %vm289_vm1, %v7964_v34, 0.0 }
 0x2fd   : > { %10397 = vst [vmem:[#allocation13_spill] sm:$0xff] %v8252_v46 }
 0x2fe   : > { %5896 = vmatmul.msk.f32.gmra.mxu0 %vm2388_vm4, %v8215_v32  ;;  %v2865_v40 = vadd.f32 %v2777_v6, %v2660_v2  ;;  %v2358_v6 = vrot.slane %v7974_v7, 1  ;;  %10398 = vst [vmem:[#allocation63_spill] sm:$0xff] %v8265_v17 }
 0x2ff   : > { %5797 = vmatmul.msk.f32.gmra.mxu1 %vm2388_vm4, %v7928_v41 }
 0x300   : > { %v8244_v36 = vadd.f32 %v2927_v33, %v2865_v40  ;;  %5829 = vmatmul.msk.f32.gmra.mxu2 %vm2388_vm4, %v8240_v52  ;;  %v2357_v33 = vrot.slane %v8252_v46, 1 }
 0x301   : > { %5863 = vmatmul.msk.f32.gmra.mxu3 %vm2388_vm4, %v8203_v26 }
 0x302   : > { %10396 = vst [vmem:[#allocation60_spill] sm:$0xff] %v8244_v36  ;;  %v8261_v36 = vsel %vm434_vm2, %v2357_v33, %v2358_v6 }
 0x303   : > { %v2936_v37 = vpop.f32.mrf.mxu0  ;;  %v2662_v28 = vpop.f32.mrf.mxu2 }
 0x304   : > { %v2663_v44 = vadd.f32 %v2662_v28, %v2485_v31  ;;  %v2780_v2 = vpop.f32.mrf.mxu3  ;;  %v2488_v59 = vpop.f32.mrf.mxu1  ;;  %v2360_v28 = vrot.slane %v8265_v17, 1 }
 0x306   : > { %5897 = vmatmul.msk.f32.gmra.mxu0 %vm2388_vm4, %v7928_v41  ;;  %v2866_v40 = vadd.f32 %v2780_v2, %v2663_v44 }
 0x307   : > { %5798 = vmatmul.msk.f32.gmra.mxu1 %vm2388_vm4, %v8252_v46 }
 0x308   : > { %v8267_v39 = vadd.f32 %v2930_v1, %v2866_v40  ;;  %5830 = vmatmul.msk.f32.gmra.mxu2 %vm2388_vm4, %v8261_v36  ;;  %v8277_v1 = vsel %vm434_vm2, %v2358_v6, %v2360_v28 }
 0x309   : > { %5864 = vmatmul.msk.f32.gmra.mxu3 %vm2388_vm4, %v8224_v30 }
 0x30a   : > { %10399 = vst [vmem:[#allocation20_spill] sm:$0xff] %v8267_v39 }
 0x30b   : > { %v2939_v31 = vpop.f32.mrf.mxu0  ;;  %v2665_v44 = vpop.f32.mrf.mxu2 }
 0x30c   : > { %v2666_v2 = vadd.f32 %v2665_v44, %v2488_v59  ;;  %v2783_v32 = vpop.f32.mrf.mxu3  ;;  %v2491_v33 = vpop.f32.mrf.mxu1  ;;  %v8289_v44 = vsel %vm289_vm1, 0.0, %v8008_v61  ;;  %v8302_v61 = vsel %vm289_vm1, %v8010_v21, 0.0 }
 0x30d   : > { %10401 = vst [vmem:[#allocation24_spill] sm:$0xff] %v8289_v44 }
 0x30e   : > { %5898 = vmatmul.msk.f32.gmra.mxu0 %vm2388_vm4, %v8252_v46  ;;  %v2867_v34 = vadd.f32 %v2783_v32, %v2666_v2  ;;  %v2363_v32 = vrot.slane %v8020_v22, 1  ;;  %10402 = vst [vmem:[#allocation69_spill] sm:$0xff] %v8302_v61 }
 0x30f   : > { %5799 = vmatmul.msk.f32.gmra.mxu1 %vm2388_vm4, %v7974_v7 }
 0x310   : > { %v8281_v40 = vadd.f32 %v2933_v58, %v2867_v34  ;;  %5831 = vmatmul.msk.f32.gmra.mxu2 %vm2388_vm4, %v8277_v1  ;;  %v2362_v58 = vrot.slane %v8289_v44, 1 }
 0x311   : > { %5865 = vmatmul.msk.f32.gmra.mxu3 %vm2388_vm4, %v8240_v52 }
 0x312   : > { %10400 = vst [vmem:[#allocation66_spill] sm:$0xff] %v8281_v40  ;;  %v8298_v40 = vsel %vm434_vm2, %v2362_v58, %v2363_v32 }
 0x313   : > { %v2942_v59 = vpop.f32.mrf.mxu0  ;;  %v2668_v6 = vpop.f32.mrf.mxu2 }
 0x314   : > { %v2669_v28 = vadd.f32 %v2668_v6, %v2491_v33  ;;  %v2786_v2 = vpop.f32.mrf.mxu3  ;;  %v2494_v39 = vpop.f32.mrf.mxu1  ;;  %v2365_v6 = vrot.slane %v8302_v61, 1 }
 0x316   : > { %5899 = vmatmul.msk.f32.gmra.mxu0 %vm2388_vm4, %v7974_v7  ;;  %v2868_v34 = vadd.f32 %v2786_v2, %v2669_v28 }
 0x317   : > { %5800 = vmatmul.msk.f32.gmra.mxu1 %vm2388_vm4, %v8289_v44 }
 0x318   : > { %v8304_v17 = vadd.f32 %v2936_v37, %v2868_v34  ;;  %5832 = vmatmul.msk.f32.gmra.mxu2 %vm2388_vm4, %v8298_v40  ;;  %v8314_v37 = vsel %vm434_vm2, %v2363_v32, %v2365_v6 }
 0x319   : > { %5866 = vmatmul.msk.f32.gmra.mxu3 %vm2388_vm4, %v8261_v36 }
 0x31a   : > { %10403 = vst [vmem:[#allocation70_spill] sm:$0xff] %v8304_v17 }
 0x31b   : > { %v2945_v33 = vpop.f32.mrf.mxu0  ;;  %v2671_v28 = vpop.f32.mrf.mxu2 }
 0x31c   : > { %v2672_v2 = vadd.f32 %v2671_v28, %v2494_v39  ;;  %v2789_v46 = vpop.f32.mrf.mxu3  ;;  %v2497_v58 = vpop.f32.mrf.mxu1  ;;  %v8326_v28 = vsel %vm289_vm1, 0.0, %v8054_v16  ;;  %v8339_v16 = vsel %vm289_vm1, %v8056_v13, 0.0 }
 0x31d   : > { %10405 = vst [vmem:[#allocation41_spill] sm:$0xff] %v8326_v28 }
 0x31e   : > { %5900 = vmatmul.msk.f32.gmra.mxu0 %vm2388_vm4, %v8289_v44  ;;  %v2869_v21 = vadd.f32 %v2789_v46, %v2672_v2  ;;  %v2368_v46 = vrot.slane %v8066_v12, 1  ;;  %10407 = vst [vmem:[#allocation71_spill] sm:$0xff] %v8339_v16 }
 0x31f   : > { %5801 = vmatmul.msk.f32.gmra.mxu1 %vm2388_vm4, %v8020_v22 }
 0x320   : > { %v8318_v34 = vadd.f32 %v2939_v31, %v2869_v21  ;;  %5833 = vmatmul.msk.f32.gmra.mxu2 %vm2388_vm4, %v8314_v37  ;;  %v2367_v31 = vrot.slane %v8326_v28, 1 }
 0x321   : > { %5867 = vmatmul.msk.f32.gmra.mxu3 %vm2388_vm4, %v8277_v1 }
 0x322   : > { %10404 = vst [vmem:[#allocation36_spill] sm:$0xff] %v8318_v34  ;;  %v8335_v34 = vsel %vm434_vm2, %v2367_v31, %v2368_v46 }
 0x323   : > { %v2948_v39 = vpop.f32.mrf.mxu0  ;;  %v2674_v32 = vpop.f32.mrf.mxu2  ;;  %10406 = vst [vmem:[#allocation44_spill] sm:$0xff] %v8335_v34 }
 0x324   : > { %v2675_v6 = vadd.f32 %v2674_v32, %v2497_v58  ;;  %v2792_v2 = vpop.f32.mrf.mxu3  ;;  %v2500_v17 = vpop.f32.mrf.mxu1  ;;  %v2370_v32 = vrot.slane %v8339_v16, 1 }
 0x326   : > { %5901 = vmatmul.msk.f32.gmra.mxu0 %vm2388_vm4, %v8020_v22  ;;  %v2870_v21 = vadd.f32 %v2792_v2, %v2675_v6 }
 0x327   : > { %5802 = vmatmul.msk.f32.gmra.mxu1 %vm2388_vm4, %v8326_v28 }
 0x328   : > { %v8341_v61 = vadd.f32 %v2942_v59, %v2870_v21  ;;  %5834 = vmatmul.msk.f32.gmra.mxu2 %vm2388_vm4, %v8335_v34  ;;  %v8351_v59 = vsel %vm434_vm2, %v2368_v46, %v2370_v32 }
 0x329   : > { %5868 = vmatmul.msk.f32.gmra.mxu3 %vm2388_vm4, %v8298_v40 }
 0x32a   : > { %10408 = vst [vmem:[#allocation40_spill] sm:$0xff] %v8341_v61 }
 0x32b   : > { %v2951_v58 = vpop.f32.mrf.mxu0  ;;  %v2677_v6 = vpop.f32.mrf.mxu2 }
 0x32c   : > { %v2678_v2 = vadd.f32 %v2677_v6, %v2500_v17  ;;  %v2795_v44 = vpop.f32.mrf.mxu3  ;;  %v2503_v31 = vpop.f32.mrf.mxu1  ;;  %v8363_v6 = vsel %vm289_vm1, 0.0, %v8113_v18  ;;  %v8376_v18 = vsel %vm289_vm1, %v8115_v63, 0.0 }
 0x32d   : > { %10410 = vst [vmem:[#allocation72_spill] sm:$0xff] %v8376_v18  ;;  %v2375_v63 = vrot.slane %v8376_v18, 1  ;;  %v8425_v18 = vsel %vm289_vm1, %v8158_v49, 0.0 }
 0x32e   : > { %5902 = vmatmul.msk.f32.gmra.mxu0 %vm2388_vm4, %v8326_v28  ;;  %v2871_v13 = vadd.f32 %v2795_v44, %v2678_v2  ;;  %v2373_v44 = vrot.slane %v8125_v9, 1  ;;  %10413 = vst [vmem:[#allocation10_spill] sm:$0xff] %v8425_v18 }
 0x32f   : > { %5803 = vmatmul.msk.f32.gmra.mxu1 %vm2388_vm4, %v8066_v12 }
 0x330   : > { %v8355_v21 = vadd.f32 %v2945_v33, %v2871_v13  ;;  %5835 = vmatmul.msk.f32.gmra.mxu2 %vm2388_vm4, %v8351_v59  ;;  %v2372_v33 = vrot.slane %v8363_v6, 1 }
 0x331   : > { %5869 = vmatmul.msk.f32.gmra.mxu3 %vm2388_vm4, %v8314_v37 }
 0x332   : > { %10409 = vst [vmem:[#allocation47_spill] sm:$0xff] %v8355_v21  ;;  %v8372_v21 = vsel %vm434_vm2, %v2372_v33, %v2373_v44 }
 0x333   : > { %v2954_v17 = vpop.f32.mrf.mxu0  ;;  %v2680_v46 = vpop.f32.mrf.mxu2 }
 0x334   : > { %v2681_v32 = vadd.f32 %v2680_v46, %v2503_v31  ;;  %v2798_v2 = vpop.f32.mrf.mxu3  ;;  %v2506_v61 = vpop.f32.mrf.mxu1  ;;  %v6043_v46 = vld [vmem:[%s9964_s3 + $0x18] sm:$0xff] }
 0x335   : > { %4142 = vmatpush.msrb.mxu2 %v6043_v46  ;;  %v8406_v46 = vsel %vm289_vm1, 0.0, %v8156_v0 }
 0x336   : > { %5903 = vmatmul.msk.f32.gmra.mxu0 %vm2388_vm4, %v8066_v12  ;;  %v2872_v13 = vadd.f32 %v2798_v2, %v2681_v32  ;;  %v6109_v32 = vld [vmem:[%s9964_s3 + $0x98] sm:$0xff]  ;;  %v2377_v0 = vrot.slane %v8406_v46, 1 }
 0x337   : > { %5804 = vmatmul.msk.f32.gmra.mxu1 %vm2388_vm4, %v8363_v6  ;;  %4258 = vmatpush.msrb.mxu3 %v6109_v32  ;;  %v2378_v32 = vrot.slane %v8168_v20, 1 }
 0x338   : > { %v8378_v16 = vadd.f32 %v2948_v39, %v2872_v13  ;;  %5836 = vmatmul.msk.f32.gmra.mxu2 %vm2388_vm4, %v8372_v21 }
 0x339   : > { %5870 = vmatmul.msk.f32.gmra.mxu3 %vm2388_vm4, %v8335_v34  ;;  %v8394_v34 = vsel %vm434_vm2, %v2373_v44, %v2375_v63  ;;  %v6045_v44 = vld [vmem:[%s9964_s3 + $0x38] sm:$0xff] }
 0x33a   : > { %10411 = vst [vmem:[#allocation18_spill] sm:$0xff] %v8378_v16  ;;  %4029 = vmatpush.msrb.mxu1 %v6045_v44 }
 0x33b   : > { %v2957_v31 = vpop.f32.mrf.mxu0  ;;  %v2683_v2 = vpop.f32.mrf.mxu2 }
 0x33c   : > { %v2684_v39 = vadd.f32 %v2683_v2, %v2506_v61  ;;  %v2801_v33 = vpop.f32.mrf.mxu3  ;;  %v2509_v13 = vpop.f32.mrf.mxu1 }
 0x33e   : > { %5904 = vmatmul.msk.f32.gmra.mxu0 %vm2388_vm4, %v8363_v6  ;;  %v2873_v16 = vadd.f32 %v2801_v33, %v2684_v39 }
 0x33f   : > { %5805 = vmatmul.msk.f32.gmra.mxu1 %vm2388_vm4, %v8125_v9 }
 0x340   : > { %v8398_v28 = vadd.f32 %v2951_v58, %v2873_v16  ;;  %5837 = vmatmul.msk.f32.gmra.mxu2 %vm2388_vm4, %v8394_v34  ;;  %v6143_v16 = vld [vmem:[%s9964_s3 + $0xb8] sm:$0xff] }
 0x341   : > { %5871 = vmatmul.msk.f32.gmra.mxu3 %vm2388_vm4, %v8351_v59  ;;  %4406 = vmatpush.msrb.mxu0 %v6143_v16  ;;  %v2380_v16 = vrot.slane %v8425_v18, 1 }
 0x342   : > { %10412 = vst [vmem:[#allocation7_spill] sm:$0xff] %v8398_v28  ;;  %v8421_v28 = vsel %vm434_vm2, %v2377_v0, %v2378_v32 }
 0x343   : > { %v2960_v61 = vpop.f32.mrf.mxu0  ;;  %v2686_v58 = vpop.f32.mrf.mxu2 }
 0x344   : > { %v2687_v63 = vadd.f32 %v2686_v58, %v2509_v13  ;;  %v2804_v2 = vpop.f32.mrf.mxu3  ;;  %v2512_v39 = vpop.f32.mrf.mxu1 }
 0x346   : > { %5905 = vmatmul.msk.f32.gmra.mxu0 %vm2388_vm4, %v8125_v9  ;;  %v2874_v33 = vadd.f32 %v2804_v2, %v2687_v63 }
 0x347   : > { %5806 = vmatmul.msk.f32.gmra.mxu1 %vm2388_vm4, %v8406_v46 }
 0x348   : > { %v8427_v44 = vadd.f32 %v2954_v17, %v2874_v33  ;;  %5838 = vmatmul.msk.f32.gmra.mxu2 %vm2388_vm4, %v8421_v28  ;;  %v8439_v17 = vsel %vm434_vm2, %v2378_v32, %v2380_v16  ;;  %v3111_v32 = vrot.slane %v7754_v11, 2 }
 0x349   : > { %5872 = vmatmul.msk.f32.gmra.mxu3 %vm2388_vm4, %v8372_v21 }
 0x34a   : > { %10414 = vst [vmem:[#allocation33_spill] sm:$0xff] %v8427_v44  ;;  %v3112_v44 = vrot.slane %v7553_v23, 2 }
 0x34b   : > { %v2963_v13 = vpop.f32.mrf.mxu0  ;;  %v2689_v58 = vpop.f32.mrf.mxu2 }
 0x34c   : > { %v2690_v63 = vadd.f32 %v2689_v58, %v2512_v39  ;;  %v2807_v2 = vpop.f32.mrf.mxu3  ;;  %v2515_v0 = vpop.f32.mrf.mxu1  ;;  %v8454_v16 = vsel %vm865_vm3, %v3111_v32, %v3112_v44 }
 0x34d   : > { %10416 = vst [vmem:[#allocation16_spill] sm:$0xff] %v8454_v16 }
 0x34e   : > { %6010 = vmatmul.msk.f32.vlgmr.msra.gmra.mxu0 %vm2388_vm4, %v10363_v19  ;;  %v2875_v49 = vadd.f32 %v2807_v2, %v2690_v63 }
 0x34f   : > { %5807 = vmatmul.msk.f32.gmra.mxu1 %vm2388_vm4, %v8168_v20 }
 0x350   : > { %v8441_v33 = vadd.f32 %v2957_v31, %v2875_v49  ;;  %5839 = vmatmul.msk.f32.gmra.mxu2 %vm2388_vm4, %v8439_v17 }
 0x351   : > { %5873 = vmatmul.msk.f32.gmra.mxu3 %vm2388_vm4, %v8394_v34 }
 0x352   : > { %10415 = vst [vmem:[#allocation6_spill] sm:$0xff] %v8441_v33 }
 0x353   : > { %v2966_v39 = vpop.f32.mrf.mxu0  ;;  %v2692_v58 = vpop.f32.mrf.mxu2 }
 0x354   : > { %v2693_v18 = vadd.f32 %v2692_v58, %v2515_v0  ;;  %v2810_v63 = vpop.f32.mrf.mxu3  ;;  %v2518_v2 = vpop.f32.mrf.mxu1 }
 0x356   : > { %6011 = vmatmul.msk.f32.gmra.mxu0 %vm2388_vm4, %v10363_v19  ;;  %v2876_v31 = vadd.f32 %v2810_v63, %v2693_v18  ;;  %v3114_v19 = vrot.slane %v7767_v15, 2 }
 0x357   : > { %5910 = vmatmul.msk.f32.vlgmr.msra.gmra.mxu1 %vm2388_vm4, %v7763_v5 }
 0x358   : > { %v8456_v49 = vadd.f32 %v2960_v61, %v2876_v31  ;;  %5942 = vmatmul.msk.f32.vlgmr.msra.gmra.mxu2 %vm2388_vm4, %v8454_v16  ;;  %v8468_v61 = vsel %vm865_vm3, %v3112_v44, %v3114_v19  ;;  %v3116_v19 = vrot.slane %v7799_v27, 2 }
 0x359   : > { %5976 = vmatmul.msk.f32.vlgmr.msra.gmra.mxu3 %vm2388_vm4, %v10360_v50  ;;  %10418 = vst [vmem:[#allocation21_spill] sm:$0xff] %v8468_v61 }
 0x35a   : > { %10417 = vst [vmem:[#allocation73_spill] sm:$0xff] %v8456_v49 }
 0x35b   : > { %v2969_v0 = vpop.f32.mrf.mxu0  ;;  %v2695_v58 = vpop.f32.mrf.mxu2 }
 0x35c   : > { %v2696_v33 = vadd.f32 %v2695_v58, %v2518_v2  ;;  %v2813_v18 = vpop.f32.mrf.mxu3  ;;  %v2521_v63 = vpop.f32.mrf.mxu1  ;;  %v3117_v58 = vrot.slane %v7582_v29, 2 }
 0x35e   : > { %6012 = vmatmul.msk.f32.gmra.mxu0 %vm2388_vm4, %v7763_v5  ;;  %v2877_v32 = vadd.f32 %v2813_v18, %v2696_v33 }
 0x35f   : > { %5911 = vmatmul.msk.f32.gmra.mxu1 %vm2388_vm4, %v7785_v25 }
 0x360   : > { %v8470_v31 = vadd.f32 %v2963_v13, %v2877_v32  ;;  %5943 = vmatmul.msk.f32.gmra.mxu2 %vm2388_vm4, %v8468_v61  ;;  %v8483_v13 = vsel %vm865_vm3, %v3116_v19, %v3117_v58 }
 0x361   : > { %5977 = vmatmul.msk.f32.gmra.mxu3 %vm2388_vm4, %v10360_v50  ;;  %10420 = vst [vmem:[#allocation28_spill] sm:$0xff] %v8483_v13  ;;  %v10422_v50 = vld [vmem:[#allocation53_spill] sm:$0xff] }
 0x362   : > { %10419 = vst [vmem:[#allocation74_spill] sm:$0xff] %v8470_v31  ;;  %v3119_v31 = vrot.slane %v10422_v50, 2 }
 0x363   : > { %v2972_v15 = vpop.f32.mrf.mxu0  ;;  %v2698_v2 = vpop.f32.mrf.mxu2 }
 0x364   : > { %v2699_v49 = vadd.f32 %v2698_v2, %v2521_v63  ;;  %v2816_v33 = vpop.f32.mrf.mxu3  ;;  %v2524_v18 = vpop.f32.mrf.mxu1 }
 0x366   : > { %6013 = vmatmul.msk.f32.gmra.mxu0 %vm2388_vm4, %v7785_v25  ;;  %v2878_v44 = vadd.f32 %v2816_v33, %v2699_v49 }
 0x367   : > { %5912 = vmatmul.msk.f32.gmra.mxu1 %vm2388_vm4, %v7809_v24 }
 0x368   : > { %v8485_v32 = vadd.f32 %v2966_v39, %v2878_v44  ;;  %5944 = vmatmul.msk.f32.gmra.mxu2 %vm2388_vm4, %v8483_v13  ;;  %v8497_v39 = vsel %vm865_vm3, %v3117_v58, %v3119_v31  ;;  %v10426_v31 = vld [vmem:[#allocation3_spill] sm:$0xff] }
 0x369   : > { %5978 = vmatmul.msk.f32.gmra.mxu3 %vm2388_vm4, %v8454_v16  ;;  %10423 = vst [vmem:[#allocation27_spill] sm:$0xff] %v8497_v39  ;;  %v3121_v58 = vrot.slane %v10426_v31, 2 }
 0x36a   : > { %10421 = vst [vmem:[#allocation17_spill] sm:$0xff] %v8485_v32 }
 0x36b   : > { %v2975_v63 = vpop.f32.mrf.mxu0  ;;  %v2701_v2 = vpop.f32.mrf.mxu2 }
 0x36c   : > { %v2702_v25 = vadd.f32 %v2701_v2, %v2524_v18  ;;  %v2819_v49 = vpop.f32.mrf.mxu3  ;;  %v2527_v33 = vpop.f32.mrf.mxu1  ;;  %v10425_v2 = vld [vmem:[#allocation30_spill] sm:$0xff] }
 0x36d   : > { %v3122_v16 = vrot.slane %v10425_v2, 2 }
 0x36e   : > { %6014 = vmatmul.msk.f32.gmra.mxu0 %vm2388_vm4, %v7809_v24  ;;  %v2879_v19 = vadd.f32 %v2819_v49, %v2702_v25 }
 0x36f   : > { %5913 = vmatmul.msk.f32.gmra.mxu1 %vm2388_vm4, %v7829_v43 }
 0x370   : > { %v8499_v44 = vadd.f32 %v2969_v0, %v2879_v19  ;;  %5945 = vmatmul.msk.f32.gmra.mxu2 %vm2388_vm4, %v8497_v39  ;;  %v8512_v19 = vsel %vm865_vm3, %v3121_v58, %v3122_v16 }
 0x371   : > { %5979 = vmatmul.msk.f32.gmra.mxu3 %vm2388_vm4, %v8468_v61  ;;  %10427 = vst [vmem:[#allocation29_spill] sm:$0xff] %v8512_v19 }
 0x372   : > { %10424 = vst [vmem:[#allocation75_spill] sm:$0xff] %v8499_v44  ;;  %v10429_v44 = vld [vmem:[#allocation12_spill] sm:$0xff] }
 0x373   : > { %v2978_v50 = vpop.f32.mrf.mxu0  ;;  %v2704_v18 = vpop.f32.mrf.mxu2  ;;  %v3124_v2 = vrot.slane %v10429_v44, 2 }
 0x374   : > { %v2705_v32 = vadd.f32 %v2704_v18, %v2527_v33  ;;  %v2822_v25 = vpop.f32.mrf.mxu3  ;;  %v2530_v49 = vpop.f32.mrf.mxu1 }
 0x376   : > { %6015 = vmatmul.msk.f32.gmra.mxu0 %vm2388_vm4, %v7829_v43  ;;  %v2880_v0 = vadd.f32 %v2822_v25, %v2705_v32 }
 0x377   : > { %5914 = vmatmul.msk.f32.gmra.mxu1 %vm2388_vm4, %v7855_v51 }
 0x378   : > { %v8514_v61 = vadd.f32 %v2972_v15, %v2880_v0  ;;  %5946 = vmatmul.msk.f32.gmra.mxu2 %vm2388_vm4, %v8512_v19  ;;  %v8526_v15 = vsel %vm865_vm3, %v3122_v16, %v3124_v2  ;;  %v10433_v16 = vld [vmem:[#allocation55_spill] sm:$0xff] }
 0x379   : > { %5980 = vmatmul.msk.f32.gmra.mxu3 %vm2388_vm4, %v8483_v13  ;;  %10430 = vst [vmem:[#allocation11_spill] sm:$0xff] %v8526_v15  ;;  %v3126_v2 = vrot.slane %v10433_v16, 2 }
 0x37a   : > { %10428 = vst [vmem:[#allocation32_spill] sm:$0xff] %v8514_v61 }
 0x37b   : > { %v2981_v33 = vpop.f32.mrf.mxu0  ;;  %v2707_v18 = vpop.f32.mrf.mxu2 }
 0x37c   : > { %v2708_v31 = vadd.f32 %v2707_v18, %v2530_v49  ;;  %v2825_v32 = vpop.f32.mrf.mxu3  ;;  %v2533_v25 = vpop.f32.mrf.mxu1  ;;  %v10432_v18 = vld [vmem:[#allocation42_spill] sm:$0xff] }
 0x37d   : > { %v3127_v13 = vrot.slane %v10432_v18, 2 }
 0x37e   : > { %6016 = vmatmul.msk.f32.gmra.mxu0 %vm2388_vm4, %v7855_v51  ;;  %v2881_v58 = vadd.f32 %v2825_v32, %v2708_v31 }
 0x37f   : > { %5915 = vmatmul.msk.f32.gmra.mxu1 %vm2388_vm4, %v7875_v55 }
 0x380   : > { %v8528_v0 = vadd.f32 %v2975_v63, %v2881_v58  ;;  %5947 = vmatmul.msk.f32.gmra.mxu2 %vm2388_vm4, %v8526_v15  ;;  %v8541_v58 = vsel %vm865_vm3, %v3126_v2, %v3127_v13 }
 0x381   : > { %5981 = vmatmul.msk.f32.gmra.mxu3 %vm2388_vm4, %v8497_v39  ;;  %10434 = vst [vmem:[#allocation76_spill] sm:$0xff] %v8541_v58 }
 0x382   : > { %10431 = vst [vmem:[#allocation39_spill] sm:$0xff] %v8528_v0  ;;  %v10436_v0 = vld [vmem:[#allocation15_spill] sm:$0xff] }
 0x383   : > { %v2984_v44 = vpop.f32.mrf.mxu0  ;;  %v2710_v49 = vpop.f32.mrf.mxu2  ;;  %v3129_v18 = vrot.slane %v10436_v0, 2 }
 0x384   : > { %v2711_v61 = vadd.f32 %v2710_v49, %v2533_v25  ;;  %v2828_v31 = vpop.f32.mrf.mxu3  ;;  %v2536_v32 = vpop.f32.mrf.mxu1 }
 0x386   : > { %6017 = vmatmul.msk.f32.gmra.mxu0 %vm2388_vm4, %v7875_v55  ;;  %v2882_v63 = vadd.f32 %v2828_v31, %v2711_v61 }
 0x387   : > { %5916 = vmatmul.msk.f32.gmra.mxu1 %vm2388_vm4, %v7901_v62 }
 0x388   : > { %v8543_v39 = vadd.f32 %v2978_v50, %v2882_v63  ;;  %5948 = vmatmul.msk.f32.gmra.mxu2 %vm2388_vm4, %v8541_v58  ;;  %v8555_v50 = vsel %vm865_vm3, %v3127_v13, %v3129_v18  ;;  %v10440_v13 = vld [vmem:[#allocation65_spill] sm:$0xff] }
 0x389   : > { %5982 = vmatmul.msk.f32.gmra.mxu3 %vm2388_vm4, %v8512_v19  ;;  %10437 = vst [vmem:[#allocation22_spill] sm:$0xff] %v8555_v50  ;;  %v3131_v18 = vrot.slane %v10440_v13, 2 }
 0x38a   : > { %10435 = vst [vmem:[#allocation45_spill] sm:$0xff] %v8543_v39 }
 0x38b   : > { %v2987_v25 = vpop.f32.mrf.mxu0  ;;  %v2713_v49 = vpop.f32.mrf.mxu2 }
 0x38c   : > { %v2714_v16 = vadd.f32 %v2713_v49, %v2536_v32  ;;  %v2831_v61 = vpop.f32.mrf.mxu3  ;;  %v2539_v31 = vpop.f32.mrf.mxu1  ;;  %v10439_v49 = vld [vmem:[#allocation56_spill] sm:$0xff] }
 0x38d   : > { %v3132_v19 = vrot.slane %v10439_v49, 2 }
 0x38e   : > { %6018 = vmatmul.msk.f32.gmra.mxu0 %vm2388_vm4, %v7901_v62  ;;  %v2883_v2 = vadd.f32 %v2831_v61, %v2714_v16 }
 0x38f   : > { %5917 = vmatmul.msk.f32.gmra.mxu1 %vm2388_vm4, %v7921_v4 }
 0x390   : > { %v8557_v63 = vadd.f32 %v2981_v33, %v2883_v2  ;;  %5949 = vmatmul.msk.f32.gmra.mxu2 %vm2388_vm4, %v8555_v50  ;;  %v8570_v2 = vsel %vm865_vm3, %v3131_v18, %v3132_v19 }
 0x391   : > { %5983 = vmatmul.msk.f32.gmra.mxu3 %vm2388_vm4, %v8526_v15  ;;  %10441 = vst [vmem:[#allocation77_spill] sm:$0xff] %v8570_v2 }
 0x392   : > { %10438 = vst [vmem:[#allocation48_spill] sm:$0xff] %v8557_v63  ;;  %v10443_v63 = vld [vmem:[#allocation58_spill] sm:$0xff] }
 0x393   : > { %v2990_v0 = vpop.f32.mrf.mxu0  ;;  %v2716_v32 = vpop.f32.mrf.mxu2  ;;  %v3134_v49 = vrot.slane %v10443_v63, 2 }
 0x394   : > { %v2717_v39 = vadd.f32 %v2716_v32, %v2539_v31  ;;  %v2834_v16 = vpop.f32.mrf.mxu3  ;;  %v2542_v61 = vpop.f32.mrf.mxu1 }
 0x396   : > { %6019 = vmatmul.msk.f32.gmra.mxu0 %vm2388_vm4, %v7921_v4  ;;  %v2884_v33 = vadd.f32 %v2834_v16, %v2717_v39 }
 0x397   : > { %5918 = vmatmul.msk.f32.gmra.mxu1 %vm2388_vm4, %v7947_v14 }
 0x398   : > { %v8572_v15 = vadd.f32 %v2984_v44, %v2884_v33  ;;  %5950 = vmatmul.msk.f32.gmra.mxu2 %vm2388_vm4, %v8570_v2  ;;  %v8584_v44 = vsel %vm865_vm3, %v3132_v19, %v3134_v49  ;;  %v10447_v19 = vld [vmem:[#allocation23_spill] sm:$0xff] }
 0x399   : > { %5984 = vmatmul.msk.f32.gmra.mxu3 %vm2388_vm4, %v8541_v58  ;;  %10444 = vst [vmem:[#allocation53_spill] sm:$0xff] %v8584_v44  ;;  %v3136_v49 = vrot.slane %v10447_v19, 2 }
 0x39a   : > { %10442 = vst [vmem:[#allocation34_spill] sm:$0xff] %v8572_v15 }
 0x39b   : > { %v2993_v31 = vpop.f32.mrf.mxu0  ;;  %v2719_v32 = vpop.f32.mrf.mxu2 }
 0x39c   : > { %v2720_v13 = vadd.f32 %v2719_v32, %v2542_v61  ;;  %v2837_v39 = vpop.f32.mrf.mxu3  ;;  %v2545_v16 = vpop.f32.mrf.mxu1  ;;  %v10446_v32 = vld [vmem:[#allocation51_spill] sm:$0xff] }
 0x39d   : > { %v3137_v58 = vrot.slane %v10446_v32, 2 }
 0x39e   : > { %6020 = vmatmul.msk.f32.gmra.mxu0 %vm2388_vm4, %v7947_v14  ;;  %v2885_v18 = vadd.f32 %v2837_v39, %v2720_v13 }
 0x39f   : > { %5919 = vmatmul.msk.f32.gmra.mxu1 %vm2388_vm4, %v7967_v53 }
 0x3a0   : > { %v8586_v33 = vadd.f32 %v2987_v25, %v2885_v18  ;;  %5951 = vmatmul.msk.f32.gmra.mxu2 %vm2388_vm4, %v8584_v44  ;;  %v8599_v18 = vsel %vm865_vm3, %v3136_v49, %v3137_v58 }
 0x3a1   : > { %5985 = vmatmul.msk.f32.gmra.mxu3 %vm2388_vm4, %v8555_v50  ;;  %10448 = vst [vmem:[#allocation15_spill] sm:$0xff] %v8599_v18 }
 0x3a2   : > { %10445 = vst [vmem:[#allocation12_spill] sm:$0xff] %v8586_v33  ;;  %v10450_v33 = vld [vmem:[#allocation68_spill] sm:$0xff] }
 0x3a3   : > { %v2996_v63 = vpop.f32.mrf.mxu0  ;;  %v2722_v61 = vpop.f32.mrf.mxu2  ;;  %v3139_v32 = vrot.slane %v10450_v33, 2 }
 0x3a4   : > { %v2723_v15 = vadd.f32 %v2722_v61, %v2545_v16  ;;  %v2840_v13 = vpop.f32.mrf.mxu3  ;;  %v2548_v39 = vpop.f32.mrf.mxu1 }
 0x3a6   : > { %6021 = vmatmul.msk.f32.gmra.mxu0 %vm2388_vm4, %v7967_v53  ;;  %v2886_v25 = vadd.f32 %v2840_v13, %v2723_v15 }
 0x3a7   : > { %5920 = vmatmul.msk.f32.gmra.mxu1 %vm2388_vm4, %v7993_v54 }
 0x3a8   : > { %v8601_v50 = vadd.f32 %v2990_v0, %v2886_v25  ;;  %5952 = vmatmul.msk.f32.gmra.mxu2 %vm2388_vm4, %v8599_v18  ;;  %v8613_v0 = vsel %vm865_vm3, %v3137_v58, %v3139_v32  ;;  %v10454_v58 = vld [vmem:[#allocation31_spill] sm:$0xff] }
 0x3a9   : > { %5986 = vmatmul.msk.f32.gmra.mxu3 %vm2388_vm4, %v8570_v2  ;;  %10451 = vst [vmem:[#allocation68_spill] sm:$0xff] %v8613_v0  ;;  %v3141_v32 = vrot.slane %v10454_v58, 2 }
 0x3aa   : > { %10449 = vst [vmem:[#allocation58_spill] sm:$0xff] %v8601_v50 }
 0x3ab   : > { %v2999_v16 = vpop.f32.mrf.mxu0  ;;  %v2725_v61 = vpop.f32.mrf.mxu2 }
 0x3ac   : > { %v2726_v19 = vadd.f32 %v2725_v61, %v2548_v39  ;;  %v2843_v15 = vpop.f32.mrf.mxu3  ;;  %v2551_v13 = vpop.f32.mrf.mxu1  ;;  %v10453_v61 = vld [vmem:[#allocation4_spill] sm:$0xff] }
 0x3ad   : > { %v3142_v2 = vrot.slane %v10453_v61, 2 }
 0x3ae   : > { %6022 = vmatmul.msk.f32.gmra.mxu0 %vm2388_vm4, %v7993_v54  ;;  %v2887_v49 = vadd.f32 %v2843_v15, %v2726_v19 }
 0x3af   : > { %5921 = vmatmul.msk.f32.gmra.mxu1 %vm2388_vm4, %v8013_v48 }
 0x3b0   : > { %v8615_v25 = vadd.f32 %v2993_v31, %v2887_v49  ;;  %5953 = vmatmul.msk.f32.gmra.mxu2 %vm2388_vm4, %v8613_v0  ;;  %v10455_v49 = vld [vmem:[#allocation50_spill] sm:$0xff] }
 0x3b1   : > { %5987 = vmatmul.msk.f32.gmra.mxu3 %vm2388_vm4, %v8584_v44 }
 0x3b2   : > { %10452 = vst [vmem:[#allocation78_spill] sm:$0xff] %v8615_v25  ;;  %v8628_v25 = vsel %vm865_vm3, %v3141_v32, %v3142_v2  ;;  %v10458_v32 = vld [vmem:[#allocation64_spill] sm:$0xff] }
 0x3b3   : > { %v3002_v33 = vpop.f32.mrf.mxu0  ;;  %v2728_v39 = vpop.f32.mrf.mxu2  ;;  %10456 = vst [vmem:[#allocation50_spill] sm:$0xff] %v8628_v25  ;;  %v3144_v61 = vrot.slane %v10458_v32, 2  ;;  %v10461_v32 = vld [vmem:[#allocation35_spill] sm:$0xff] }
 0x3b4   : > { %v2729_v50 = vadd.f32 %v2728_v39, %v2551_v13  ;;  %v2846_v19 = vpop.f32.mrf.mxu3  ;;  %v2554_v15 = vpop.f32.mrf.mxu1  ;;  %v6042_v39 = vld [vmem:[%s9964_s3 + $0x10] sm:$0xff] }
 0x3b5   : > { %4143 = vmatpush.msrb.mxu2 %v6042_v39  ;;  %v8648_v58 = vsel %vm865_vm3, %v3142_v2, %v3144_v61  ;;  %v6142_v39 = vld [vmem:[%s9964_s3 + $0xb0] sm:$0xff] }
 0x3b6   : > { %6023 = vmatmul.msk.f32.gmra.mxu0 %vm2388_vm4, %v8013_v48  ;;  %v2888_v31 = vadd.f32 %v2846_v19, %v2729_v50  ;;  %v6108_v50 = vld [vmem:[%s9964_s3 + $0x90] sm:$0xff]  ;;  %10459 = vst [vmem:[#allocation64_spill] sm:$0xff] %v8648_v58 }
 0x3b7   : > { %5922 = vmatmul.msk.f32.gmra.mxu1 %vm2388_vm4, %v10455_v49  ;;  %4259 = vmatpush.msrb.mxu3 %v6108_v50 }
 0x3b8   : > { %v8630_v44 = vadd.f32 %v2996_v63, %v2888_v31  ;;  %5954 = vmatmul.msk.f32.gmra.mxu2 %vm2388_vm4, %v8628_v25  ;;  %4407 = vmatpush.msrb.mxu0 %v6142_v39 }
 0x3b9   : > { %5988 = vmatmul.msk.f32.gmra.mxu3 %vm2388_vm4, %v8599_v18 }
 0x3ba   : > { %10457 = vst [vmem:[#allocation79_spill] sm:$0xff] %v8630_v44 }
 0x3bb   : > { %v3005_v13 = vpop.f32.mrf.mxu0  ;;  %v2731_v19 = vpop.f32.mrf.mxu2 }
 0x3bc   : > { %v2732_v63 = vadd.f32 %v2731_v19, %v2554_v15  ;;  %v2849_v31 = vpop.f32.mrf.mxu3  ;;  %v2557_v44 = vpop.f32.mrf.mxu1  ;;  %v6044_v15 = vld [vmem:[%s9964_s3 + $0x30] sm:$0xff] }
 0x3bd   : > { %4030 = vmatpush.msrb.mxu1 %v6044_v15 }
 0x3be   : > { %6024 = vmatmul.msk.f32.gmra.mxu0 %vm2388_vm4, %v10455_v49  ;;  %v2889_v18 = vadd.f32 %v2849_v31, %v2732_v63  ;;  %v3146_v63 = vrot.slane %v10461_v32, 2 }
 0x3bf   : > { %5923 = vmatmul.msk.f32.gmra.mxu1 %vm2388_vm4, %v8059_v35 }
 0x3c0   : > { %v8650_v48 = vadd.f32 %v2999_v16, %v2889_v18  ;;  %5955 = vmatmul.msk.f32.gmra.mxu2 %vm2388_vm4, %v8648_v58  ;;  %v3147_v18 = vrot.slane %v7790_v42, 2 }
 0x3c1   : > { %5989 = vmatmul.msk.f32.gmra.mxu3 %vm2388_vm4, %v8613_v0  ;;  %v10462_v0 = vld [vmem:[#allocation52_spill] sm:$0xff] }
 0x3c2   : > { %10460 = vst [vmem:[#allocation80_spill] sm:$0xff] %v8650_v48  ;;  %v8669_v15 = vsel %vm865_vm3, %v3146_v63, %v3147_v18 }
 0x3c3   : > { %v3008_v50 = vpop.f32.mrf.mxu0  ;;  %v2734_v2 = vpop.f32.mrf.mxu2  ;;  %10463 = vst [vmem:[#allocation52_spill] sm:$0xff] %v8669_v15 }
 0x3c4   : > { %v2735_v16 = vadd.f32 %v2734_v2, %v2557_v44  ;;  %v2852_v61 = vpop.f32.mrf.mxu3  ;;  %v2560_v19 = vpop.f32.mrf.mxu1  ;;  %v10465_v2 = vld [vmem:[#allocation67_spill] sm:$0xff] }
 0x3c5   : > { %v3149_v42 = vrot.slane %v10465_v2, 2  ;;  %v3152_v2 = vrot.slane %v7836_v56, 2 }
 0x3c6   : > { %6025 = vmatmul.msk.f32.gmra.mxu0 %vm2388_vm4, %v8059_v35  ;;  %v2890_v31 = vadd.f32 %v2852_v61, %v2735_v16 }
 0x3c7   : > { %5924 = vmatmul.msk.f32.gmra.mxu1 %vm2388_vm4, %v10462_v0 }
 0x3c8   : > { %v8671_v48 = vadd.f32 %v3002_v33, %v2890_v31  ;;  %5956 = vmatmul.msk.f32.gmra.mxu2 %vm2388_vm4, %v8669_v15  ;;  %v8683_v33 = vsel %vm865_vm3, %v3147_v18, %v3149_v42  ;;  %v3151_v42 = vrot.slane %v8134_v45, 2 }
 0x3c9   : > { %5990 = vmatmul.msk.f32.gmra.mxu3 %vm2388_vm4, %v8628_v25  ;;  %10466 = vst [vmem:[#allocation67_spill] sm:$0xff] %v8683_v33 }
 0x3ca   : > { %10464 = vst [vmem:[#allocation81_spill] sm:$0xff] %v8671_v48  ;;  %v8698_v18 = vsel %vm865_vm3, %v3151_v42, %v3152_v2 }
 0x3cb   : > { %v3657_v44 = vpop.f32.mrf.mxu0  ;;  %v2737_v39 = vpop.f32.mrf.mxu2  ;;  %10468 = vst [vmem:[#allocation83_spill] sm:$0xff] %v8698_v18 }
 0x3cc   : > { %v2738_v32 = vadd.f32 %v2737_v39, %v2560_v19  ;;  %v2855_v16 = vpop.f32.mrf.mxu3  ;;  %v2563_v61 = vpop.f32.mrf.mxu1 }
 0x3ce   : > { %6026 = vmatmul.msk.f32.gmra.mxu0 %vm2388_vm4, %v10462_v0  ;;  %v2891_v63 = vadd.f32 %v2855_v16, %v2738_v32 }
 0x3cf   : > { %5925 = vmatmul.msk.f32.gmra.mxu1 %vm2388_vm4, %v8118_v3 }
 0x3d0   : > { %v8685_v31 = vadd.f32 %v3005_v13, %v2891_v63  ;;  %5957 = vmatmul.msk.f32.gmra.mxu2 %vm2388_vm4, %v8683_v33 }
 0x3d1   : > { %5991 = vmatmul.msk.f32.gmra.mxu3 %vm2388_vm4, %v8648_v58  ;;  %v3154_v58 = vrot.slane %v8147_v47, 2 }
 0x3d2   : > { %10467 = vst [vmem:[#allocation82_spill] sm:$0xff] %v8685_v31 }
 0x3d3   : > { %v3660_v19 = vpop.f32.mrf.mxu0  ;;  %v2740_v39 = vpop.f32.mrf.mxu2 }
 0x3d4   : > { %v2741_v25 = vadd.f32 %v2740_v39, %v2563_v61  ;;  %v2858_v32 = vpop.f32.mrf.mxu3  ;;  %v3214_v16 = vpop.f32.mrf.mxu1 }
 0x3d6   : > { %6027 = vmatmul.msk.f32.gmra.mxu0 %vm2388_vm4, %v8118_v3  ;;  %v2892_v13 = vadd.f32 %v2858_v32, %v2741_v25 }
 0x3d7   : > { %5926 = vmatmul.msk.f32.gmra.mxu1 %vm2388_vm4, %v8143_v8 }
 0x3d8   : > { %v8700_v63 = vadd.f32 %v3008_v50, %v2892_v13  ;;  %5958 = vmatmul.msk.f32.gmra.mxu2 %vm2388_vm4, %v8698_v18  ;;  %v8712_v50 = vsel %vm865_vm3, %v3152_v2, %v3154_v58  ;;  %v8717_v13 = vld [vmem:[%s9965_s4] ss:$0 sm:$0xff] }
 0x3d9   : > { %5992 = vmatmul.msk.f32.gmra.mxu3 %vm2388_vm4, %v8669_v15  ;;  %10470 = vst [vmem:[#allocation85_spill] sm:$0xff] %v8712_v50 }
 0x3da   : > { %10469 = vst [vmem:[#allocation84_spill] sm:$0xff] %v8700_v63 }
 0x3db   : > { %v3663_v61 = vpop.f32.mrf.mxu0  ;;  %v3391_v39 = vpop.f32.mrf.mxu2 }
 0x3dc   : > { %v3392_v31 = vadd.f32 %v3391_v39, %v3214_v16  ;;  %v3509_v25 = vpop.f32.mrf.mxu3  ;;  %v3217_v32 = vpop.f32.mrf.mxu1  ;;  %v3157_v39 = vrot.slane %v7882_v57, 2 }
 0x3de   : > { %6028 = vmatmul.msk.f32.gmra.mxu0 %vm2388_vm4, %v8143_v8  ;;  %v3605_v42 = vadd.f32 %v3509_v25, %v3392_v31 }
 0x3df   : > { %5927 = vmatmul.msk.f32.gmra.mxu1 %vm2388_vm4, %v8161_v60 }
 0x3e0   : > { %v3753_v15 = vadd.f32 %v3657_v44, %v3605_v42  ;;  %5959 = vmatmul.msk.f32.gmra.mxu2 %vm2388_vm4, %v8712_v50  ;;  %v3156_v44 = vrot.slane %v8178_v38, 2 }
 0x3e1   : > { %5993 = vmatmul.msk.f32.gmra.mxu3 %vm2388_vm4, %v8683_v33 }
 0x3e2   : > { %v3785_v31 = vadd.f32 %v8717_v13, %v3753_v15  ;;  %v8732_v15 = vsel %vm865_vm3, %v3156_v44, %v3157_v39 }
 0x3e3   : > { %v3666_v47 = vpop.f32.mrf.mxu0  ;;  %v3394_v16 = vpop.f32.mrf.mxu2  ;;  %10471 = vst [vmem:[#allocation86_spill] sm:$0xff] %v8732_v15 }
 0x3e4   : > { %v3395_v58 = vadd.f32 %v3394_v16, %v3217_v32  ;;  %v3512_v2 = vpop.f32.mrf.mxu3  ;;  %v3220_v25 = vpop.f32.mrf.mxu1  ;;  %v3817_v63 = vmax.f32 %v3785_v31, 0.0 }
 0x3e6   : > { %6029 = vmatmul.msk.f32.gmra.mxu0 %vm2388_vm4, %v8161_v60  ;;  %v3606_v42 = vadd.f32 %v3512_v2, %v3395_v58  ;;  %3881 = vrot.lane.b32.xlu0 %v3817_v63, %s6341_s27  ;;  %v10472_v58 = vld [vmem:[#allocation54_spill] sm:$0xff] }
 0x3e7   : > { %5928 = vmatmul.msk.f32.gmra.mxu1 %vm2388_vm4, %v8187_v10  ;;  %v3159_v2 = vrot.slane %v10472_v58, 2 }
 0x3e8   : > { %v3754_v33 = vadd.f32 %v3660_v19, %v3606_v42  ;;  %5960 = vmatmul.msk.f32.gmra.mxu2 %vm2388_vm4, %v8732_v15 }
 0x3e9   : > { %5994 = vmatmul.msk.f32.gmra.mxu3 %vm2388_vm4, %v8698_v18  ;;  %v8746_v44 = vsel %vm865_vm3, %v3157_v39, %v3159_v2 }
 0x3ea   : > { %v3786_v31 = vadd.f32 %v8717_v13, %v3754_v33  ;;  %10473 = vst [vmem:[#allocation54_spill] sm:$0xff] %v8746_v44 }
 0x3eb   : > { %v3669_v32 = vpop.f32.mrf.mxu0  ;;  %v3397_v16 = vpop.f32.mrf.mxu2 }
 0x3ec   : > { %v3398_v63 = vadd.f32 %v3397_v16, %v3220_v25  ;;  %v3515_v48 = vpop.f32.mrf.mxu3  ;;  %v3223_v57 = vpop.f32.mrf.mxu1  ;;  %v3818_v38 = vmax.f32 %v3786_v31, 0.0 }
 0x3ee   : > { %6030 = vmatmul.msk.f32.gmra.mxu0 %vm2388_vm4, %v8187_v10  ;;  %v3607_v19 = vadd.f32 %v3515_v48, %v3398_v63  ;;  %3883 = vrot.lane.b32.xlu0 %v3818_v38, %s6341_s27  ;;  %v3162_v48 = vrot.slane %v7928_v41, 2 }
 0x3ef   : > { %5929 = vmatmul.msk.f32.gmra.mxu1 %vm2388_vm4, %v8203_v26 }
 0x3f0   : > { %v3755_v33 = vadd.f32 %v3663_v61, %v3607_v19  ;;  %5961 = vmatmul.msk.f32.gmra.mxu2 %vm2388_vm4, %v8746_v44  ;;  %v10474_v61 = vld [vmem:[#allocation57_spill] sm:$0xff] }
 0x3f1   : > { %5995 = vmatmul.msk.f32.gmra.mxu3 %vm2388_vm4, %v8712_v50  ;;  %v3161_v39 = vrot.slane %v10474_v61, 2 }
 0x3f2   : > { %v3787_v42 = vadd.f32 %v8717_v13, %v3755_v33 }
 0x3f3   : > { %v3672_v25 = vpop.f32.mrf.mxu0  ;;  %v3400_v31 = vpop.f32.mrf.mxu2  ;;  %v8761_v19 = vsel %vm865_vm3, %v3161_v39, %v3162_v48 }
 0x3f4   : > { %v3401_v38 = vadd.f32 %v3400_v31, %v3223_v57  ;;  %v3518_v16 = vpop.f32.mrf.mxu3  ;;  %v3226_v58 = vpop.f32.mrf.mxu1  ;;  %v3819_v63 = vmax.f32 %v3787_v42, 0.0  ;;  %10475 = vst [vmem:[#allocation57_spill] sm:$0xff] %v8761_v19 }
 0x3f6   : > { %6031 = vmatmul.msk.f32.gmra.mxu0 %vm2388_vm4, %v8203_v26  ;;  %v3608_v2 = vadd.f32 %v3518_v16, %v3401_v38  ;;  %3885 = vrot.lane.b32.xlu1 %v3819_v63, %s6341_s27  ;;  %v10476_v38 = vld [vmem:[#allocation5_spill] sm:$0xff] }
 0x3f7   : > { %5930 = vmatmul.msk.f32.gmra.mxu1 %vm2388_vm4, %v8224_v30  ;;  %v3164_v16 = vrot.slane %v10476_v38, 2 }
 0x3f8   : > { %v3756_v33 = vadd.f32 %v3666_v47, %v3608_v2  ;;  %5962 = vmatmul.msk.f32.gmra.mxu2 %vm2388_vm4, %v8761_v19 }
 0x3f9   : > { %5996 = vmatmul.msk.f32.gmra.mxu3 %vm2388_vm4, %v8732_v15  ;;  %v8775_v39 = vsel %vm865_vm3, %v3162_v48, %v3164_v16 }
 0x3fa   : > { %v3788_v42 = vadd.f32 %v8717_v13, %v3756_v33  ;;  %10477 = vst [vmem:[#allocation5_spill] sm:$0xff] %v8775_v39 }
 0x3fb   : > { %v3675_v57 = vpop.f32.mrf.mxu0  ;;  %v3403_v31 = vpop.f32.mrf.mxu2 }
 0x3fc   : > { %v3404_v63 = vadd.f32 %v3403_v31, %v3226_v58  ;;  %v3521_v50 = vpop.f32.mrf.mxu3  ;;  %v3229_v18 = vpop.f32.mrf.mxu1  ;;  %v3820_v41 = vmax.f32 %v3788_v42, 0.0 }
 0x3fe   : > { %6032 = vmatmul.msk.f32.gmra.mxu0 %vm2388_vm4, %v8224_v30  ;;  %v3609_v47 = vadd.f32 %v3521_v50, %v3404_v63  ;;  %3887 = vrot.lane.b32.xlu1 %v3820_v41, %s6341_s27  ;;  %v3167_v50 = vrot.slane %v7974_v7, 2 }
 0x3ff   : > { %5931 = vmatmul.msk.f32.gmra.mxu1 %vm2388_vm4, %v8240_v52 }
 0x400   : > { %v3757_v2 = vadd.f32 %v3669_v32, %v3609_v47  ;;  %5963 = vmatmul.msk.f32.gmra.mxu2 %vm2388_vm4, %v8775_v39  ;;  %v10478_v32 = vld [vmem:[#allocation13_spill] sm:$0xff] }
 0x401   : > { %5997 = vmatmul.msk.f32.gmra.mxu3 %vm2388_vm4, %v8746_v44  ;;  %v3166_v48 = vrot.slane %v10478_v32, 2 }
 0x402   : > { %v3789_v33 = vadd.f32 %v8717_v13, %v3757_v2 }
 0x403   : > { %v3678_v58 = vpop.f32.mrf.mxu0  ;;  %v3406_v42 = vpop.f32.mrf.mxu2  ;;  %v8790_v47 = vsel %vm865_vm3, %v3166_v48, %v3167_v50 }
 0x404   : > { %v3407_v41 = vadd.f32 %v3406_v42, %v3229_v18  ;;  %v3524_v31 = vpop.f32.mrf.mxu3  ;;  %v3232_v38 = vpop.f32.mrf.mxu1  ;;  %v3821_v63 = vmax.f32 %v3789_v33, 0.0  ;;  %10479 = vst [vmem:[#allocation13_spill] sm:$0xff] %v8790_v47 }
 0x406   : > { %6033 = vmatmul.msk.f32.gmra.mxu0 %vm2388_vm4, %v8240_v52  ;;  %v3610_v16 = vadd.f32 %v3524_v31, %v3407_v41  ;;  %3889 = vrot.lane.b32.xlu2 %v3821_v63, %s6341_s27  ;;  %v10480_v41 = vld [vmem:[#allocation63_spill] sm:$0xff] }
 0x407   : > { %5932 = vmatmul.msk.f32.gmra.mxu1 %vm2388_vm4, %v8261_v36  ;;  %v3169_v31 = vrot.slane %v10480_v41, 2 }
 0x408   : > { %v3758_v2 = vadd.f32 %v3672_v25, %v3610_v16  ;;  %5964 = vmatmul.msk.f32.gmra.mxu2 %vm2388_vm4, %v8790_v47 }
 0x409   : > { %5998 = vmatmul.msk.f32.gmra.mxu3 %vm2388_vm4, %v8761_v19  ;;  %v8804_v48 = vsel %vm865_vm3, %v3167_v50, %v3169_v31 }
 0x40a   : > { %v3790_v33 = vadd.f32 %v8717_v13, %v3758_v2  ;;  %10481 = vst [vmem:[#allocation63_spill] sm:$0xff] %v8804_v48 }
 0x40b   : > { %v3681_v18 = vpop.f32.mrf.mxu0  ;;  %v3409_v42 = vpop.f32.mrf.mxu2 }
 0x40c   : > { %v3410_v63 = vadd.f32 %v3409_v42, %v3232_v38  ;;  %v3527_v44 = vpop.f32.mrf.mxu3  ;;  %v3235_v15 = vpop.f32.mrf.mxu1  ;;  %v3822_v7 = vmax.f32 %v3790_v33, 0.0 }
 0x40e   : > { %6034 = vmatmul.msk.f32.gmra.mxu0 %vm2388_vm4, %v8261_v36  ;;  %v3611_v25 = vadd.f32 %v3527_v44, %v3410_v63  ;;  %3891 = vrot.lane.b32.xlu2 %v3822_v7, %s6341_s27  ;;  %v3172_v44 = vrot.slane %v8020_v22, 2 }
 0x40f   : > { %5933 = vmatmul.msk.f32.gmra.mxu1 %vm2388_vm4, %v8277_v1 }
 0x410   : > { %v3759_v16 = vadd.f32 %v3675_v57, %v3611_v25  ;;  %5965 = vmatmul.msk.f32.gmra.mxu2 %vm2388_vm4, %v8804_v48  ;;  %v10482_v57 = vld [vmem:[#allocation24_spill] sm:$0xff] }
 0x411   : > { %5999 = vmatmul.msk.f32.gmra.mxu3 %vm2388_vm4, %v8775_v39  ;;  %v3171_v50 = vrot.slane %v10482_v57, 2 }
 0x412   : > { %v3791_v2 = vadd.f32 %v8717_v13, %v3759_v16 }
 0x413   : > { %v3684_v38 = vpop.f32.mrf.mxu0  ;;  %v3412_v33 = vpop.f32.mrf.mxu2  ;;  %v8819_v25 = vsel %vm865_vm3, %v3171_v50, %v3172_v44 }
 0x414   : > { %v3413_v7 = vadd.f32 %v3412_v33, %v3235_v15  ;;  %v3530_v42 = vpop.f32.mrf.mxu3  ;;  %v3238_v41 = vpop.f32.mrf.mxu1  ;;  %v3823_v63 = vmax.f32 %v3791_v2, 0.0  ;;  %10483 = vst [vmem:[#allocation24_spill] sm:$0xff] %v8819_v25 }
 0x416   : > { %6035 = vmatmul.msk.f32.gmra.mxu0 %vm2388_vm4, %v8277_v1  ;;  %v3612_v31 = vadd.f32 %v3530_v42, %v3413_v7  ;;  %3893 = vrot.lane.b32.xlu0 %v3823_v63, %s6341_s27  ;;  %v10484_v7 = vld [vmem:[#allocation69_spill] sm:$0xff] }
 0x417   : > { %5934 = vmatmul.msk.f32.gmra.mxu1 %vm2388_vm4, %v8298_v40  ;;  %v3174_v42 = vrot.slane %v10484_v7, 2 }
 0x418   : > { %v3760_v16 = vadd.f32 %v3678_v58, %v3612_v31  ;;  %5966 = vmatmul.msk.f32.gmra.mxu2 %vm2388_vm4, %v8819_v25 }
 0x419   : > { %6000 = vmatmul.msk.f32.gmra.mxu3 %vm2388_vm4, %v8790_v47  ;;  %v8833_v50 = vsel %vm865_vm3, %v3172_v44, %v3174_v42 }
 0x41a   : > { %v3792_v2 = vadd.f32 %v8717_v13, %v3760_v16  ;;  %10485 = vst [vmem:[#allocation69_spill] sm:$0xff] %v8833_v50 }
 0x41b   : > { %v3687_v15 = vpop.f32.mrf.mxu0  ;;  %v3415_v33 = vpop.f32.mrf.mxu2 }
 0x41c   : > { %v3416_v63 = vadd.f32 %v3415_v33, %v3238_v41  ;;  %v3533_v39 = vpop.f32.mrf.mxu3  ;;  %v3241_v19 = vpop.f32.mrf.mxu1  ;;  %v3824_v22 = vmax.f32 %v3792_v2, 0.0 }
 0x41e   : > { %6036 = vmatmul.msk.f32.gmra.mxu0 %vm2388_vm4, %v8298_v40  ;;  %v3613_v58 = vadd.f32 %v3533_v39, %v3416_v63  ;;  %3895 = vrot.lane.b32.xlu1 %v3824_v22, %s6341_s27  ;;  %v3177_v39 = vrot.slane %v8066_v12, 2 }
 0x41f   : > { %5935 = vmatmul.msk.f32.gmra.mxu1 %vm2388_vm4, %v8314_v37 }
 0x420   : > { %v3761_v31 = vadd.f32 %v3681_v18, %v3613_v58  ;;  %5967 = vmatmul.msk.f32.gmra.mxu2 %vm2388_vm4, %v8833_v50  ;;  %v10486_v18 = vld [vmem:[#allocation41_spill] sm:$0xff]  ;;  %v10487_v58 = vld [vmem:[#allocation44_spill] sm:$0xff] }
 0x421   : > { %6001 = vmatmul.msk.f32.gmra.mxu3 %vm2388_vm4, %v8804_v48  ;;  %v3176_v44 = vrot.slane %v10486_v18, 2 }
 0x422   : > { %v3793_v16 = vadd.f32 %v8717_v13, %v3761_v31 }
 0x423   : > { %v3690_v41 = vpop.f32.mrf.mxu0  ;;  %v3418_v2 = vpop.f32.mrf.mxu2  ;;  %v8848_v31 = vsel %vm865_vm3, %v3176_v44, %v3177_v39 }
 0x424   : > { %v3419_v22 = vadd.f32 %v3418_v2, %v3241_v19  ;;  %v3536_v33 = vpop.f32.mrf.mxu3  ;;  %v3244_v7 = vpop.f32.mrf.mxu1  ;;  %v3825_v63 = vmax.f32 %v3793_v16, 0.0  ;;  %10488 = vst [vmem:[#allocation44_spill] sm:$0xff] %v8848_v31 }
 0x426   : > { %6037 = vmatmul.msk.f32.gmra.mxu0 %vm2388_vm4, %v8314_v37  ;;  %v3614_v42 = vadd.f32 %v3536_v33, %v3419_v22  ;;  %3897 = vrot.lane.b32.xlu2 %v3825_v63, %s6341_s27  ;;  %v10489_v22 = vld [vmem:[#allocation71_spill] sm:$0xff] }
 0x427   : > { %5936 = vmatmul.msk.f32.gmra.mxu1 %vm2388_vm4, %v10487_v58  ;;  %v3179_v33 = vrot.slane %v10489_v22, 2 }
 0x428   : > { %v3762_v48 = vadd.f32 %v3684_v38, %v3614_v42  ;;  %5968 = vmatmul.msk.f32.gmra.mxu2 %vm2388_vm4, %v8848_v31 }
 0x429   : > { %6002 = vmatmul.msk.f32.gmra.mxu3 %vm2388_vm4, %v8819_v25  ;;  %v8862_v44 = vsel %vm865_vm3, %v3177_v39, %v3179_v33 }
 0x42a   : > { %v3794_v16 = vadd.f32 %v8717_v13, %v3762_v48  ;;  %10490 = vst [vmem:[#allocation71_spill] sm:$0xff] %v8862_v44 }
 0x42b   : > { %v3693_v19 = vpop.f32.mrf.mxu0  ;;  %v3421_v2 = vpop.f32.mrf.mxu2 }
 0x42c   : > { %v3422_v63 = vadd.f32 %v3421_v2, %v3244_v7  ;;  %v3539_v47 = vpop.f32.mrf.mxu3  ;;  %v3247_v12 = vpop.f32.mrf.mxu1  ;;  %v3826_v18 = vmax.f32 %v3794_v16, 0.0 }
 0x42e   : > { %6038 = vmatmul.msk.f32.gmra.mxu0 %vm2388_vm4, %v10487_v58  ;;  %v3615_v38 = vadd.f32 %v3539_v47, %v3422_v63  ;;  %3899 = vrot.lane.b32.xlu0 %v3826_v18, %s6341_s27  ;;  %v3182_v47 = vrot.slane %v8125_v9, 2 }
 0x42f   : > { %5937 = vmatmul.msk.f32.gmra.mxu1 %vm2388_vm4, %v8351_v59 }
 0x430   : > { %v3763_v48 = vadd.f32 %v3687_v15, %v3615_v38  ;;  %5969 = vmatmul.msk.f32.gmra.mxu2 %vm2388_vm4, %v8862_v44  ;;  %v3181_v15 = vrot.slane %v8363_v6, 2 }
 0x431   : > { %6003 = vmatmul.msk.f32.gmra.mxu3 %vm2388_vm4, %v8833_v50 }
 0x432   : > { %v3795_v42 = vadd.f32 %v8717_v13, %v3763_v48  ;;  %v8877_v33 = vsel %vm865_vm3, %v3181_v15, %v3182_v47 }
 0x433   : > { %v3696_v7 = vpop.f32.mrf.mxu0  ;;  %v3424_v16 = vpop.f32.mrf.mxu2 }
 0x434   : > { %v3425_v18 = vadd.f32 %v3424_v16, %v3247_v12  ;;  %v3542_v2 = vpop.f32.mrf.mxu3  ;;  %v3250_v22 = vpop.f32.mrf.mxu1  ;;  %v3827_v63 = vmax.f32 %v3795_v42, 0.0  ;;  %v4602_v12 = vld [vmem:[%s9964_s3 + $0x8] sm:$0xff] }
 0x435   : > { %4733 = vmatpush.msra.mxu2 %v4602_v12  ;;  %v6243_v16 = vld [vmem:[%s9964_s3 + $0x88] sm:$0xff] }
 0x436   : > { %6039 = vmatmul.msk.f32.gmra.mxu0 %vm2388_vm4, %v8351_v59  ;;  %v3616_v39 = vadd.f32 %v3542_v2, %v3425_v18  ;;  %3901 = vrot.lane.b32.xlu1 %v3827_v63, %s6341_s27 }
 0x437   : > { %5938 = vmatmul.msk.f32.gmra.mxu1 %vm2388_vm4, %v8372_v21  ;;  %4849 = vmatpush.msra.mxu3 %v6243_v16 }
 0x438   : > { %v3764_v38 = vadd.f32 %v3690_v41, %v3616_v39  ;;  %5970 = vmatmul.msk.f32.gmra.mxu2 %vm2388_vm4, %v8877_v33  ;;  %v10491_v41 = vld [vmem:[#allocation72_spill] sm:$0xff] }
 0x439   : > { %6004 = vmatmul.msk.f32.gmra.mxu3 %vm2388_vm4, %v8848_v31  ;;  %v3184_v2 = vrot.slane %v10491_v41, 2 }
 0x43a   : > { %v3796_v42 = vadd.f32 %v8717_v13, %v3764_v38 }
 0x43b   : > { %v3699_v48 = vpop.f32.mrf.mxu0  ;;  %v3427_v18 = vpop.f32.mrf.mxu2  ;;  %v8897_v38 = vsel %vm865_vm3, %v3182_v47, %v3184_v2 }
 0x43c   : > { %v3428_v63 = vadd.f32 %v3427_v18, %v3250_v22  ;;  %v3545_v15 = vpop.f32.mrf.mxu3  ;;  %v3253_v39 = vpop.f32.mrf.mxu1  ;;  %v3828_v31 = vmax.f32 %v3796_v42, 0.0  ;;  %v6177_v22 = vld [vmem:[%s9964_s3 + $0x28] sm:$0xff]  ;;  %v3187_v18 = vrot.slane %v8168_v20, 2 }
 0x43d   : > { %4620 = vmatpush.msra.mxu1 %v6177_v22 }
 0x43e   : > { %6040 = vmatmul.msk.f32.gmra.mxu0 %vm2388_vm4, %v8372_v21  ;;  %v3617_v50 = vadd.f32 %v3545_v15, %v3428_v63  ;;  %3903 = vrot.lane.b32.xlu2 %v3828_v31, %s6341_s27  ;;  %v3186_v63 = vrot.slane %v8406_v46, 2 }
 0x43f   : > { %5939 = vmatmul.msk.f32.gmra.mxu1 %vm2388_vm4, %v8394_v34 }
 0x440   : > { %v3765_v12 = vadd.f32 %v3693_v19, %v3617_v50  ;;  %5971 = vmatmul.msk.f32.gmra.mxu2 %vm2388_vm4, %v8897_v38  ;;  %v6277_v50 = vld [vmem:[%s9964_s3 + $0xa8] sm:$0xff] }
 0x441   : > { %6005 = vmatmul.msk.f32.gmra.mxu3 %vm2388_vm4, %v8862_v44  ;;  %4997 = vmatpush.msra.mxu0 %v6277_v50  ;;  %v10492_v50 = vld [vmem:[#allocation10_spill] sm:$0xff] }
 0x442   : > { %v3797_v31 = vadd.f32 %v8717_v13, %v3765_v12  ;;  %v8918_v12 = vsel %vm865_vm3, %v3186_v63, %v3187_v18 }
 0x443   : > { %v3702_v42 = vpop.f32.mrf.mxu0  ;;  %v3430_v16 = vpop.f32.mrf.mxu2 }
 0x444   : > { %v3431_v19 = vadd.f32 %v3430_v16, %v3253_v39  ;;  %v3548_v47 = vpop.f32.mrf.mxu3  ;;  %v3256_v41 = vpop.f32.mrf.mxu1  ;;  %v3829_v2 = vmax.f32 %v3797_v31, 0.0 }
 0x446   : > { %6041 = vmatmul.msk.f32.gmra.mxu0 %vm2388_vm4, %v8394_v34  ;;  %v3618_v15 = vadd.f32 %v3548_v47, %v3431_v19  ;;  %3905 = vrot.lane.b32.xlu0 %v3829_v2, %s6341_s27  ;;  %v3189_v19 = vrot.slane %v10492_v50, 2 }
 0x447   : > { %5940 = vmatmul.msk.f32.gmra.mxu1 %vm2388_vm4, %v8421_v28 }
 0x448   : > { %v3766_v22 = vadd.f32 %v3696_v7, %v3618_v15  ;;  %5972 = vmatmul.msk.f32.gmra.mxu2 %vm2388_vm4, %v8918_v12  ;;  %v8932_v63 = vsel %vm865_vm3, %v3187_v18, %v3189_v19 }
 0x449   : > { %6006 = vmatmul.msk.f32.gmra.mxu3 %vm2388_vm4, %v8877_v33  ;;  %10493 = vst [vmem:[#allocation72_spill] sm:$0xff] %v8932_v63 }
 0x44a   : > { %v3798_v31 = vadd.f32 %v8717_v13, %v3766_v22 }
 0x44b   : > { %v3705_v39 = vpop.f32.mrf.mxu0  ;;  %v3433_v16 = vpop.f32.mrf.mxu2 }
 0x44c   : > { %v3434_v47 = vadd.f32 %v3433_v16, %v3256_v41  ;;  %v3551_v2 = vpop.f32.mrf.mxu3  ;;  %v3259_v44 = vpop.f32.mrf.mxu1  ;;  %v3830_v25 = vmax.f32 %v3798_v31, 0.0 }
 0x44e   : > { %6144 = vmatmul.msk.f32.vlgmr.msrb.gmra.mxu0 %vm2388_vm4, %v7754_v11  ;;  %v3619_v7 = vadd.f32 %v3551_v2, %v3434_v47  ;;  %3907 = vrot.lane.b32.xlu1 %v3830_v25, %s6341_s27  ;;  %v10494_v11 = vld [vmem:[#allocation38_spill] sm:$0xff] }
 0x44f   : > { %5941 = vmatmul.msk.f32.gmra.mxu1 %vm2388_vm4, %v8439_v17  ;;  %v3047_v31 = vadd.f32 %v8717_v13, %v10494_v11 }
 0x450   : > { %v3767_v15 = vadd.f32 %v3699_v48, %v3619_v7  ;;  %5973 = vmatmul.msk.f32.gmra.mxu2 %vm2388_vm4, %v8932_v63 }
 0x451   : > { %6007 = vmatmul.msk.f32.gmra.mxu3 %vm2388_vm4, %v8897_v38  ;;  %v3079_v19 = vmax.f32 %v3047_v31, 0.0 }
 0x452   : > { %v3799_v22 = vadd.f32 %v8717_v13, %v3767_v15 }
 0x453   : > { %v3708_v41 = vpop.f32.mrf.mxu0  ;;  %v3436_v25 = vpop.f32.mrf.mxu2 }
 0x454   : > { %v3437_v16 = vadd.f32 %v3436_v25, %v3259_v44  ;;  %v3554_v50 = vpop.f32.mrf.mxu3  ;;  %v3262_v47 = vpop.f32.mrf.mxu1  ;;  %v3831_v18 = vmax.f32 %v3799_v22, 0.0  ;;  %v10495_v22 = vld [vmem:[#allocation37_spill] sm:$0xff]  ;;  %v10496_v25 = vld [vmem:[#allocation60_spill] sm:$0xff] }
 0x455   : > { %v3048_v11 = vadd.f32 %v8717_v13, %v10495_v22 }
 0x456   : > { %6145 = vmatmul.msk.f32.gmra.mxu0 %vm2388_vm4, %v7553_v23  ;;  %v3620_v48 = vadd.f32 %v3554_v50, %v3437_v16  ;;  %3909 = vrot.lane.b32.xlu2 %v3831_v18, %s6341_s27 }
 0x457   : > { %6046 = vmatmul.msk.f32.vlgmr.msrb.gmra.mxu1 %vm2388_vm4, %v7799_v27 }
 0x458   : > { %v3768_v44 = vadd.f32 %v3702_v42, %v3620_v48  ;;  %6076 = vmatmul.msk.f32.vlgmr.msrb.gmra.mxu2 %vm2388_vm4, %v7809_v24  ;;  %v3882_v2 = vpop.permute.xlu0 %3881  ;;  %v3051_v42 = vadd.f32 %v8717_v13, %v10496_v25  ;;  %v10497_v25 = vld [vmem:[#allocation8_spill] sm:$0xff] }
 0x459   : > { %6110 = vmatmul.msk.f32.vlgmr.msrb.gmra.mxu3 %vm2388_vm4, %v7763_v5  ;;  %v3977_v23 = vsel %vm514_vm0, %v3079_v19, %v3882_v2  ;;  %v3080_v2 = vmax.f32 %v3048_v11, 0.0  ;;  %v10499_v11 = vld [vmem:[#allocation20_spill] sm:$0xff] }
 0x45a   : > { %5352 = vst.msk [vmem:[%s8948_s14] sm:$0xff] %vm2388_vm4, %v3977_v23  ;;  %v3800_v15 = vadd.f32 %v8717_v13, %v3768_v44  ;;  %v3083_v44 = vmax.f32 %v3051_v42, 0.0  ;;  %v10498_v42 = vld [vmem:[#allocation46_spill] sm:$0xff] }
 0x45b   : > { %v3711_v7 = vpop.f32.mrf.mxu0  ;;  %v3439_v31 = vpop.f32.mrf.mxu2 }
 0x45c   : > { %v3440_v16 = vadd.f32 %v3439_v31, %v3262_v47  ;;  %v3557_v50 = vpop.f32.mrf.mxu3  ;;  %v3265_v18 = vpop.f32.mrf.mxu1  ;;  %v3832_v48 = vmax.f32 %v3800_v15, 0.0 }
 0x45e   : > { %6146 = vmatmul.msk.f32.gmra.mxu0 %vm2388_vm4, %v7799_v27  ;;  %v3621_v19 = vadd.f32 %v3557_v50, %v3440_v16  ;;  %3911 = vrot.lane.b32.xlu0 %v3832_v48, %s6341_s27  ;;  %v3052_v50 = vadd.f32 %v8717_v13, %v10499_v11 }
 0x45f   : > { %6047 = vmatmul.msk.f32.gmra.mxu1 %vm2388_vm4, %v7582_v29 }
 0x460   : > { %v3769_v23 = vadd.f32 %v3705_v39, %v3621_v19  ;;  %6077 = vmatmul.msk.f32.gmra.mxu2 %vm2388_vm4, %v7829_v43  ;;  %v3890_v47 = vpop.permute.xlu2 %3889  ;;  %v3884_v22 = vpop.permute.xlu0 %3883  ;;  %v3049_v39 = vadd.f32 %v8717_v13, %v10498_v42 }
 0x461   : > { %6111 = vmatmul.msk.f32.gmra.mxu3 %vm2388_vm4, %v10497_v25  ;;  %v3981_v27 = vsel %vm514_vm0, %v3083_v44, %v3890_v47  ;;  %v3978_v15 = vsel %vm514_vm0, %v3080_v2, %v3884_v22  ;;  %v3084_v22 = vmax.f32 %v3052_v50, 0.0  ;;  %v10501_v50 = vld [vmem:[#allocation9_spill] sm:$0xff] }
 0x462   : > { %5360 = vst.msk [vmem:[%s8948_s14 + $0x40] sm:$0xff] %vm2388_vm4, %v3981_v27  ;;  %v3801_v16 = vadd.f32 %v8717_v13, %v3769_v23  ;;  %v10500_v23 = vld [vmem:[#allocation3_spill] sm:$0xff]  ;;  %v3081_v27 = vmax.f32 %v3049_v39, 0.0 }
 0x463   : > { %v3714_v31 = vpop.f32.mrf.mxu0  ;;  %5353 = vst.msk [vmem:[%s8948_s14 + $0x8] sm:$0xff] %vm2388_vm4, %v3978_v15  ;;  %v3442_v48 = vpop.f32.mrf.mxu2 }
 0x464   : > { %v3443_v19 = vadd.f32 %v3442_v48, %v3265_v18  ;;  %v3560_v63 = vpop.f32.mrf.mxu3  ;;  %v3268_v44 = vpop.f32.mrf.mxu1  ;;  %v3833_v47 = vmax.f32 %v3801_v16, 0.0 }
 0x466   : > { %6147 = vmatmul.msk.f32.gmra.mxu0 %vm2388_vm4, %v7582_v29  ;;  %v3622_v2 = vadd.f32 %v3560_v63, %v3443_v19  ;;  %3913 = vrot.lane.b32.xlu1 %v3833_v47, %s6341_s27 }
 0x467   : > { %6048 = vmatmul.msk.f32.gmra.mxu1 %vm2388_vm4, %v10500_v23 }
 0x468   : > { %v3770_v42 = vadd.f32 %v3708_v41, %v3622_v2  ;;  %6078 = vmatmul.msk.f32.gmra.mxu2 %vm2388_vm4, %v7855_v51  ;;  %v3892_v18 = vpop.permute.xlu2 %3891  ;;  %v3886_v15 = vpop.permute.xlu1 %3885  ;;  %v3050_v41 = vadd.f32 %v8717_v13, %v10501_v50 }
 0x469   : > { %6112 = vmatmul.msk.f32.gmra.mxu3 %vm2388_vm4, %v7809_v24  ;;  %v3982_v29 = vsel %vm514_vm0, %v3084_v22, %v3892_v18  ;;  %v3979_v63 = vsel %vm514_vm0, %v3081_v27, %v3886_v15  ;;  %v10502_v27 = vld [vmem:[#allocation30_spill] sm:$0xff] }
 0x46a   : > { %5361 = vst.msk [vmem:[%s8948_s14 + $0x48] sm:$0xff] %vm2388_vm4, %v3982_v29  ;;  %v3802_v11 = vadd.f32 %v8717_v13, %v3770_v42  ;;  %v3082_v42 = vmax.f32 %v3050_v41, 0.0 }
 0x46b   : > { %v3717_v16 = vpop.f32.mrf.mxu0  ;;  %5356 = vst.msk [vmem:[%s8948_s14 + $0x20] sm:$0xff] %vm2388_vm4, %v3979_v63  ;;  %v3445_v39 = vpop.f32.mrf.mxu2 }
 0x46c   : > { %v3446_v48 = vadd.f32 %v3445_v39, %v3268_v44  ;;  %v3563_v19 = vpop.f32.mrf.mxu3  ;;  %v3271_v47 = vpop.f32.mrf.mxu1  ;;  %v3834_v2 = vmax.f32 %v3802_v11, 0.0 }
 0x46e   : > { %6148 = vmatmul.msk.f32.gmra.mxu0 %vm2388_vm4, %v10500_v23  ;;  %v3623_v22 = vadd.f32 %v3563_v19, %v3446_v48  ;;  %3915 = vrot.lane.b32.xlu2 %v3834_v2, %s6341_s27  ;;  %v10503_v48 = vld [vmem:[#allocation55_spill] sm:$0xff] }
 0x46f   : > { %6049 = vmatmul.msk.f32.gmra.mxu1 %vm2388_vm4, %v10502_v27 }
 0x470   : > { %v3771_v18 = vadd.f32 %v3711_v7, %v3623_v22  ;;  %6079 = vmatmul.msk.f32.gmra.mxu2 %vm2388_vm4, %v7875_v55  ;;  %v3888_v15 = vpop.permute.xlu1 %3887  ;;  %v10504_v22 = vld [vmem:[#allocation36_spill] sm:$0xff] }
 0x471   : > { %6113 = vmatmul.msk.f32.gmra.mxu3 %vm2388_vm4, %v7829_v43  ;;  %v3980_v44 = vsel %vm514_vm0, %v3082_v42, %v3888_v15  ;;  %v3055_v42 = vadd.f32 %v8717_v13, %v10504_v22 }
 0x472   : > { %5357 = vst.msk [vmem:[%s8948_s14 + $0x28] sm:$0xff] %vm2388_vm4, %v3980_v44  ;;  %v3803_v29 = vadd.f32 %v8717_v13, %v3771_v18 }
 0x473   : > { %v3720_v23 = vpop.f32.mrf.mxu0  ;;  %v3448_v63 = vpop.f32.mrf.mxu2 }
 0x474   : > { %v3449_v11 = vadd.f32 %v3448_v63, %v3271_v47  ;;  %v3566_v50 = vpop.f32.mrf.mxu3  ;;  %v3274_v39 = vpop.f32.mrf.mxu1  ;;  %v3835_v41 = vmax.f32 %v3803_v29, 0.0  ;;  %v10505_v63 = vld [vmem:[#allocation42_spill] sm:$0xff] }
 0x476   : > { %6149 = vmatmul.msk.f32.gmra.mxu0 %vm2388_vm4, %v10502_v27  ;;  %v3624_v7 = vadd.f32 %v3566_v50, %v3449_v11  ;;  %3917 = vrot.lane.b32.xlu0 %v3835_v41, %s6341_s27  ;;  %v3087_v11 = vmax.f32 %v3055_v42, 0.0 }
 0x477   : > { %6050 = vmatmul.msk.f32.gmra.mxu1 %vm2388_vm4, %v10503_v48 }
 0x478   : > { %v3772_v19 = vadd.f32 %v3714_v31, %v3624_v7  ;;  %6080 = vmatmul.msk.f32.gmra.mxu2 %vm2388_vm4, %v7901_v62 }
 0x479   : > { %6114 = vmatmul.msk.f32.gmra.mxu3 %vm2388_vm4, %v7855_v51 }
 0x47a   : > { %v3804_v2 = vadd.f32 %v8717_v13, %v3772_v19  ;;  %v10506_v19 = vld [vmem:[#allocation66_spill] sm:$0xff] }
 0x47b   : > { %v3723_v47 = vpop.f32.mrf.mxu0  ;;  %v3451_v27 = vpop.f32.mrf.mxu2 }
 0x47c   : > { %v3452_v18 = vadd.f32 %v3451_v27, %v3274_v39  ;;  %v3569_v15 = vpop.f32.mrf.mxu3  ;;  %v3277_v44 = vpop.f32.mrf.mxu1  ;;  %v3836_v29 = vmax.f32 %v3804_v2, 0.0  ;;  %v3053_v2 = vadd.f32 %v8717_v13, %v10506_v19 }
 0x47e   : > { %6150 = vmatmul.msk.f32.gmra.mxu0 %vm2388_vm4, %v10503_v48  ;;  %v3625_v31 = vadd.f32 %v3569_v15, %v3452_v18  ;;  %3919 = vrot.lane.b32.xlu1 %v3836_v29, %s6341_s27  ;;  %v10507_v29 = vld [vmem:[#allocation65_spill] sm:$0xff] }
 0x47f   : > { %6051 = vmatmul.msk.f32.gmra.mxu1 %vm2388_vm4, %v10505_v63 }
 0x480   : > { %v3773_v50 = vadd.f32 %v3717_v16, %v3625_v31  ;;  %6081 = vmatmul.msk.f32.gmra.mxu2 %vm2388_vm4, %v7921_v4  ;;  %v3898_v41 = vpop.permute.xlu2 %3897  ;;  %v3085_v31 = vmax.f32 %v3053_v2, 0.0 }
 0x481   : > { %6115 = vmatmul.msk.f32.gmra.mxu3 %vm2388_vm4, %v7875_v55  ;;  %v3985_v39 = vsel %vm514_vm0, %v3087_v11, %v3898_v41 }
 0x482   : > { %5368 = vst.msk [vmem:[%s8948_s14 + $0x80] sm:$0xff] %vm2388_vm4, %v3985_v39  ;;  %v3805_v48 = vadd.f32 %v8717_v13, %v3773_v50  ;;  %v10508_v39 = vld [vmem:[#allocation70_spill] sm:$0xff] }
 0x483   : > { %v3726_v7 = vpop.f32.mrf.mxu0  ;;  %v3454_v22 = vpop.f32.mrf.mxu2 }
 0x484   : > { %v3455_v16 = vadd.f32 %v3454_v22, %v3277_v44  ;;  %v3572_v42 = vpop.f32.mrf.mxu3  ;;  %v3280_v27 = vpop.f32.mrf.mxu1  ;;  %v3837_v18 = vmax.f32 %v3805_v48, 0.0  ;;  %v3054_v48 = vadd.f32 %v8717_v13, %v10508_v39 }
 0x486   : > { %6151 = vmatmul.msk.f32.gmra.mxu0 %vm2388_vm4, %v10505_v63  ;;  %v3626_v15 = vadd.f32 %v3572_v42, %v3455_v16  ;;  %3921 = vrot.lane.b32.xlu2 %v3837_v18, %s6341_s27  ;;  %v10509_v18 = vld [vmem:[#allocation56_spill] sm:$0xff] }
 0x487   : > { %6052 = vmatmul.msk.f32.gmra.mxu1 %vm2388_vm4, %v10507_v29 }
 0x488   : > { %v3774_v11 = vadd.f32 %v3720_v23, %v3626_v15  ;;  %6082 = vmatmul.msk.f32.gmra.mxu2 %vm2388_vm4, %v7947_v14  ;;  %v3894_v50 = vpop.permute.xlu0 %3893  ;;  %v3086_v15 = vmax.f32 %v3054_v48, 0.0 }
 0x489   : > { %6116 = vmatmul.msk.f32.gmra.mxu3 %vm2388_vm4, %v7901_v62  ;;  %v3983_v44 = vsel %vm514_vm0, %v3085_v31, %v3894_v50 }
 0x48a   : > { %5364 = vst.msk [vmem:[%s8948_s14 + $0x60] sm:$0xff] %vm2388_vm4, %v3983_v44  ;;  %v3806_v41 = vadd.f32 %v8717_v13, %v3774_v11  ;;  %v10510_v44 = vld [vmem:[#allocation18_spill] sm:$0xff] }
 0x48b   : > { %v3729_v63 = vpop.f32.mrf.mxu0  ;;  %v3457_v19 = vpop.f32.mrf.mxu2 }
 0x48c   : > { %v3458_v23 = vadd.f32 %v3457_v19, %v3280_v27  ;;  %v3575_v2 = vpop.f32.mrf.mxu3  ;;  %v3283_v22 = vpop.f32.mrf.mxu1  ;;  %v3838_v16 = vmax.f32 %v3806_v41, 0.0  ;;  %v3058_v41 = vadd.f32 %v8717_v13, %v10510_v44 }
 0x48e   : > { %6152 = vmatmul.msk.f32.gmra.mxu0 %vm2388_vm4, %v10507_v29  ;;  %v3627_v42 = vadd.f32 %v3575_v2, %v3458_v23  ;;  %3923 = vrot.lane.b32.xlu0 %v3838_v16, %s6341_s27  ;;  %v10511_v16 = vld [vmem:[#allocation23_spill] sm:$0xff] }
 0x48f   : > { %6053 = vmatmul.msk.f32.gmra.mxu1 %vm2388_vm4, %v10509_v18 }
 0x490   : > { %v3775_v31 = vadd.f32 %v3723_v47, %v3627_v42  ;;  %6083 = vmatmul.msk.f32.gmra.mxu2 %vm2388_vm4, %v7967_v53  ;;  %v3896_v11 = vpop.permute.xlu1 %3895  ;;  %v3090_v42 = vmax.f32 %v3058_v41, 0.0 }
 0x491   : > { %6117 = vmatmul.msk.f32.gmra.mxu3 %vm2388_vm4, %v7921_v4  ;;  %v3984_v27 = vsel %vm514_vm0, %v3086_v15, %v3896_v11 }
 0x492   : > { %5365 = vst.msk [vmem:[%s8948_s14 + $0x68] sm:$0xff] %vm2388_vm4, %v3984_v27  ;;  %v3807_v50 = vadd.f32 %v8717_v13, %v3775_v31  ;;  %v10512_v27 = vld [vmem:[#allocation40_spill] sm:$0xff] }
 0x493   : > { %v3732_v29 = vpop.f32.mrf.mxu0  ;;  %v3460_v39 = vpop.f32.mrf.mxu2 }
 0x494   : > { %v3461_v47 = vadd.f32 %v3460_v39, %v3283_v22  ;;  %v3578_v48 = vpop.f32.mrf.mxu3  ;;  %v3286_v19 = vpop.f32.mrf.mxu1  ;;  %v3839_v23 = vmax.f32 %v3807_v50, 0.0  ;;  %v3056_v50 = vadd.f32 %v8717_v13, %v10512_v27 }
 0x496   : > { %6153 = vmatmul.msk.f32.gmra.mxu0 %vm2388_vm4, %v10509_v18  ;;  %v3628_v2 = vadd.f32 %v3578_v48, %v3461_v47  ;;  %3925 = vrot.lane.b32.xlu1 %v3839_v23, %s6341_s27  ;;  %v10513_v23 = vld [vmem:[#allocation51_spill] sm:$0xff] }
 0x497   : > { %6054 = vmatmul.msk.f32.gmra.mxu1 %vm2388_vm4, %v10511_v16 }
 0x498   : > { %v3776_v15 = vadd.f32 %v3726_v7, %v3628_v2  ;;  %6084 = vmatmul.msk.f32.gmra.mxu2 %vm2388_vm4, %v7993_v54  ;;  %v3904_v31 = vpop.permute.xlu2 %3903  ;;  %v3088_v2 = vmax.f32 %v3056_v50, 0.0 }
 0x499   : > { %6118 = vmatmul.msk.f32.gmra.mxu3 %vm2388_vm4, %v7947_v14  ;;  %v3988_v22 = vsel %vm514_vm0, %v3090_v42, %v3904_v31 }
 0x49a   : > { %5373 = vst.msk [vmem:[%s8948_s14 + $0xa8] sm:$0xff] %vm2388_vm4, %v3988_v22  ;;  %v3808_v11 = vadd.f32 %v8717_v13, %v3776_v15  ;;  %v10514_v15 = vld [vmem:[#allocation61_spill] sm:$0xff] }
 0x49b   : > { %v3735_v18 = vpop.f32.mrf.mxu0  ;;  %v3463_v44 = vpop.f32.mrf.mxu2 }
 0x49c   : > { %v3464_v7 = vadd.f32 %v3463_v44, %v3286_v19  ;;  %v3581_v41 = vpop.f32.mrf.mxu3  ;;  %v3289_v39 = vpop.f32.mrf.mxu1  ;;  %v3840_v47 = vmax.f32 %v3808_v11, 0.0  ;;  %v10515_v11 = vld [vmem:[#allocation47_spill] sm:$0xff] }
 0x49d   : > { %v3057_v27 = vadd.f32 %v8717_v13, %v10515_v11 }
 0x49e   : > { %6154 = vmatmul.msk.f32.gmra.mxu0 %vm2388_vm4, %v10511_v16  ;;  %v3629_v48 = vadd.f32 %v3581_v41, %v3464_v7  ;;  %3927 = vrot.lane.b32.xlu2 %v3840_v47, %s6341_s27 }
 0x49f   : > { %6055 = vmatmul.msk.f32.gmra.mxu1 %vm2388_vm4, %v10513_v23 }
 0x4a0   : > { %v3777_v42 = vadd.f32 %v3729_v63, %v3629_v48  ;;  %6085 = vmatmul.msk.f32.gmra.mxu2 %vm2388_vm4, %v10514_v15  ;;  %v3900_v31 = vpop.permute.xlu0 %3899  ;;  %v10516_v48 = vld [vmem:[#allocation31_spill] sm:$0xff] }
 0x4a1   : > { %6119 = vmatmul.msk.f32.gmra.mxu3 %vm2388_vm4, %v7967_v53  ;;  %v3986_v19 = vsel %vm514_vm0, %v3088_v2, %v3900_v31  ;;  %v3089_v2 = vmax.f32 %v3057_v27, 0.0 }
 0x4a2   : > { %5369 = vst.msk [vmem:[%s8948_s14 + $0x88] sm:$0xff] %vm2388_vm4, %v3986_v19  ;;  %v3809_v22 = vadd.f32 %v8717_v13, %v3777_v42 }
 0x4a3   : > { %v3738_v16 = vpop.f32.mrf.mxu0  ;;  %v3466_v50 = vpop.f32.mrf.mxu2 }
 0x4a4   : > { %v3467_v63 = vadd.f32 %v3466_v50, %v3289_v39  ;;  %v3584_v44 = vpop.f32.mrf.mxu3  ;;  %v3292_v7 = vpop.f32.mrf.mxu1  ;;  %v3841_v41 = vmax.f32 %v3809_v22, 0.0  ;;  %v10517_v22 = vld [vmem:[#allocation6_spill] sm:$0xff] }
 0x4a5   : > { %v3061_v11 = vadd.f32 %v8717_v13, %v10517_v22 }
 0x4a6   : > { %6155 = vmatmul.msk.f32.gmra.mxu0 %vm2388_vm4, %v10513_v23  ;;  %v3630_v47 = vadd.f32 %v3584_v44, %v3467_v63  ;;  %3929 = vrot.lane.b32.xlu0 %v3841_v41, %s6341_s27 }
 0x4a7   : > { %6056 = vmatmul.msk.f32.gmra.mxu1 %vm2388_vm4, %v10516_v48 }
 0x4a8   : > { %v3778_v42 = vadd.f32 %v3732_v29, %v3630_v47  ;;  %6086 = vmatmul.msk.f32.gmra.mxu2 %vm2388_vm4, %v10455_v49  ;;  %v3902_v31 = vpop.permute.xlu1 %3901  ;;  %v10518_v47 = vld [vmem:[#allocation4_spill] sm:$0xff] }
 0x4a9   : > { %6120 = vmatmul.msk.f32.gmra.mxu3 %vm2388_vm4, %v7993_v54  ;;  %v3987_v39 = vsel %vm514_vm0, %v3089_v2, %v3902_v31  ;;  %v3093_v2 = vmax.f32 %v3061_v11, 0.0 }
 0x4aa   : > { %5372 = vst.msk [vmem:[%s8948_s14 + $0xa0] sm:$0xff] %vm2388_vm4, %v3987_v39  ;;  %v3810_v19 = vadd.f32 %v8717_v13, %v3778_v42 }
 0x4ab   : > { %v3741_v23 = vpop.f32.mrf.mxu0  ;;  %v3469_v27 = vpop.f32.mrf.mxu2 }
 0x4ac   : > { %v3470_v29 = vadd.f32 %v3469_v27, %v3292_v7  ;;  %v3587_v50 = vpop.f32.mrf.mxu3  ;;  %v3295_v63 = vpop.f32.mrf.mxu1  ;;  %v3842_v44 = vmax.f32 %v3810_v19, 0.0  ;;  %v10519_v19 = vld [vmem:[#allocation7_spill] sm:$0xff] }
 0x4ad   : > { %v3059_v22 = vadd.f32 %v8717_v13, %v10519_v19  ;;  %v10521_v19 = vld [vmem:[#allocation33_spill] sm:$0xff] }
 0x4ae   : > { %6156 = vmatmul.msk.f32.gmra.mxu0 %vm2388_vm4, %v10516_v48  ;;  %v3631_v41 = vadd.f32 %v3587_v50, %v3470_v29  ;;  %3931 = vrot.lane.b32.xlu1 %v3842_v44, %s6341_s27 }
 0x4af   : > { %6057 = vmatmul.msk.f32.gmra.mxu1 %vm2388_vm4, %v10518_v47 }
 0x4b0   : > { %v3779_v42 = vadd.f32 %v3735_v18, %v3631_v41  ;;  %6087 = vmatmul.msk.f32.gmra.mxu2 %vm2388_vm4, %v8059_v35  ;;  %v3910_v31 = vpop.permute.xlu2 %3909  ;;  %v10520_v41 = vld [vmem:[#allocation35_spill] sm:$0xff] }
 0x4b1   : > { %6121 = vmatmul.msk.f32.gmra.mxu3 %vm2388_vm4, %v10514_v15  ;;  %v3991_v7 = vsel %vm514_vm0, %v3093_v2, %v3910_v31  ;;  %v3091_v2 = vmax.f32 %v3059_v22, 0.0  ;;  %v3060_v22 = vadd.f32 %v8717_v13, %v10521_v19  ;;  %v10523_v19 = vld [vmem:[#allocation17_spill] sm:$0xff] }
 0x4b2   : > { %5380 = vst.msk [vmem:[%s8948_s14 + $0xe0] sm:$0xff] %vm2388_vm4, %v3991_v7  ;;  %v3811_v39 = vadd.f32 %v8717_v13, %v3779_v42 }
 0x4b3   : > { %v3744_v48 = vpop.f32.mrf.mxu0  ;;  %v3472_v27 = vpop.f32.mrf.mxu2 }
 0x4b4   : > { %v3473_v18 = vadd.f32 %v3472_v27, %v3295_v63  ;;  %v3590_v11 = vpop.f32.mrf.mxu3  ;;  %v3298_v29 = vpop.f32.mrf.mxu1  ;;  %v3843_v50 = vmax.f32 %v3811_v39, 0.0 }
 0x4b6   : > { %6157 = vmatmul.msk.f32.gmra.mxu0 %vm2388_vm4, %v10518_v47  ;;  %v3632_v44 = vadd.f32 %v3590_v11, %v3473_v18  ;;  %3933 = vrot.lane.b32.xlu2 %v3843_v50, %s6341_s27  ;;  %v4601_v47 = vld [vmem:[%s9964_s3] sm:$0xff] }
 0x4b7   : > { %6058 = vmatmul.msk.f32.gmra.mxu1 %vm2388_vm4, %v10520_v41  ;;  %4734 = vmatpush.msra.mxu2 %v4601_v47  ;;  %v9168_v47 = vld [vmem:[%s9965_s4] ss:$0 sm:$0xff] }
 0x4b8   : > { %v3780_v42 = vadd.f32 %v3738_v16, %v3632_v44  ;;  %6088 = vmatmul.msk.f32.gmra.mxu2 %vm2388_vm4, %v10462_v0  ;;  %v3906_v31 = vpop.permute.xlu0 %3905  ;;  %v6242_v16 = vld [vmem:[%s9964_s3 + $0x80] sm:$0xff] }
 0x4b9   : > { %6122 = vmatmul.msk.f32.gmra.mxu3 %vm2388_vm4, %v10455_v49  ;;  %v3989_v63 = vsel %vm514_vm0, %v3091_v2, %v3906_v31  ;;  %v3092_v31 = vmax.f32 %v3060_v22, 0.0  ;;  %v3064_v22 = vadd.f32 %v9168_v47, %v10523_v19 }
 0x4ba   : > { %5376 = vst.msk [vmem:[%s8948_s14 + $0xc0] sm:$0xff] %vm2388_vm4, %v3989_v63  ;;  %v3812_v39 = vadd.f32 %v8717_v13, %v3780_v42  ;;  %4850 = vmatpush.msra.mxu3 %v6242_v16  ;;  %v10522_v42 = vld [vmem:[#allocation59_spill] sm:$0xff]  ;;  %v6276_v16 = vld [vmem:[%s9964_s3 + $0xa0] sm:$0xff] }
 0x4bb   : > { %v3747_v7 = vpop.f32.mrf.mxu0  ;;  %v3475_v27 = vpop.f32.mrf.mxu2  ;;  %4998 = vmatpush.msra.mxu0 %v6276_v16 }
 0x4bc   : > { %v3476_v18 = vadd.f32 %v3475_v27, %v3298_v29  ;;  %v3593_v11 = vpop.f32.mrf.mxu3  ;;  %v3301_v50 = vpop.f32.mrf.mxu1  ;;  %v3844_v44 = vmax.f32 %v3812_v39, 0.0 }
 0x4be   : > { %6158 = vmatmul.msk.f32.gmra.mxu0 %vm2388_vm4, %v10520_v41  ;;  %v3633_v2 = vadd.f32 %v3593_v11, %v3476_v18  ;;  %3935 = vrot.lane.b32.xlu0 %v3844_v44, %s6341_s27 }
 0x4bf   : > { %6059 = vmatmul.msk.f32.gmra.mxu1 %vm2388_vm4, %v10522_v42 }
 0x4c0   : > { %v3781_v63 = vadd.f32 %v3741_v23, %v3633_v2  ;;  %6089 = vmatmul.msk.f32.gmra.mxu2 %vm2388_vm4, %v8118_v3  ;;  %v3908_v13 = vpop.permute.xlu1 %3907  ;;  %v6176_v23 = vld [vmem:[%s9964_s3 + $0x20] sm:$0xff] }
 0x4c1   : > { %6123 = vmatmul.msk.f32.gmra.mxu3 %vm2388_vm4, %v8059_v35  ;;  %v3990_v29 = vsel %vm514_vm0, %v3092_v31, %v3908_v13  ;;  %4621 = vmatpush.msra.mxu1 %v6176_v23  ;;  %v10524_v23 = vld [vmem:[#allocation73_spill] sm:$0xff] }
 0x4c2   : > { %5377 = vst.msk [vmem:[%s8948_s14 + $0xc8] sm:$0xff] %vm2388_vm4, %v3990_v29  ;;  %v3813_v39 = vadd.f32 %v9168_v47, %v3781_v63  ;;  %v3096_v63 = vmax.f32 %v3064_v22, 0.0  ;;  %v3062_v16 = vadd.f32 %v9168_v47, %v10524_v23 }
 0x4c3   : > { %v3750_v41 = vpop.f32.mrf.mxu0  ;;  %v3478_v27 = vpop.f32.mrf.mxu2 }
 0x4c4   : > { %v3479_v18 = vadd.f32 %v3478_v27, %v3301_v50  ;;  %v3596_v11 = vpop.f32.mrf.mxu3  ;;  %v3304_v44 = vpop.f32.mrf.mxu1  ;;  %v3845_v2 = vmax.f32 %v3813_v39, 0.0 }
 0x4c6   : > { %6159 = vmatmul.msk.f32.gmra.mxu0 %vm2388_vm4, %v10522_v42  ;;  %v3634_v31 = vadd.f32 %v3596_v11, %v3479_v18  ;;  %3937 = vrot.lane.b32.xlu1 %v3845_v2, %s6341_s27  ;;  %v3094_v2 = vmax.f32 %v3062_v16, 0.0 }
 0x4c7   : > { %6060 = vmatmul.msk.f32.gmra.mxu1 %vm2388_vm4, %v8134_v45 }
 0x4c8   : > { %v3782_v13 = vadd.f32 %v3744_v48, %v3634_v31  ;;  %6090 = vmatmul.msk.f32.gmra.mxu2 %vm2388_vm4, %v8143_v8  ;;  %v3916_v29 = vpop.permute.xlu2 %3915 }
 0x4c9   : > { %6124 = vmatmul.msk.f32.gmra.mxu3 %vm2388_vm4, %v10462_v0  ;;  %v3994_v50 = vsel %vm514_vm0, %v3096_v63, %v3916_v29  ;;  %v10525_v29 = vld [vmem:[#allocation74_spill] sm:$0xff] }
 0x4ca   : > { %5385 = vst.msk [vmem:[%s8948_s14 + $0x108] sm:$0xff] %vm2388_vm4, %v3994_v50  ;;  %v3814_v39 = vadd.f32 %v9168_v47, %v3782_v13  ;;  %v3063_v50 = vadd.f32 %v9168_v47, %v10525_v29 }
 0x4cb   : > { %v4409_v42 = vpop.f32.mrf.mxu0  ;;  %v3481_v19 = vpop.f32.mrf.mxu2 }
 0x4cc   : > { %v3482_v48 = vadd.f32 %v3481_v19, %v3304_v44  ;;  %v3599_v22 = vpop.f32.mrf.mxu3  ;;  %v3307_v27 = vpop.f32.mrf.mxu1  ;;  %v3846_v18 = vmax.f32 %v3814_v39, 0.0 }
 0x4ce   : > { %6160 = vmatmul.msk.f32.gmra.mxu0 %vm2388_vm4, %v8134_v45  ;;  %v3635_v11 = vadd.f32 %v3599_v22, %v3482_v48  ;;  %3939 = vrot.lane.b32.xlu2 %v3846_v18, %s6341_s27  ;;  %v10526_v22 = vld [vmem:[#allocation43_spill] sm:$0xff]  ;;  %v3095_v18 = vmax.f32 %v3063_v50, 0.0 }
 0x4cf   : > { %6061 = vmatmul.msk.f32.gmra.mxu1 %vm2388_vm4, %v7836_v56 }
 0x4d0   : > { %v3783_v31 = vadd.f32 %v3747_v7, %v3635_v11  ;;  %6091 = vmatmul.msk.f32.gmra.mxu2 %vm2388_vm4, %v8161_v60  ;;  %v3912_v63 = vpop.permute.xlu0 %3911 }
 0x4d1   : > { %6125 = vmatmul.msk.f32.gmra.mxu3 %vm2388_vm4, %v8118_v3  ;;  %v3992_v44 = vsel %vm514_vm0, %v3094_v2, %v3912_v63  ;;  %v10527_v63 = vld [vmem:[#allocation39_spill] sm:$0xff] }
 0x4d2   : > { %5381 = vst.msk [vmem:[%s8948_s14 + $0xe8] sm:$0xff] %vm2388_vm4, %v3992_v44  ;;  %v3815_v13 = vadd.f32 %v9168_v47, %v3783_v31  ;;  %v3067_v44 = vadd.f32 %v9168_v47, %v10527_v63 }
 0x4d3   : > { %v4412_v45 = vpop.f32.mrf.mxu0  ;;  %v3484_v39 = vpop.f32.mrf.mxu2 }
 0x4d4   : > { %v3485_v7 = vadd.f32 %v3484_v39, %v3307_v27  ;;  %v3602_v23 = vpop.f32.mrf.mxu3  ;;  %v4032_v16 = vpop.f32.mrf.mxu1  ;;  %v3847_v19 = vmax.f32 %v3815_v13, 0.0 }
 0x4d6   : > { %6161 = vmatmul.msk.f32.gmra.mxu0 %vm2388_vm4, %v7836_v56  ;;  %v3636_v48 = vadd.f32 %v3602_v23, %v3485_v7  ;;  %3941 = vrot.lane.b32.xlu0 %v3847_v19, %s6341_s27  ;;  %v10528_v23 = vld [vmem:[#allocation62_spill] sm:$0xff]  ;;  %v3099_v19 = vmax.f32 %v3067_v44, 0.0 }
 0x4d7   : > { %6062 = vmatmul.msk.f32.gmra.mxu1 %vm2388_vm4, %v10526_v22 }
 0x4d8   : > { %v3784_v11 = vadd.f32 %v3750_v41, %v3636_v48  ;;  %6092 = vmatmul.msk.f32.gmra.mxu2 %vm2388_vm4, %v8187_v10  ;;  %v3914_v2 = vpop.permute.xlu1 %3913 }
 0x4d9   : > { %6126 = vmatmul.msk.f32.gmra.mxu3 %vm2388_vm4, %v8143_v8  ;;  %v3993_v27 = vsel %vm514_vm0, %v3095_v18, %v3914_v2 }
 0x4da   : > { %5384 = vst.msk [vmem:[%s8948_s14 + $0x100] sm:$0xff] %vm2388_vm4, %v3993_v27  ;;  %v3816_v31 = vadd.f32 %v9168_v47, %v3784_v11  ;;  %v10529_v11 = vld [vmem:[#allocation75_spill] sm:$0xff] }
 0x4db   : > { %v4415_v56 = vpop.f32.mrf.mxu0  ;;  %v4145_v13 = vpop.f32.mrf.mxu2  ;;  %v3065_v2 = vadd.f32 %v9168_v47, %v10529_v11 }
 0x4dc   : > { %v4146_v41 = vadd.f32 %v4145_v13, %v4032_v16  ;;  %v4261_v29 = vpop.f32.mrf.mxu3  ;;  %v4035_v50 = vpop.f32.mrf.mxu1  ;;  %v3848_v39 = vmax.f32 %v3816_v31, 0.0 }
 0x4dd   : > { %v3097_v13 = vmax.f32 %v3065_v2, 0.0  ;;  %v10531_v2 = vld [vmem:[#allocation19_spill] sm:$0xff] }
 0x4de   : > { %6162 = vmatmul.msk.f32.gmra.mxu0 %vm2388_vm4, %v10526_v22  ;;  %v4357_v7 = vadd.f32 %v4261_v29, %v4146_v41  ;;  %3943 = vrot.lane.b32.xlu1 %v3848_v39, %s6341_s27 }
 0x4df   : > { %6063 = vmatmul.msk.f32.gmra.mxu1 %vm2388_vm4, %v10528_v23 }
 0x4e0   : > { %v9229_v48 = vadd.f32 %v4409_v42, %v4357_v7  ;;  %6093 = vmatmul.msk.f32.gmra.mxu2 %vm2388_vm4, %v8203_v26  ;;  %v3922_v18 = vpop.permute.xlu2 %3921  ;;  %v10530_v7 = vld [vmem:[#allocation32_spill] sm:$0xff] }
 0x4e1   : > { %6127 = vmatmul.msk.f32.gmra.mxu3 %vm2388_vm4, %v8161_v60  ;;  %v3997_v16 = vsel %vm514_vm0, %v3099_v19, %v3922_v18 }
 0x4e2   : > { %5392 = vst.msk [vmem:[%s8948_s14 + $0x140] sm:$0xff] %vm2388_vm4, %v3997_v16 }
 0x4e3   : > { %v4418_v22 = vpop.f32.mrf.mxu0  ;;  %v4148_v27 = vpop.f32.mrf.mxu2 }
 0x4e4   : > { %v4149_v31 = vadd.f32 %v4148_v27, %v4035_v50  ;;  %v4264_v42 = vpop.f32.mrf.mxu3  ;;  %v4038_v63 = vpop.f32.mrf.mxu1 }
 0x4e6   : > { %6163 = vmatmul.msk.f32.gmra.mxu0 %vm2388_vm4, %v10528_v23  ;;  %v4358_v44 = vadd.f32 %v4264_v42, %v4149_v31  ;;  %v3066_v23 = vadd.f32 %v9168_v47, %v10530_v7 }
 0x4e7   : > { %6064 = vmatmul.msk.f32.gmra.mxu1 %vm2388_vm4, %v10474_v61 }
 0x4e8   : > { %v9244_v41 = vadd.f32 %v4412_v45, %v4358_v44  ;;  %6094 = vmatmul.msk.f32.gmra.mxu2 %vm2388_vm4, %v8224_v30  ;;  %v3918_v29 = vpop.permute.xlu0 %3917  ;;  %v3098_v27 = vmax.f32 %v3066_v23, 0.0  ;;  %v10532_v44 = vld [vmem:[#allocation34_spill] sm:$0xff] }
 0x4e9   : > { %6128 = vmatmul.msk.f32.gmra.mxu3 %vm2388_vm4, %v8187_v10  ;;  %v3995_v50 = vsel %vm514_vm0, %v3097_v13, %v3918_v29  ;;  %v3070_v13 = vadd.f32 %v9168_v47, %v10532_v44 }
 0x4ea   : > { %5388 = vst.msk [vmem:[%s8948_s14 + $0x120] sm:$0xff] %vm2388_vm4, %v3995_v50 }
 0x4eb   : > { %v4421_v39 = vpop.f32.mrf.mxu0  ;;  %v4151_v19 = vpop.f32.mrf.mxu2 }
 0x4ec   : > { %v4152_v18 = vadd.f32 %v4151_v19, %v4038_v63  ;;  %v4267_v45 = vpop.f32.mrf.mxu3  ;;  %v4041_v16 = vpop.f32.mrf.mxu1  ;;  %v3102_v19 = vmax.f32 %v3070_v13, 0.0 }
 0x4ee   : > { %6164 = vmatmul.msk.f32.gmra.mxu0 %vm2388_vm4, %v10474_v61  ;;  %v4359_v11 = vadd.f32 %v4267_v45, %v4152_v18 }
 0x4ef   : > { %6065 = vmatmul.msk.f32.gmra.mxu1 %vm2388_vm4, %v10531_v2 }
 0x4f0   : > { %v9259_v31 = vadd.f32 %v4415_v56, %v4359_v11  ;;  %6095 = vmatmul.msk.f32.gmra.mxu2 %vm2388_vm4, %v8240_v52  ;;  %v3920_v42 = vpop.permute.xlu1 %3919 }
 0x4f1   : > { %6129 = vmatmul.msk.f32.gmra.mxu3 %vm2388_vm4, %v8203_v26  ;;  %v3996_v63 = vsel %vm514_vm0, %v3098_v27, %v3920_v42 }
 0x4f2   : > { %5389 = vst.msk [vmem:[%s8948_s14 + $0x128] sm:$0xff] %vm2388_vm4, %v3996_v63 }
 0x4f3   : > { %v4424_v61 = vpop.f32.mrf.mxu0  ;;  %v4154_v29 = vpop.f32.mrf.mxu2 }
 0x4f4   : > { %v4155_v50 = vadd.f32 %v4154_v29, %v4041_v16  ;;  %v4270_v56 = vpop.f32.mrf.mxu3  ;;  %v4044_v7 = vpop.f32.mrf.mxu1  ;;  %v10534_v29 = vld [vmem:[#allocation14_spill] sm:$0xff] }
 0x4f6   : > { %6165 = vmatmul.msk.f32.gmra.mxu0 %vm2388_vm4, %v10531_v2  ;;  %v4360_v23 = vadd.f32 %v4270_v56, %v4155_v50  ;;  %v10533_v2 = vld [vmem:[#allocation45_spill] sm:$0xff] }
 0x4f7   : > { %6066 = vmatmul.msk.f32.gmra.mxu1 %vm2388_vm4, %v10478_v32  ;;  %v3068_v27 = vadd.f32 %v9168_v47, %v10533_v2 }
 0x4f8   : > { %v9274_v18 = vadd.f32 %v4418_v22, %v4360_v23  ;;  %6096 = vmatmul.msk.f32.gmra.mxu2 %vm2388_vm4, %v8261_v36  ;;  %v3928_v45 = vpop.permute.xlu2 %3927 }
 0x4f9   : > { %6130 = vmatmul.msk.f32.gmra.mxu3 %vm2388_vm4, %v8224_v30  ;;  %v4000_v16 = vsel %vm514_vm0, %v3102_v19, %v3928_v45  ;;  %v3100_v50 = vmax.f32 %v3068_v27, 0.0  ;;  %v10535_v19 = vld [vmem:[#allocation48_spill] sm:$0xff] }
 0x4fa   : > { %5397 = vst.msk [vmem:[%s8948_s14 + $0x168] sm:$0xff] %vm2388_vm4, %v4000_v16  ;;  %v3069_v45 = vadd.f32 %v9168_v47, %v10535_v19 }
 0x4fb   : > { %v4427_v11 = vpop.f32.mrf.mxu0  ;;  %v4157_v42 = vpop.f32.mrf.mxu2 }
 0x4fc   : > { %v4158_v63 = vadd.f32 %v4157_v42, %v4044_v7  ;;  %v4273_v22 = vpop.f32.mrf.mxu3  ;;  %v4047_v44 = vpop.f32.mrf.mxu1 }
 0x4fe   : > { %6166 = vmatmul.msk.f32.gmra.mxu0 %vm2388_vm4, %v10478_v32  ;;  %v4361_v13 = vadd.f32 %v4273_v22, %v4158_v63  ;;  %v3101_v63 = vmax.f32 %v3069_v45, 0.0 }
 0x4ff   : > { %6067 = vmatmul.msk.f32.gmra.mxu1 %vm2388_vm4, %v10534_v29 }
 0x500   : > { %v9289_v56 = vadd.f32 %v4421_v39, %v4361_v13  ;;  %6097 = vmatmul.msk.f32.gmra.mxu2 %vm2388_vm4, %v8277_v1  ;;  %v3924_v23 = vpop.permute.xlu0 %3923 }
 0x501   : > { %6131 = vmatmul.msk.f32.gmra.mxu3 %vm2388_vm4, %v8240_v52  ;;  %v3998_v7 = vsel %vm514_vm0, %v3100_v50, %v3924_v23  ;;  %v10536_v50 = vld [vmem:[#allocation78_spill] sm:$0xff] }
 0x502   : > { %5393 = vst.msk [vmem:[%s8948_s14 + $0x148] sm:$0xff] %vm2388_vm4, %v3998_v7  ;;  %v3073_v23 = vadd.f32 %v9168_v47, %v10536_v50 }
 0x503   : > { %v4430_v32 = vpop.f32.mrf.mxu0  ;;  %v4160_v16 = vpop.f32.mrf.mxu2 }
 0x504   : > { %v4161_v2 = vadd.f32 %v4160_v16, %v4047_v44  ;;  %v4276_v39 = vpop.f32.mrf.mxu3  ;;  %v4050_v27 = vpop.f32.mrf.mxu1 }
 0x506   : > { %6167 = vmatmul.msk.f32.gmra.mxu0 %vm2388_vm4, %v10534_v29  ;;  %v4362_v42 = vadd.f32 %v4276_v39, %v4161_v2  ;;  %v10537_v2 = vld [vmem:[#allocation26_spill] sm:$0xff]  ;;  %v3105_v39 = vmax.f32 %v3073_v23, 0.0 }
 0x507   : > { %6068 = vmatmul.msk.f32.gmra.mxu1 %vm2388_vm4, %v10482_v57 }
 0x508   : > { %v9304_v22 = vadd.f32 %v4424_v61, %v4362_v42  ;;  %6098 = vmatmul.msk.f32.gmra.mxu2 %vm2388_vm4, %v8298_v40  ;;  %v3926_v13 = vpop.permute.xlu1 %3925 }
 0x509   : > { %6132 = vmatmul.msk.f32.gmra.mxu3 %vm2388_vm4, %v8261_v36  ;;  %v3999_v44 = vsel %vm514_vm0, %v3101_v63, %v3926_v13  ;;  %v10538_v13 = vld [vmem:[#allocation12_spill] sm:$0xff] }
 0x50a   : > { %5396 = vst.msk [vmem:[%s8948_s14 + $0x160] sm:$0xff] %vm2388_vm4, %v3999_v44  ;;  %v3071_v44 = vadd.f32 %v9168_v47, %v10538_v13 }
 0x50b   : > { %v4433_v29 = vpop.f32.mrf.mxu0  ;;  %v4163_v7 = vpop.f32.mrf.mxu2 }
 0x50c   : > { %v4164_v19 = vadd.f32 %v4163_v7, %v4050_v27  ;;  %v4279_v61 = vpop.f32.mrf.mxu3  ;;  %v4053_v45 = vpop.f32.mrf.mxu1 }
 0x50e   : > { %6168 = vmatmul.msk.f32.gmra.mxu0 %vm2388_vm4, %v10482_v57  ;;  %v4363_v16 = vadd.f32 %v4279_v61, %v4164_v19  ;;  %v10539_v61 = vld [vmem:[#allocation41_spill] sm:$0xff] }
 0x50f   : > { %6069 = vmatmul.msk.f32.gmra.mxu1 %vm2388_vm4, %v10537_v2 }
 0x510   : > { %v9319_v42 = vadd.f32 %v4427_v11, %v4363_v16  ;;  %6099 = vmatmul.msk.f32.gmra.mxu2 %vm2388_vm4, %v8314_v37  ;;  %v3934_v63 = vpop.permute.xlu2 %3933  ;;  %v3103_v16 = vmax.f32 %v3071_v44, 0.0 }
 0x511   : > { %6133 = vmatmul.msk.f32.gmra.mxu3 %vm2388_vm4, %v8277_v1  ;;  %v4003_v27 = vsel %vm514_vm0, %v3105_v39, %v3934_v63 }
 0x512   : > { %5404 = vst.msk [vmem:[%s8948_s14 + $0x1a0] sm:$0xff] %vm2388_vm4, %v4003_v27  ;;  %v10541_v27 = vld [vmem:[#allocation58_spill] sm:$0xff] }
 0x513   : > { %v4436_v57 = vpop.f32.mrf.mxu0  ;;  %v4166_v50 = vpop.f32.mrf.mxu2  ;;  %v3072_v13 = vadd.f32 %v9168_v47, %v10541_v27 }
 0x514   : > { %v4167_v23 = vadd.f32 %v4166_v50, %v4053_v45  ;;  %v4282_v11 = vpop.f32.mrf.mxu3  ;;  %v4056_v7 = vpop.f32.mrf.mxu1 }
 0x516   : > { %6169 = vmatmul.msk.f32.gmra.mxu0 %vm2388_vm4, %v10537_v2  ;;  %v4364_v19 = vadd.f32 %v4282_v11, %v4167_v23 }
 0x517   : > { %6070 = vmatmul.msk.f32.gmra.mxu1 %vm2388_vm4, %v10539_v61 }
 0x518   : > { %v9334_v39 = vadd.f32 %v4430_v32, %v4364_v19  ;;  %6100 = vmatmul.msk.f32.gmra.mxu2 %vm2388_vm4, %v10487_v58  ;;  %v3930_v63 = vpop.permute.xlu0 %3929  ;;  %v10542_v19 = vld [vmem:[#allocation25_spill] sm:$0xff] }
 0x519   : > { %6134 = vmatmul.msk.f32.gmra.mxu3 %vm2388_vm4, %v8298_v40  ;;  %v4001_v45 = vsel %vm514_vm0, %v3103_v16, %v3930_v63 }
 0x51a   : > { %10540 = vst [vmem:[#allocation10_spill] sm:$0xff] %v9334_v39  ;;  %v3104_v39 = vmax.f32 %v3072_v13, 0.0 }
 0x51b   : > { %5400 = vst.msk [vmem:[%s8948_s14 + $0x180] sm:$0xff] %vm2388_vm4, %v4001_v45  ;;  %v4439_v2 = vpop.f32.mrf.mxu0  ;;  %v4169_v50 = vpop.f32.mrf.mxu2  ;;  %v10543_v45 = vld [vmem:[#allocation81_spill] sm:$0xff] }
 0x51c   : > { %v4170_v44 = vadd.f32 %v4169_v50, %v4056_v7  ;;  %v4285_v32 = vpop.f32.mrf.mxu3  ;;  %v4059_v23 = vpop.f32.mrf.mxu1  ;;  %v3076_v27 = vadd.f32 %v9168_v47, %v10543_v45 }
 0x51e   : > { %6170 = vmatmul.msk.f32.gmra.mxu0 %vm2388_vm4, %v10539_v61  ;;  %v4365_v11 = vadd.f32 %v4285_v32, %v4170_v44 }
 0x51f   : > { %6071 = vmatmul.msk.f32.gmra.mxu1 %vm2388_vm4, %v10542_v19 }
 0x520   : > { %v9349_v16 = vadd.f32 %v4433_v29, %v4365_v11  ;;  %6101 = vmatmul.msk.f32.gmra.mxu2 %vm2388_vm4, %v8351_v59  ;;  %v3932_v63 = vpop.permute.xlu1 %3931  ;;  %v3108_v11 = vmax.f32 %v3076_v27, 0.0 }
 0x521   : > { %6135 = vmatmul.msk.f32.gmra.mxu3 %vm2388_vm4, %v8314_v37  ;;  %v4002_v7 = vsel %vm514_vm0, %v3104_v39, %v3932_v63 }
 0x522   : > { %5401 = vst.msk [vmem:[%s8948_s14 + $0x188] sm:$0xff] %vm2388_vm4, %v4002_v7  ;;  %v10544_v7 = vld [vmem:[#allocation79_spill] sm:$0xff] }
 0x523   : > { %v4442_v61 = vpop.f32.mrf.mxu0  ;;  %v4172_v50 = vpop.f32.mrf.mxu2  ;;  %v3074_v45 = vadd.f32 %v9168_v47, %v10544_v7 }
 0x524   : > { %v4173_v13 = vadd.f32 %v4172_v50, %v4059_v23  ;;  %v4288_v29 = vpop.f32.mrf.mxu3  ;;  %v4062_v44 = vpop.f32.mrf.mxu1 }
 0x526   : > { %6171 = vmatmul.msk.f32.gmra.mxu0 %vm2388_vm4, %v10542_v19  ;;  %v4366_v32 = vadd.f32 %v4288_v29, %v4173_v13 }
 0x527   : > { %6072 = vmatmul.msk.f32.gmra.mxu1 %vm2388_vm4, %v8363_v6 }
 0x528   : > { %v9364_v39 = vadd.f32 %v4436_v57, %v4366_v32  ;;  %6102 = vmatmul.msk.f32.gmra.mxu2 %vm2388_vm4, %v8372_v21  ;;  %v3940_v63 = vpop.permute.xlu2 %3939  ;;  %v3106_v32 = vmax.f32 %v3074_v45, 0.0 }
 0x529   : > { %6136 = vmatmul.msk.f32.gmra.mxu3 %vm2388_vm4, %v10487_v58  ;;  %v4006_v23 = vsel %vm514_vm0, %v3108_v11, %v3940_v63 }
 0x52a   : > { %5409 = vst.msk [vmem:[%s8948_s14 + $0x1c8] sm:$0xff] %vm2388_vm4, %v4006_v23  ;;  %v10546_v23 = vld [vmem:[#allocation80_spill] sm:$0xff] }
 0x52b   : > { %v4445_v19 = vpop.f32.mrf.mxu0  ;;  %v4175_v50 = vpop.f32.mrf.mxu2  ;;  %v3075_v7 = vadd.f32 %v9168_v47, %v10546_v23 }
 0x52c   : > { %v4176_v27 = vadd.f32 %v4175_v50, %v4062_v44  ;;  %v4291_v57 = vpop.f32.mrf.mxu3  ;;  %v4065_v13 = vpop.f32.mrf.mxu1 }
 0x52e   : > { %6172 = vmatmul.msk.f32.gmra.mxu0 %vm2388_vm4, %v8363_v6  ;;  %v4367_v29 = vadd.f32 %v4291_v57, %v4176_v27 }
 0x52f   : > { %6073 = vmatmul.msk.f32.gmra.mxu1 %vm2388_vm4, %v8125_v9 }
 0x530   : > { %v9379_v11 = vadd.f32 %v4439_v2, %v4367_v29  ;;  %6103 = vmatmul.msk.f32.gmra.mxu2 %vm2388_vm4, %v8394_v34  ;;  %v3936_v63 = vpop.permute.xlu0 %3935  ;;  %v3107_v29 = vmax.f32 %v3075_v7, 0.0 }
 0x531   : > { %6137 = vmatmul.msk.f32.gmra.mxu3 %vm2388_vm4, %v8351_v59  ;;  %v4004_v44 = vsel %vm514_vm0, %v3106_v32, %v3936_v63 }
 0x532   : > { %10545 = vst [vmem:[#allocation38_spill] sm:$0xff] %v9379_v11 }
 0x533   : > { %5405 = vst.msk [vmem:[%s8948_s14 + $0x1a8] sm:$0xff] %vm2388_vm4, %v4004_v44  ;;  %v4448_v6 = vpop.f32.mrf.mxu0  ;;  %v4178_v50 = vpop.f32.mrf.mxu2 }
 0x534   : > { %v4179_v45 = vadd.f32 %v4178_v50, %v4065_v13  ;;  %v4294_v2 = vpop.f32.mrf.mxu3  ;;  %v4068_v27 = vpop.f32.mrf.mxu1 }
 0x536   : > { %6173 = vmatmul.msk.f32.gmra.mxu0 %vm2388_vm4, %v8125_v9  ;;  %v4368_v57 = vadd.f32 %v4294_v2, %v4179_v45 }
 0x537   : > { %6074 = vmatmul.msk.f32.gmra.mxu1 %vm2388_vm4, %v8406_v46 }
 0x538   : > { %v9394_v32 = vadd.f32 %v4442_v61, %v4368_v57  ;;  %6104 = vmatmul.msk.f32.gmra.mxu2 %vm2388_vm4, %v8421_v28  ;;  %v3938_v63 = vpop.permute.xlu1 %3937 }
 0x539   : > { %6138 = vmatmul.msk.f32.gmra.mxu3 %vm2388_vm4, %v8372_v21  ;;  %v4005_v13 = vsel %vm514_vm0, %v3107_v29, %v3938_v63 }
 0x53a   : > { %10547 = vst [vmem:[#allocation37_spill] sm:$0xff] %v9394_v32 }
 0x53b   : > { %5408 = vst.msk [vmem:[%s8948_s14 + $0x1c0] sm:$0xff] %vm2388_vm4, %v4005_v13  ;;  %v4451_v44 = vpop.f32.mrf.mxu0  ;;  %v4181_v9 = vpop.f32.mrf.mxu2 }
 0x53c   : > { %v4182_v23 = vadd.f32 %v4181_v9, %v4068_v27  ;;  %v4297_v50 = vpop.f32.mrf.mxu3  ;;  %v4071_v45 = vpop.f32.mrf.mxu1  ;;  %v10548_v27 = vld [vmem:[#allocation82_spill] sm:$0xff]  ;;  %v10549_v9 = vmov 0.0  }
 0x53d   : > { %v3077_v57 = vadd.f32 %v9168_v47, %v10548_v27 }
 0x53e   : > { %6174 = vmatmul.msk.f32.gmra.mxu0 %vm2388_vm4, %v8406_v46  ;;  %v4369_v61 = vadd.f32 %v4297_v50, %v4182_v23 }
 0x53f   : > { %6075 = vmatmul.msk.f32.gmra.mxu1 %vm2388_vm4, %v8168_v20  ;;  %v3109_v23 = vmax.f32 %v3077_v57, 0.0 }
 0x540   : > { %v9407_v7 = vadd.f32 %v4445_v19, %v4369_v61  ;;  %6105 = vmatmul.msk.f32.gmra.mxu2 %vm2388_vm4, %v8439_v17  ;;  %v10551_v61 = vld [vmem:[#allocation2_spill] sm:$0xff] }
 0x541   : > { %6139 = vmatmul.msk.f32.gmra.mxu3 %vm2388_vm4, %v8394_v34 }
 0x543   : > { %v4454_v2 = vpop.f32.mrf.mxu0  ;;  %v4184_v29 = vpop.f32.mrf.mxu2 }
 0x544   : > { %v4185_v63 = vadd.f32 %v4184_v29, %v4071_v45  ;;  %v4300_v46 = vpop.f32.mrf.mxu3  ;;  %v4074_v13 = vpop.f32.mrf.mxu1 }
 0x546   : > { %6175 = vmatmul.msk.f32.gmra.mxu0 %vm2388_vm4, %v8168_v20  ;;  %v4370_v19 = vadd.f32 %v4300_v46, %v4185_v63  ;;  %v10552_v20 = vld [vmem:[#allocation84_spill] sm:$0xff] }
 0x547   : > { %4121 = vmatmul.f32.gmra.mxu1 %v10549_v9  ;;  %v3078_v29 = vadd.f32 %v9168_v47, %v10552_v20 }
 0x548   : > { %v9418_v50 = vadd.f32 %v4448_v6, %v4370_v19  ;;  %6106 = vmatmul.msk.f32.gmra.mxu2 %vm2388_vm4, %v10551_v61  ;;  %v3942_v32 = vpop.permute.xlu0 %3941 }
 0x549   : > { %6140 = vmatmul.msk.f32.gmra.mxu3 %vm2388_vm4, %v8421_v28  ;;  %v4007_v45 = vsel %vm514_vm0, %v3109_v23, %v3942_v32 }
 0x54a   : > { %10550 = vst [vmem:[#allocation60_spill] sm:$0xff] %v9418_v50  ;;  %v3110_v50 = vmax.f32 %v3078_v29, 0.0  ;;  %v10553_v29 = vld [vmem:[#allocation28_spill] sm:$0xff] }
 0x54b   : > { %5412 = vst.msk [vmem:[%s8948_s14 + $0x1e0] sm:$0xff] %vm2388_vm4, %v4007_v45  ;;  %v4457_v27 = vpop.f32.mrf.mxu0  ;;  %v4187_v63 = vpop.f32.mrf.mxu2 }
 0x54c   : > { %v4188_v57 = vadd.f32 %v4187_v63, %v4074_v13  ;;  %v4303_v6 = vpop.f32.mrf.mxu3  ;;  %v4077_v46 = vpop.f32.mrf.mxu1 }
 0x54e   : > { %6278 = vmatmul.msk.f32.vlgmr.msra.gmra.mxu0 %vm2388_vm4, %v7763_v5  ;;  %v4371_v19 = vadd.f32 %v4303_v6, %v4188_v57 }
 0x54f   : > { %4124 = vmatmul.f32.gmra.mxu1 %v10549_v9 }
 0x550   : > { %v9432_v11 = vadd.f32 %v4451_v44, %v4371_v19  ;;  %6107 = vmatmul.msk.f32.gmra.mxu2 %vm2388_vm4, %v10551_v61  ;;  %v3944_v32 = vpop.permute.xlu1 %3943 }
 0x551   : > { %6141 = vmatmul.msk.f32.gmra.mxu3 %vm2388_vm4, %v8439_v17  ;;  %v4008_v13 = vsel %vm514_vm0, %v3110_v50, %v3944_v32  ;;  %v10554_v50 = vld [vmem:[#allocation16_spill] sm:$0xff] }
 0x552   : > { %5413 = vst.msk [vmem:[%s8948_s14 + $0x1e8] sm:$0xff] %vm2388_vm4, %v4008_v13  ;;  %v10555_v13 = vld [vmem:[#allocation27_spill] sm:$0xff] }
 0x553   : > { %v4460_v23 = vpop.f32.mrf.mxu0  ;;  %v4190_v45 = vpop.f32.mrf.mxu2 }
 0x554   : > { %v4191_v5 = vadd.f32 %v4190_v45, %v4077_v46  ;;  %v4306_v20 = vpop.f32.mrf.mxu3  ;;  %v4080_v63 = vpop.f32.mrf.mxu1  ;;  %v10556_v45 = vld [vmem:[#allocation21_spill] sm:$0xff] }
 0x556   : > { %6279 = vmatmul.msk.f32.gmra.mxu0 %vm2388_vm4, %v10497_v25  ;;  %v4372_v44 = vadd.f32 %v4306_v20, %v4191_v5 }
 0x557   : > { %6178 = vmatmul.msk.f32.vlgmr.msra.gmra.mxu1 %vm2388_vm4, %v7809_v24 }
 0x558   : > { %v9445_v9 = vadd.f32 %v4454_v2, %v4372_v44  ;;  %6210 = vmatmul.msk.f32.vlgmr.msra.gmra.mxu2 %vm2388_vm4, %v10553_v29 }
 0x559   : > { %6244 = vmatmul.msk.f32.vlgmr.msra.gmra.mxu3 %vm2388_vm4, %v10554_v50 }
 0x55b   : > { %v4463_v57 = vpop.f32.mrf.mxu0  ;;  %v4193_v6 = vpop.f32.mrf.mxu2 }
 0x55c   : > { %v4194_v46 = vadd.f32 %v4193_v6, %v4080_v63  ;;  %v4309_v19 = vpop.f32.mrf.mxu3  ;;  %v4083_v32 = vpop.f32.mrf.mxu1  ;;  %v10557_v6 = vld [vmem:[#allocation29_spill] sm:$0xff] }
 0x55e   : > { %6280 = vmatmul.msk.f32.gmra.mxu0 %vm2388_vm4, %v7809_v24  ;;  %v4373_v25 = vadd.f32 %v4309_v19, %v4194_v46 }
 0x55f   : > { %6179 = vmatmul.msk.f32.gmra.mxu1 %vm2388_vm4, %v7829_v43 }
 0x560   : > { %v9455_v2 = vadd.f32 %v4457_v27, %v4373_v25  ;;  %6211 = vmatmul.msk.f32.gmra.mxu2 %vm2388_vm4, %v10555_v13 }
 0x561   : > { %6245 = vmatmul.msk.f32.gmra.mxu3 %vm2388_vm4, %v10556_v45 }
 0x563   : > { %v4466_v5 = vpop.f32.mrf.mxu0  ;;  %v4196_v20 = vpop.f32.mrf.mxu2 }
 0x564   : > { %v4197_v63 = vadd.f32 %v4196_v20, %v4083_v32  ;;  %v4312_v44 = vpop.f32.mrf.mxu3  ;;  %v4086_v50 = vpop.f32.mrf.mxu1  ;;  %v10558_v20 = vld [vmem:[#allocation11_spill] sm:$0xff] }
 0x566   : > { %6281 = vmatmul.msk.f32.gmra.mxu0 %vm2388_vm4, %v7829_v43  ;;  %v4374_v24 = vadd.f32 %v4312_v44, %v4197_v63 }
 0x567   : > { %6180 = vmatmul.msk.f32.gmra.mxu1 %vm2388_vm4, %v7855_v51 }
 0x568   : > { %v9465_v27 = vadd.f32 %v4460_v23, %v4374_v24  ;;  %6212 = vmatmul.msk.f32.gmra.mxu2 %vm2388_vm4, %v10557_v6 }
 0x569   : > { %6246 = vmatmul.msk.f32.gmra.mxu3 %vm2388_vm4, %v10553_v29 }
 0x56b   : > { %v4469_v46 = vpop.f32.mrf.mxu0  ;;  %v4199_v19 = vpop.f32.mrf.mxu2 }
 0x56c   : > { %v4200_v32 = vadd.f32 %v4199_v19, %v4086_v50  ;;  %v4315_v25 = vpop.f32.mrf.mxu3  ;;  %v4089_v45 = vpop.f32.mrf.mxu1  ;;  %v10559_v19 = vld [vmem:[#allocation76_spill] sm:$0xff] }
 0x56e   : > { %6282 = vmatmul.msk.f32.gmra.mxu0 %vm2388_vm4, %v7855_v51  ;;  %v4375_v43 = vadd.f32 %v4315_v25, %v4200_v32 }
 0x56f   : > { %6181 = vmatmul.msk.f32.gmra.mxu1 %vm2388_vm4, %v7875_v55 }
 0x570   : > { %v9475_v23 = vadd.f32 %v4463_v57, %v4375_v43  ;;  %6213 = vmatmul.msk.f32.gmra.mxu2 %vm2388_vm4, %v10558_v20 }
 0x571   : > { %6247 = vmatmul.msk.f32.gmra.mxu3 %vm2388_vm4, %v10555_v13 }
 0x573   : > { %v4472_v29 = vpop.f32.mrf.mxu0  ;;  %v4202_v63 = vpop.f32.mrf.mxu2 }
 0x574   : > { %v4203_v44 = vadd.f32 %v4202_v63, %v4089_v45  ;;  %v4318_v50 = vpop.f32.mrf.mxu3  ;;  %v4092_v24 = vpop.f32.mrf.mxu1  ;;  %v10560_v63 = vld [vmem:[#allocation22_spill] sm:$0xff] }
 0x576   : > { %6283 = vmatmul.msk.f32.gmra.mxu0 %vm2388_vm4, %v7875_v55  ;;  %v4376_v51 = vadd.f32 %v4318_v50, %v4203_v44 }
 0x577   : > { %6182 = vmatmul.msk.f32.gmra.mxu1 %vm2388_vm4, %v7901_v62 }
 0x578   : > { %v9485_v57 = vadd.f32 %v4466_v5, %v4376_v51  ;;  %6214 = vmatmul.msk.f32.gmra.mxu2 %vm2388_vm4, %v10559_v19 }
 0x579   : > { %6248 = vmatmul.msk.f32.gmra.mxu3 %vm2388_vm4, %v10557_v6 }
 0x57b   : > { %v4475_v13 = vpop.f32.mrf.mxu0  ;;  %v4205_v32 = vpop.f32.mrf.mxu2 }
 0x57c   : > { %v4206_v25 = vadd.f32 %v4205_v32, %v4092_v24  ;;  %v4321_v45 = vpop.f32.mrf.mxu3  ;;  %v4095_v43 = vpop.f32.mrf.mxu1  ;;  %v10561_v32 = vld [vmem:[#allocation77_spill] sm:$0xff] }
 0x57e   : > { %6284 = vmatmul.msk.f32.gmra.mxu0 %vm2388_vm4, %v7901_v62  ;;  %v4377_v55 = vadd.f32 %v4321_v45, %v4206_v25 }
 0x57f   : > { %6183 = vmatmul.msk.f32.gmra.mxu1 %vm2388_vm4, %v7921_v4 }
 0x580   : > { %v9495_v5 = vadd.f32 %v4469_v46, %v4377_v55  ;;  %6215 = vmatmul.msk.f32.gmra.mxu2 %vm2388_vm4, %v10560_v63 }
 0x581   : > { %6249 = vmatmul.msk.f32.gmra.mxu3 %vm2388_vm4, %v10558_v20 }
 0x583   : > { %v4478_v6 = vpop.f32.mrf.mxu0  ;;  %v4208_v44 = vpop.f32.mrf.mxu2 }
 0x584   : > { %v4209_v50 = vadd.f32 %v4208_v44, %v4095_v43  ;;  %v4324_v24 = vpop.f32.mrf.mxu3  ;;  %v4098_v51 = vpop.f32.mrf.mxu1  ;;  %v10562_v44 = vld [vmem:[#allocation53_spill] sm:$0xff] }
 0x586   : > { %6285 = vmatmul.msk.f32.gmra.mxu0 %vm2388_vm4, %v7921_v4  ;;  %v4378_v62 = vadd.f32 %v4324_v24, %v4209_v50 }
 0x587   : > { %6184 = vmatmul.msk.f32.gmra.mxu1 %vm2388_vm4, %v7947_v14 }
 0x588   : > { %v9505_v46 = vadd.f32 %v4472_v29, %v4378_v62  ;;  %6216 = vmatmul.msk.f32.gmra.mxu2 %vm2388_vm4, %v10561_v32 }
 0x589   : > { %6250 = vmatmul.msk.f32.gmra.mxu3 %vm2388_vm4, %v10559_v19 }
 0x58b   : > { %v4481_v20 = vpop.f32.mrf.mxu0  ;;  %v4211_v25 = vpop.f32.mrf.mxu2 }
 0x58c   : > { %v4212_v45 = vadd.f32 %v4211_v25, %v4098_v51  ;;  %v4327_v43 = vpop.f32.mrf.mxu3  ;;  %v4101_v55 = vpop.f32.mrf.mxu1  ;;  %v10563_v25 = vld [vmem:[#allocation15_spill] sm:$0xff] }
 0x58e   : > { %6286 = vmatmul.msk.f32.gmra.mxu0 %vm2388_vm4, %v7947_v14  ;;  %v4379_v4 = vadd.f32 %v4327_v43, %v4212_v45 }
 0x58f   : > { %6185 = vmatmul.msk.f32.gmra.mxu1 %vm2388_vm4, %v7967_v53 }
 0x590   : > { %v9515_v29 = vadd.f32 %v4475_v13, %v4379_v4  ;;  %6217 = vmatmul.msk.f32.gmra.mxu2 %vm2388_vm4, %v10562_v44 }
 0x591   : > { %6251 = vmatmul.msk.f32.gmra.mxu3 %vm2388_vm4, %v10560_v63 }
 0x593   : > { %v4484_v19 = vpop.f32.mrf.mxu0  ;;  %v4214_v50 = vpop.f32.mrf.mxu2 }
 0x594   : > { %v4215_v24 = vadd.f32 %v4214_v50, %v4101_v55  ;;  %v4330_v51 = vpop.f32.mrf.mxu3  ;;  %v4104_v62 = vpop.f32.mrf.mxu1  ;;  %v10564_v50 = vld [vmem:[#allocation68_spill] sm:$0xff] }
 0x596   : > { %6287 = vmatmul.msk.f32.gmra.mxu0 %vm2388_vm4, %v7967_v53  ;;  %v4380_v14 = vadd.f32 %v4330_v51, %v4215_v24 }
 0x597   : > { %6186 = vmatmul.msk.f32.gmra.mxu1 %vm2388_vm4, %v7993_v54 }
 0x598   : > { %v9525_v13 = vadd.f32 %v4478_v6, %v4380_v14  ;;  %6218 = vmatmul.msk.f32.gmra.mxu2 %vm2388_vm4, %v10563_v25 }
 0x599   : > { %6252 = vmatmul.msk.f32.gmra.mxu3 %vm2388_vm4, %v10561_v32 }
 0x59b   : > { %v4487_v63 = vpop.f32.mrf.mxu0  ;;  %v4217_v45 = vpop.f32.mrf.mxu2 }
 0x59c   : > { %v4218_v43 = vadd.f32 %v4217_v45, %v4104_v62  ;;  %v4333_v55 = vpop.f32.mrf.mxu3  ;;  %v4107_v4 = vpop.f32.mrf.mxu1  ;;  %v10565_v45 = vld [vmem:[#allocation50_spill] sm:$0xff] }
 0x59e   : > { %6288 = vmatmul.msk.f32.gmra.mxu0 %vm2388_vm4, %v7993_v54  ;;  %v4381_v53 = vadd.f32 %v4333_v55, %v4218_v43 }
 0x59f   : > { %6187 = vmatmul.msk.f32.gmra.mxu1 %vm2388_vm4, %v10514_v15 }
 0x5a0   : > { %v9535_v6 = vadd.f32 %v4481_v20, %v4381_v53  ;;  %6219 = vmatmul.msk.f32.gmra.mxu2 %vm2388_vm4, %v10564_v50 }
 0x5a1   : > { %6253 = vmatmul.msk.f32.gmra.mxu3 %vm2388_vm4, %v10562_v44 }
 0x5a3   : > { %v4490_v32 = vpop.f32.mrf.mxu0  ;;  %v4220_v24 = vpop.f32.mrf.mxu2 }
 0x5a4   : > { %v4221_v51 = vadd.f32 %v4220_v24, %v4107_v4  ;;  %v4336_v62 = vpop.f32.mrf.mxu3  ;;  %v4110_v14 = vpop.f32.mrf.mxu1  ;;  %v10566_v24 = vld [vmem:[#allocation64_spill] sm:$0xff] }
 0x5a6   : > { %6289 = vmatmul.msk.f32.gmra.mxu0 %vm2388_vm4, %v10514_v15  ;;  %v4382_v54 = vadd.f32 %v4336_v62, %v4221_v51 }
 0x5a7   : > { %6188 = vmatmul.msk.f32.gmra.mxu1 %vm2388_vm4, %v10455_v49 }
 0x5a8   : > { %v9545_v20 = vadd.f32 %v4484_v19, %v4382_v54  ;;  %6220 = vmatmul.msk.f32.gmra.mxu2 %vm2388_vm4, %v10565_v45 }
 0x5a9   : > { %6254 = vmatmul.msk.f32.gmra.mxu3 %vm2388_vm4, %v10563_v25 }
 0x5ab   : > { %v4493_v44 = vpop.f32.mrf.mxu0  ;;  %v4223_v43 = vpop.f32.mrf.mxu2 }
 0x5ac   : > { %v4224_v55 = vadd.f32 %v4223_v43, %v4110_v14  ;;  %v4339_v4 = vpop.f32.mrf.mxu3  ;;  %v4113_v53 = vpop.f32.mrf.mxu1  ;;  %v10567_v43 = vld [vmem:[#allocation52_spill] sm:$0xff] }
 0x5ae   : > { %6290 = vmatmul.msk.f32.gmra.mxu0 %vm2388_vm4, %v10455_v49  ;;  %v4383_v15 = vadd.f32 %v4339_v4, %v4224_v55 }
 0x5af   : > { %6189 = vmatmul.msk.f32.gmra.mxu1 %vm2388_vm4, %v8059_v35 }
 0x5b0   : > { %v9555_v19 = vadd.f32 %v4487_v63, %v4383_v15  ;;  %6221 = vmatmul.msk.f32.gmra.mxu2 %vm2388_vm4, %v10566_v24 }
 0x5b1   : > { %6255 = vmatmul.msk.f32.gmra.mxu3 %vm2388_vm4, %v10564_v50 }
 0x5b3   : > { %v4496_v25 = vpop.f32.mrf.mxu0  ;;  %v4226_v51 = vpop.f32.mrf.mxu2 }
 0x5b4   : > { %v4227_v62 = vadd.f32 %v4226_v51, %v4113_v53  ;;  %v4342_v14 = vpop.f32.mrf.mxu3  ;;  %v4116_v54 = vpop.f32.mrf.mxu1  ;;  %v10568_v51 = vld [vmem:[#allocation67_spill] sm:$0xff] }
 0x5b6   : > { %6291 = vmatmul.msk.f32.gmra.mxu0 %vm2388_vm4, %v8059_v35  ;;  %v4384_v49 = vadd.f32 %v4342_v14, %v4227_v62 }
 0x5b7   : > { %6190 = vmatmul.msk.f32.gmra.mxu1 %vm2388_vm4, %v10462_v0 }
 0x5b8   : > { %v9565_v63 = vadd.f32 %v4490_v32, %v4384_v49  ;;  %6222 = vmatmul.msk.f32.gmra.mxu2 %vm2388_vm4, %v10567_v43 }
 0x5b9   : > { %6256 = vmatmul.msk.f32.gmra.mxu3 %vm2388_vm4, %v10565_v45 }
 0x5bb   : > { %v4499_v50 = vpop.f32.mrf.mxu0  ;;  %v4229_v55 = vpop.f32.mrf.mxu2 }
 0x5bc   : > { %v4230_v4 = vadd.f32 %v4229_v55, %v4116_v54  ;;  %v4345_v53 = vpop.f32.mrf.mxu3  ;;  %v4119_v15 = vpop.f32.mrf.mxu1  ;;  %v10569_v55 = vld [vmem:[#allocation83_spill] sm:$0xff] }
 0x5be   : > { %6292 = vmatmul.msk.f32.gmra.mxu0 %vm2388_vm4, %v10462_v0  ;;  %v4385_v35 = vadd.f32 %v4345_v53, %v4230_v4 }
 0x5bf   : > { %6191 = vmatmul.msk.f32.gmra.mxu1 %vm2388_vm4, %v8118_v3 }
 0x5c0   : > { %v9575_v32 = vadd.f32 %v4493_v44, %v4385_v35  ;;  %6223 = vmatmul.msk.f32.gmra.mxu2 %vm2388_vm4, %v10568_v51 }
 0x5c1   : > { %6257 = vmatmul.msk.f32.gmra.mxu3 %vm2388_vm4, %v10566_v24 }
 0x5c3   : > { %v4502_v45 = vpop.f32.mrf.mxu0  ;;  %v4232_v62 = vpop.f32.mrf.mxu2 }
 0x5c4   : > { %v4233_v14 = vadd.f32 %v4232_v62, %v4119_v15  ;;  %v4348_v54 = vpop.f32.mrf.mxu3  ;;  %v4122_v49 = vpop.f32.mrf.mxu1  ;;  %v10570_v62 = vld [vmem:[#allocation85_spill] sm:$0xff] }
 0x5c6   : > { %6293 = vmatmul.msk.f32.gmra.mxu0 %vm2388_vm4, %v8118_v3  ;;  %v4386_v0 = vadd.f32 %v4348_v54, %v4233_v14 }
 0x5c7   : > { %6192 = vmatmul.msk.f32.gmra.mxu1 %vm2388_vm4, %v8143_v8 }
 0x5c8   : > { %v9585_v44 = vadd.f32 %v4496_v25, %v4386_v0  ;;  %6224 = vmatmul.msk.f32.gmra.mxu2 %vm2388_vm4, %v10569_v55 }
 0x5c9   : > { %6258 = vmatmul.msk.f32.gmra.mxu3 %vm2388_vm4, %v10567_v43 }
 0x5cb   : > { %v5000_v24 = vpop.f32.mrf.mxu0  ;;  %v4235_v4 = vpop.f32.mrf.mxu2 }
 0x5cc   : > { %v4236_v53 = vadd.f32 %v4235_v4, %v4122_v49  ;;  %v4351_v15 = vpop.f32.mrf.mxu3  ;;  %v4125_v35 = vpop.f32.mrf.mxu1  ;;  %v10572_v4 = vld [vmem:[#allocation86_spill] sm:$0xff] }
 0x5ce   : > { %6294 = vmatmul.msk.f32.gmra.mxu0 %vm2388_vm4, %v8143_v8  ;;  %v4387_v3 = vadd.f32 %v4351_v15, %v4236_v53 }
 0x5cf   : > { %6193 = vmatmul.msk.f32.gmra.mxu1 %vm2388_vm4, %v8161_v60 }
 0x5d0   : > { %v9595_v25 = vadd.f32 %v4499_v50, %v4387_v3  ;;  %6225 = vmatmul.msk.f32.gmra.mxu2 %vm2388_vm4, %v10570_v62 }
 0x5d1   : > { %6259 = vmatmul.msk.f32.gmra.mxu3 %vm2388_vm4, %v10568_v51 }
 0x5d3   : > { %v5003_v43 = vpop.f32.mrf.mxu0  ;;  %v4238_v14 = vpop.f32.mrf.mxu2 }
 0x5d4   : > { %v4239_v54 = vadd.f32 %v4238_v14, %v4125_v35  ;;  %v4354_v49 = vpop.f32.mrf.mxu3  ;;  %v4623_v0 = vpop.f32.mrf.mxu1  ;;  %v10573_v14 = vld [vmem:[#allocation54_spill] sm:$0xff] }
 0x5d6   : > { %6295 = vmatmul.msk.f32.gmra.mxu0 %vm2388_vm4, %v8161_v60  ;;  %v4388_v8 = vadd.f32 %v4354_v49, %v4239_v54 }
 0x5d7   : > { %6194 = vmatmul.msk.f32.gmra.mxu1 %vm2388_vm4, %v8187_v10 }
 0x5d8   : > { %v9605_v50 = vadd.f32 %v4502_v45, %v4388_v8  ;;  %6226 = vmatmul.msk.f32.gmra.mxu2 %vm2388_vm4, %v10572_v4 }
 0x5d9   : > { %6260 = vmatmul.msk.f32.gmra.mxu3 %vm2388_vm4, %v10569_v55 }
 0x5da   : > { %10571 = vst [vmem:[#allocation8_spill] sm:$0xff] %v9605_v50 }
 0x5db   : > { %v5006_v51 = vpop.f32.mrf.mxu0  ;;  %v4736_v53 = vpop.f32.mrf.mxu2 }
 0x5dc   : > { %v4737_v15 = vadd.f32 %v4736_v53, %v4623_v0  ;;  %v4852_v35 = vpop.f32.mrf.mxu3  ;;  %v4626_v3 = vpop.f32.mrf.mxu1 }
 0x5de   : > { %6296 = vmatmul.msk.f32.gmra.mxu0 %vm2388_vm4, %v8187_v10  ;;  %v4948_v60 = vadd.f32 %v4852_v35, %v4737_v15  ;;  %v10574_v15 = vld [vmem:[#allocation57_spill] sm:$0xff] }
 0x5df   : > { %6195 = vmatmul.msk.f32.gmra.mxu1 %vm2388_vm4, %v8203_v26 }
 0x5e0   : > { %v5096_v45 = vadd.f32 %v5000_v24, %v4948_v60  ;;  %6227 = vmatmul.msk.f32.gmra.mxu2 %vm2388_vm4, %v10573_v14 }
 0x5e1   : > { %6261 = vmatmul.msk.f32.gmra.mxu3 %vm2388_vm4, %v10570_v62 }
 0x5e2   : > { %v5128_v54 = vadd.f32 %v9168_v47, %v5096_v45 }
 0x5e3   : > { %v5009_v55 = vpop.f32.mrf.mxu0  ;;  %v4739_v49 = vpop.f32.mrf.mxu2 }
 0x5e4   : > { %v4740_v0 = vadd.f32 %v4739_v49, %v4626_v3  ;;  %v4855_v8 = vpop.f32.mrf.mxu3  ;;  %v4629_v53 = vpop.f32.mrf.mxu1  ;;  %v5160_v50 = vmax.f32 %v5128_v54, 0.0  ;;  %v10575_v49 = vld [vmem:[#allocation5_spill] sm:$0xff] }
 0x5e6   : > { %6297 = vmatmul.msk.f32.gmra.mxu0 %vm2388_vm4, %v8203_v26  ;;  %v4949_v10 = vadd.f32 %v4855_v8, %v4740_v0  ;;  %5224 = vrot.lane.b32.xlu2 %v5160_v50, %s6341_s27 }
 0x5e7   : > { %6196 = vmatmul.msk.f32.gmra.mxu1 %vm2388_vm4, %v8224_v30 }
 0x5e8   : > { %v5097_v24 = vadd.f32 %v5003_v43, %v4949_v10  ;;  %6228 = vmatmul.msk.f32.gmra.mxu2 %vm2388_vm4, %v10574_v15 }
 0x5e9   : > { %6262 = vmatmul.msk.f32.gmra.mxu3 %vm2388_vm4, %v10572_v4  ;;  %v9642_v4 = vld [vmem:[%s9965_s4] ss:$0 sm:$0xff] }
 0x5ea   : > { %v5129_v35 = vadd.f32 %v9168_v47, %v5097_v24 }
 0x5eb   : > { %v5012_v62 = vpop.f32.mrf.mxu0  ;;  %v4742_v3 = vpop.f32.mrf.mxu2 }
 0x5ec   : > { %v4743_v60 = vadd.f32 %v4742_v3, %v4629_v53  ;;  %v4858_v45 = vpop.f32.mrf.mxu3  ;;  %v4632_v26 = vpop.f32.mrf.mxu1  ;;  %v5161_v54 = vmax.f32 %v5129_v35, 0.0  ;;  %v10576_v35 = vld [vmem:[#allocation13_spill] sm:$0xff] }
 0x5ee   : > { %6298 = vmatmul.msk.f32.gmra.mxu0 %vm2388_vm4, %v8224_v30  ;;  %v4950_v50 = vadd.f32 %v4858_v45, %v4743_v60  ;;  %5226 = vrot.lane.b32.xlu0 %v5161_v54, %s6341_s27 }
 0x5ef   : > { %6197 = vmatmul.msk.f32.gmra.mxu1 %vm2388_vm4, %v8240_v52 }
 0x5f0   : > { %v5098_v43 = vadd.f32 %v5006_v51, %v4950_v50  ;;  %6229 = vmatmul.msk.f32.gmra.mxu2 %vm2388_vm4, %v10575_v49 }
 0x5f1   : > { %6263 = vmatmul.msk.f32.gmra.mxu3 %vm2388_vm4, %v10573_v14 }
 0x5f2   : > { %v5130_v30 = vadd.f32 %v9642_v4, %v5098_v43 }
 0x5f3   : > { %v5015_v47 = vpop.f32.mrf.mxu0  ;;  %v4745_v0 = vpop.f32.mrf.mxu2 }
 0x5f4   : > { %v4746_v8 = vadd.f32 %v4745_v0, %v4632_v26  ;;  %v4861_v53 = vpop.f32.mrf.mxu3  ;;  %v4635_v10 = vpop.f32.mrf.mxu1  ;;  %v5162_v24 = vmax.f32 %v5130_v30, 0.0  ;;  %v10577_v30 = vld [vmem:[#allocation63_spill] sm:$0xff] }
 0x5f6   : > { %6299 = vmatmul.msk.f32.gmra.mxu0 %vm2388_vm4, %v8240_v52  ;;  %v4951_v51 = vadd.f32 %v4861_v53, %v4746_v8  ;;  %5228 = vrot.lane.b32.xlu1 %v5162_v24, %s6341_s27 }
 0x5f7   : > { %6198 = vmatmul.msk.f32.gmra.mxu1 %vm2388_vm4, %v8261_v36 }
 0x5f8   : > { %v5099_v14 = vadd.f32 %v5009_v55, %v4951_v51  ;;  %6230 = vmatmul.msk.f32.gmra.mxu2 %vm2388_vm4, %v10576_v35 }
 0x5f9   : > { %6264 = vmatmul.msk.f32.gmra.mxu3 %vm2388_vm4, %v10574_v15 }
 0x5fa   : > { %v5131_v60 = vadd.f32 %v9642_v4, %v5099_v14  ;;  %v10578_v14 = vld [vmem:[#allocation24_spill] sm:$0xff] }
 0x5fb   : > { %v5018_v3 = vpop.f32.mrf.mxu0  ;;  %v4748_v45 = vpop.f32.mrf.mxu2 }
 0x5fc   : > { %v4749_v26 = vadd.f32 %v4748_v45, %v4635_v10  ;;  %v4864_v54 = vpop.f32.mrf.mxu3  ;;  %v4638_v52 = vpop.f32.mrf.mxu1  ;;  %v5163_v50 = vmax.f32 %v5131_v60, 0.0 }
 0x5fe   : > { %6300 = vmatmul.msk.f32.gmra.mxu0 %vm2388_vm4, %v8261_v36  ;;  %v4952_v43 = vadd.f32 %v4864_v54, %v4749_v26  ;;  %5230 = vrot.lane.b32.xlu2 %v5163_v50, %s6341_s27 }
 0x5ff   : > { %6199 = vmatmul.msk.f32.gmra.mxu1 %vm2388_vm4, %v8277_v1 }
 0x600   : > { %v5100_v55 = vadd.f32 %v5012_v62, %v4952_v43  ;;  %6231 = vmatmul.msk.f32.gmra.mxu2 %vm2388_vm4, %v10577_v30  ;;  %v10579_v43 = vld [vmem:[#allocation69_spill] sm:$0xff] }
 0x601   : > { %6265 = vmatmul.msk.f32.gmra.mxu3 %vm2388_vm4, %v10575_v49 }
 0x602   : > { %v5132_v0 = vadd.f32 %v9642_v4, %v5100_v55 }
 0x603   : > { %v5021_v15 = vpop.f32.mrf.mxu0  ;;  %v4751_v8 = vpop.f32.mrf.mxu2 }
 0x604   : > { %v4752_v53 = vadd.f32 %v4751_v8, %v4638_v52  ;;  %v4867_v10 = vpop.f32.mrf.mxu3  ;;  %v4641_v36 = vpop.f32.mrf.mxu1  ;;  %v5164_v24 = vmax.f32 %v5132_v0, 0.0 }
 0x606   : > { %6301 = vmatmul.msk.f32.gmra.mxu0 %vm2388_vm4, %v8277_v1  ;;  %v4953_v51 = vadd.f32 %v4867_v10, %v4752_v53  ;;  %5232 = vrot.lane.b32.xlu0 %v5164_v24, %s6341_s27  ;;  %v10580_v24 = vld [vmem:[#allocation44_spill] sm:$0xff] }
 0x607   : > { %6200 = vmatmul.msk.f32.gmra.mxu1 %vm2388_vm4, %v8298_v40 }
 0x608   : > { %v5101_v62 = vadd.f32 %v5015_v47, %v4953_v51  ;;  %6232 = vmatmul.msk.f32.gmra.mxu2 %vm2388_vm4, %v10578_v14 }
 0x609   : > { %6266 = vmatmul.msk.f32.gmra.mxu3 %vm2388_vm4, %v10576_v35 }
 0x60a   : > { %v5133_v60 = vadd.f32 %v9642_v4, %v5101_v62 }
 0x60b   : > { %v5024_v49 = vpop.f32.mrf.mxu0  ;;  %v4754_v45 = vpop.f32.mrf.mxu2 }
 0x60c   : > { %v4755_v26 = vadd.f32 %v4754_v45, %v4641_v36  ;;  %v4870_v54 = vpop.f32.mrf.mxu3  ;;  %v4644_v1 = vpop.f32.mrf.mxu1  ;;  %v5165_v52 = vmax.f32 %v5133_v60, 0.0 }
 0x60e   : > { %6302 = vmatmul.msk.f32.gmra.mxu0 %vm2388_vm4, %v8298_v40  ;;  %v4954_v50 = vadd.f32 %v4870_v54, %v4755_v26  ;;  %5234 = vrot.lane.b32.xlu1 %v5165_v52, %s6341_s27 }
 0x60f   : > { %6201 = vmatmul.msk.f32.gmra.mxu1 %vm2388_vm4, %v8314_v37 }
 0x610   : > { %v5102_v47 = vadd.f32 %v5018_v3, %v4954_v50  ;;  %6233 = vmatmul.msk.f32.gmra.mxu2 %vm2388_vm4, %v10579_v43 }
 0x611   : > { %6267 = vmatmul.msk.f32.gmra.mxu3 %vm2388_vm4, %v10577_v30 }
 0x612   : > { %v5134_v55 = vadd.f32 %v9642_v4, %v5102_v47 }
 0x613   : > { %v5027_v35 = vpop.f32.mrf.mxu0  ;;  %v4757_v0 = vpop.f32.mrf.mxu2 }
 0x614   : > { %v4758_v8 = vadd.f32 %v4757_v0, %v4644_v1  ;;  %v4873_v53 = vpop.f32.mrf.mxu3  ;;  %v4647_v40 = vpop.f32.mrf.mxu1  ;;  %v5166_v10 = vmax.f32 %v5134_v55, 0.0  ;;  %v10581_v1 = vld [vmem:[#allocation71_spill] sm:$0xff] }
 0x616   : > { %6303 = vmatmul.msk.f32.gmra.mxu0 %vm2388_vm4, %v8314_v37  ;;  %v4955_v36 = vadd.f32 %v4873_v53, %v4758_v8  ;;  %5236 = vrot.lane.b32.xlu2 %v5166_v10, %s6341_s27 }
 0x617   : > { %6202 = vmatmul.msk.f32.gmra.mxu1 %vm2388_vm4, %v10487_v58 }
 0x618   : > { %v5103_v3 = vadd.f32 %v5021_v15, %v4955_v36  ;;  %6234 = vmatmul.msk.f32.gmra.mxu2 %vm2388_vm4, %v10580_v24 }
 0x619   : > { %6268 = vmatmul.msk.f32.gmra.mxu3 %vm2388_vm4, %v10578_v14 }
 0x61a   : > { %v5135_v51 = vadd.f32 %v9642_v4, %v5103_v3 }
 0x61b   : > { %v5030_v30 = vpop.f32.mrf.mxu0  ;;  %v4760_v62 = vpop.f32.mrf.mxu2 }
 0x61c   : > { %v4761_v60 = vadd.f32 %v4760_v62, %v4647_v40  ;;  %v4876_v45 = vpop.f32.mrf.mxu3  ;;  %v4650_v37 = vpop.f32.mrf.mxu1  ;;  %v5167_v26 = vmax.f32 %v5135_v51, 0.0 }
 0x61e   : > { %6304 = vmatmul.msk.f32.gmra.mxu0 %vm2388_vm4, %v10487_v58  ;;  %v4956_v54 = vadd.f32 %v4876_v45, %v4761_v60  ;;  %5238 = vrot.lane.b32.xlu0 %v5167_v26, %s6341_s27 }
 0x61f   : > { %6203 = vmatmul.msk.f32.gmra.mxu1 %vm2388_vm4, %v8351_v59 }
 0x620   : > { %v5104_v15 = vadd.f32 %v5024_v49, %v4956_v54  ;;  %6235 = vmatmul.msk.f32.gmra.mxu2 %vm2388_vm4, %v10581_v1 }
 0x621   : > { %6269 = vmatmul.msk.f32.gmra.mxu3 %vm2388_vm4, %v10579_v43 }
 0x622   : > { %v5136_v52 = vadd.f32 %v9642_v4, %v5104_v15 }
 0x623   : > { %v5033_v14 = vpop.f32.mrf.mxu0  ;;  %v4763_v50 = vpop.f32.mrf.mxu2 }
 0x624   : > { %v4764_v47 = vadd.f32 %v4763_v50, %v4650_v37  ;;  %v4879_v55 = vpop.f32.mrf.mxu3  ;;  %v4653_v58 = vpop.f32.mrf.mxu1  ;;  %v5168_v0 = vmax.f32 %v5136_v52, 0.0  ;;  %v4537_v52 = vadd.f32 %v9642_v4, %v9229_v48 }
 0x626   : > { %6305 = vmatmul.msk.f32.gmra.mxu0 %vm2388_vm4, %v8351_v59  ;;  %v4957_v8 = vadd.f32 %v4879_v55, %v4764_v47  ;;  %5240 = vrot.lane.b32.xlu1 %v5168_v0, %s6341_s27 }
 0x627   : > { %6204 = vmatmul.msk.f32.gmra.mxu1 %vm2388_vm4, %v8372_v21 }
 0x628   : > { %v5105_v49 = vadd.f32 %v5027_v35, %v4957_v8  ;;  %6236 = vmatmul.msk.f32.gmra.mxu2 %vm2388_vm4, %v8877_v33  ;;  %v10582_v8 = vld [vmem:[#allocation72_spill] sm:$0xff] }
 0x629   : > { %6270 = vmatmul.msk.f32.gmra.mxu3 %vm2388_vm4, %v10580_v24 }
 0x62a   : > { %v5137_v53 = vadd.f32 %v9642_v4, %v5105_v49 }
 0x62b   : > { %v5036_v43 = vpop.f32.mrf.mxu0  ;;  %v4766_v40 = vpop.f32.mrf.mxu2 }
 0x62c   : > { %v4767_v10 = vadd.f32 %v4766_v40, %v4653_v58  ;;  %v4882_v36 = vpop.f32.mrf.mxu3  ;;  %v4656_v59 = vpop.f32.mrf.mxu1  ;;  %v5169_v3 = vmax.f32 %v5137_v53, 0.0 }
 0x62e   : > { %6306 = vmatmul.msk.f32.gmra.mxu0 %vm2388_vm4, %v8372_v21  ;;  %v4958_v51 = vadd.f32 %v4882_v36, %v4767_v10  ;;  %5242 = vrot.lane.b32.xlu2 %v5169_v3, %s6341_s27 }
 0x62f   : > { %6205 = vmatmul.msk.f32.gmra.mxu1 %vm2388_vm4, %v8394_v34 }
 0x630   : > { %v5106_v35 = vadd.f32 %v5030_v30, %v4958_v51  ;;  %6237 = vmatmul.msk.f32.gmra.mxu2 %vm2388_vm4, %v8897_v38  ;;  %v10583_v51 = vld [vmem:[#allocation49_spill] sm:$0xff] }
 0x631   : > { %6271 = vmatmul.msk.f32.gmra.mxu3 %vm2388_vm4, %v10581_v1 }
 0x632   : > { %v5138_v62 = vadd.f32 %v9642_v4, %v5106_v35 }
 0x633   : > { %v5039_v24 = vpop.f32.mrf.mxu0  ;;  %v4769_v60 = vpop.f32.mrf.mxu2 }
 0x634   : > { %v4770_v45 = vadd.f32 %v4769_v60, %v4656_v59  ;;  %v4885_v37 = vpop.f32.mrf.mxu3  ;;  %v4659_v21 = vpop.f32.mrf.mxu1  ;;  %v5170_v26 = vmax.f32 %v5138_v62, 0.0 }
 0x636   : > { %6307 = vmatmul.msk.f32.gmra.mxu0 %vm2388_vm4, %v8394_v34  ;;  %v4959_v54 = vadd.f32 %v4885_v37, %v4770_v45  ;;  %5244 = vrot.lane.b32.xlu0 %v5170_v26, %s6341_s27 }
 0x637   : > { %6206 = vmatmul.msk.f32.gmra.mxu1 %vm2388_vm4, %v8421_v28 }
 0x638   : > { %v5107_v30 = vadd.f32 %v5033_v14, %v4959_v54  ;;  %6238 = vmatmul.msk.f32.gmra.mxu2 %vm2388_vm4, %v8918_v12 }
 0x639   : > { %6272 = vmatmul.msk.f32.gmra.mxu3 %vm2388_vm4, %v8877_v33  ;;  %v4569_v33 = vmax.f32 %v4537_v52, 0.0 }
 0x63a   : > { %v5139_v1 = vadd.f32 %v9642_v4, %v5107_v30  ;;  %v4540_v30 = vadd.f32 %v9642_v4, %v9274_v18  ;;  %v4538_v18 = vadd.f32 %v9642_v4, %v9244_v41  ;;  %v4539_v41 = vadd.f32 %v9642_v4, %v9259_v31 }
 0x63b   : > { %v5042_v15 = vpop.f32.mrf.mxu0  ;;  %v4772_v34 = vpop.f32.mrf.mxu2  ;;  %v4543_v31 = vadd.f32 %v9642_v4, %v9319_v42  ;;  %v4541_v42 = vadd.f32 %v9642_v4, %v9289_v56  ;;  %v4542_v56 = vadd.f32 %v9642_v4, %v9304_v22  ;;  %v4546_v22 = vadd.f32 %v9642_v4, %v9364_v39  ;;  %v10584_v39 = vld [vmem:[#allocation10_spill] sm:$0xff] }
 0x63c   : > { %v4773_v50 = vadd.f32 %v4772_v34, %v4659_v21  ;;  %v4888_v47 = vpop.f32.mrf.mxu3  ;;  %v4662_v55 = vpop.f32.mrf.mxu1  ;;  %v5171_v58 = vmax.f32 %v5139_v1, 0.0 }
 0x63e   : > { %6308 = vmatmul.msk.f32.gmra.mxu0 %vm2388_vm4, %v8421_v28  ;;  %v4960_v14 = vadd.f32 %v4888_v47, %v4773_v50  ;;  %5246 = vrot.lane.b32.xlu1 %v5171_v58, %s6341_s27 }
 0x63f   : > { %6207 = vmatmul.msk.f32.gmra.mxu1 %vm2388_vm4, %v8439_v17 }
 0x640   : > { %v5108_v0 = vadd.f32 %v5036_v43, %v4960_v14  ;;  %6239 = vmatmul.msk.f32.gmra.mxu2 %vm2388_vm4, %v10582_v8  ;;  %v5225_v48 = vpop.permute.xlu2 %5224 }
 0x641   : > { %6273 = vmatmul.msk.f32.gmra.mxu3 %vm2388_vm4, %v8897_v38  ;;  %v5320_v49 = vsel %vm514_vm0, %v4569_v33, %v5225_v48 }
 0x642   : > { %5354 = vst.msk [vmem:[%s8948_s14 + $0x10] sm:$0xff] %vm2388_vm4, %v5320_v49  ;;  %v5140_v53 = vadd.f32 %v9642_v4, %v5108_v0 }
 0x643   : > { %v5045_v28 = vpop.f32.mrf.mxu0  ;;  %v4775_v40 = vpop.f32.mrf.mxu2 }
 0x644   : > { %v4776_v10 = vadd.f32 %v4775_v40, %v4662_v55  ;;  %v4891_v36 = vpop.f32.mrf.mxu3  ;;  %v4665_v59 = vpop.f32.mrf.mxu1  ;;  %v5172_v3 = vmax.f32 %v5140_v53, 0.0 }
 0x646   : > { %6309 = vmatmul.msk.f32.gmra.mxu0 %vm2388_vm4, %v8439_v17  ;;  %v4961_v43 = vadd.f32 %v4891_v36, %v4776_v10  ;;  %5248 = vrot.lane.b32.xlu2 %v5172_v3, %s6341_s27 }
 0x647   : > { %6208 = vmatmul.msk.f32.gmra.mxu1 %vm2388_vm4, %v10551_v61 }
 0x648   : > { %v5109_v38 = vadd.f32 %v5039_v24, %v4961_v43  ;;  %6240 = vmatmul.msk.f32.gmra.mxu2 %vm2388_vm4, %v10583_v51 }
 0x649   : > { %6274 = vmatmul.msk.f32.gmra.mxu3 %vm2388_vm4, %v8918_v12 }
 0x64a   : > { %v5141_v62 = vadd.f32 %v9642_v4, %v5109_v38 }
 0x64b   : > { %v5048_v35 = vpop.f32.mrf.mxu0  ;;  %v4778_v60 = vpop.f32.mrf.mxu2 }
 0x64c   : > { %v4779_v45 = vadd.f32 %v4778_v60, %v4665_v59  ;;  %v4894_v37 = vpop.f32.mrf.mxu3  ;;  %v4668_v17 = vpop.f32.mrf.mxu1  ;;  %v5173_v21 = vmax.f32 %v5141_v62, 0.0 }
 0x64e   : > { %v4962_v26 = vadd.f32 %v4894_v37, %v4779_v45  ;;  %5250 = vrot.lane.b32.xlu0 %v5173_v21, %s6341_s27 }
 0x64f   : > { %6209 = vmatmul.msk.f32.gmra.mxu1 %vm2388_vm4, %v10551_v61 }
 0x650   : > { %v5110_v24 = vadd.f32 %v5042_v15, %v4962_v26  ;;  %6241 = vmatmul.msk.f32.gmra.mxu2 %vm2388_vm4, %v10583_v51  ;;  %v4572_v15 = vmax.f32 %v4540_v30, 0.0 }
 0x651   : > { %6275 = vmatmul.msk.f32.gmra.mxu3 %vm2388_vm4, %v10582_v8 }
 0x652   : > { %v5142_v54 = vadd.f32 %v9642_v4, %v5110_v24 }
 0x653   : > { %v5051_v12 = vpop.f32.mrf.mxu0  ;;  %v4781_v1 = vpop.f32.mrf.mxu2 }
 0x654   : > { %v4782_v52 = vadd.f32 %v4781_v1, %v4668_v17  ;;  %v4897_v34 = vpop.f32.mrf.mxu3  ;;  %v4671_v50 = vpop.f32.mrf.mxu1  ;;  %v5174_v47 = vmax.f32 %v5142_v54, 0.0 }
 0x656   : > { %v4963_v61 = vadd.f32 %v4897_v34, %v4782_v52  ;;  %5252 = vrot.lane.b32.xlu1 %v5174_v47, %s6341_s27 }
 0x658   : > { %v5111_v55 = vadd.f32 %v5045_v28, %v4963_v61  ;;  %v5231_v58 = vpop.permute.xlu2 %5230  ;;  %v4570_v28 = vmax.f32 %v4538_v18, 0.0 }
 0x659   : > { %v5323_v14 = vsel %vm514_vm0, %v4572_v15, %v5231_v58 }
 0x65a   : > { %5359 = vst.msk [vmem:[%s8948_s14 + $0x38] sm:$0xff] %vm2388_vm4, %v5323_v14  ;;  %v5143_v0 = vadd.f32 %v9642_v4, %v5111_v55 }
 0x65b   : > { %v5054_v33 = vpop.f32.mrf.mxu0  ;;  %v4784_v8 = vpop.f32.mrf.mxu2 }
 0x65c   : > { %v4785_v48 = vadd.f32 %v4784_v8, %v4671_v50  ;;  %v4900_v49 = vpop.f32.mrf.mxu3  ;;  %v4674_v53 = vpop.f32.mrf.mxu1  ;;  %v5175_v40 = vmax.f32 %v5143_v0, 0.0 }
 0x65e   : > { %v4964_v10 = vadd.f32 %v4900_v49, %v4785_v48  ;;  %5254 = vrot.lane.b32.xlu2 %v5175_v40, %s6341_s27 }
 0x660   : > { %v5112_v36 = vadd.f32 %v5048_v35, %v4964_v10  ;;  %v5227_v59 = vpop.permute.xlu0 %5226  ;;  %v4571_v35 = vmax.f32 %v4539_v41, 0.0 }
 0x661   : > { %v5321_v3 = vsel %vm514_vm0, %v4570_v28, %v5227_v59 }
 0x662   : > { %5355 = vst.msk [vmem:[%s8948_s14 + $0x18] sm:$0xff] %vm2388_vm4, %v5321_v3  ;;  %v5144_v38 = vadd.f32 %v9642_v4, %v5112_v36 }
 0x663   : > { %v5057_v43 = vpop.f32.mrf.mxu0  ;;  %v4787_v51 = vpop.f32.mrf.mxu2 }
 0x664   : > { %v4788_v62 = vadd.f32 %v4787_v51, %v4674_v53  ;;  %v4903_v60 = vpop.f32.mrf.mxu3  ;;  %v4677_v45 = vpop.f32.mrf.mxu1  ;;  %v5176_v37 = vmax.f32 %v5144_v38, 0.0 }
 0x666   : > { %v4965_v17 = vadd.f32 %v4903_v60, %v4788_v62  ;;  %5256 = vrot.lane.b32.xlu0 %v5176_v37, %s6341_s27 }
 0x668   : > { %v5113_v21 = vadd.f32 %v5051_v12, %v4965_v17  ;;  %v5229_v26 = vpop.permute.xlu1 %5228  ;;  %v4575_v12 = vmax.f32 %v4543_v31, 0.0 }
 0x669   : > { %v5322_v24 = vsel %vm514_vm0, %v4571_v35, %v5229_v26 }
 0x66a   : > { %5358 = vst.msk [vmem:[%s8948_s14 + $0x30] sm:$0xff] %vm2388_vm4, %v5322_v24  ;;  %v5145_v30 = vadd.f32 %v9642_v4, %v5113_v21 }
 0x66b   : > { %v5060_v54 = vpop.f32.mrf.mxu0  ;;  %v4790_v1 = vpop.f32.mrf.mxu2 }
 0x66c   : > { %v4791_v52 = vadd.f32 %v4790_v1, %v4677_v45  ;;  %v4906_v34 = vpop.f32.mrf.mxu3  ;;  %v4680_v50 = vpop.f32.mrf.mxu1  ;;  %v5177_v47 = vmax.f32 %v5145_v30, 0.0 }
 0x66e   : > { %v4966_v61 = vadd.f32 %v4906_v34, %v4791_v52  ;;  %5258 = vrot.lane.b32.xlu1 %v5177_v47, %s6341_s27  ;;  %v4578_v34 = vmax.f32 %v4546_v22, 0.0 }
 0x670   : > { %v5114_v15 = vadd.f32 %v5054_v33, %v4966_v61  ;;  %v5237_v55 = vpop.permute.xlu2 %5236  ;;  %v4573_v33 = vmax.f32 %v4541_v42, 0.0 }
 0x671   : > { %v5326_v58 = vsel %vm514_vm0, %v4575_v12, %v5237_v55 }
 0x672   : > { %5366 = vst.msk [vmem:[%s8948_s14 + $0x70] sm:$0xff] %vm2388_vm4, %v5326_v58  ;;  %v5146_v14 = vadd.f32 %v9642_v4, %v5114_v15  ;;  %v4544_v15 = vadd.f32 %v9642_v4, %v10584_v39 }
 0x673   : > { %v4793_v0 = vpop.f32.mrf.mxu2  ;;  %v5063_v18 = vpop.f32.mrf.mxu0 }
 0x674   : > { %v4794_v8 = vadd.f32 %v4793_v0, %v4680_v50  ;;  %v4909_v48 = vpop.f32.mrf.mxu3  ;;  %v4683_v49 = vpop.f32.mrf.mxu1  ;;  %v5178_v53 = vmax.f32 %v5146_v14, 0.0 }
 0x676   : > { %v4967_v40 = vadd.f32 %v4909_v48, %v4794_v8  ;;  %5260 = vrot.lane.b32.xlu2 %v5178_v53, %s6341_s27 }
 0x678   : > { %v5115_v10 = vadd.f32 %v5057_v43, %v4967_v40  ;;  %v5233_v28 = vpop.permute.xlu0 %5232  ;;  %v4574_v43 = vmax.f32 %v4542_v56, 0.0 }
 0x679   : > { %v5324_v36 = vsel %vm514_vm0, %v4573_v33, %v5233_v28 }
 0x67a   : > { %5362 = vst.msk [vmem:[%s8948_s14 + $0x50] sm:$0xff] %vm2388_vm4, %v5324_v36  ;;  %v5147_v59 = vadd.f32 %v9642_v4, %v5115_v10  ;;  %v4545_v10 = vadd.f32 %v9642_v4, %v9349_v16  ;;  %v4549_v16 = vadd.f32 %v9642_v4, %v9407_v7  ;;  %v10585_v7 = vld [vmem:[#allocation38_spill] sm:$0xff] }
 0x67b   : > { %v4796_v3 = vpop.f32.mrf.mxu2  ;;  %v5066_v60 = vpop.f32.mrf.mxu0 }
 0x67c   : > { %v4797_v38 = vadd.f32 %v4796_v3, %v4683_v49  ;;  %v4912_v41 = vpop.f32.mrf.mxu3  ;;  %v4686_v51 = vpop.f32.mrf.mxu1  ;;  %v5179_v62 = vmax.f32 %v5147_v59, 0.0 }
 0x67e   : > { %v4968_v45 = vadd.f32 %v4912_v41, %v4797_v38  ;;  %5262 = vrot.lane.b32.xlu0 %v5179_v62, %s6341_s27  ;;  %v4577_v41 = vmax.f32 %v4545_v10, 0.0 }
 0x680   : > { %v5116_v37 = vadd.f32 %v5060_v54, %v4968_v45  ;;  %v5235_v17 = vpop.permute.xlu1 %5234 }
 0x681   : > { %v5325_v35 = vsel %vm514_vm0, %v4574_v43, %v5235_v17 }
 0x682   : > { %5363 = vst.msk [vmem:[%s8948_s14 + $0x58] sm:$0xff] %vm2388_vm4, %v5325_v35  ;;  %v5148_v21 = vadd.f32 %v9642_v4, %v5116_v37 }
 0x683   : > { %v4799_v26 = vpop.f32.mrf.mxu2  ;;  %v5069_v54 = vpop.f32.mrf.mxu0 }
 0x684   : > { %v4800_v24 = vadd.f32 %v4799_v26, %v4686_v51  ;;  %v4915_v30 = vpop.f32.mrf.mxu3  ;;  %v4689_v31 = vpop.f32.mrf.mxu1  ;;  %v5180_v1 = vmax.f32 %v5148_v21, 0.0 }
 0x686   : > { %v4969_v52 = vadd.f32 %v4915_v30, %v4800_v24  ;;  %5264 = vrot.lane.b32.xlu1 %v5180_v1, %s6341_s27  ;;  %v4581_v24 = vmax.f32 %v4549_v16, 0.0 }
 0x688   : > { %v5117_v50 = vadd.f32 %v5063_v18, %v4969_v52  ;;  %v5243_v47 = vpop.permute.xlu2 %5242  ;;  %v4576_v18 = vmax.f32 %v4544_v15, 0.0 }
 0x689   : > { %v5329_v61 = vsel %vm514_vm0, %v4578_v34, %v5243_v47 }
 0x68a   : > { %5371 = vst.msk [vmem:[%s8948_s14 + $0x98] sm:$0xff] %vm2388_vm4, %v5329_v61  ;;  %v5149_v12 = vadd.f32 %v9642_v4, %v5117_v50 }
 0x68b   : > { %v4802_v55 = vpop.f32.mrf.mxu2  ;;  %v5072_v53 = vpop.f32.mrf.mxu0 }
 0x68c   : > { %v4803_v58 = vadd.f32 %v4802_v55, %v4689_v31  ;;  %v4918_v14 = vpop.f32.mrf.mxu3  ;;  %v4692_v42 = vpop.f32.mrf.mxu1  ;;  %v5181_v0 = vmax.f32 %v5149_v12, 0.0 }
 0x68e   : > { %v4970_v8 = vadd.f32 %v4918_v14, %v4803_v58  ;;  %5266 = vrot.lane.b32.xlu2 %v5181_v0, %s6341_s27 }
 0x690   : > { %v5118_v48 = vadd.f32 %v5066_v60, %v4970_v8  ;;  %v5239_v49 = vpop.permute.xlu0 %5238  ;;  %v10586_v8 = vld [vmem:[#allocation37_spill] sm:$0xff] }
 0x691   : > { %v5327_v40 = vsel %vm514_vm0, %v4576_v18, %v5239_v49  ;;  %v4548_v18 = vadd.f32 %v9642_v4, %v10586_v8 }
 0x692   : > { %5367 = vst.msk [vmem:[%s8948_s14 + $0x78] sm:$0xff] %vm2388_vm4, %v5327_v40  ;;  %v5150_v33 = vadd.f32 %v9642_v4, %v5118_v48 }
 0x693   : > { %v4805_v28 = vpop.f32.mrf.mxu2  ;;  %v5075_v43 = vpop.f32.mrf.mxu0 }
 0x694   : > { %v4806_v36 = vadd.f32 %v4805_v28, %v4692_v42  ;;  %v4921_v59 = vpop.f32.mrf.mxu3  ;;  %v4695_v56 = vpop.f32.mrf.mxu1  ;;  %v5182_v3 = vmax.f32 %v5150_v33, 0.0 }
 0x696   : > { %v4971_v38 = vadd.f32 %v4921_v59, %v4806_v36  ;;  %5268 = vrot.lane.b32.xlu0 %v5182_v3, %s6341_s27  ;;  %v4580_v36 = vmax.f32 %v4548_v18, 0.0 }
 0x698   : > { %v5119_v51 = vadd.f32 %v5069_v54, %v4971_v38  ;;  %v5241_v62 = vpop.permute.xlu1 %5240  ;;  %v4547_v54 = vadd.f32 %v9642_v4, %v10585_v7 }
 0x699   : > { %v5328_v60 = vsel %vm514_vm0, %v4577_v41, %v5241_v62  ;;  %v4552_v41 = vadd.f32 %v9642_v4, %v9445_v9  ;;  %v10587_v9 = vld [vmem:[#allocation60_spill] sm:$0xff] }
 0x69a   : > { %5370 = vst.msk [vmem:[%s8948_s14 + $0x90] sm:$0xff] %vm2388_vm4, %v5328_v60  ;;  %v5151_v45 = vadd.f32 %v9642_v4, %v5119_v51  ;;  %v4579_v55 = vmax.f32 %v4547_v54, 0.0 }
 0x69b   : > { %v4808_v37 = vpop.f32.mrf.mxu2  ;;  %v5078_v39 = vpop.f32.mrf.mxu0 }
 0x69c   : > { %v4809_v17 = vadd.f32 %v4808_v37, %v4695_v56  ;;  %v4924_v35 = vpop.f32.mrf.mxu3  ;;  %v4698_v21 = vpop.f32.mrf.mxu1  ;;  %v5183_v22 = vmax.f32 %v5151_v45, 0.0  ;;  %v4584_v37 = vmax.f32 %v4552_v41, 0.0 }
 0x69e   : > { %v4972_v26 = vadd.f32 %v4924_v35, %v4809_v17  ;;  %5270 = vrot.lane.b32.xlu1 %v5183_v22, %s6341_s27 }
 0x6a0   : > { %v5120_v30 = vadd.f32 %v5072_v53, %v4972_v26  ;;  %v5249_v31 = vpop.permute.xlu2 %5248 }
 0x6a1   : > { %v5332_v1 = vsel %vm514_vm0, %v4581_v24, %v5249_v31  ;;  %v4550_v24 = vadd.f32 %v9642_v4, %v10587_v9 }
 0x6a2   : > { %5378 = vst.msk [vmem:[%s8948_s14 + $0xd0] sm:$0xff] %vm2388_vm4, %v5332_v1  ;;  %v5152_v52 = vadd.f32 %v9642_v4, %v5120_v30 }
 0x6a3   : > { %v4811_v34 = vpop.f32.mrf.mxu2  ;;  %v5081_v28 = vpop.f32.mrf.mxu0 }
 0x6a4   : > { %v4812_v50 = vadd.f32 %v4811_v34, %v4698_v21  ;;  %v4927_v47 = vpop.f32.mrf.mxu3  ;;  %v4701_v61 = vpop.f32.mrf.mxu1  ;;  %v5184_v12 = vmax.f32 %v5152_v52, 0.0  ;;  %v4582_v34 = vmax.f32 %v4550_v24, 0.0 }
 0x6a6   : > { %v4973_v15 = vadd.f32 %v4927_v47, %v4812_v50  ;;  %5272 = vrot.lane.b32.xlu2 %v5184_v12, %s6341_s27 }
 0x6a8   : > { %v5121_v58 = vadd.f32 %v5075_v43, %v4973_v15  ;;  %v5245_v14 = vpop.permute.xlu0 %5244 }
 0x6a9   : > { %v5330_v42 = vsel %vm514_vm0, %v4579_v55, %v5245_v14 }
 0x6aa   : > { %5374 = vst.msk [vmem:[%s8948_s14 + $0xb0] sm:$0xff] %vm2388_vm4, %v5330_v42  ;;  %v5153_v0 = vadd.f32 %v9642_v4, %v5121_v58 }
 0x6ab   : > { %v4814_v48 = vpop.f32.mrf.mxu2  ;;  %v5084_v21 = vpop.f32.mrf.mxu0 }
 0x6ac   : > { %v4815_v49 = vadd.f32 %v4814_v48, %v4701_v61  ;;  %v4930_v53 = vpop.f32.mrf.mxu3  ;;  %v4704_v40 = vpop.f32.mrf.mxu1  ;;  %v5185_v33 = vmax.f32 %v5153_v0, 0.0 }
 0x6ae   : > { %v4974_v10 = vadd.f32 %v4930_v53, %v4815_v49  ;;  %5274 = vrot.lane.b32.xlu0 %v5185_v33, %s6341_s27 }
 0x6b0   : > { %v5122_v59 = vadd.f32 %v5078_v39, %v4974_v10  ;;  %v5247_v56 = vpop.permute.xlu1 %5246  ;;  %v4551_v39 = vadd.f32 %v9642_v4, %v9432_v11  ;;  %v4555_v11 = vadd.f32 %v9642_v4, %v9475_v23  ;;  %v4553_v23 = vadd.f32 %v9642_v4, %v9455_v2 }
 0x6b1   : > { %v5331_v3 = vsel %vm514_vm0, %v4580_v36, %v5247_v56  ;;  %v4554_v2 = vadd.f32 %v9642_v4, %v9465_v27  ;;  %v4556_v27 = vadd.f32 %v9642_v4, %v9485_v57  ;;  %v4561_v57 = vadd.f32 %v9642_v4, %v9535_v6 }
 0x6b2   : > { %5375 = vst.msk [vmem:[%s8948_s14 + $0xb8] sm:$0xff] %vm2388_vm4, %v5331_v3  ;;  %v5154_v38 = vadd.f32 %v9642_v4, %v5122_v59  ;;  %v4583_v8 = vmax.f32 %v4551_v39, 0.0  ;;  %v4587_v3 = vmax.f32 %v4555_v11, 0.0  ;;  %v4560_v6 = vadd.f32 %v9642_v4, %v9525_v13 }
 0x6b3   : > { %v4817_v51 = vpop.f32.mrf.mxu2  ;;  %v5087_v15 = vpop.f32.mrf.mxu0  ;;  %v4562_v13 = vadd.f32 %v9642_v4, %v9545_v20  ;;  %v4567_v20 = vadd.f32 %v9642_v4, %v9595_v25 }
 0x6b4   : > { %v4818_v62 = vadd.f32 %v4817_v51, %v4704_v40  ;;  %v4933_v60 = vpop.f32.mrf.mxu3  ;;  %v5186_v45 = vmax.f32 %v5154_v38, 0.0  ;;  %v4707_v16 = vpop.f32.mrf.mxu1 }
 0x6b6   : > { %v4975_v43 = vadd.f32 %v4933_v60, %v4818_v62  ;;  %5276 = vrot.lane.b32.xlu1 %v5186_v45, %s6341_s27 }
 0x6b8   : > { %v5123_v17 = vadd.f32 %v5081_v28, %v4975_v43  ;;  %v5255_v35 = vpop.permute.xlu2 %5254 }
 0x6b9   : > { %v5335_v22 = vsel %vm514_vm0, %v4584_v37, %v5255_v35 }
 0x6ba   : > { %5383 = vst.msk [vmem:[%s8948_s14 + $0xf8] sm:$0xff] %vm2388_vm4, %v5335_v22  ;;  %v5155_v26 = vadd.f32 %v9642_v4, %v5123_v17 }
 0x6bb   : > { %v4820_v30 = vpop.f32.mrf.mxu2  ;;  %v5090_v59 = vpop.f32.mrf.mxu0 }
 0x6bc   : > { %v4821_v31 = vadd.f32 %v4820_v30, %v4707_v16  ;;  %v4936_v1 = vpop.f32.mrf.mxu3  ;;  %v5187_v52 = vmax.f32 %v5155_v26, 0.0  ;;  %v4710_v54 = vpop.f32.mrf.mxu1 }
 0x6be   : > { %v4976_v7 = vadd.f32 %v4936_v1, %v4821_v31  ;;  %5278 = vrot.lane.b32.xlu2 %v5187_v52, %s6341_s27  ;;  %v4586_v31 = vmax.f32 %v4554_v2, 0.0 }
 0x6c0   : > { %v5124_v50 = vadd.f32 %v5084_v21, %v4976_v7  ;;  %v5251_v47 = vpop.permute.xlu0 %5250  ;;  %v4585_v21 = vmax.f32 %v4553_v23, 0.0  ;;  %v4558_v7 = vadd.f32 %v9642_v4, %v9505_v46  ;;  %v4557_v46 = vadd.f32 %v9642_v4, %v9495_v5 }
 0x6c1   : > { %v5333_v61 = vsel %vm514_vm0, %v4582_v34, %v5251_v47  ;;  %v4588_v47 = vmax.f32 %v4556_v27, 0.0  ;;  %v4559_v5 = vadd.f32 %v9642_v4, %v9515_v29  ;;  %v4564_v29 = vadd.f32 %v9642_v4, %v9565_v63 }
 0x6c2   : > { %5379 = vst.msk [vmem:[%s8948_s14 + $0xd8] sm:$0xff] %vm2388_vm4, %v5333_v61  ;;  %v5156_v12 = vadd.f32 %v9642_v4, %v5124_v50  ;;  %v4589_v39 = vmax.f32 %v4557_v46, 0.0  ;;  %v4563_v63 = vadd.f32 %v9642_v4, %v9555_v19  ;;  %v4565_v19 = vadd.f32 %v9642_v4, %v9575_v32 }
 0x6c3   : > { %v4823_v55 = vpop.f32.mrf.mxu2  ;;  %v5093_v35 = vpop.f32.mrf.mxu0 }
 0x6c4   : > { %v4824_v58 = vadd.f32 %v4823_v55, %v4710_v54  ;;  %v4939_v14 = vpop.f32.mrf.mxu3  ;;  %v5188_v42 = vmax.f32 %v5156_v12, 0.0  ;;  %v4713_v18 = vpop.f32.mrf.mxu1  ;;  %v4590_v54 = vmax.f32 %v4558_v7, 0.0 }
 0x6c6   : > { %v4977_v0 = vadd.f32 %v4939_v14, %v4824_v58  ;;  %5280 = vrot.lane.b32.xlu0 %v5188_v42, %s6341_s27  ;;  %v4593_v58 = vmax.f32 %v4561_v57, 0.0 }
 0x6c8   : > { %v5125_v48 = vadd.f32 %v5087_v15, %v4977_v0  ;;  %v5253_v49 = vpop.permute.xlu1 %5252  ;;  %v4591_v0 = vmax.f32 %v4559_v5, 0.0 }
 0x6c9   : > { %v5334_v53 = vsel %vm514_vm0, %v4583_v8, %v5253_v49 }
 0x6ca   : > { %5382 = vst.msk [vmem:[%s8948_s14 + $0xf0] sm:$0xff] %vm2388_vm4, %v5334_v53  ;;  %v5157_v40 = vadd.f32 %v9642_v4, %v5125_v48  ;;  %v4592_v48 = vmax.f32 %v4560_v6, 0.0 }
 0x6cb   : > { %v4826_v33 = vpop.f32.mrf.mxu2 }
 0x6cc   : > { %v4827_v10 = vadd.f32 %v4826_v33, %v4713_v18  ;;  %v4942_v28 = vpop.f32.mrf.mxu3  ;;  %v5189_v36 = vmax.f32 %v5157_v40, 0.0  ;;  %v4716_v62 = vpop.f32.mrf.mxu1  ;;  %v4596_v40 = vmax.f32 %v4564_v29, 0.0 }
 0x6ce   : > { %v4978_v56 = vadd.f32 %v4942_v28, %v4827_v10  ;;  %5282 = vrot.lane.b32.xlu1 %v5189_v36, %s6341_s27  ;;  %v4594_v10 = vmax.f32 %v4562_v13, 0.0 }
 0x6d0   : > { %v5126_v38 = vadd.f32 %v5090_v59, %v4978_v56  ;;  %v5261_v41 = vpop.permute.xlu2 %5260  ;;  %v4595_v59 = vmax.f32 %v4563_v63, 0.0 }
 0x6d1   : > { %v5338_v51 = vsel %vm514_vm0, %v4587_v3, %v5261_v41 }
 0x6d2   : > { %5390 = vst.msk [vmem:[%s8948_s14 + $0x130] sm:$0xff] %vm2388_vm4, %v5338_v51  ;;  %v5158_v60 = vadd.f32 %v9642_v4, %v5126_v38  ;;  %v4599_v38 = vmax.f32 %v4567_v20, 0.0 }
 0x6d3   : > { %v4829_v45 = vpop.f32.mrf.mxu2 }
 0x6d4   : > { %v4830_v16 = vadd.f32 %v4829_v45, %v4716_v62  ;;  %v5190_v43 = vmax.f32 %v5158_v60, 0.0  ;;  %v4945_v37 = vpop.f32.mrf.mxu3  ;;  %v4597_v62 = vmax.f32 %v4565_v19, 0.0  ;;  %v4566_v45 = vadd.f32 %v9642_v4, %v9585_v44 }
 0x6d6   : > { %v4979_v17 = vadd.f32 %v4945_v37, %v4830_v16  ;;  %5284 = vrot.lane.b32.xlu2 %v5190_v43, %s6341_s27  ;;  %v4598_v25 = vmax.f32 %v4566_v45, 0.0  ;;  %v10588_v37 = vld [vmem:[#allocation8_spill] sm:$0xff] }
 0x6d8   : > { %v5127_v22 = vadd.f32 %v5093_v35, %v4979_v17  ;;  %v5257_v26 = vpop.permute.xlu0 %5256  ;;  %v4568_v17 = vadd.f32 %v9642_v4, %v10588_v37 }
 0x6d9   : > { %v5336_v9 = vsel %vm514_vm0, %v4585_v21, %v5257_v26 }
 0x6da   : > { %5386 = vst.msk [vmem:[%s8948_s14 + $0x110] sm:$0xff] %vm2388_vm4, %v5336_v9  ;;  %v5159_v24 = vadd.f32 %v9642_v4, %v5127_v22  ;;  %v4600_v35 = vmax.f32 %v4568_v17, 0.0 }
 0x6dc   : > { %v5191_v30 = vmax.f32 %v5159_v24, 0.0 }
 0x6de   : > { %5286 = vrot.lane.b32.xlu0 %v5191_v30, %s6341_s27 }
 0x6e0   : > { %v5259_v1 = vpop.permute.xlu1 %5258 }
 0x6e1   : > { %v5337_v52 = vsel %vm514_vm0, %v4586_v31, %v5259_v1 }
 0x6e2   : > { %5387 = vst.msk [vmem:[%s8948_s14 + $0x118] sm:$0xff] %vm2388_vm4, %v5337_v52 }
 0x6e8   : > { %v5267_v34 = vpop.permute.xlu2 %5266 }
 0x6e9   : > { %v5341_v50 = vsel %vm514_vm0, %v4590_v54, %v5267_v34 }
 0x6ea   : > { %5395 = vst.msk [vmem:[%s8948_s14 + $0x158] sm:$0xff] %vm2388_vm4, %v5341_v50 }
 0x6f0   : > { %v5263_v61 = vpop.permute.xlu0 %5262 }
 0x6f1   : > { %v5339_v12 = vsel %vm514_vm0, %v4588_v47, %v5263_v61 }
 0x6f2   : > { %5391 = vst.msk [vmem:[%s8948_s14 + $0x138] sm:$0xff] %vm2388_vm4, %v5339_v12 }
 0x6f8   : > { %v5265_v15 = vpop.permute.xlu1 %5264 }
 0x6f9   : > { %v5340_v55 = vsel %vm514_vm0, %v4589_v39, %v5265_v15 }
 0x6fa   : > { %5394 = vst.msk [vmem:[%s8948_s14 + $0x150] sm:$0xff] %vm2388_vm4, %v5340_v55 }
 0x700   : > { %v5273_v14 = vpop.permute.xlu2 %5272 }
 0x701   : > { %v5344_v42 = vsel %vm514_vm0, %v4593_v58, %v5273_v14 }
 0x702   : > { %5402 = vst.msk [vmem:[%s8948_s14 + $0x190] sm:$0xff] %vm2388_vm4, %v5344_v42 }
 0x708   : > { %v5269_v8 = vpop.permute.xlu0 %5268 }
 0x709   : > { %v5342_v18 = vsel %vm514_vm0, %v4591_v0, %v5269_v8 }
 0x70a   : > { %5398 = vst.msk [vmem:[%s8948_s14 + $0x170] sm:$0xff] %vm2388_vm4, %v5342_v18 }
 0x710   : > { %v5271_v49 = vpop.permute.xlu1 %5270 }
 0x711   : > { %v5343_v53 = vsel %vm514_vm0, %v4592_v48, %v5271_v49 }
 0x712   : > { %5399 = vst.msk [vmem:[%s8948_s14 + $0x178] sm:$0xff] %vm2388_vm4, %v5343_v53 }
 0x718   : > { %v5279_v11 = vpop.permute.xlu2 %5278 }
 0x719   : > { %v5347_v33 = vsel %vm514_vm0, %v4596_v40, %v5279_v11 }
 0x71a   : > { %5407 = vst.msk [vmem:[%s8948_s14 + $0x1b8] sm:$0xff] %vm2388_vm4, %v5347_v33 }
 0x720   : > { %v5275_v28 = vpop.permute.xlu0 %5274 }
 0x721   : > { %v5345_v36 = vsel %vm514_vm0, %v4594_v10, %v5275_v28 }
 0x722   : > { %5403 = vst.msk [vmem:[%s8948_s14 + $0x198] sm:$0xff] %vm2388_vm4, %v5345_v36 }
 0x728   : > { %v5277_v56 = vpop.permute.xlu1 %5276 }
 0x729   : > { %v5346_v3 = vsel %vm514_vm0, %v4595_v59, %v5277_v56 }
 0x72a   : > { %5406 = vst.msk [vmem:[%s8948_s14 + $0x1b0] sm:$0xff] %vm2388_vm4, %v5346_v3 }
 0x730   : > { %v5285_v41 = vpop.permute.xlu2 %5284 }
 0x731   : > { %v5350_v51 = vsel %vm514_vm0, %v4599_v38, %v5285_v41 }
 0x732   : > { %5414 = vst.msk [vmem:[%s8948_s14 + $0x1f0] sm:$0xff] %vm2388_vm4, %v5350_v51 }
 0x738   : > { %v5281_v60 = vpop.permute.xlu0 %5280 }
 0x739   : > { %v5348_v23 = vsel %vm514_vm0, %v4597_v62, %v5281_v60 }
 0x73a   : > { %5410 = vst.msk [vmem:[%s8948_s14 + $0x1d0] sm:$0xff] %vm2388_vm4, %v5348_v23 }
 0x740   : > { %v5283_v16 = vpop.permute.xlu1 %5282 }
 0x741   : > { %v5349_v43 = vsel %vm514_vm0, %v4598_v25, %v5283_v16 }
 0x742   : > { %5411 = vst.msk [vmem:[%s8948_s14 + $0x1d8] sm:$0xff] %vm2388_vm4, %v5349_v43 }
 0x750   : > { %v5287_v32 = vpop.permute.xlu0 %5286 }
 0x751   : > { %v5351_v21 = vsel %vm514_vm0, %v4600_v35, %v5287_v32 }
 0x752   : > { %5415 = vst.msk [vmem:[%s8948_s14 + $0x1f8] sm:$0xff] %vm2388_vm4, %v5351_v21 }
 0x753 PF: > { %s15_s18 = sadd.s32 1, %s6338_s18  }
 0x754   : > { %p12_p4 = scmp.ge.s32.totalorder %s15_s18, 4  }
 0x756   :  { %14 = sbr.rel (!%p12_p4) target bundleno = 1 (0x1), region = 93 }

</bundles_post_ra>
